<compile_context>
chip_gen: v6e
topology: v6e:2x2x1
jax: 0.10.0
libtpu: 0.0.40
codegen_flags: <defaults>
</compile_context>

<pallas_src>
import jax
import jax.numpy as jnp
from jax import lax
from jax.experimental import pallas as pl
from jax.experimental.pallas import tpu as pltpu

# ----------------------------- model config -----------------------------
CATEGORIES = (5, 6, 7, 8)          # -> num_categories = 4, total_tokens = 26
NUM_CONT = 3
DIM = 32
DIM_HEAD = 16                      # column-attention head dim
ROW_DIM_HEAD = 64                  # SAINT hardcodes dim_head=64 for row attention
HEADS = 4
DEPTH = 1
NUM_SPECIAL = 0
CONT_HID = 100                     # simple_MLP([1, 100, dim]) hidden width

NUM_CAT = len(CATEGORIES)
NFEATS = NUM_CAT + NUM_CONT
TOTAL_TOKENS = sum(CATEGORIES) + NUM_SPECIAL
RD = NFEATS * DIM                  # row-stream width (224)
DEC_OUT_DIMS = tuple(CATEGORIES[1:]) + (1,) * NUM_CONT   # (6,7,8,1,1,1)
DEC_TOTAL = sum(DEC_OUT_DIMS)      # 24
DEC_HID = 5 * DIM                  # 160
BATCH = 8


# ----------------------------- packed-parameter layouts (static) -----------------------------
def _align(x, m):
    return (x + m - 1) // m * m


def _layout(items, align):
    offs, off = {}, 0
    for name, size in items:
        offs[name] = (off, size)
        off += _align(size, align)
    return offs, _align(off, align)


# (1, P) vector pack: every bias / LN gamma / LN beta, each 128-lane aligned.
_vec_items = []
for _i in range(NUM_CONT):
    _vec_items += [(f"cont_w1_{_i}", CONT_HID), (f"cont_b1_{_i}", CONT_HID),
                   (f"cont_b2_{_i}", DIM)]
for _li in range(DEPTH):
    _vec_items += [
        (f"l{_li}_a1_ln_g", DIM), (f"l{_li}_a1_ln_b", DIM), (f"l{_li}_a1_out_b", DIM),
        (f"l{_li}_f1_ln_g", DIM), (f"l{_li}_f1_ln_b", DIM),
        (f"l{_li}_f1_b1", 8 * DIM), (f"l{_li}_f1_b2", DIM),
        (f"l{_li}_a2_ln_g", RD), (f"l{_li}_a2_ln_b", RD), (f"l{_li}_a2_out_b", RD),
        (f"l{_li}_f2_ln_g", RD), (f"l{_li}_f2_ln_b", RD),
        (f"l{_li}_f2_b1", 8 * RD), (f"l{_li}_f2_b2", RD),
    ]
_vec_items += [("dec_b1", len(DEC_OUT_DIMS) * DEC_HID), ("dec_b2", DEC_TOTAL)]
VEC_LAYOUT, VEC_LEN = _layout(_vec_items, 128)

# matrices with a DIM(=32)-row contraction, packed along columns (128-lane aligned).
WD32_ROWS = max(DIM, _align(TOTAL_TOKENS, 8))
_wd32_items = [("embeds", DIM)]
for _li in range(DEPTH):
    _wd32_items += [(f"l{_li}_a1_qkv", 3 * HEADS * DIM_HEAD), (f"l{_li}_f1_w1", 8 * DIM)]
_wd32_items += [("dec_w1", len(DEC_OUT_DIMS) * DEC_HID)]
WD32_LAYOUT, WD32_COLS = _layout(_wd32_items, 128)

# matrices with DIM(=32) output columns, packed along rows (8-sublane aligned).
_wcolb_items = [(f"cont_w2_{_i}", CONT_HID) for _i in range(NUM_CONT)]
for _li in range(DEPTH):
    _wcolb_items += [(f"l{_li}_a1_ow", HEADS * DIM_HEAD), (f"l{_li}_f1_w2", 4 * DIM)]
WCOLB_LAYOUT, WCOLB_ROWS = _layout(_wcolb_items, 8)

# matrices with an RD(=224)-row contraction, packed along columns.
_wd224_items = []
for _li in range(DEPTH):
    _wd224_items += [(f"l{_li}_a2_qkv", 3 * HEADS * ROW_DIM_HEAD), (f"l{_li}_f2_w1", 8 * RD)]
WD224_LAYOUT, WD224_COLS = _layout(_wd224_items, 128)

# matrices with RD(=224) output columns, packed along rows.
_wrowb_items = []
for _li in range(DEPTH):
    _wrowb_items += [(f"l{_li}_a2_ow", HEADS * ROW_DIM_HEAD), (f"l{_li}_f2_w2", 4 * RD)]
WROWB_LAYOUT, WROWB_ROWS = _layout(_wrowb_items, 8)


# ----------------------------- in-kernel helpers (values only) -----------------------------
_SQRT_HALF = 0.7071067811865476


def _erf_approx(x):
    # Abramowitz & Stegun 7.1.26 rational approximation of erf, |error| <= 1.5e-7.
    t = 1.0 / (1.0 + 0.3275911 * jnp.abs(x))
    poly = t * (0.254829592 + t * (-0.284496736 + t * (1.421413741 +
                t * (-1.453152027 + t * 1.061405429))))
    y = 1.0 - poly * jnp.exp(-(x * x))
    return jnp.where(x >= 0.0, y, -y)


def _gelu_erf(x):
    return 0.5 * x * (1.0 + _erf_approx(x * _SQRT_HALF))


def _layernorm(x, g, b):
    mu = jnp.mean(x, axis=-1, keepdims=True)
    var = jnp.mean(jnp.square(x - mu), axis=-1, keepdims=True)
    return (x - mu) * lax.rsqrt(var + 1e-5) * g + b


def _softmax(s):
    s = s - jnp.max(s, axis=-1, keepdims=True)
    p = jnp.exp(s)
    return p * pl.reciprocal(jnp.sum(p, axis=-1, keepdims=True), approx=True)


def _dotf(a, b):
    return jnp.dot(a, b, preferred_element_type=jnp.float32)


# ----------------------------- the fused kernel -----------------------------
def _saint_fused_kernel(ids_ref, xcont_ref, vec_ref, wd32_ref, wcolb_ref,
                        wd224_ref, wrowb_ref, decw2_ref, out_ref,
                        xcol_ref, xrow_ref, qkvc_ref, abuf_ref, qkvr_ref, rbuf_ref):
    B = xcont_ref.shape[0]
    n, d = NFEATS, DIM
    ncol = n * B

    def vec(name):
        off, size = VEC_LAYOUT[name]
        return vec_ref[:, off:off + size]

    def w32(name):
        off, size = WD32_LAYOUT[name]
        return wd32_ref[0:DIM, off:off + size]

    def wcol(name):
        off, size = WCOLB_LAYOUT[name]
        return wcolb_ref[off:off + size, :]

    def w224(name):
        off, size = WD224_LAYOUT[name]
        return wd224_ref[:, off:off + size]

    def wrow(name):
        off, size = WROWB_LAYOUT[name]
        return wrowb_ref[off:off + size, :]

    # ---------- embedding, emitted directly in the feature-major column layout ----------
    # categorical: ONE fused one-hot gather for all B*NUM_CAT tokens (rows = feat*B + b)
    eoff, _ = WD32_LAYOUT["embeds"]
    emb_tbl = wd32_ref[0:WD32_ROWS, eoff:eoff + DIM]                 # (32, d); rows >= 26 are 0
    tok = lax.broadcasted_iota(jnp.int32, (NUM_CAT * B, WD32_ROWS), 1)
    onehot = jnp.where(tok == ids_ref[...], 1.0, 0.0).astype(jnp.float32)
    xcol_ref[0:NUM_CAT * B, :] = _dotf(onehot, emb_tbl)
    # continuous: per-feature simple_MLP([1, 100, dim])
    for i in range(NUM_CONT):
        xi = xcont_ref[:, i:i + 1]                                   # (B, 1)
        h = jnp.maximum(xi * vec(f"cont_w1_{i}") + vec(f"cont_b1_{i}"), 0.0)
        e = _dotf(h, wcol(f"cont_w2_{i}")) + vec(f"cont_b2_{i}")
        r0 = (NUM_CAT + i) * B
        xcol_ref[r0:r0 + B, :] = e

    # additive same-sample mask for the batched column attention (feature-major: r%B == c%B)
    rio = lax.broadcasted_iota(jnp.int32, (ncol, ncol), 0)
    cio = lax.broadcasted_iota(jnp.int32, (ncol, ncol), 1)
    col_mask = jnp.where((rio % B) == (cio % B), 0.0, -1e9).astype(jnp.float32)

    ic = HEADS * DIM_HEAD
    ir = HEADS * ROW_DIM_HEAD
    xr = None

    # ---------- RowColTransformer ('colrow'); each stage: out = f(LN(x)) + LN(x) ----------
    for li in range(DEPTH):
        pfx = f"l{li}_"

        # -- column attention: 4 per-head full-batch dots + same-sample mask --
        xn = _layernorm(xcol_ref[...], vec(pfx + "a1_ln_g"), vec(pfx + "a1_ln_b"))
        qkvc_ref[...] = _dotf(xn, w32(pfx + "a1_qkv"))               # (ncol, 3*H*dh), no bias
        for hh in range(HEADS):
            c0 = hh * DIM_HEAD
            q = qkvc_ref[:, c0:c0 + DIM_HEAD]
            k = qkvc_ref[:, ic + c0:ic + c0 + DIM_HEAD]
            v = qkvc_ref[:, 2 * ic + c0:2 * ic + c0 + DIM_HEAD]
            s = lax.dot_general(q, k, (((1,), (1,)), ((), ())),
                                preferred_element_type=jnp.float32) * (DIM_HEAD ** -0.5)
            abuf_ref[:, c0:c0 + DIM_HEAD] = _dotf(_softmax(s + col_mask), v)
        x = _dotf(abuf_ref[...], wcol(pfx + "a1_ow")) + vec(pfx + "a1_out_b") + xn

        # -- column feed-forward (GEGLU) --
        xn = _layernorm(x, vec(pfx + "f1_ln_g"), vec(pfx + "f1_ln_b"))
        h1 = _dotf(xn, w32(pfx + "f1_w1")) + vec(pfx + "f1_b1")      # (ncol, 8d)
        hg = h1[:, :4 * d] * _gelu_erf(h1[:, 4 * d:])                # 128-lane aligned split
        xcol_ref[...] = _dotf(hg, wcol(pfx + "f1_w2")) + vec(pfx + "f1_b2") + xn

        # -- shuttle col -> row: n dense (B, d) block copies --
        for j in range(n):
            xrow_ref[:, j * d:(j + 1) * d] = xcol_ref[j * B:(j + 1) * B, :]

        # -- row attention ('b n d -> 1 b (n d)'; sequence = the B samples, full attention) --
        xn = _layernorm(xrow_ref[...], vec(pfx + "a2_ln_g"), vec(pfx + "a2_ln_b"))
        qkvr_ref[...] = _dotf(xn, w224(pfx + "a2_qkv"))              # (B, 3*H*64)
        for hh in range(HEADS):
            c0 = hh * ROW_DIM_HEAD
            q = qkvr_ref[:, c0:c0 + ROW_DIM_HEAD]
            k = qkvr_ref[:, ir + c0:ir + c0 + ROW_DIM_HEAD]
            v = qkvr_ref[:, 2 * ir + c0:2 * ir + c0 + ROW_DIM_HEAD]
            s = lax.dot_general(q, k, (((1,), (1,)), ((), ())),
                                preferred_element_type=jnp.float32) * (ROW_DIM_HEAD ** -0.5)
            rbuf_ref[:, c0:c0 + ROW_DIM_HEAD] = _dotf(_softmax(s), v)
        xr = _dotf(rbuf_ref[...], wrow(pfx + "a2_ow")) + vec(pfx + "a2_out_b") + xn

        # -- row feed-forward (GEGLU) --
        xn = _layernorm(xr, vec(pfx + "f2_ln_g"), vec(pfx + "f2_ln_b"))
        h1 = _dotf(xn, w224(pfx + "f2_w1")) + vec(pfx + "f2_b1")     # (B, 8*n*d)
        hg = h1[:, :4 * n * d] * _gelu_erf(h1[:, 4 * n * d:])        # 896 = 7*128 lane aligned
        xr = _dotf(hg, wrow(pfx + "f2_w2")) + vec(pfx + "f2_b2") + xn

        if li + 1 < DEPTH:                    # shuttle row -> col for the next layer
            xrow_ref[...] = xr
            for j in range(n):
                xcol_ref[j * B:(j + 1) * B, :] = xrow_ref[:, j * d:(j + 1) * d]

    # ---------- encode(): x[:, 0, :]; decode(): all sep_MLP heads fused (block-diag w2) ----------
    z = xr[:, 0:d]                                                    # (B, d)
    h = jnp.maximum(_dotf(z, w32("dec_w1")) + vec("dec_b1"), 0.0)     # (B, n_heads*5d)
    out_ref[...] = _dotf(h, decw2_ref[...]) + vec("dec_b2")           # (B, DEC_TOTAL)


# ----------------------------- wrapper -----------------------------
def saint_ae_forward(params, x_categ, x_cont):
    """params: packed params (see pack_params); x_categ int32 (B, NUM_CAT); x_cont f32 (B, NUM_CONT)."""
    B = x_categ.shape[0]
    # feature-major token ids (row = feat*B + b) with the categories offset folded in.
    ids = (x_categ.astype(jnp.int32) + params["categories_offset"][None, :])
    ids = ids.T.reshape(NUM_CAT * B, 1)

    out = pl.pallas_call(
        _saint_fused_kernel,
        out_shape=jax.ShapeDtypeStruct((B, DEC_TOTAL), jnp.float32),
        scratch_shapes=[
            pltpu.VMEM((NFEATS * B, DIM), jnp.float32),                    # column-stream activation
            pltpu.VMEM((B, RD), jnp.float32),                              # row-stream activation
            pltpu.VMEM((NFEATS * B, 3 * HEADS * DIM_HEAD), jnp.float32),   # col qkv
            pltpu.VMEM((NFEATS * B, HEADS * DIM_HEAD), jnp.float32),       # col attn head assembly
            pltpu.VMEM((B, 3 * HEADS * ROW_DIM_HEAD), jnp.float32),        # row qkv
            pltpu.VMEM((B, HEADS * ROW_DIM_HEAD), jnp.float32),            # row attn head assembly
        ],
        compiler_params=pltpu.CompilerParams(vmem_limit_bytes=32 * 1024 * 1024),
    )(ids, x_cont.astype(jnp.float32), params["vec"], params["w_d32"],
      params["w_colb"], params["w_d224"], params["w_rowb"], params["dec_w2"])

    cat_outs, con_outs, off = [], [], 0
    for c in CATEGORIES[1:]:
        cat_outs.append(out[:, off:off + c]); off += c
    for _ in range(NUM_CONT):
        con_outs.append(out[:, off:off + 1]); off += 1
    return cat_outs, con_outs


# ----------------------------- parameter init (torch-like layout) -----------------------------
def init_params(key):
    keys = iter(jax.random.split(key, 64))

    def w(shape, scale=0.05):
        return scale * jax.random.normal(next(keys), shape, dtype=jnp.float32)

    zeros = lambda s: jnp.zeros(s, jnp.float32)
    ones = lambda s: jnp.ones(s, jnp.float32)

    p = {}
    # categories_offset = cumsum(pad(categories, (1,0), value=num_special))[:-1]
    p["categories_offset"] = jnp.cumsum(
        jnp.array((NUM_SPECIAL,) + CATEGORIES, dtype=jnp.int32))[:-1]
    p["embeds"] = w((TOTAL_TOKENS, DIM))
    p["cont_w1"] = [w((1, CONT_HID)) for _ in range(NUM_CONT)]
    p["cont_b1"] = [zeros((1, CONT_HID)) for _ in range(NUM_CONT)]
    p["cont_w2"] = [w((CONT_HID, DIM)) for _ in range(NUM_CONT)]
    p["cont_b2"] = [zeros((1, DIM)) for _ in range(NUM_CONT)]

    rd = RD
    inner_col = HEADS * DIM_HEAD
    inner_row = HEADS * ROW_DIM_HEAD
    layers = []
    for _ in range(DEPTH):
        layers.append(dict(
            attn1_ln_g=ones((1, DIM)), attn1_ln_b=zeros((1, DIM)),
            attn1_qkv_w=w((DIM, 3 * inner_col)),
            attn1_out_w=w((inner_col, DIM)), attn1_out_b=zeros((1, DIM)),
            ff1_ln_g=ones((1, DIM)), ff1_ln_b=zeros((1, DIM)),
            ff1_w1=w((DIM, DIM * 8)), ff1_b1=zeros((1, DIM * 8)),
            ff1_w2=w((DIM * 4, DIM)), ff1_b2=zeros((1, DIM)),
            attn2_ln_g=ones((1, rd)), attn2_ln_b=zeros((1, rd)),
            attn2_qkv_w=w((rd, 3 * inner_row)),
            attn2_out_w=w((inner_row, rd)), attn2_out_b=zeros((1, rd)),
            ff2_ln_g=ones((1, rd)), ff2_ln_b=zeros((1, rd)),
            ff2_w1=w((rd, rd * 8)), ff2_b1=zeros((1, rd * 8)),
            ff2_w2=w((rd * 4, rd)), ff2_b2=zeros((1, rd)),
        ))
    p["layers"] = layers
    p["mlp1"] = [dict(w1=w((DIM, DEC_HID)), b1=zeros((1, DEC_HID)),
                      w2=w((DEC_HID, c)), b2=zeros((1, c))) for c in CATEGORIES[1:]]
    p["mlp2"] = [dict(w1=w((DIM, DEC_HID)), b1=zeros((1, DEC_HID)),
                      w2=w((DEC_HID, 1)), b2=zeros((1, 1))) for _ in range(NUM_CONT)]
    return p


def pack_params(p):
    """One-time host-side repacking of the torch-like params into the fused-kernel layout."""
    packed = {"categories_offset": jnp.asarray(p["categories_offset"], jnp.int32)}

    vec = jnp.zeros((1, VEC_LEN), jnp.float32)

    def vput(v, name, arr):
        off, size = VEC_LAYOUT[name]
        return v.at[0, off:off + size].set(jnp.asarray(arr, jnp.float32).reshape(-1))

    def cput(m, layout, name, arr):        # pack along columns
        off, size = layout[name]
        arr = jnp.asarray(arr, jnp.float32)
        return m.at[0:arr.shape[0], off:off + size].set(arr)

    def rput(m, layout, name, arr):        # pack along rows
        off, size = layout[name]
        arr = jnp.asarray(arr, jnp.float32)
        return m.at[off:off + size, 0:arr.shape[1]].set(arr)

    for i in range(NUM_CONT):
        vec = vput(vec, f"cont_w1_{i}", p["cont_w1"][i])
        vec = vput(vec, f"cont_b1_{i}", p["cont_b1"][i])
        vec = vput(vec, f"cont_b2_{i}", p["cont_b2"][i])

    # decoder: all sep_MLP heads fused; block-diagonal second layer (exact).
    heads = list(p["mlp1"]) + list(p["mlp2"])
    dec_w1 = jnp.concatenate([h["w1"] for h in heads], axis=1)          # (DIM, 6*160)
    dec_b1 = jnp.concatenate([h["b1"] for h in heads], axis=1)          # (1, 960)
    dec_b2 = jnp.concatenate([h["b2"] for h in heads], axis=1)          # (1, 24)
    dec_w2 = jnp.zeros((len(heads) * DEC_HID, DEC_TOTAL), jnp.float32)
    off = 0
    for i, h in enumerate(heads):
        c = h["w2"].shape[1]
        dec_w2 = dec_w2.at[i * DEC_HID:(i + 1) * DEC_HID, off:off + c].set(h["w2"])
        off += c

    wd32 = jnp.zeros((WD32_ROWS, WD32_COLS), jnp.float32)
    wcolb = jnp.zeros((WCOLB_ROWS, DIM), jnp.float32)
    wd224 = jnp.zeros((RD, WD224_COLS), jnp.float32)
    wrowb = jnp.zeros((WROWB_ROWS, RD), jnp.float32)

    wd32 = cput(wd32, WD32_LAYOUT, "embeds", p["embeds"])               # rows >= 26 stay 0
    wd32 = cput(wd32, WD32_LAYOUT, "dec_w1", dec_w1)
    for i in range(NUM_CONT):
        wcolb = rput(wcolb, WCOLB_LAYOUT, f"cont_w2_{i}", p["cont_w2"][i])

    for li, lay in enumerate(p["layers"]):
        pfx = f"l{li}_"
        vec = vput(vec, pfx + "a1_ln_g", lay["attn1_ln_g"])
        vec = vput(vec, pfx + "a1_ln_b", lay["attn1_ln_b"])
        vec = vput(vec, pfx + "a1_out_b", lay["attn1_out_b"])
        vec = vput(vec, pfx + "f1_ln_g", lay["ff1_ln_g"])
        vec = vput(vec, pfx + "f1_ln_b", lay["ff1_ln_b"])
        vec = vput(vec, pfx + "f1_b1", lay["ff1_b1"])
        vec = vput(vec, pfx + "f1_b2", lay["ff1_b2"])
        vec = vput(vec, pfx + "a2_ln_g", lay["attn2_ln_g"])
        vec = vput(vec, pfx + "a2_ln_b", lay["attn2_ln_b"])
        vec = vput(vec, pfx + "a2_out_b", lay["attn2_out_b"])
        vec = vput(vec, pfx + "f2_ln_g", lay["ff2_ln_g"])
        vec = vput(vec, pfx + "f2_ln_b", lay["ff2_ln_b"])
        vec = vput(vec, pfx + "f2_b1", lay["ff2_b1"])
        vec = vput(vec, pfx + "f2_b2", lay["ff2_b2"])
        wd32 = cput(wd32, WD32_LAYOUT, pfx + "a1_qkv", lay["attn1_qkv_w"])
        wd32 = cput(wd32, WD32_LAYOUT, pfx + "f1_w1", lay["ff1_w1"])
        wcolb = rput(wcolb, WCOLB_LAYOUT, pfx + "a1_ow", lay["attn1_out_w"])
        wcolb = rput(wcolb, WCOLB_LAYOUT, pfx + "f1_w2", lay["ff1_w2"])
        wd224 = cput(wd224, WD224_LAYOUT, pfx + "a2_qkv", lay["attn2_qkv_w"])
        wd224 = cput(wd224, WD224_LAYOUT, pfx + "f2_w1", lay["ff2_w1"])
        wrowb = rput(wrowb, WROWB_LAYOUT, pfx + "a2_ow", lay["attn2_out_w"])
        wrowb = rput(wrowb, WROWB_LAYOUT, pfx + "f2_w2", lay["ff2_w2"])

    vec = vput(vec, "dec_b1", dec_b1)
    vec = vput(vec, "dec_b2", dec_b2)

    packed.update(vec=vec, w_d32=wd32, w_colb=wcolb, w_d224=wd224,
                  w_rowb=wrowb, dec_w2=dec_w2)
    return packed


# ----------------------------- pure-JAX reference (for correctness check) -----------------------------
def saint_ae_reference(p, x_categ, x_cont):
    B = x_categ.shape[0]
    ids = x_categ + p["categories_offset"][None, :]
    x_cat = jnp.take(p["embeds"], ids, axis=0)                       # (B, NUM_CAT, DIM)
    cont = []
    for i in range(NUM_CONT):
        h = jax.nn.relu(x_cont[:, i:i + 1] * p["cont_w1"][i] + p["cont_b1"][i])
        cont.append(h @ p["cont_w2"][i] + p["cont_b2"][i])
    x = jnp.concatenate([x_cat, jnp.stack(cont, axis=1)], axis=1)    # (B, n, DIM)
    n = x.shape[1]

    def ln(v, g, b):
        mu = v.mean(-1, keepdims=True)
        var = ((v - mu) ** 2).mean(-1, keepdims=True)
        return (v - mu) * lax.rsqrt(var + 1e-5) * g + b

    def attn(v, wqkv, wo, bo, heads, dh):
        b_, n_, d_ = v.shape
        qkv = (v.reshape(b_ * n_, d_) @ wqkv).reshape(b_, n_, 3 * heads * dh)
        q, k, vv = jnp.split(qkv, 3, axis=-1)
        sh = lambda t: t.reshape(b_, n_, heads, dh).transpose(0, 2, 1, 3)
        q, k, vv = sh(q), sh(k), sh(vv)
        s = jnp.einsum('bhid,bhjd->bhij', q, k) * (dh ** -0.5)
        o = jnp.einsum('bhij,bhjd->bhid', jax.nn.softmax(s, axis=-1), vv)
        o = o.transpose(0, 2, 1, 3).reshape(b_ * n_, heads * dh)
        return (o @ wo + bo).reshape(b_, n_, d_)

    def ff(v2d, w1, b1, w2, b2):
        h = v2d @ w1 + b1
        a, g = jnp.split(h, 2, axis=-1)
        return (a * jax.nn.gelu(g, approximate=False)) @ w2 + b2

    for lay in p["layers"]:
        xn = ln(x, lay["attn1_ln_g"], lay["attn1_ln_b"])
        x = attn(xn, lay["attn1_qkv_w"], lay["attn1_out_w"], lay["attn1_out_b"], HEADS, DIM_HEAD) + xn
        xn = ln(x, lay["ff1_ln_g"], lay["ff1_ln_b"])
        x = ff(xn.reshape(B * n, DIM), lay["ff1_w1"], lay["ff1_b1"],
               lay["ff1_w2"], lay["ff1_b2"]).reshape(B, n, DIM) + xn
        xr = x.reshape(1, B, n * DIM)
        xn = ln(xr, lay["attn2_ln_g"], lay["attn2_ln_b"])
        xr = attn(xn, lay["attn2_qkv_w"], lay["attn2_out_w"], lay["attn2_out_b"], HEADS, ROW_DIM_HEAD) + xn
        xn = ln(xr, lay["ff2_ln_g"], lay["ff2_ln_b"])
        xr = ff(xn.reshape(B, n * DIM), lay["ff2_w1"], lay["ff2_b1"],
                lay["ff2_w2"], lay["ff2_b2"]).reshape(1, B, n * DIM) + xn
        x = xr.reshape(B, n, DIM)
    z = x[:, 0, :]
    cat_outs = [jax.nn.relu(z @ hp["w1"] + hp["b1"]) @ hp["w2"] + hp["b2"] for hp in p["mlp1"]]
    con_outs = [jax.nn.relu(z @ hp["w1"] + hp["b1"]) @ hp["w2"] + hp["b2"] for hp in p["mlp2"]]
    return cat_outs, con_outs


# ----------------------------- main -----------------------------
if __name__ == "__main__":
    key = jax.random.PRNGKey(0)
    pkey, ckey, dkey = jax.random.split(key, 3)

    raw_params = init_params(pkey)
    params = pack_params(raw_params)

    x_categ = jax.random.randint(ckey, (BATCH, NUM_CAT), minval=0,
                                 maxval=jnp.array(CATEGORIES, dtype=jnp.int32),
                                 dtype=jnp.int32)
    x_cont = jax.random.normal(dkey, (BATCH, NUM_CONT), dtype=jnp.float32)

    fwd = jax.jit(saint_ae_forward)
    cat_outs, con_outs = jax.block_until_ready(fwd(params, x_categ, x_cont))

    # shape / sanity checks
    assert [tuple(o.shape) for o in cat_outs] == [(BATCH, c) for c in CATEGORIES[1:]]
    assert all(tuple(o.shape) == (BATCH, 1) for o in con_outs)
    assert all(bool(jnp.all(jnp.isfinite(o))) for o in cat_outs + con_outs)

    # numerical check against a pure-JAX reference of the same forward semantics
    ref_cat, ref_con = jax.jit(saint_ae_reference)(raw_params, x_categ, x_cont)
    for got, want in zip(cat_outs + con_outs, ref_cat + ref_con):
        assert bool(jnp.allclose(got, want, rtol=5e-2, atol=5e-3)), \
            float(jnp.max(jnp.abs(got - want)))

    print("KERNEL_OK")
</pallas_src>

<mosaic_0001>
module attributes {stable_mosaic.version = 11 : i64} {
  func.func @_saint_fused_kernel(%arg0: memref<32x1xi32, #tpu.memory_space<vmem>>, %arg1: memref<8x3xf32, #tpu.memory_space<vmem>>, %arg2: memref<1x6656xf32, #tpu.memory_space<vmem>>, %arg3: memref<32x1664xf32, #tpu.memory_space<vmem>>, %arg4: memref<504x32xf32, #tpu.memory_space<vmem>>, %arg5: memref<224x2560xf32, #tpu.memory_space<vmem>>, %arg6: memref<1152x224xf32, #tpu.memory_space<vmem>>, %arg7: memref<960x24xf32, #tpu.memory_space<vmem>>, %arg8: memref<8x24xf32, #tpu.memory_space<vmem>>, %arg9: memref<56x32xf32, #tpu.memory_space<vmem>>, %arg10: memref<8x224xf32, #tpu.memory_space<vmem>>, %arg11: memref<56x192xf32, #tpu.memory_space<vmem>>, %arg12: memref<56x64xf32, #tpu.memory_space<vmem>>, %arg13: memref<8x768xf32, #tpu.memory_space<vmem>>, %arg14: memref<8x256xf32, #tpu.memory_space<vmem>>) attributes {dimension_semantics = [], scalar_prefetch = 0 : i64, scratch_operands = 6 : i64, tpu.core_type = #tpu.core_type<tc>} {
    %c0 = arith.constant 0 : index
    %c0_0 = arith.constant 0 : index
    %0 = vector.load %arg3[%c0, %c0_0] : memref<32x1664xf32, #tpu.memory_space<vmem>>, vector<32x32xf32>
    %1 = tpu.iota {dimensions = array<i32: 1>} : vector<32x32xi32>
    %c0_1 = arith.constant 0 : index
    %c0_2 = arith.constant 0 : index
    %2 = vector.load %arg0[%c0_1, %c0_2] : memref<32x1xi32, #tpu.memory_space<vmem>>, vector<32x1xi32>
    %3 = vector.broadcast %2 : vector<32x1xi32> to vector<32x32xi32>
    %4 = arith.cmpi eq, %1, %3 : vector<32x32xi32>
    %cst = arith.constant 1.000000e+00 : f32
    %cst_3 = arith.constant 0.000000e+00 : f32
    %5 = vector.broadcast %cst : f32 to vector<32x32xf32>
    %6 = vector.broadcast %cst_3 : f32 to vector<32x32xf32>
    %7 = arith.select %4, %5, %6 : vector<32x32xi1>, vector<32x32xf32>
    %cst_4 = arith.constant dense<0.000000e+00> : vector<32x32xf32>
    %8 = tpu.matmul %7, %0, %cst_4 {dimension_numbers = #tpu.dot_dimension_numbers<[1], [0], [0], [1], [0, 0, 1, 1], [], []>} : vector<32x32xf32>, vector<32x32xf32>, vector<32x32xf32> -> vector<32x32xf32>
    %c0_5 = arith.constant 0 : index
    %c0_6 = arith.constant 0 : index
    %9 = vector.load %arg9[%c0_5, %c0_6] : memref<56x32xf32, #tpu.memory_space<vmem>>, vector<32x32xf32>
    tpu.vector_store %arg9[%c0_5, %c0_6], %8 {strides = array<i32>} : memref<56x32xf32, #tpu.memory_space<vmem>>, vector<32x32xf32>,
    %c0_7 = arith.constant 0 : index
    %c0_8 = arith.constant 0 : index
    %10 = vector.load %arg1[%c0_7, %c0_8] : memref<8x3xf32, #tpu.memory_space<vmem>>, vector<8x1xf32>
    %c0_9 = arith.constant 0 : index
    %c0_10 = arith.constant 0 : index
    %11 = vector.load %arg2[%c0_9, %c0_10] : memref<1x6656xf32, #tpu.memory_space<vmem>>, vector<1x100xf32>
    %12 = vector.broadcast %10 : vector<8x1xf32> to vector<8x100xf32>
    %13 = vector.broadcast %11 : vector<1x100xf32> to vector<8x100xf32>
    %14 = arith.mulf %12, %13 : vector<8x100xf32>
    %c0_11 = arith.constant 0 : index
    %c128 = arith.constant 128 : index
    %15 = vector.load %arg2[%c0_11, %c128] : memref<1x6656xf32, #tpu.memory_space<vmem>>, vector<1x100xf32>
    %16 = vector.broadcast %15 : vector<1x100xf32> to vector<8x100xf32>
    %17 = arith.addf %14, %16 : vector<8x100xf32>
    %cst_12 = arith.constant 0.000000e+00 : f32
    %18 = vector.broadcast %cst_12 : f32 to vector<8x100xf32>
    %19 = arith.maximumf %17, %18 : vector<8x100xf32>
    %c0_13 = arith.constant 0 : index
    %c0_14 = arith.constant 0 : index
    %20 = vector.load %arg4[%c0_13, %c0_14] : memref<504x32xf32, #tpu.memory_space<vmem>>, vector<100x32xf32>
    %cst_15 = arith.constant dense<0.000000e+00> : vector<8x32xf32>
    %21 = tpu.matmul %19, %20, %cst_15 {dimension_numbers = #tpu.dot_dimension_numbers<[1], [0], [0], [1], [0, 0, 1, 1], [], []>} : vector<8x100xf32>, vector<100x32xf32>, vector<8x32xf32> -> vector<8x32xf32>
    %c0_16 = arith.constant 0 : index
    %c256 = arith.constant 256 : index
    %22 = vector.load %arg2[%c0_16, %c256] : memref<1x6656xf32, #tpu.memory_space<vmem>>, vector<1x32xf32>
    %23 = vector.broadcast %22 : vector<1x32xf32> to vector<8x32xf32>
    %24 = arith.addf %21, %23 : vector<8x32xf32>
    %c32 = arith.constant 32 : index
    %c0_17 = arith.constant 0 : index
    %25 = vector.load %arg9[%c32, %c0_17] : memref<56x32xf32, #tpu.memory_space<vmem>>, vector<8x32xf32>
    tpu.vector_store %arg9[%c32, %c0_17], %24 {strides = array<i32>} : memref<56x32xf32, #tpu.memory_space<vmem>>, vector<8x32xf32>,
    %c0_18 = arith.constant 0 : index
    %c1 = arith.constant 1 : index
    %26 = vector.load %arg1[%c0_18, %c1] : memref<8x3xf32, #tpu.memory_space<vmem>>, vector<8x1xf32>
    %c0_19 = arith.constant 0 : index
    %c384 = arith.constant 384 : index
    %27 = vector.load %arg2[%c0_19, %c384] : memref<1x6656xf32, #tpu.memory_space<vmem>>, vector<1x100xf32>
    %28 = vector.broadcast %26 : vector<8x1xf32> to vector<8x100xf32>
    %29 = vector.broadcast %27 : vector<1x100xf32> to vector<8x100xf32>
    %30 = arith.mulf %28, %29 : vector<8x100xf32>
    %c0_20 = arith.constant 0 : index
    %c512 = arith.constant 512 : index
    %31 = vector.load %arg2[%c0_20, %c512] : memref<1x6656xf32, #tpu.memory_space<vmem>>, vector<1x100xf32>
    %32 = vector.broadcast %31 : vector<1x100xf32> to vector<8x100xf32>
    %33 = arith.addf %30, %32 : vector<8x100xf32>
    %cst_21 = arith.constant 0.000000e+00 : f32
    %34 = vector.broadcast %cst_21 : f32 to vector<8x100xf32>
    %35 = arith.maximumf %33, %34 : vector<8x100xf32>
    %c104 = arith.constant 104 : index
    %c0_22 = arith.constant 0 : index
    %36 = vector.load %arg4[%c104, %c0_22] : memref<504x32xf32, #tpu.memory_space<vmem>>, vector<100x32xf32>
    %cst_23 = arith.constant dense<0.000000e+00> : vector<8x32xf32>
    %37 = tpu.matmul %35, %36, %cst_23 {dimension_numbers = #tpu.dot_dimension_numbers<[1], [0], [0], [1], [0, 0, 1, 1], [], []>} : vector<8x100xf32>, vector<100x32xf32>, vector<8x32xf32> -> vector<8x32xf32>
    %c0_24 = arith.constant 0 : index
    %c640 = arith.constant 640 : index
    %38 = vector.load %arg2[%c0_24, %c640] : memref<1x6656xf32, #tpu.memory_space<vmem>>, vector<1x32xf32>
    %39 = vector.broadcast %38 : vector<1x32xf32> to vector<8x32xf32>
    %40 = arith.addf %37, %39 : vector<8x32xf32>
    %c40 = arith.constant 40 : index
    %c0_25 = arith.constant 0 : index
    %41 = vector.load %arg9[%c40, %c0_25] : memref<56x32xf32, #tpu.memory_space<vmem>>, vector<8x32xf32>
    tpu.vector_store %arg9[%c40, %c0_25], %40 {strides = array<i32>} : memref<56x32xf32, #tpu.memory_space<vmem>>, vector<8x32xf32>,
    %c0_26 = arith.constant 0 : index
    %c2 = arith.constant 2 : index
    %42 = vector.load %arg1[%c0_26, %c2] : memref<8x3xf32, #tpu.memory_space<vmem>>, vector<8x1xf32>
    %c0_27 = arith.constant 0 : index
    %c768 = arith.constant 768 : index
    %43 = vector.load %arg2[%c0_27, %c768] : memref<1x6656xf32, #tpu.memory_space<vmem>>, vector<1x100xf32>
    %44 = vector.broadcast %42 : vector<8x1xf32> to vector<8x100xf32>
    %45 = vector.broadcast %43 : vector<1x100xf32> to vector<8x100xf32>
    %46 = arith.mulf %44, %45 : vector<8x100xf32>
    %c0_28 = arith.constant 0 : index
    %c896 = arith.constant 896 : index
    %47 = vector.load %arg2[%c0_28, %c896] : memref<1x6656xf32, #tpu.memory_space<vmem>>, vector<1x100xf32>
    %48 = vector.broadcast %47 : vector<1x100xf32> to vector<8x100xf32>
    %49 = arith.addf %46, %48 : vector<8x100xf32>
    %cst_29 = arith.constant 0.000000e+00 : f32
    %50 = vector.broadcast %cst_29 : f32 to vector<8x100xf32>
    %51 = arith.maximumf %49, %50 : vector<8x100xf32>
    %c208 = arith.constant 208 : index
    %c0_30 = arith.constant 0 : index
    %52 = vector.load %arg4[%c208, %c0_30] : memref<504x32xf32, #tpu.memory_space<vmem>>, vector<100x32xf32>
    %cst_31 = arith.constant dense<0.000000e+00> : vector<8x32xf32>
    %53 = tpu.matmul %51, %52, %cst_31 {dimension_numbers = #tpu.dot_dimension_numbers<[1], [0], [0], [1], [0, 0, 1, 1], [], []>} : vector<8x100xf32>, vector<100x32xf32>, vector<8x32xf32> -> vector<8x32xf32>
    %c0_32 = arith.constant 0 : index
    %c1024 = arith.constant 1024 : index
    %54 = vector.load %arg2[%c0_32, %c1024] : memref<1x6656xf32, #tpu.memory_space<vmem>>, vector<1x32xf32>
    %55 = vector.broadcast %54 : vector<1x32xf32> to vector<8x32xf32>
    %56 = arith.addf %53, %55 : vector<8x32xf32>
    %c48 = arith.constant 48 : index
    %c0_33 = arith.constant 0 : index
    %57 = vector.load %arg9[%c48, %c0_33] : memref<56x32xf32, #tpu.memory_space<vmem>>, vector<8x32xf32>
    tpu.vector_store %arg9[%c48, %c0_33], %56 {strides = array<i32>} : memref<56x32xf32, #tpu.memory_space<vmem>>, vector<8x32xf32>,
    %58 = tpu.iota {dimensions = array<i32: 0>} : vector<56x56xi32>
    %59 = tpu.iota {dimensions = array<i32: 1>} : vector<56x56xi32>
    %c8_i32 = arith.constant 8 : i32
    %c0_i32 = arith.constant 0 : i32
    %60 = arith.cmpi eq, %c8_i32, %c0_i32 : i32
    %c1_i32 = arith.constant 1 : i32
    %61 = arith.select %60, %c1_i32, %c8_i32 : i32
    %62 = vector.broadcast %61 : i32 to vector<56x56xi32>
    %63 = arith.remsi %58, %62 : vector<56x56xi32>
    %c0_i32_34 = arith.constant 0 : i32
    %64 = vector.broadcast %c0_i32_34 : i32 to vector<56x56xi32>
    %65 = arith.cmpi ne, %63, %64 : vector<56x56xi32>
    %c0_i32_35 = arith.constant 0 : i32
    %66 = vector.broadcast %c0_i32_35 : i32 to vector<56x56xi32>
    %67 = arith.cmpi slt, %63, %66 : vector<56x56xi32>
    %c0_i32_36 = arith.constant 0 : i32
    %68 = arith.cmpi slt, %61, %c0_i32_36 : i32
    %69 = vector.broadcast %68 : i1 to vector<56x56xi1>
    %70 = vector.broadcast %69 : vector<56x56xi1> to vector<56x56xi1>
    %71 = arith.xori %67, %70 : vector<56x56xi1>
    %72 = arith.andi %71, %65 : vector<56x56xi1>
    %73 = vector.broadcast %61 : i32 to vector<56x56xi32>
    %74 = arith.addi %63, %73 : vector<56x56xi32>
    %75 = arith.select %72, %74, %63 : vector<56x56xi1>, vector<56x56xi32>
    %c8_i32_37 = arith.constant 8 : i32
    %c0_i32_38 = arith.constant 0 : i32
    %76 = arith.cmpi eq, %c8_i32_37, %c0_i32_38 : i32
    %c1_i32_39 = arith.constant 1 : i32
    %77 = arith.select %76, %c1_i32_39, %c8_i32_37 : i32
    %78 = vector.broadcast %77 : i32 to vector<56x56xi32>
    %79 = arith.remsi %59, %78 : vector<56x56xi32>
    %c0_i32_40 = arith.constant 0 : i32
    %80 = vector.broadcast %c0_i32_40 : i32 to vector<56x56xi32>
    %81 = arith.cmpi ne, %79, %80 : vector<56x56xi32>
    %c0_i32_41 = arith.constant 0 : i32
    %82 = vector.broadcast %c0_i32_41 : i32 to vector<56x56xi32>
    %83 = arith.cmpi slt, %79, %82 : vector<56x56xi32>
    %c0_i32_42 = arith.constant 0 : i32
    %84 = arith.cmpi slt, %77, %c0_i32_42 : i32
    %85 = vector.broadcast %84 : i1 to vector<56x56xi1>
    %86 = vector.broadcast %85 : vector<56x56xi1> to vector<56x56xi1>
    %87 = arith.xori %83, %86 : vector<56x56xi1>
    %88 = arith.andi %87, %81 : vector<56x56xi1>
    %89 = vector.broadcast %77 : i32 to vector<56x56xi32>
    %90 = arith.addi %79, %89 : vector<56x56xi32>
    %91 = arith.select %88, %90, %79 : vector<56x56xi1>, vector<56x56xi32>
    %92 = arith.cmpi eq, %75, %91 : vector<56x56xi32>
    %cst_43 = arith.constant 0.000000e+00 : f32
    %cst_44 = arith.constant -1.000000e+09 : f32
    %93 = vector.broadcast %cst_43 : f32 to vector<56x56xf32>
    %94 = vector.broadcast %cst_44 : f32 to vector<56x56xf32>
    %95 = arith.select %92, %93, %94 : vector<56x56xi1>, vector<56x56xf32>
    %c0_45 = arith.constant 0 : index
    %c0_46 = arith.constant 0 : index
    %96 = vector.load %arg9[%c0_45, %c0_46] : memref<56x32xf32, #tpu.memory_space<vmem>>, vector<56x32xf32>
    %c0_47 = arith.constant 0 : index
    %c1152 = arith.constant 1152 : index
    %97 = vector.load %arg2[%c0_47, %c1152] : memref<1x6656xf32, #tpu.memory_space<vmem>>, vector<1x32xf32>
    %c0_48 = arith.constant 0 : index
    %c1280 = arith.constant 1280 : index
    %98 = vector.load %arg2[%c0_48, %c1280] : memref<1x6656xf32, #tpu.memory_space<vmem>>, vector<1x32xf32>
    %cst_49 = arith.constant dense<0.000000e+00> : vector<56xf32>
    %99 = vector.multi_reduction <add>, %96, %cst_49 [1] : vector<56x32xf32> to vector<56xf32>
    %100 = vector.shape_cast %99 : vector<56xf32> to vector<56x1xf32>
    %cst_50 = arith.constant 3.200000e+01 : f32
    %101 = vector.broadcast %cst_50 : f32 to vector<56x1xf32>
    %102 = arith.divf %100, %101 : vector<56x1xf32>
    %103 = vector.broadcast %102 : vector<56x1xf32> to vector<56x32xf32>
    %104 = arith.subf %96, %103 : vector<56x32xf32>
    %105 = arith.mulf %104, %104 : vector<56x32xf32>
    %cst_51 = arith.constant dense<0.000000e+00> : vector<56xf32>
    %106 = vector.multi_reduction <add>, %105, %cst_51 [1] : vector<56x32xf32> to vector<56xf32>
    %107 = vector.shape_cast %106 : vector<56xf32> to vector<56x1xf32>
    %cst_52 = arith.constant 3.200000e+01 : f32
    %108 = vector.broadcast %cst_52 : f32 to vector<56x1xf32>
    %109 = arith.divf %107, %108 : vector<56x1xf32>
    %110 = vector.broadcast %102 : vector<56x1xf32> to vector<56x32xf32>
    %111 = arith.subf %96, %110 : vector<56x32xf32>
    %cst_53 = arith.constant 9.99999974E-6 : f32
    %112 = vector.broadcast %cst_53 : f32 to vector<56x1xf32>
    %113 = arith.addf %109, %112 : vector<56x1xf32>
    %114 = math.rsqrt %113 : vector<56x1xf32>
    %115 = vector.broadcast %114 : vector<56x1xf32> to vector<56x32xf32>
    %116 = arith.mulf %111, %115 : vector<56x32xf32>
    %117 = vector.broadcast %97 : vector<1x32xf32> to vector<56x32xf32>
    %118 = arith.mulf %116, %117 : vector<56x32xf32>
    %119 = vector.broadcast %98 : vector<1x32xf32> to vector<56x32xf32>
    %120 = arith.addf %118, %119 : vector<56x32xf32>
    %c0_54 = arith.constant 0 : index
    %c128_55 = arith.constant 128 : index
    %121 = vector.load %arg3[%c0_54, %c128_55] : memref<32x1664xf32, #tpu.memory_space<vmem>>, vector<32x192xf32>
    %cst_56 = arith.constant dense<0.000000e+00> : vector<56x192xf32>
    %122 = tpu.matmul %120, %121, %cst_56 {dimension_numbers = #tpu.dot_dimension_numbers<[1], [0], [0], [1], [0, 0, 1, 1], [], []>} : vector<56x32xf32>, vector<32x192xf32>, vector<56x192xf32> -> vector<56x192xf32>
    %c0_57 = arith.constant 0 : index
    %c0_58 = arith.constant 0 : index
    %123 = vector.load %arg11[%c0_57, %c0_58] : memref<56x192xf32, #tpu.memory_space<vmem>>, vector<56x192xf32>
    tpu.vector_store %arg11[%c0_57, %c0_58], %122 {strides = array<i32>} : memref<56x192xf32, #tpu.memory_space<vmem>>, vector<56x192xf32>,
    %c0_59 = arith.constant 0 : index
    %c0_60 = arith.constant 0 : index
    %124 = vector.load %arg11[%c0_59, %c0_60] : memref<56x192xf32, #tpu.memory_space<vmem>>, vector<56x16xf32>
    %c0_61 = arith.constant 0 : index
    %c64 = arith.constant 64 : index
    %125 = vector.load %arg11[%c0_61, %c64] : memref<56x192xf32, #tpu.memory_space<vmem>>, vector<56x16xf32>
    %c0_62 = arith.constant 0 : index
    %c128_63 = arith.constant 128 : index
    %126 = vector.load %arg11[%c0_62, %c128_63] : memref<56x192xf32, #tpu.memory_space<vmem>>, vector<56x16xf32>
    %cst_64 = arith.constant dense<0.000000e+00> : vector<56x56xf32>
    %127 = tpu.matmul %124, %125, %cst_64 {dimension_numbers = #tpu.dot_dimension_numbers<[1], [1], [0], [0], [0, 0, 1, 0], [], []>} : vector<56x16xf32>, vector<56x16xf32>, vector<56x56xf32> -> vector<56x56xf32>
    %cst_65 = arith.constant 2.500000e-01 : f32
    %128 = vector.broadcast %cst_65 : f32 to vector<56x56xf32>
    %129 = arith.mulf %127, %128 : vector<56x56xf32>
    %130 = arith.addf %129, %95 : vector<56x56xf32>
    %cst_66 = arith.constant dense<0xFF800000> : vector<56xf32>
    %131 = vector.multi_reduction <maximumf>, %130, %cst_66 [1] : vector<56x56xf32> to vector<56xf32>
    %132 = vector.shape_cast %131 : vector<56xf32> to vector<56x1xf32>
    %133 = vector.broadcast %132 : vector<56x1xf32> to vector<56x56xf32>
    %134 = arith.subf %130, %133 : vector<56x56xf32>
    %135 = math.exp %134 : vector<56x56xf32>
    %cst_67 = arith.constant dense<0.000000e+00> : vector<56xf32>
    %136 = vector.multi_reduction <add>, %135, %cst_67 [1] : vector<56x56xf32> to vector<56xf32>
    %137 = vector.shape_cast %136 : vector<56xf32> to vector<56x1xf32>
    %138 = tpu.reciprocal %137 {approx = true} : vector<56x1xf32> -> vector<56x1xf32>
    %139 = vector.broadcast %138 : vector<56x1xf32> to vector<56x56xf32>
    %140 = arith.mulf %135, %139 : vector<56x56xf32>
    %cst_68 = arith.constant dense<0.000000e+00> : vector<56x16xf32>
    %141 = tpu.matmul %140, %126, %cst_68 {dimension_numbers = #tpu.dot_dimension_numbers<[1], [0], [0], [1], [0, 0, 1, 1], [], []>} : vector<56x56xf32>, vector<56x16xf32>, vector<56x16xf32> -> vector<56x16xf32>
    %c0_69 = arith.constant 0 : index
    %c0_70 = arith.constant 0 : index
    %142 = vector.load %arg12[%c0_69, %c0_70] : memref<56x64xf32, #tpu.memory_space<vmem>>, vector<56x16xf32>
    tpu.vector_store %arg12[%c0_69, %c0_70], %141 {strides = array<i32>} : memref<56x64xf32, #tpu.memory_space<vmem>>, vector<56x16xf32>,
    %c0_71 = arith.constant 0 : index
    %c16 = arith.constant 16 : index
    %143 = vector.load %arg11[%c0_71, %c16] : memref<56x192xf32, #tpu.memory_space<vmem>>, vector<56x16xf32>
    %c0_72 = arith.constant 0 : index
    %c80 = arith.constant 80 : index
    %144 = vector.load %arg11[%c0_72, %c80] : memref<56x192xf32, #tpu.memory_space<vmem>>, vector<56x16xf32>
    %c0_73 = arith.constant 0 : index
    %c144 = arith.constant 144 : index
    %145 = vector.load %arg11[%c0_73, %c144] : memref<56x192xf32, #tpu.memory_space<vmem>>, vector<56x16xf32>
    %cst_74 = arith.constant dense<0.000000e+00> : vector<56x56xf32>
    %146 = tpu.matmul %143, %144, %cst_74 {dimension_numbers = #tpu.dot_dimension_numbers<[1], [1], [0], [0], [0, 0, 1, 0], [], []>} : vector<56x16xf32>, vector<56x16xf32>, vector<56x56xf32> -> vector<56x56xf32>
    %cst_75 = arith.constant 2.500000e-01 : f32
    %147 = vector.broadcast %cst_75 : f32 to vector<56x56xf32>
    %148 = arith.mulf %146, %147 : vector<56x56xf32>
    %149 = arith.addf %148, %95 : vector<56x56xf32>
    %cst_76 = arith.constant dense<0xFF800000> : vector<56xf32>
    %150 = vector.multi_reduction <maximumf>, %149, %cst_76 [1] : vector<56x56xf32> to vector<56xf32>
    %151 = vector.shape_cast %150 : vector<56xf32> to vector<56x1xf32>
    %152 = vector.broadcast %151 : vector<56x1xf32> to vector<56x56xf32>
    %153 = arith.subf %149, %152 : vector<56x56xf32>
    %154 = math.exp %153 : vector<56x56xf32>
    %cst_77 = arith.constant dense<0.000000e+00> : vector<56xf32>
    %155 = vector.multi_reduction <add>, %154, %cst_77 [1] : vector<56x56xf32> to vector<56xf32>
    %156 = vector.shape_cast %155 : vector<56xf32> to vector<56x1xf32>
    %157 = tpu.reciprocal %156 {approx = true} : vector<56x1xf32> -> vector<56x1xf32>
    %158 = vector.broadcast %157 : vector<56x1xf32> to vector<56x56xf32>
    %159 = arith.mulf %154, %158 : vector<56x56xf32>
    %cst_78 = arith.constant dense<0.000000e+00> : vector<56x16xf32>
    %160 = tpu.matmul %159, %145, %cst_78 {dimension_numbers = #tpu.dot_dimension_numbers<[1], [0], [0], [1], [0, 0, 1, 1], [], []>} : vector<56x56xf32>, vector<56x16xf32>, vector<56x16xf32> -> vector<56x16xf32>
    %c0_79 = arith.constant 0 : index
    %c16_80 = arith.constant 16 : index
    %161 = vector.load %arg12[%c0_79, %c16_80] : memref<56x64xf32, #tpu.memory_space<vmem>>, vector<56x16xf32>
    tpu.vector_store %arg12[%c0_79, %c16_80], %160 {strides = array<i32>} : memref<56x64xf32, #tpu.memory_space<vmem>>, vector<56x16xf32>,
    %c0_81 = arith.constant 0 : index
    %c32_82 = arith.constant 32 : index
    %162 = vector.load %arg11[%c0_81, %c32_82] : memref<56x192xf32, #tpu.memory_space<vmem>>, vector<56x16xf32>
    %c0_83 = arith.constant 0 : index
    %c96 = arith.constant 96 : index
    %163 = vector.load %arg11[%c0_83, %c96] : memref<56x192xf32, #tpu.memory_space<vmem>>, vector<56x16xf32>
    %c0_84 = arith.constant 0 : index
    %c160 = arith.constant 160 : index
    %164 = vector.load %arg11[%c0_84, %c160] : memref<56x192xf32, #tpu.memory_space<vmem>>, vector<56x16xf32>
    %cst_85 = arith.constant dense<0.000000e+00> : vector<56x56xf32>
    %165 = tpu.matmul %162, %163, %cst_85 {dimension_numbers = #tpu.dot_dimension_numbers<[1], [1], [0], [0], [0, 0, 1, 0], [], []>} : vector<56x16xf32>, vector<56x16xf32>, vector<56x56xf32> -> vector<56x56xf32>
    %cst_86 = arith.constant 2.500000e-01 : f32
    %166 = vector.broadcast %cst_86 : f32 to vector<56x56xf32>
    %167 = arith.mulf %165, %166 : vector<56x56xf32>
    %168 = arith.addf %167, %95 : vector<56x56xf32>
    %cst_87 = arith.constant dense<0xFF800000> : vector<56xf32>
    %169 = vector.multi_reduction <maximumf>, %168, %cst_87 [1] : vector<56x56xf32> to vector<56xf32>
    %170 = vector.shape_cast %169 : vector<56xf32> to vector<56x1xf32>
    %171 = vector.broadcast %170 : vector<56x1xf32> to vector<56x56xf32>
    %172 = arith.subf %168, %171 : vector<56x56xf32>
    %173 = math.exp %172 : vector<56x56xf32>
    %cst_88 = arith.constant dense<0.000000e+00> : vector<56xf32>
    %174 = vector.multi_reduction <add>, %173, %cst_88 [1] : vector<56x56xf32> to vector<56xf32>
    %175 = vector.shape_cast %174 : vector<56xf32> to vector<56x1xf32>
    %176 = tpu.reciprocal %175 {approx = true} : vector<56x1xf32> -> vector<56x1xf32>
    %177 = vector.broadcast %176 : vector<56x1xf32> to vector<56x56xf32>
    %178 = arith.mulf %173, %177 : vector<56x56xf32>
    %cst_89 = arith.constant dense<0.000000e+00> : vector<56x16xf32>
    %179 = tpu.matmul %178, %164, %cst_89 {dimension_numbers = #tpu.dot_dimension_numbers<[1], [0], [0], [1], [0, 0, 1, 1], [], []>} : vector<56x56xf32>, vector<56x16xf32>, vector<56x16xf32> -> vector<56x16xf32>
    %c0_90 = arith.constant 0 : index
    %c32_91 = arith.constant 32 : index
    %180 = vector.load %arg12[%c0_90, %c32_91] : memref<56x64xf32, #tpu.memory_space<vmem>>, vector<56x16xf32>
    tpu.vector_store %arg12[%c0_90, %c32_91], %179 {strides = array<i32>} : memref<56x64xf32, #tpu.memory_space<vmem>>, vector<56x16xf32>,
    %c0_92 = arith.constant 0 : index
    %c48_93 = arith.constant 48 : index
    %181 = vector.load %arg11[%c0_92, %c48_93] : memref<56x192xf32, #tpu.memory_space<vmem>>, vector<56x16xf32>
    %c0_94 = arith.constant 0 : index
    %c112 = arith.constant 112 : index
    %182 = vector.load %arg11[%c0_94, %c112] : memref<56x192xf32, #tpu.memory_space<vmem>>, vector<56x16xf32>
    %c0_95 = arith.constant 0 : index
    %c176 = arith.constant 176 : index
    %183 = vector.load %arg11[%c0_95, %c176] : memref<56x192xf32, #tpu.memory_space<vmem>>, vector<56x16xf32>
    %cst_96 = arith.constant dense<0.000000e+00> : vector<56x56xf32>
    %184 = tpu.matmul %181, %182, %cst_96 {dimension_numbers = #tpu.dot_dimension_numbers<[1], [1], [0], [0], [0, 0, 1, 0], [], []>} : vector<56x16xf32>, vector<56x16xf32>, vector<56x56xf32> -> vector<56x56xf32>
    %cst_97 = arith.constant 2.500000e-01 : f32
    %185 = vector.broadcast %cst_97 : f32 to vector<56x56xf32>
    %186 = arith.mulf %184, %185 : vector<56x56xf32>
    %187 = arith.addf %186, %95 : vector<56x56xf32>
    %cst_98 = arith.constant dense<0xFF800000> : vector<56xf32>
    %188 = vector.multi_reduction <maximumf>, %187, %cst_98 [1] : vector<56x56xf32> to vector<56xf32>
    %189 = vector.shape_cast %188 : vector<56xf32> to vector<56x1xf32>
    %190 = vector.broadcast %189 : vector<56x1xf32> to vector<56x56xf32>
    %191 = arith.subf %187, %190 : vector<56x56xf32>
    %192 = math.exp %191 : vector<56x56xf32>
    %cst_99 = arith.constant dense<0.000000e+00> : vector<56xf32>
    %193 = vector.multi_reduction <add>, %192, %cst_99 [1] : vector<56x56xf32> to vector<56xf32>
    %194 = vector.shape_cast %193 : vector<56xf32> to vector<56x1xf32>
    %195 = tpu.reciprocal %194 {approx = true} : vector<56x1xf32> -> vector<56x1xf32>
    %196 = vector.broadcast %195 : vector<56x1xf32> to vector<56x56xf32>
    %197 = arith.mulf %192, %196 : vector<56x56xf32>
    %cst_100 = arith.constant dense<0.000000e+00> : vector<56x16xf32>
    %198 = tpu.matmul %197, %183, %cst_100 {dimension_numbers = #tpu.dot_dimension_numbers<[1], [0], [0], [1], [0, 0, 1, 1], [], []>} : vector<56x56xf32>, vector<56x16xf32>, vector<56x16xf32> -> vector<56x16xf32>
    %c0_101 = arith.constant 0 : index
    %c48_102 = arith.constant 48 : index
    %199 = vector.load %arg12[%c0_101, %c48_102] : memref<56x64xf32, #tpu.memory_space<vmem>>, vector<56x16xf32>
    tpu.vector_store %arg12[%c0_101, %c48_102], %198 {strides = array<i32>} : memref<56x64xf32, #tpu.memory_space<vmem>>, vector<56x16xf32>,
    %c0_103 = arith.constant 0 : index
    %c0_104 = arith.constant 0 : index
    %200 = vector.load %arg12[%c0_103, %c0_104] : memref<56x64xf32, #tpu.memory_space<vmem>>, vector<56x64xf32>
    %c312 = arith.constant 312 : index
    %c0_105 = arith.constant 0 : index
    %201 = vector.load %arg4[%c312, %c0_105] : memref<504x32xf32, #tpu.memory_space<vmem>>, vector<64x32xf32>
    %cst_106 = arith.constant dense<0.000000e+00> : vector<56x32xf32>
    %202 = tpu.matmul %200, %201, %cst_106 {dimension_numbers = #tpu.dot_dimension_numbers<[1], [0], [0], [1], [0, 0, 1, 1], [], []>} : vector<56x64xf32>, vector<64x32xf32>, vector<56x32xf32> -> vector<56x32xf32>
    %c0_107 = arith.constant 0 : index
    %c1408 = arith.constant 1408 : index
    %203 = vector.load %arg2[%c0_107, %c1408] : memref<1x6656xf32, #tpu.memory_space<vmem>>, vector<1x32xf32>
    %204 = vector.broadcast %203 : vector<1x32xf32> to vector<56x32xf32>
    %205 = arith.addf %202, %204 : vector<56x32xf32>
    %206 = arith.addf %205, %120 : vector<56x32xf32>
    %c0_108 = arith.constant 0 : index
    %c1536 = arith.constant 1536 : index
    %207 = vector.load %arg2[%c0_108, %c1536] : memref<1x6656xf32, #tpu.memory_space<vmem>>, vector<1x32xf32>
    %c0_109 = arith.constant 0 : index
    %c1664 = arith.constant 1664 : index
    %208 = vector.load %arg2[%c0_109, %c1664] : memref<1x6656xf32, #tpu.memory_space<vmem>>, vector<1x32xf32>
    %cst_110 = arith.constant dense<0.000000e+00> : vector<56xf32>
    %209 = vector.multi_reduction <add>, %206, %cst_110 [1] : vector<56x32xf32> to vector<56xf32>
    %210 = vector.shape_cast %209 : vector<56xf32> to vector<56x1xf32>
    %cst_111 = arith.constant 3.200000e+01 : f32
    %211 = vector.broadcast %cst_111 : f32 to vector<56x1xf32>
    %212 = arith.divf %210, %211 : vector<56x1xf32>
    %213 = vector.broadcast %212 : vector<56x1xf32> to vector<56x32xf32>
    %214 = arith.subf %206, %213 : vector<56x32xf32>
    %215 = arith.mulf %214, %214 : vector<56x32xf32>
    %cst_112 = arith.constant dense<0.000000e+00> : vector<56xf32>
    %216 = vector.multi_reduction <add>, %215, %cst_112 [1] : vector<56x32xf32> to vector<56xf32>
    %217 = vector.shape_cast %216 : vector<56xf32> to vector<56x1xf32>
    %cst_113 = arith.constant 3.200000e+01 : f32
    %218 = vector.broadcast %cst_113 : f32 to vector<56x1xf32>
    %219 = arith.divf %217, %218 : vector<56x1xf32>
    %220 = vector.broadcast %212 : vector<56x1xf32> to vector<56x32xf32>
    %221 = arith.subf %206, %220 : vector<56x32xf32>
    %cst_114 = arith.constant 9.99999974E-6 : f32
    %222 = vector.broadcast %cst_114 : f32 to vector<56x1xf32>
    %223 = arith.addf %219, %222 : vector<56x1xf32>
    %224 = math.rsqrt %223 : vector<56x1xf32>
    %225 = vector.broadcast %224 : vector<56x1xf32> to vector<56x32xf32>
    %226 = arith.mulf %221, %225 : vector<56x32xf32>
    %227 = vector.broadcast %207 : vector<1x32xf32> to vector<56x32xf32>
    %228 = arith.mulf %226, %227 : vector<56x32xf32>
    %229 = vector.broadcast %208 : vector<1x32xf32> to vector<56x32xf32>
    %230 = arith.addf %228, %229 : vector<56x32xf32>
    %c0_115 = arith.constant 0 : index
    %c384_116 = arith.constant 384 : index
    %231 = vector.load %arg3[%c0_115, %c384_116] : memref<32x1664xf32, #tpu.memory_space<vmem>>, vector<32x256xf32>
    %cst_117 = arith.constant dense<0.000000e+00> : vector<56x256xf32>
    %232 = tpu.matmul %230, %231, %cst_117 {dimension_numbers = #tpu.dot_dimension_numbers<[1], [0], [0], [1], [0, 0, 1, 1], [], []>} : vector<56x32xf32>, vector<32x256xf32>, vector<56x256xf32> -> vector<56x256xf32>
    %c0_118 = arith.constant 0 : index
    %c1792 = arith.constant 1792 : index
    %233 = vector.load %arg2[%c0_118, %c1792] : memref<1x6656xf32, #tpu.memory_space<vmem>>, vector<1x256xf32>
    %234 = vector.broadcast %233 : vector<1x256xf32> to vector<56x256xf32>
    %235 = arith.addf %232, %234 : vector<56x256xf32>
    %236 = vector.extract_strided_slice %235 {offsets = [0, 0], sizes = [56, 128], strides = [1, 1]} : vector<56x256xf32> to vector<56x128xf32>
    %237 = vector.extract_strided_slice %235 {offsets = [0, 128], sizes = [56, 128], strides = [1, 1]} : vector<56x256xf32> to vector<56x128xf32>
    %cst_119 = arith.constant 5.000000e-01 : f32
    %238 = vector.broadcast %cst_119 : f32 to vector<56x128xf32>
    %239 = arith.mulf %238, %237 : vector<56x128xf32>
    %cst_120 = arith.constant 0.707106769 : f32
    %240 = vector.broadcast %cst_120 : f32 to vector<56x128xf32>
    %241 = arith.mulf %237, %240 : vector<56x128xf32>
    %242 = math.absf %241 : vector<56x128xf32>
    %cst_121 = arith.constant 0.327591091 : f32
    %243 = vector.broadcast %cst_121 : f32 to vector<56x128xf32>
    %244 = arith.mulf %243, %242 : vector<56x128xf32>
    %cst_122 = arith.constant 1.000000e+00 : f32
    %245 = vector.broadcast %cst_122 : f32 to vector<56x128xf32>
    %246 = arith.addf %245, %244 : vector<56x128xf32>
    %cst_123 = arith.constant 1.000000e+00 : f32
    %247 = vector.broadcast %cst_123 : f32 to vector<56x128xf32>
    %248 = arith.divf %247, %246 : vector<56x128xf32>
    %cst_124 = arith.constant 1.06140542 : f32
    %249 = vector.broadcast %cst_124 : f32 to vector<56x128xf32>
    %250 = arith.mulf %248, %249 : vector<56x128xf32>
    %cst_125 = arith.constant -1.45315206 : f32
    %251 = vector.broadcast %cst_125 : f32 to vector<56x128xf32>
    %252 = arith.addf %251, %250 : vector<56x128xf32>
    %253 = arith.mulf %248, %252 : vector<56x128xf32>
    %cst_126 = arith.constant 1.42141378 : f32
    %254 = vector.broadcast %cst_126 : f32 to vector<56x128xf32>
    %255 = arith.addf %254, %253 : vector<56x128xf32>
    %256 = arith.mulf %248, %255 : vector<56x128xf32>
    %cst_127 = arith.constant -0.284496725 : f32
    %257 = vector.broadcast %cst_127 : f32 to vector<56x128xf32>
    %258 = arith.addf %257, %256 : vector<56x128xf32>
    %259 = arith.mulf %248, %258 : vector<56x128xf32>
    %cst_128 = arith.constant 0.254829586 : f32
    %260 = vector.broadcast %cst_128 : f32 to vector<56x128xf32>
    %261 = arith.addf %260, %259 : vector<56x128xf32>
    %262 = arith.mulf %248, %261 : vector<56x128xf32>
    %263 = arith.mulf %241, %241 : vector<56x128xf32>
    %cst_129 = arith.constant 0.000000e+00 : f32
    %264 = vector.broadcast %cst_129 : f32 to vector<56x128xf32>
    %265 = arith.subf %264, %263 : vector<56x128xf32>
    %266 = math.exp %265 : vector<56x128xf32>
    %267 = arith.mulf %262, %266 : vector<56x128xf32>
    %cst_130 = arith.constant 1.000000e+00 : f32
    %268 = vector.broadcast %cst_130 : f32 to vector<56x128xf32>
    %269 = arith.subf %268, %267 : vector<56x128xf32>
    %cst_131 = arith.constant 0.000000e+00 : f32
    %270 = vector.broadcast %cst_131 : f32 to vector<56x128xf32>
    %271 = arith.cmpf oge, %241, %270 : vector<56x128xf32>
    %cst_132 = arith.constant 0.000000e+00 : f32
    %272 = vector.broadcast %cst_132 : f32 to vector<56x128xf32>
    %273 = arith.subf %272, %269 : vector<56x128xf32>
    %274 = arith.select %271, %269, %273 : vector<56x128xi1>, vector<56x128xf32>
    %cst_133 = arith.constant 1.000000e+00 : f32
    %275 = vector.broadcast %cst_133 : f32 to vector<56x128xf32>
    %276 = arith.addf %275, %274 : vector<56x128xf32>
    %277 = arith.mulf %239, %276 : vector<56x128xf32>
    %278 = arith.mulf %236, %277 : vector<56x128xf32>
    %c376 = arith.constant 376 : index
    %c0_134 = arith.constant 0 : index
    %279 = vector.load %arg4[%c376, %c0_134] : memref<504x32xf32, #tpu.memory_space<vmem>>, vector<128x32xf32>
    %cst_135 = arith.constant dense<0.000000e+00> : vector<56x32xf32>
    %280 = tpu.matmul %278, %279, %cst_135 {dimension_numbers = #tpu.dot_dimension_numbers<[1], [0], [0], [1], [0, 0, 1, 1], [], []>} : vector<56x128xf32>, vector<128x32xf32>, vector<56x32xf32> -> vector<56x32xf32>
    %c0_136 = arith.constant 0 : index
    %c2048 = arith.constant 2048 : index
    %281 = vector.load %arg2[%c0_136, %c2048] : memref<1x6656xf32, #tpu.memory_space<vmem>>, vector<1x32xf32>
    %282 = vector.broadcast %281 : vector<1x32xf32> to vector<56x32xf32>
    %283 = arith.addf %280, %282 : vector<56x32xf32>
    %284 = arith.addf %283, %230 : vector<56x32xf32>
    %c0_137 = arith.constant 0 : index
    %c0_138 = arith.constant 0 : index
    %285 = vector.load %arg9[%c0_137, %c0_138] : memref<56x32xf32, #tpu.memory_space<vmem>>, vector<56x32xf32>
    tpu.vector_store %arg9[%c0_137, %c0_138], %284 {strides = array<i32>} : memref<56x32xf32, #tpu.memory_space<vmem>>, vector<56x32xf32>,
    %c0_139 = arith.constant 0 : index
    %c0_140 = arith.constant 0 : index
    %286 = vector.load %arg9[%c0_139, %c0_140] : memref<56x32xf32, #tpu.memory_space<vmem>>, vector<8x32xf32>
    %c0_141 = arith.constant 0 : index
    %c0_142 = arith.constant 0 : index
    %287 = vector.load %arg10[%c0_141, %c0_142] : memref<8x224xf32, #tpu.memory_space<vmem>>, vector<8x32xf32>
    tpu.vector_store %arg10[%c0_141, %c0_142], %286 {strides = array<i32>} : memref<8x224xf32, #tpu.memory_space<vmem>>, vector<8x32xf32>,
    %c8 = arith.constant 8 : index
    %c0_143 = arith.constant 0 : index
    %288 = vector.load %arg9[%c8, %c0_143] : memref<56x32xf32, #tpu.memory_space<vmem>>, vector<8x32xf32>
    %c0_144 = arith.constant 0 : index
    %c32_145 = arith.constant 32 : index
    %289 = vector.load %arg10[%c0_144, %c32_145] : memref<8x224xf32, #tpu.memory_space<vmem>>, vector<8x32xf32>
    tpu.vector_store %arg10[%c0_144, %c32_145], %288 {strides = array<i32>} : memref<8x224xf32, #tpu.memory_space<vmem>>, vector<8x32xf32>,
    %c16_146 = arith.constant 16 : index
    %c0_147 = arith.constant 0 : index
    %290 = vector.load %arg9[%c16_146, %c0_147] : memref<56x32xf32, #tpu.memory_space<vmem>>, vector<8x32xf32>
    %c0_148 = arith.constant 0 : index
    %c64_149 = arith.constant 64 : index
    %291 = vector.load %arg10[%c0_148, %c64_149] : memref<8x224xf32, #tpu.memory_space<vmem>>, vector<8x32xf32>
    tpu.vector_store %arg10[%c0_148, %c64_149], %290 {strides = array<i32>} : memref<8x224xf32, #tpu.memory_space<vmem>>, vector<8x32xf32>,
    %c24 = arith.constant 24 : index
    %c0_150 = arith.constant 0 : index
    %292 = vector.load %arg9[%c24, %c0_150] : memref<56x32xf32, #tpu.memory_space<vmem>>, vector<8x32xf32>
    %c0_151 = arith.constant 0 : index
    %c96_152 = arith.constant 96 : index
    %293 = vector.load %arg10[%c0_151, %c96_152] : memref<8x224xf32, #tpu.memory_space<vmem>>, vector<8x32xf32>
    tpu.vector_store %arg10[%c0_151, %c96_152], %292 {strides = array<i32>} : memref<8x224xf32, #tpu.memory_space<vmem>>, vector<8x32xf32>,
    %c32_153 = arith.constant 32 : index
    %c0_154 = arith.constant 0 : index
    %294 = vector.load %arg9[%c32_153, %c0_154] : memref<56x32xf32, #tpu.memory_space<vmem>>, vector<8x32xf32>
    %c0_155 = arith.constant 0 : index
    %c128_156 = arith.constant 128 : index
    %295 = vector.load %arg10[%c0_155, %c128_156] : memref<8x224xf32, #tpu.memory_space<vmem>>, vector<8x32xf32>
    tpu.vector_store %arg10[%c0_155, %c128_156], %294 {strides = array<i32>} : memref<8x224xf32, #tpu.memory_space<vmem>>, vector<8x32xf32>,
    %c40_157 = arith.constant 40 : index
    %c0_158 = arith.constant 0 : index
    %296 = vector.load %arg9[%c40_157, %c0_158] : memref<56x32xf32, #tpu.memory_space<vmem>>, vector<8x32xf32>
    %c0_159 = arith.constant 0 : index
    %c160_160 = arith.constant 160 : index
    %297 = vector.load %arg10[%c0_159, %c160_160] : memref<8x224xf32, #tpu.memory_space<vmem>>, vector<8x32xf32>
    tpu.vector_store %arg10[%c0_159, %c160_160], %296 {strides = array<i32>} : memref<8x224xf32, #tpu.memory_space<vmem>>, vector<8x32xf32>,
    %c48_161 = arith.constant 48 : index
    %c0_162 = arith.constant 0 : index
    %298 = vector.load %arg9[%c48_161, %c0_162] : memref<56x32xf32, #tpu.memory_space<vmem>>, vector<8x32xf32>
    %c0_163 = arith.constant 0 : index
    %c192 = arith.constant 192 : index
    %299 = vector.load %arg10[%c0_163, %c192] : memref<8x224xf32, #tpu.memory_space<vmem>>, vector<8x32xf32>
    tpu.vector_store %arg10[%c0_163, %c192], %298 {strides = array<i32>} : memref<8x224xf32, #tpu.memory_space<vmem>>, vector<8x32xf32>,
    %c0_164 = arith.constant 0 : index
    %c0_165 = arith.constant 0 : index
    %300 = vector.load %arg10[%c0_164, %c0_165] : memref<8x224xf32, #tpu.memory_space<vmem>>, vector<8x224xf32>
    %c0_166 = arith.constant 0 : index
    %c2176 = arith.constant 2176 : index
    %301 = vector.load %arg2[%c0_166, %c2176] : memref<1x6656xf32, #tpu.memory_space<vmem>>, vector<1x224xf32>
    %c0_167 = arith.constant 0 : index
    %c2432 = arith.constant 2432 : index
    %302 = vector.load %arg2[%c0_167, %c2432] : memref<1x6656xf32, #tpu.memory_space<vmem>>, vector<1x224xf32>
    %cst_168 = arith.constant dense<0.000000e+00> : vector<8xf32>
    %303 = vector.multi_reduction <add>, %300, %cst_168 [1] : vector<8x224xf32> to vector<8xf32>
    %304 = vector.shape_cast %303 : vector<8xf32> to vector<8x1xf32>
    %cst_169 = arith.constant 2.240000e+02 : f32
    %305 = vector.broadcast %cst_169 : f32 to vector<8x1xf32>
    %306 = arith.divf %304, %305 : vector<8x1xf32>
    %307 = vector.broadcast %306 : vector<8x1xf32> to vector<8x224xf32>
    %308 = arith.subf %300, %307 : vector<8x224xf32>
    %309 = arith.mulf %308, %308 : vector<8x224xf32>
    %cst_170 = arith.constant dense<0.000000e+00> : vector<8xf32>
    %310 = vector.multi_reduction <add>, %309, %cst_170 [1] : vector<8x224xf32> to vector<8xf32>
    %311 = vector.shape_cast %310 : vector<8xf32> to vector<8x1xf32>
    %cst_171 = arith.constant 2.240000e+02 : f32
    %312 = vector.broadcast %cst_171 : f32 to vector<8x1xf32>
    %313 = arith.divf %311, %312 : vector<8x1xf32>
    %314 = vector.broadcast %306 : vector<8x1xf32> to vector<8x224xf32>
    %315 = arith.subf %300, %314 : vector<8x224xf32>
    %cst_172 = arith.constant 9.99999974E-6 : f32
    %316 = vector.broadcast %cst_172 : f32 to vector<8x1xf32>
    %317 = arith.addf %313, %316 : vector<8x1xf32>
    %318 = math.rsqrt %317 : vector<8x1xf32>
    %319 = vector.broadcast %318 : vector<8x1xf32> to vector<8x224xf32>
    %320 = arith.mulf %315, %319 : vector<8x224xf32>
    %321 = vector.broadcast %301 : vector<1x224xf32> to vector<8x224xf32>
    %322 = arith.mulf %320, %321 : vector<8x224xf32>
    %323 = vector.broadcast %302 : vector<1x224xf32> to vector<8x224xf32>
    %324 = arith.addf %322, %323 : vector<8x224xf32>
    %c0_173 = arith.constant 0 : index
    %c0_174 = arith.constant 0 : index
    %325 = vector.load %arg5[%c0_173, %c0_174] : memref<224x2560xf32, #tpu.memory_space<vmem>>, vector<224x768xf32>
    %cst_175 = arith.constant dense<0.000000e+00> : vector<8x768xf32>
    %326 = tpu.matmul %324, %325, %cst_175 {dimension_numbers = #tpu.dot_dimension_numbers<[1], [0], [0], [1], [0, 0, 1, 1], [], []>} : vector<8x224xf32>, vector<224x768xf32>, vector<8x768xf32> -> vector<8x768xf32>
    %c0_176 = arith.constant 0 : index
    %c0_177 = arith.constant 0 : index
    %327 = vector.load %arg13[%c0_176, %c0_177] : memref<8x768xf32, #tpu.memory_space<vmem>>, vector<8x768xf32>
    tpu.vector_store %arg13[%c0_176, %c0_177], %326 {strides = array<i32>} : memref<8x768xf32, #tpu.memory_space<vmem>>, vector<8x768xf32>,
    %c0_178 = arith.constant 0 : index
    %c0_179 = arith.constant 0 : index
    %328 = vector.load %arg13[%c0_178, %c0_179] : memref<8x768xf32, #tpu.memory_space<vmem>>, vector<8x64xf32>
    %c0_180 = arith.constant 0 : index
    %c256_181 = arith.constant 256 : index
    %329 = vector.load %arg13[%c0_180, %c256_181] : memref<8x768xf32, #tpu.memory_space<vmem>>, vector<8x64xf32>
    %c0_182 = arith.constant 0 : index
    %c512_183 = arith.constant 512 : index
    %330 = vector.load %arg13[%c0_182, %c512_183] : memref<8x768xf32, #tpu.memory_space<vmem>>, vector<8x64xf32>
    %cst_184 = arith.constant dense<0.000000e+00> : vector<8x8xf32>
    %331 = tpu.matmul %328, %329, %cst_184 {dimension_numbers = #tpu.dot_dimension_numbers<[1], [1], [0], [0], [0, 0, 1, 0], [], []>} : vector<8x64xf32>, vector<8x64xf32>, vector<8x8xf32> -> vector<8x8xf32>
    %cst_185 = arith.constant 1.250000e-01 : f32
    %332 = vector.broadcast %cst_185 : f32 to vector<8x8xf32>
    %333 = arith.mulf %331, %332 : vector<8x8xf32>
    %cst_186 = arith.constant dense<0xFF800000> : vector<8xf32>
    %334 = vector.multi_reduction <maximumf>, %333, %cst_186 [1] : vector<8x8xf32> to vector<8xf32>
    %335 = vector.shape_cast %334 : vector<8xf32> to vector<8x1xf32>
    %336 = vector.broadcast %335 : vector<8x1xf32> to vector<8x8xf32>
    %337 = arith.subf %333, %336 : vector<8x8xf32>
    %338 = math.exp %337 : vector<8x8xf32>
    %cst_187 = arith.constant dense<0.000000e+00> : vector<8xf32>
    %339 = vector.multi_reduction <add>, %338, %cst_187 [1] : vector<8x8xf32> to vector<8xf32>
    %340 = vector.shape_cast %339 : vector<8xf32> to vector<8x1xf32>
    %341 = tpu.reciprocal %340 {approx = true} : vector<8x1xf32> -> vector<8x1xf32>
    %342 = vector.broadcast %341 : vector<8x1xf32> to vector<8x8xf32>
    %343 = arith.mulf %338, %342 : vector<8x8xf32>
    %cst_188 = arith.constant dense<0.000000e+00> : vector<8x64xf32>
    %344 = tpu.matmul %343, %330, %cst_188 {dimension_numbers = #tpu.dot_dimension_numbers<[1], [0], [0], [1], [0, 0, 1, 1], [], []>} : vector<8x8xf32>, vector<8x64xf32>, vector<8x64xf32> -> vector<8x64xf32>
    %c0_189 = arith.constant 0 : index
    %c0_190 = arith.constant 0 : index
    %345 = vector.load %arg14[%c0_189, %c0_190] : memref<8x256xf32, #tpu.memory_space<vmem>>, vector<8x64xf32>
    tpu.vector_store %arg14[%c0_189, %c0_190], %344 {strides = array<i32>} : memref<8x256xf32, #tpu.memory_space<vmem>>, vector<8x64xf32>,
    %c0_191 = arith.constant 0 : index
    %c64_192 = arith.constant 64 : index
    %346 = vector.load %arg13[%c0_191, %c64_192] : memref<8x768xf32, #tpu.memory_space<vmem>>, vector<8x64xf32>
    %c0_193 = arith.constant 0 : index
    %c320 = arith.constant 320 : index
    %347 = vector.load %arg13[%c0_193, %c320] : memref<8x768xf32, #tpu.memory_space<vmem>>, vector<8x64xf32>
    %c0_194 = arith.constant 0 : index
    %c576 = arith.constant 576 : index
    %348 = vector.load %arg13[%c0_194, %c576] : memref<8x768xf32, #tpu.memory_space<vmem>>, vector<8x64xf32>
    %cst_195 = arith.constant dense<0.000000e+00> : vector<8x8xf32>
    %349 = tpu.matmul %346, %347, %cst_195 {dimension_numbers = #tpu.dot_dimension_numbers<[1], [1], [0], [0], [0, 0, 1, 0], [], []>} : vector<8x64xf32>, vector<8x64xf32>, vector<8x8xf32> -> vector<8x8xf32>
    %cst_196 = arith.constant 1.250000e-01 : f32
    %350 = vector.broadcast %cst_196 : f32 to vector<8x8xf32>
    %351 = arith.mulf %349, %350 : vector<8x8xf32>
    %cst_197 = arith.constant dense<0xFF800000> : vector<8xf32>
    %352 = vector.multi_reduction <maximumf>, %351, %cst_197 [1] : vector<8x8xf32> to vector<8xf32>
    %353 = vector.shape_cast %352 : vector<8xf32> to vector<8x1xf32>
    %354 = vector.broadcast %353 : vector<8x1xf32> to vector<8x8xf32>
    %355 = arith.subf %351, %354 : vector<8x8xf32>
    %356 = math.exp %355 : vector<8x8xf32>
    %cst_198 = arith.constant dense<0.000000e+00> : vector<8xf32>
    %357 = vector.multi_reduction <add>, %356, %cst_198 [1] : vector<8x8xf32> to vector<8xf32>
    %358 = vector.shape_cast %357 : vector<8xf32> to vector<8x1xf32>
    %359 = tpu.reciprocal %358 {approx = true} : vector<8x1xf32> -> vector<8x1xf32>
    %360 = vector.broadcast %359 : vector<8x1xf32> to vector<8x8xf32>
    %361 = arith.mulf %356, %360 : vector<8x8xf32>
    %cst_199 = arith.constant dense<0.000000e+00> : vector<8x64xf32>
    %362 = tpu.matmul %361, %348, %cst_199 {dimension_numbers = #tpu.dot_dimension_numbers<[1], [0], [0], [1], [0, 0, 1, 1], [], []>} : vector<8x8xf32>, vector<8x64xf32>, vector<8x64xf32> -> vector<8x64xf32>
    %c0_200 = arith.constant 0 : index
    %c64_201 = arith.constant 64 : index
    %363 = vector.load %arg14[%c0_200, %c64_201] : memref<8x256xf32, #tpu.memory_space<vmem>>, vector<8x64xf32>
    tpu.vector_store %arg14[%c0_200, %c64_201], %362 {strides = array<i32>} : memref<8x256xf32, #tpu.memory_space<vmem>>, vector<8x64xf32>,
    %c0_202 = arith.constant 0 : index
    %c128_203 = arith.constant 128 : index
    %364 = vector.load %arg13[%c0_202, %c128_203] : memref<8x768xf32, #tpu.memory_space<vmem>>, vector<8x64xf32>
    %c0_204 = arith.constant 0 : index
    %c384_205 = arith.constant 384 : index
    %365 = vector.load %arg13[%c0_204, %c384_205] : memref<8x768xf32, #tpu.memory_space<vmem>>, vector<8x64xf32>
    %c0_206 = arith.constant 0 : index
    %c640_207 = arith.constant 640 : index
    %366 = vector.load %arg13[%c0_206, %c640_207] : memref<8x768xf32, #tpu.memory_space<vmem>>, vector<8x64xf32>
    %cst_208 = arith.constant dense<0.000000e+00> : vector<8x8xf32>
    %367 = tpu.matmul %364, %365, %cst_208 {dimension_numbers = #tpu.dot_dimension_numbers<[1], [1], [0], [0], [0, 0, 1, 0], [], []>} : vector<8x64xf32>, vector<8x64xf32>, vector<8x8xf32> -> vector<8x8xf32>
    %cst_209 = arith.constant 1.250000e-01 : f32
    %368 = vector.broadcast %cst_209 : f32 to vector<8x8xf32>
    %369 = arith.mulf %367, %368 : vector<8x8xf32>
    %cst_210 = arith.constant dense<0xFF800000> : vector<8xf32>
    %370 = vector.multi_reduction <maximumf>, %369, %cst_210 [1] : vector<8x8xf32> to vector<8xf32>
    %371 = vector.shape_cast %370 : vector<8xf32> to vector<8x1xf32>
    %372 = vector.broadcast %371 : vector<8x1xf32> to vector<8x8xf32>
    %373 = arith.subf %369, %372 : vector<8x8xf32>
    %374 = math.exp %373 : vector<8x8xf32>
    %cst_211 = arith.constant dense<0.000000e+00> : vector<8xf32>
    %375 = vector.multi_reduction <add>, %374, %cst_211 [1] : vector<8x8xf32> to vector<8xf32>
    %376 = vector.shape_cast %375 : vector<8xf32> to vector<8x1xf32>
    %377 = tpu.reciprocal %376 {approx = true} : vector<8x1xf32> -> vector<8x1xf32>
    %378 = vector.broadcast %377 : vector<8x1xf32> to vector<8x8xf32>
    %379 = arith.mulf %374, %378 : vector<8x8xf32>
    %cst_212 = arith.constant dense<0.000000e+00> : vector<8x64xf32>
    %380 = tpu.matmul %379, %366, %cst_212 {dimension_numbers = #tpu.dot_dimension_numbers<[1], [0], [0], [1], [0, 0, 1, 1], [], []>} : vector<8x8xf32>, vector<8x64xf32>, vector<8x64xf32> -> vector<8x64xf32>
    %c0_213 = arith.constant 0 : index
    %c128_214 = arith.constant 128 : index
    %381 = vector.load %arg14[%c0_213, %c128_214] : memref<8x256xf32, #tpu.memory_space<vmem>>, vector<8x64xf32>
    tpu.vector_store %arg14[%c0_213, %c128_214], %380 {strides = array<i32>} : memref<8x256xf32, #tpu.memory_space<vmem>>, vector<8x64xf32>,
    %c0_215 = arith.constant 0 : index
    %c192_216 = arith.constant 192 : index
    %382 = vector.load %arg13[%c0_215, %c192_216] : memref<8x768xf32, #tpu.memory_space<vmem>>, vector<8x64xf32>
    %c0_217 = arith.constant 0 : index
    %c448 = arith.constant 448 : index
    %383 = vector.load %arg13[%c0_217, %c448] : memref<8x768xf32, #tpu.memory_space<vmem>>, vector<8x64xf32>
    %c0_218 = arith.constant 0 : index
    %c704 = arith.constant 704 : index
    %384 = vector.load %arg13[%c0_218, %c704] : memref<8x768xf32, #tpu.memory_space<vmem>>, vector<8x64xf32>
    %cst_219 = arith.constant dense<0.000000e+00> : vector<8x8xf32>
    %385 = tpu.matmul %382, %383, %cst_219 {dimension_numbers = #tpu.dot_dimension_numbers<[1], [1], [0], [0], [0, 0, 1, 0], [], []>} : vector<8x64xf32>, vector<8x64xf32>, vector<8x8xf32> -> vector<8x8xf32>
    %cst_220 = arith.constant 1.250000e-01 : f32
    %386 = vector.broadcast %cst_220 : f32 to vector<8x8xf32>
    %387 = arith.mulf %385, %386 : vector<8x8xf32>
    %cst_221 = arith.constant dense<0xFF800000> : vector<8xf32>
    %388 = vector.multi_reduction <maximumf>, %387, %cst_221 [1] : vector<8x8xf32> to vector<8xf32>
    %389 = vector.shape_cast %388 : vector<8xf32> to vector<8x1xf32>
    %390 = vector.broadcast %389 : vector<8x1xf32> to vector<8x8xf32>
    %391 = arith.subf %387, %390 : vector<8x8xf32>
    %392 = math.exp %391 : vector<8x8xf32>
    %cst_222 = arith.constant dense<0.000000e+00> : vector<8xf32>
    %393 = vector.multi_reduction <add>, %392, %cst_222 [1] : vector<8x8xf32> to vector<8xf32>
    %394 = vector.shape_cast %393 : vector<8xf32> to vector<8x1xf32>
    %395 = tpu.reciprocal %394 {approx = true} : vector<8x1xf32> -> vector<8x1xf32>
    %396 = vector.broadcast %395 : vector<8x1xf32> to vector<8x8xf32>
    %397 = arith.mulf %392, %396 : vector<8x8xf32>
    %cst_223 = arith.constant dense<0.000000e+00> : vector<8x64xf32>
    %398 = tpu.matmul %397, %384, %cst_223 {dimension_numbers = #tpu.dot_dimension_numbers<[1], [0], [0], [1], [0, 0, 1, 1], [], []>} : vector<8x8xf32>, vector<8x64xf32>, vector<8x64xf32> -> vector<8x64xf32>
    %c0_224 = arith.constant 0 : index
    %c192_225 = arith.constant 192 : index
    %399 = vector.load %arg14[%c0_224, %c192_225] : memref<8x256xf32, #tpu.memory_space<vmem>>, vector<8x64xf32>
    tpu.vector_store %arg14[%c0_224, %c192_225], %398 {strides = array<i32>} : memref<8x256xf32, #tpu.memory_space<vmem>>, vector<8x64xf32>,
    %c0_226 = arith.constant 0 : index
    %c0_227 = arith.constant 0 : index
    %400 = vector.load %arg14[%c0_226, %c0_227] : memref<8x256xf32, #tpu.memory_space<vmem>>, vector<8x256xf32>
    %c0_228 = arith.constant 0 : index
    %c0_229 = arith.constant 0 : index
    %401 = vector.load %arg6[%c0_228, %c0_229] : memref<1152x224xf32, #tpu.memory_space<vmem>>, vector<256x224xf32>
    %cst_230 = arith.constant dense<0.000000e+00> : vector<8x224xf32>
    %402 = tpu.matmul %400, %401, %cst_230 {dimension_numbers = #tpu.dot_dimension_numbers<[1], [0], [0], [1], [0, 0, 1, 1], [], []>} : vector<8x256xf32>, vector<256x224xf32>, vector<8x224xf32> -> vector<8x224xf32>
    %c0_231 = arith.constant 0 : index
    %c2688 = arith.constant 2688 : index
    %403 = vector.load %arg2[%c0_231, %c2688] : memref<1x6656xf32, #tpu.memory_space<vmem>>, vector<1x224xf32>
    %404 = vector.broadcast %403 : vector<1x224xf32> to vector<8x224xf32>
    %405 = arith.addf %402, %404 : vector<8x224xf32>
    %406 = arith.addf %405, %324 : vector<8x224xf32>
    %c0_232 = arith.constant 0 : index
    %c2944 = arith.constant 2944 : index
    %407 = vector.load %arg2[%c0_232, %c2944] : memref<1x6656xf32, #tpu.memory_space<vmem>>, vector<1x224xf32>
    %c0_233 = arith.constant 0 : index
    %c3200 = arith.constant 3200 : index
    %408 = vector.load %arg2[%c0_233, %c3200] : memref<1x6656xf32, #tpu.memory_space<vmem>>, vector<1x224xf32>
    %cst_234 = arith.constant dense<0.000000e+00> : vector<8xf32>
    %409 = vector.multi_reduction <add>, %406, %cst_234 [1] : vector<8x224xf32> to vector<8xf32>
    %410 = vector.shape_cast %409 : vector<8xf32> to vector<8x1xf32>
    %cst_235 = arith.constant 2.240000e+02 : f32
    %411 = vector.broadcast %cst_235 : f32 to vector<8x1xf32>
    %412 = arith.divf %410, %411 : vector<8x1xf32>
    %413 = vector.broadcast %412 : vector<8x1xf32> to vector<8x224xf32>
    %414 = arith.subf %406, %413 : vector<8x224xf32>
    %415 = arith.mulf %414, %414 : vector<8x224xf32>
    %cst_236 = arith.constant dense<0.000000e+00> : vector<8xf32>
    %416 = vector.multi_reduction <add>, %415, %cst_236 [1] : vector<8x224xf32> to vector<8xf32>
    %417 = vector.shape_cast %416 : vector<8xf32> to vector<8x1xf32>
    %cst_237 = arith.constant 2.240000e+02 : f32
    %418 = vector.broadcast %cst_237 : f32 to vector<8x1xf32>
    %419 = arith.divf %417, %418 : vector<8x1xf32>
    %420 = vector.broadcast %412 : vector<8x1xf32> to vector<8x224xf32>
    %421 = arith.subf %406, %420 : vector<8x224xf32>
    %cst_238 = arith.constant 9.99999974E-6 : f32
    %422 = vector.broadcast %cst_238 : f32 to vector<8x1xf32>
    %423 = arith.addf %419, %422 : vector<8x1xf32>
    %424 = math.rsqrt %423 : vector<8x1xf32>
    %425 = vector.broadcast %424 : vector<8x1xf32> to vector<8x224xf32>
    %426 = arith.mulf %421, %425 : vector<8x224xf32>
    %427 = vector.broadcast %407 : vector<1x224xf32> to vector<8x224xf32>
    %428 = arith.mulf %426, %427 : vector<8x224xf32>
    %429 = vector.broadcast %408 : vector<1x224xf32> to vector<8x224xf32>
    %430 = arith.addf %428, %429 : vector<8x224xf32>
    %c0_239 = arith.constant 0 : index
    %c768_240 = arith.constant 768 : index
    %431 = vector.load %arg5[%c0_239, %c768_240] : memref<224x2560xf32, #tpu.memory_space<vmem>>, vector<224x1792xf32>
    %cst_241 = arith.constant dense<0.000000e+00> : vector<8x1792xf32>
    %432 = tpu.matmul %430, %431, %cst_241 {dimension_numbers = #tpu.dot_dimension_numbers<[1], [0], [0], [1], [0, 0, 1, 1], [], []>} : vector<8x224xf32>, vector<224x1792xf32>, vector<8x1792xf32> -> vector<8x1792xf32>
    %c0_242 = arith.constant 0 : index
    %c3456 = arith.constant 3456 : index
    %433 = vector.load %arg2[%c0_242, %c3456] : memref<1x6656xf32, #tpu.memory_space<vmem>>, vector<1x1792xf32>
    %434 = vector.broadcast %433 : vector<1x1792xf32> to vector<8x1792xf32>
    %435 = arith.addf %432, %434 : vector<8x1792xf32>
    %436 = vector.extract_strided_slice %435 {offsets = [0, 0], sizes = [8, 896], strides = [1, 1]} : vector<8x1792xf32> to vector<8x896xf32>
    %437 = vector.extract_strided_slice %435 {offsets = [0, 896], sizes = [8, 896], strides = [1, 1]} : vector<8x1792xf32> to vector<8x896xf32>
    %cst_243 = arith.constant 5.000000e-01 : f32
    %438 = vector.broadcast %cst_243 : f32 to vector<8x896xf32>
    %439 = arith.mulf %438, %437 : vector<8x896xf32>
    %cst_244 = arith.constant 0.707106769 : f32
    %440 = vector.broadcast %cst_244 : f32 to vector<8x896xf32>
    %441 = arith.mulf %437, %440 : vector<8x896xf32>
    %442 = math.absf %441 : vector<8x896xf32>
    %cst_245 = arith.constant 0.327591091 : f32
    %443 = vector.broadcast %cst_245 : f32 to vector<8x896xf32>
    %444 = arith.mulf %443, %442 : vector<8x896xf32>
    %cst_246 = arith.constant 1.000000e+00 : f32
    %445 = vector.broadcast %cst_246 : f32 to vector<8x896xf32>
    %446 = arith.addf %445, %444 : vector<8x896xf32>
    %cst_247 = arith.constant 1.000000e+00 : f32
    %447 = vector.broadcast %cst_247 : f32 to vector<8x896xf32>
    %448 = arith.divf %447, %446 : vector<8x896xf32>
    %cst_248 = arith.constant 1.06140542 : f32
    %449 = vector.broadcast %cst_248 : f32 to vector<8x896xf32>
    %450 = arith.mulf %448, %449 : vector<8x896xf32>
    %cst_249 = arith.constant -1.45315206 : f32
    %451 = vector.broadcast %cst_249 : f32 to vector<8x896xf32>
    %452 = arith.addf %451, %450 : vector<8x896xf32>
    %453 = arith.mulf %448, %452 : vector<8x896xf32>
    %cst_250 = arith.constant 1.42141378 : f32
    %454 = vector.broadcast %cst_250 : f32 to vector<8x896xf32>
    %455 = arith.addf %454, %453 : vector<8x896xf32>
    %456 = arith.mulf %448, %455 : vector<8x896xf32>
    %cst_251 = arith.constant -0.284496725 : f32
    %457 = vector.broadcast %cst_251 : f32 to vector<8x896xf32>
    %458 = arith.addf %457, %456 : vector<8x896xf32>
    %459 = arith.mulf %448, %458 : vector<8x896xf32>
    %cst_252 = arith.constant 0.254829586 : f32
    %460 = vector.broadcast %cst_252 : f32 to vector<8x896xf32>
    %461 = arith.addf %460, %459 : vector<8x896xf32>
    %462 = arith.mulf %448, %461 : vector<8x896xf32>
    %463 = arith.mulf %441, %441 : vector<8x896xf32>
    %cst_253 = arith.constant 0.000000e+00 : f32
    %464 = vector.broadcast %cst_253 : f32 to vector<8x896xf32>
    %465 = arith.subf %464, %463 : vector<8x896xf32>
    %466 = math.exp %465 : vector<8x896xf32>
    %467 = arith.mulf %462, %466 : vector<8x896xf32>
    %cst_254 = arith.constant 1.000000e+00 : f32
    %468 = vector.broadcast %cst_254 : f32 to vector<8x896xf32>
    %469 = arith.subf %468, %467 : vector<8x896xf32>
    %cst_255 = arith.constant 0.000000e+00 : f32
    %470 = vector.broadcast %cst_255 : f32 to vector<8x896xf32>
    %471 = arith.cmpf oge, %441, %470 : vector<8x896xf32>
    %cst_256 = arith.constant 0.000000e+00 : f32
    %472 = vector.broadcast %cst_256 : f32 to vector<8x896xf32>
    %473 = arith.subf %472, %469 : vector<8x896xf32>
    %474 = arith.select %471, %469, %473 : vector<8x896xi1>, vector<8x896xf32>
    %cst_257 = arith.constant 1.000000e+00 : f32
    %475 = vector.broadcast %cst_257 : f32 to vector<8x896xf32>
    %476 = arith.addf %475, %474 : vector<8x896xf32>
    %477 = arith.mulf %439, %476 : vector<8x896xf32>
    %478 = arith.mulf %436, %477 : vector<8x896xf32>
    %c256_258 = arith.constant 256 : index
    %c0_259 = arith.constant 0 : index
    %479 = vector.load %arg6[%c256_258, %c0_259] : memref<1152x224xf32, #tpu.memory_space<vmem>>, vector<896x224xf32>
    %cst_260 = arith.constant dense<0.000000e+00> : vector<8x224xf32>
    %480 = tpu.matmul %478, %479, %cst_260 {dimension_numbers = #tpu.dot_dimension_numbers<[1], [0], [0], [1], [0, 0, 1, 1], [], []>} : vector<8x896xf32>, vector<896x224xf32>, vector<8x224xf32> -> vector<8x224xf32>
    %c0_261 = arith.constant 0 : index
    %c5248 = arith.constant 5248 : index
    %481 = vector.load %arg2[%c0_261, %c5248] : memref<1x6656xf32, #tpu.memory_space<vmem>>, vector<1x224xf32>
    %482 = vector.broadcast %481 : vector<1x224xf32> to vector<8x224xf32>
    %483 = arith.addf %480, %482 : vector<8x224xf32>
    %484 = arith.addf %483, %430 : vector<8x224xf32>
    %485 = vector.extract_strided_slice %484 {offsets = [0, 0], sizes = [8, 32], strides = [1, 1]} : vector<8x224xf32> to vector<8x32xf32>
    %c0_262 = arith.constant 0 : index
    %c640_263 = arith.constant 640 : index
    %486 = vector.load %arg3[%c0_262, %c640_263] : memref<32x1664xf32, #tpu.memory_space<vmem>>, vector<32x960xf32>
    %cst_264 = arith.constant dense<0.000000e+00> : vector<8x960xf32>
    %487 = tpu.matmul %485, %486, %cst_264 {dimension_numbers = #tpu.dot_dimension_numbers<[1], [0], [0], [1], [0, 0, 1, 1], [], []>} : vector<8x32xf32>, vector<32x960xf32>, vector<8x960xf32> -> vector<8x960xf32>
    %c0_265 = arith.constant 0 : index
    %c5504 = arith.constant 5504 : index
    %488 = vector.load %arg2[%c0_265, %c5504] : memref<1x6656xf32, #tpu.memory_space<vmem>>, vector<1x960xf32>
    %489 = vector.broadcast %488 : vector<1x960xf32> to vector<8x960xf32>
    %490 = arith.addf %487, %489 : vector<8x960xf32>
    %cst_266 = arith.constant 0.000000e+00 : f32
    %491 = vector.broadcast %cst_266 : f32 to vector<8x960xf32>
    %492 = arith.maximumf %490, %491 : vector<8x960xf32>
    %c0_267 = arith.constant 0 : index
    %c0_268 = arith.constant 0 : index
    %493 = vector.load %arg7[%c0_267, %c0_268] : memref<960x24xf32, #tpu.memory_space<vmem>>, vector<960x24xf32>
    %cst_269 = arith.constant dense<0.000000e+00> : vector<8x24xf32>
    %494 = tpu.matmul %492, %493, %cst_269 {dimension_numbers = #tpu.dot_dimension_numbers<[1], [0], [0], [1], [0, 0, 1, 1], [], []>} : vector<8x960xf32>, vector<960x24xf32>, vector<8x24xf32> -> vector<8x24xf32>
    %c0_270 = arith.constant 0 : index
    %c6528 = arith.constant 6528 : index
    %495 = vector.load %arg2[%c0_270, %c6528] : memref<1x6656xf32, #tpu.memory_space<vmem>>, vector<1x24xf32>
    %496 = vector.broadcast %495 : vector<1x24xf32> to vector<8x24xf32>
    %497 = arith.addf %494, %496 : vector<8x24xf32>
    %c0_271 = arith.constant 0 : index
    %c0_272 = arith.constant 0 : index
    %498 = vector.load %arg8[%c0_271, %c0_272] : memref<8x24xf32, #tpu.memory_space<vmem>>, vector<8x24xf32>
    tpu.vector_store %arg8[%c0_271, %c0_272], %497 {strides = array<i32>} : memref<8x24xf32, #tpu.memory_space<vmem>>, vector<8x24xf32>,
    return
  }
}

</mosaic_0001>

<bundles_post_ra>
// kernel: saint_ae_forward.1
= control target key start
LH: loop header
LB: loop body
LE: loop exit
PB: predicated region body
PF: predicated region fallthrough
CT: control target
= control target key end

     0   :  { %v8454_v0 = vmov 0   ;;  %vm208_vm0 = vcmask 1043456   ;;  %v8455_v6 = vmov 0.0   ;;  %vm8456_vm1 = vmmov 0   ;;  %s8459_s18 = smov 64   ;;  %s8461_s19 = smov 48   ;;  %s13550_s1 = inlined_call_operand.vmem [shape: f32[8,3], index: 1, kind: input, shape index: {}]   ;;  %s13551_s0 = inlined_call_operand.vmem [shape: s32[32,1], index: 0, kind: input, shape index: {}]   ;;  %s13552_s4 = inlined_call_operand.vmem [shape: f32[504,32], index: 4, kind: input, shape index: {}]   ;;  %s13553_s3 = inlined_call_operand.vmem [shape: f32[32,1664], index: 3, kind: input, shape index: {}]   ;;  %s13554_s2 = inlined_call_operand.vmem [shape: f32[1,6656], index: 2, kind: input, shape index: {}]   ;;  %s13555_s5 = inlined_call_operand.vmem [shape: f32[224,2560], index: 5, kind: input, shape index: {}]   ;;  %s13556_s6 = inlined_call_operand.vmem [shape: f32[1152,224], index: 6, kind: input, shape index: {}]   ;;  %s13557_s7 = inlined_call_operand.vmem [shape: f32[960,24], index: 7, kind: input, shape index: {}]   ;;  %s13558_s8 = inlined_call_operand.vmem [shape: f32[8,24], index: 8, kind: output, shape index: {}]  }
   0x1   :  { %8235 = vset.pattern.permute.xlu1 %v8454_v0  ;;  %8234 = vset.pattern.permute.xlu0 %v8454_v0  ;;  %v161_v1 = vld [vmem:[%s13550_s1] sm:$0xff]  ;;  %v37_v4 = vld [vmem:[%s13551_s0 + $0x10] sm:$0xff]  ;;  %v36_v5 = vld [vmem:[%s13551_s0 + $0x8] sm:$0xff]  ;;  %v8457_v13 = vmov 1   ;;  %v8458_v17 = vmov 2   ;;  %v33_v26 = vlaneseq  ;;  %vm59_vm2 = vcmask 261120  }
   0x2   :  { %v35_v2 = vld [vmem:[%s13551_s0] sm:$0xff]  ;;  %165 = vperm.xlu1 %8235, %v161_v1   ;;  %7724 = vmatprep.subr.mxu1 %v8455_v6  ;;  %v195_v7 = vld [vmem:[%s13552_s4 + $0x58] sm:$0xff]  ;;  %v194_v9 = vld [vmem:[%s13552_s4 + $0x50] sm:$0xff]  ;;  %vm204_vm4 = vcmask 818176   ;;  %vm905_vm8 = vcmask 523264   ;;  %vm954_vm9 = vcmask 130048  }
   0x3   :  { %40 = vperm.xlu0 %8234, %v35_v2   ;;  %v196_v3 = vld [vmem:[%s13552_s4 + $0x60] sm:$0xf]  ;;  %7750 = vmatprep.mubr.msk.f32.mxu1 %vm8456_vm1, %v8455_v6  ;;  %v32_v8 = vld [vmem:[%s13553_s3 + $0x138] sm:$0xff]  ;;  %v31_v10 = vld [vmem:[%s13553_s3 + $0xd0] sm:$0xff]  ;;  %v8597_v27 = vand.u32 127, %v33_v26  ;;  %vm1097_vm12 = vcmask 457728  }
   0x4   :  { %7725 = vmatpush3.msk.msra.mxu1 %vm208_vm0, %v196_v3  ;;  %v38_v11 = vld [vmem:[%s13551_s0 + $0x18] sm:$0xff]  ;;  %7710 = vmatprep.subr.mxu0 %v32_v8  ;;  %v193_v12 = vld [vmem:[%s13552_s4 + $0x48] sm:$0xff]  ;;  %v192_v15 = vld [vmem:[%s13552_s4 + $0x40] sm:$0xff]  ;;  %s8462_s20 = smov 112   ;;  %s8463_s21 = smov 96  }
   0x5   :  { %7726 = vmatprep.subr.mxu1 %v8455_v6  ;;  %7711 = vmatpush3.msra.mxu0 %v32_v8  ;;  %v30_v14 = vld [vmem:[%s13553_s3 + $0x68] sm:$0xff]  ;;  %v191_v16 = vld [vmem:[%s13552_s4 + $0x38] sm:$0xff]  ;;  %v29_v18 = vld [vmem:[%s13553_s3] sm:$0xff]  ;;  %s8464_s22 = smov 32   ;;  %s8465_s23 = smov 80  }
   0x6   :  { %46 = vperm.xlu1 %8235, %v37_v4   ;;  %7727 = vmatpush3.msra.mxu1 %v195_v7  ;;  %v190_v19 = vld [vmem:[%s13552_s4 + $0x30] sm:$0xff]  ;;  %v189_v20 = vld [vmem:[%s13552_s4 + $0x28] sm:$0xff]  ;;  %v188_v21 = vld [vmem:[%s13552_s4 + $0x20] sm:$0xff]  ;;  %s8466_s24 = smov 16  }
   0x7   :  { %43 = vperm.xlu0 %8234, %v36_v5   ;;  %7728 = vmatprep.subr.mxu1 %v8455_v6  ;;  %v187_v22 = vld [vmem:[%s13552_s4 + $0x18] sm:$0xff]  ;;  %v186_v23 = vld [vmem:[%s13552_s4 + $0x10] sm:$0xff]  ;;  %v185_v24 = vld [vmem:[%s13552_s4 + $0x8] sm:$0xff] }
   0x8   :  { %7729 = vmatpush3.msra.mxu1 %v194_v9  ;;  %7712 = vmatprep.subr.mxu0 %v31_v10  ;;  %v184_v25 = vld [vmem:[%s13552_s4] sm:$0xff]  ;;  %v318_v38 = vld [vmem:[%s13552_s4 + $0xc8] sm:$0xf]  ;;  %v438_v39 = vld [vmem:[%s13552_s4 + $0x130] sm:$0xf] }
   0x9   :  { %7730 = vmatprep.subr.mxu1 %v8455_v6  ;;  %7713 = vmatpush3.msra.mxu0 %v31_v10  ;;  %v7235_v28 = vld [vmem:[%s13554_s2] ss:$0 sm:$0xff]  ;;  %v7236_v29 = vld [vmem:[%s13554_s2 + $0x1] ss:$0 sm:$0xff]  ;;  %v437_v44 = vld [vmem:[%s13552_s4 + $0x128] sm:$0xff] }
   0xa   :  { %8236 = vset.pattern.permute.xlu1 %v8457_v13  ;;  %7731 = vmatpush3.msra.mxu1 %v193_v12  ;;  %v317_v42 = vld [vmem:[%s13552_s4 + $0xc0] sm:$0xff]  ;;  %v316_v46 = vld [vmem:[%s13552_s4 + $0xb8] sm:$0xff]  ;;  %v315_v48 = vld [vmem:[%s13552_s4 + $0xb0] sm:$0xff] }
   0xb   :  { %49 = vperm.xlu0 %8234, %v38_v11   ;;  %287 = vperm.xlu1 %8236, %v161_v1   ;;  %v436_v47 = vld [vmem:[%s13552_s4 + $0x120] sm:$0xff]  ;;  %v435_v49 = vld [vmem:[%s13552_s4 + $0x118] sm:$0xff]  ;;  %v314_v50 = vld [vmem:[%s13552_s4 + $0xa8] sm:$0xff] }
   0xc   :  { %7732 = vmatprep.subr.mxu1 %v8455_v6  ;;  %7714 = vmatprep.subr.mxu0 %v30_v14  ;;  %v434_v51 = vld [vmem:[%s13552_s4 + $0x110] sm:$0xff]  ;;  %v313_v52 = vld [vmem:[%s13552_s4 + $0xa0] sm:$0xff]  ;;  %v433_v53 = vld [vmem:[%s13552_s4 + $0x108] sm:$0xff] }
   0xd   :  { %7733 = vmatpush3.msra.mxu1 %v192_v15  ;;  %7715 = vmatpush3.msra.mxu0 %v30_v14  ;;  %v312_v54 = vld [vmem:[%s13552_s4 + $0x98] sm:$0xff]  ;;  %v432_v55 = vld [vmem:[%s13552_s4 + $0x100] sm:$0xff]  ;;  %v311_v56 = vld [vmem:[%s13552_s4 + $0x90] sm:$0xff] }
   0xe   :  { %7734 = vmatprep.subr.mxu1 %v8455_v6  ;;  %7716 = vmatprep.subr.mxu0 %v29_v18  ;;  %v431_v57 = vld [vmem:[%s13552_s4 + $0xf8] sm:$0xff]  ;;  %v7240_v58 = vld [vmem:[%s13554_s2 + $0x3] ss:$0 sm:$0xff]  ;;  %v7245_v60 = vld [vmem:[%s13554_s2 + $0x6] ss:$0 sm:$0xff] }
   0xf   :  { %8237 = vset.pattern.permute.xlu0 %v8458_v17  ;;  %7735 = vmatpush3.msra.mxu1 %v191_v16  ;;  %v310_v62 = vld [vmem:[%s13552_s4 + $0x88] sm:$0xff]  ;;  %v430_v63 = vld [vmem:[%s13552_s4 + $0xf0] sm:$0xff]  ;;  %v7241_v3 = vld [vmem:[%s13554_s2 + $0x4] ss:$0 sm:$0xff] }
  0x10   :  { %407 = vperm.xlu0 %8237, %v161_v1   ;;  %7736 = vmatprep.subr.mxu1 %v8455_v6  ;;  %v429_v0 = vld [vmem:[%s13552_s4 + $0xe8] sm:$0xff]  ;;  %v309_v4 = vld [vmem:[%s13552_s4 + $0x80] sm:$0xff]  ;;  %v308_v7 = vld [vmem:[%s13552_s4 + $0x78] sm:$0xff] }
  0x11   :  { %7737 = vmatpush3.msra.mxu1 %v190_v19  ;;  %7717 = vmatpush3.msra.mxu0 %v29_v18  ;;  %v7246_v5 = vld [vmem:[%s13554_s2 + $0x7] ss:$0 sm:$0xff]  ;;  %v307_v11 = vld [vmem:[%s13552_s4 + $0x70] sm:$0xff]  ;;  %v427_v12 = vld [vmem:[%s13552_s4 + $0xd8] sm:$0xff] }
  0x12   :  { %7738 = vmatprep.subr.mxu1 %v8455_v6  ;;  %7753 = vmatprep.subr.mxu0 %v8455_v6  ;;  %v428_v8 = vld [vmem:[%s13552_s4 + $0xe0] sm:$0xff]  ;;  %v306_v13 = vld [vmem:[%s13552_s4 + $0x68] sm:$0xff]  ;;  %v426_v16 = vld [vmem:[%s13552_s4 + $0xd0] sm:$0xff] }
  0x13   :  { %7739 = vmatpush3.msra.mxu1 %v189_v20  ;;  %v7237_v17 = vld [vmem:[%s13554_s2 + $0x2] ss:$0 sm:$0xff] }
  0x14   :  { %7740 = vmatprep.subr.mxu1 %v8455_v6 }
  0x15   :  { %7741 = vmatpush3.msra.mxu1 %v188_v21 }
  0x16   :  { %7742 = vmatprep.subr.mxu1 %v8455_v6 }
  0x17   :  { %7743 = vmatpush3.msra.mxu1 %v187_v22 }
  0x18   :  { %7744 = vmatprep.subr.mxu1 %v8455_v6 }
  0x19   :  { %7745 = vmatpush3.msra.mxu1 %v186_v23 }
  0x1a   :  { %7746 = vmatprep.subr.mxu1 %v8455_v6 }
  0x1b   :  { %7747 = vmatpush3.msra.mxu1 %v185_v24 }
  0x1c   :  { %7748 = vmatprep.subr.mxu1 %v8455_v6 }
  0x1d   :  { %7749 = vmatpush3.msra.mxu1 %v184_v25 }
  0x1e   :  { %7782 = vmatprep.subr.mxu1 %v8455_v6 }
  0x7d   :  { %v166_v30 = vpop.permute.xlu1 %165 }
  0x7e   :  { %v41_v31 = vpop.permute.xlu0 %40  ;;  %v174_v32 = vmul.f32 %v7235_v28, %v166_v30 }
  0x7f   :  { %vm51_vm3 = vcmp.eq.s32.totalorder %v8597_v27, %v41_v31 }
  0x80   :  { %v55_v33 = vsel %vm51_vm3, 1.0, %v8455_v6  ;;  %v182_v34 = vadd.f32 %v7236_v29, %v174_v32 }
  0x81   :  { %7718 = vmatprep.mubr.msk.f32.mxu0 %vm59_vm2, %v55_v33  ;;  %v47_v35 = vpop.permute.xlu1 %46 }
  0x82   :  { %v44_v36 = vpop.permute.xlu0 %43  ;;  %v183_v37 = vmax.f32 %v182_v34, 0.0  ;;  %vm53_vm5 = vcmp.eq.s32.totalorder %v8597_v27, %v47_v35 }
  0x83   :  { %vm52_vm6 = vcmp.eq.s32.totalorder %v8597_v27, %v44_v36  ;;  %v57_v40 = vsel %vm53_vm5, 1.0, %v8455_v6  ;;  %vm2201_vm5 = vcmask 392448  }
  0x84   :  { %v56_v41 = vsel %vm52_vm6, 1.0, %v8455_v6  ;;  %7751 = vmatmul.mubr.msk.f32.vlgmr.msra.gmra.mxu1 %vm204_vm4, %v183_v37  ;;  %v7242_v37 = vld [vmem:[%s13554_s2 + $0x5] ss:$0 sm:$0xff]  ;;  %vm2654_vm6 = vcmask 523648  }
  0x85   :  { %7719 = vmatmul.mubr.msk.f32.vlgmr.msra.gmra.mxu0 %vm59_vm2, %v56_v41  ;;  %7783 = vmatpush3.msk.msra.mxu1 %vm208_vm0, %v438_v39 }
  0x86   :  { %7754 = vmatpush3.msk.msra.mxu0 %vm208_vm0, %v318_v38  ;;  %v50_v43 = vpop.permute.xlu0 %49  ;;  %7721 = vmatprep.mubr.msk.f32.mxu0 %vm59_vm2, %v57_v40  ;;  %v288_v59 = vpop.permute.xlu1 %287  ;;  %v7247_v38 = vld [vmem:[%s13554_s2 + $0x8] ss:$0 sm:$0xff] }
  0x87   :  { %7755 = vmatprep.subr.mxu0 %v8455_v6  ;;  %vm54_vm7 = vcmp.eq.s32.totalorder %v8597_v27, %v50_v43  ;;  %7784 = vmatprep.subr.mxu1 %v8455_v6  ;;  %v296_v1 = vmul.f32 %v7240_v58, %v288_v59 }
  0x88   :  { %v58_v45 = vsel %vm54_vm7, 1.0, %v8455_v6  ;;  %7756 = vmatpush3.msra.mxu0 %v317_v42  ;;  %7785 = vmatpush3.msra.mxu1 %v437_v44 }
  0x89   :  { %7757 = vmatprep.subr.mxu0 %v8455_v6  ;;  %7786 = vmatprep.subr.mxu1 %v8455_v6  ;;  %v304_v9 = vadd.f32 %v7241_v3, %v296_v1 }
  0x8a   :  { %7722 = vmatmul.mubr.msk.f32.gmra.mxu0 %vm59_vm2, %v58_v45  ;;  %7787 = vmatpush3.msra.mxu1 %v436_v47 }
  0x8b   :  { %7758 = vmatpush3.msra.mxu0 %v316_v46  ;;  %7788 = vmatprep.subr.mxu1 %v8455_v6  ;;  %v408_v61 = vpop.permute.xlu0 %407  ;;  %v305_v14 = vmax.f32 %v304_v9, 0.0 }
  0x8c   :  { %7759 = vmatprep.subr.mxu0 %v8455_v6  ;;  %7789 = vmatpush3.msra.mxu1 %v435_v49  ;;  %v416_v2 = vmul.f32 %v7245_v60, %v408_v61 }
  0x8d   :  { %7760 = vmatpush3.msra.mxu0 %v315_v48  ;;  %7790 = vmatprep.subr.mxu1 %v8455_v6 }
  0x8e   :  { %7761 = vmatprep.subr.mxu0 %v8455_v6  ;;  %7791 = vmatpush3.msra.mxu1 %v434_v51  ;;  %v424_v10 = vadd.f32 %v7246_v5, %v416_v2 }
  0x8f   :  { %7762 = vmatpush3.msra.mxu0 %v314_v50  ;;  %7792 = vmatprep.subr.mxu1 %v8455_v6 }
  0x90   :  { %7763 = vmatprep.subr.mxu0 %v8455_v6  ;;  %7793 = vmatpush3.msra.mxu1 %v433_v53  ;;  %v425_v15 = vmax.f32 %v424_v10, 0.0 }
  0x91   :  { %7764 = vmatpush3.msra.mxu0 %v313_v52  ;;  %7794 = vmatprep.subr.mxu1 %v8455_v6 }
  0x92   :  { %7765 = vmatprep.subr.mxu0 %v8455_v6  ;;  %7795 = vmatpush3.msra.mxu1 %v432_v55 }
  0x93   :  { %7766 = vmatpush3.msra.mxu0 %v312_v54  ;;  %7796 = vmatprep.subr.mxu1 %v8455_v6 }
  0x94   :  { %7767 = vmatprep.subr.mxu0 %v8455_v6  ;;  %7797 = vmatpush3.msra.mxu1 %v431_v57 }
  0x95   :  { %7768 = vmatpush3.msra.mxu0 %v311_v56  ;;  %7798 = vmatprep.subr.mxu1 %v8455_v6 }
  0x96   :  { %7769 = vmatprep.subr.mxu0 %v8455_v6  ;;  %7799 = vmatpush3.msra.mxu1 %v430_v63 }
  0x97   :  { %7770 = vmatpush3.msra.mxu0 %v310_v62  ;;  %7800 = vmatprep.subr.mxu1 %v8455_v6 }
  0x98   :  { %7771 = vmatprep.subr.mxu0 %v8455_v6  ;;  %7801 = vmatpush3.msra.mxu1 %v429_v0 }
  0x99   :  { %7772 = vmatpush3.msra.mxu0 %v309_v4  ;;  %7802 = vmatprep.subr.mxu1 %v8455_v6 }
  0x9a   :  { %7773 = vmatprep.subr.mxu0 %v8455_v6  ;;  %7803 = vmatpush3.msra.mxu1 %v428_v8 }
  0x9b   :  { %7774 = vmatpush3.msra.mxu0 %v308_v7  ;;  %7804 = vmatprep.subr.mxu1 %v8455_v6 }
  0x9c   :  { %7775 = vmatprep.subr.mxu0 %v8455_v6  ;;  %7805 = vmatpush3.msra.mxu1 %v427_v12 }
  0x9d   :  { %7776 = vmatpush3.msra.mxu0 %v307_v11  ;;  %7806 = vmatprep.subr.mxu1 %v8455_v6 }
  0x9e   :  { %7777 = vmatprep.subr.mxu0 %v8455_v6  ;;  %7779 = vmatprep.mubr.msk.f32.mxu0 %vm8456_vm1, %v8455_v6 }
  0x9f   :  { %7778 = vmatpush3.msra.mxu0 %v306_v13  ;;  %7807 = vmatpush3.msra.mxu1 %v426_v16 }
  0xa0   :  { %7808 = vmatprep.mubr.msk.f32.mxu1 %vm8456_vm1, %v8455_v6  ;;  %7780 = vmatmul.mubr.msk.f32.vlgmr.msra.gmra.mxu0 %vm204_vm4, %v305_v14 }
  0xa1   :  { %7809 = vmatmul.mubr.msk.f32.vlgmr.msra.gmra.mxu1 %vm204_vm4, %v425_v15  ;;  %861 = vmatprep.mubr.f32.mxu0 %v8455_v6  ;;  %vm1748_vm4 = vcmask 261248  }
  0xa2   :  { %7846 = vmatprep.subr.mxu1 %v8455_v6  ;;  %7860 = vmatprep.mubr.msk.f32.mxu1 %vm8456_vm1, %v8455_v6 }
 0x144   :  { %v278_v19 = vpop.f32.mrf.mxu1 }
 0x145   :  { %v7720_v18 = vpop.f32.mrf.mxu0  ;;  %v279_v20 = vadd.f32 %v7237_v17, %v278_v19  ;;  %v775_v17 = vld [vmem:[%s13553_s3 + $0x148] sm:$0xff]  ;;  %v773_v19 = vld [vmem:[%s13553_s3 + $0xe0] sm:$0xff] }
 0x146   :  { %158 = vst.msk [vmem:[#allocation2 + $0x8] sm:$0xff] %vm59_vm2, %v7720_v18  ;;  %v7752_v22 = vpop.f32.mrf.mxu1  ;;  %v774_v18 = vld [vmem:[%s13553_s3 + $0x140] sm:$0xff]  ;;  %821 = vmatprep.subr.mxu0 %v775_v17 }
 0x147   :  { %v138_v21 = vpop.f32.mrf.mxu0  ;;  %282 = vst.msk [vmem:[#allocation2 + $0x20] sm:$0xff] %vm59_vm2, %v279_v20  ;;  %v772_v20 = vld [vmem:[%s13553_s3 + $0xd8] sm:$0xff]  ;;  %822 = vmatpush1.msra.mxu0 %v774_v18 }
 0x148   :  { %157 = vst.msk [vmem:[#allocation2] sm:$0xff] %vm59_vm2, %v138_v21  ;;  %823 = vmatprep.subr.mxu0 %v773_v19 }
 0x149   :  { %824 = vmatpush1.msra.mxu0 %v772_v20 }
 0x14a   :  { %v7723_v23 = vpop.f32.mrf.mxu0 }
 0x14b   :  { %160 = vst.msk [vmem:[#allocation2 + $0x18] sm:$0xff] %vm59_vm2, %v7723_v23  ;;  %v771_v23 = vld [vmem:[%s13553_s3 + $0x78] sm:$0xff] }
 0x14c   :  { %v148_v24 = vpop.f32.mrf.mxu0  ;;  %825 = vmatprep.subr.mxu0 %v771_v23 }
 0x14d   :  { %159 = vst.msk [vmem:[#allocation2 + $0x10] sm:$0xff] %vm59_vm2, %v148_v24  ;;  %v642_v25 = vld [vmem:[#allocation2 + $0x8] sm:$0xff] }
 0x14e   :  { %v653_v28 = vsel %vm59_vm2, %v642_v25, 0.0  ;;  %v645_v35 = vld [vmem:[#allocation2 + $0x20] sm:$0xff] }
 0x14f   :  { %654 = vadd.xlane.f32.xlu0 %v653_v28  ;;  %v641_v29 = vld [vmem:[#allocation2] sm:$0xff]  ;;  %v662_v36 = vsel %vm59_vm2, %v645_v35, 0.0  ;;  %v770_v28 = vld [vmem:[%s13553_s3 + $0x70] sm:$0xff] }
 0x150   :  { %v650_v30 = vsel %vm59_vm2, %v641_v29, 0.0  ;;  %826 = vmatpush1.msra.mxu0 %v770_v28 }
 0x151   :  { %651 = vadd.xlane.f32.xlu1 %v650_v30  ;;  %v768_v30 = vld [vmem:[%s13553_s3 + $0x8] sm:$0xff] }
 0x152   :  { %v644_v31 = vld [vmem:[#allocation2 + $0x18] sm:$0xff] }
 0x153   :  { %v659_v32 = vsel %vm59_vm2, %v644_v31, 0.0 }
 0x154   :  { %660 = vadd.xlane.f32.xlu0 %v659_v32  ;;  %v643_v33 = vld [vmem:[#allocation2 + $0x10] sm:$0xff] }
 0x155   :  { %v656_v34 = vsel %vm59_vm2, %v643_v33, 0.0 }
 0x156   :  { %657 = vadd.xlane.f32.xlu1 %v656_v34 }
 0x15a   :  { %663 = vadd.xlane.f32.xlu1 %v662_v36 }
 0x160   :  { %v398_v39 = vpop.f32.mrf.mxu0 }
 0x161   :  { %v518_v40 = vpop.f32.mrf.mxu1  ;;  %v399_v41 = vadd.f32 %v7242_v37, %v398_v39 }
 0x162   :  { %v519_v42 = vadd.f32 %v7247_v38, %v518_v40  ;;  %v7781_v43 = vpop.f32.mrf.mxu0 }
 0x163   :  { %v7810_v44 = vpop.f32.mrf.mxu1  ;;  %402 = vst.msk [vmem:[#allocation2 + $0x28] sm:$0xff] %vm59_vm2, %v399_v41 }
 0x164   :  { %522 = vst.msk [vmem:[#allocation2 + $0x30] sm:$0xff] %vm59_vm2, %v519_v42 }
 0x16a   :  { %v646_v45 = vld [vmem:[#allocation2 + $0x28] sm:$0xff] }
 0x16b   :  { %v647_v46 = vld [vmem:[#allocation2 + $0x30] sm:$0xff]  ;;  %v665_v47 = vsel %vm59_vm2, %v646_v45, 0.0 }
 0x16c   :  { %v668_v48 = vsel %vm59_vm2, %v647_v46, 0.0  ;;  %666 = vadd.xlane.f32.xlu0 %v665_v47 }
 0x16d   :  { %669 = vadd.xlane.f32.xlu1 %v668_v48 }
 0x1d8   :  { %v655_v49 = vpop.xlane.xlu0 %654 }
 0x1d9   :  { %v673_v50 = vmul.f32 0.03125, %v655_v49 }
 0x1da   :  { %v652_v51 = vpop.xlane.xlu1 %651 }
 0x1db   :  { %v8767_v52 = vsub.f32 %v642_v25, %v673_v50  ;;  %v672_v53 = vmul.f32 0.03125, %v652_v51  ;;  %v7250_v50 = vld [vmem:[%s13554_s2 + $0x9] ss:$0 sm:$0xff] }
 0x1dd   :  { %v8769_v54 = vsub.f32 %v641_v29, %v672_v53  ;;  %v661_v55 = vpop.xlane.xlu0 %660  ;;  %v687_v56 = vmul.f32 %v8767_v52, %v8767_v52  ;;  %v769_v29 = vld [vmem:[%s13553_s3 + $0x10] sm:$0xff] }
 0x1de   :  { %v675_v57 = vmul.f32 0.03125, %v661_v55  ;;  %827 = vmatprep.subr.mxu0 %v769_v29  ;;  %v7251_v55 = vld [vmem:[%s13554_s2 + $0xa] ss:$0 sm:$0xff] }
 0x1df   :  { %v658_v58 = vpop.xlane.xlu1 %657  ;;  %v696_v59 = vsel %vm59_vm2, %v687_v56, 0.0  ;;  %v686_v60 = vmul.f32 %v8769_v54, %v8769_v54  ;;  %828 = vmatpush1.msra.mxu0 %v768_v30 }
 0x1e0   :  { %v8776_v61 = vsub.f32 %v644_v31, %v675_v57  ;;  %v674_v62 = vmul.f32 0.03125, %v658_v58  ;;  %697 = vadd.xlane.f32.xlu1 %v696_v59  ;;  %7811 = vmatprep.subr.mxu0 %v8455_v6 }
 0x1e1   :  { %v693_v63 = vsel %vm59_vm2, %v686_v60, 0.0 }
 0x1e2   :  { %v8779_v0 = vsub.f32 %v643_v33, %v674_v62  ;;  %694 = vadd.xlane.f32.xlu0 %v693_v63  ;;  %v689_v1 = vmul.f32 %v8776_v61, %v8776_v61 }
 0x1e3   :  { %v664_v2 = vpop.xlane.xlu1 %663 }
 0x1e4   :  { %v676_v3 = vmul.f32 0.03125, %v664_v2  ;;  %v702_v4 = vsel %vm59_vm2, %v689_v1, 0.0  ;;  %v688_v5 = vmul.f32 %v8779_v0, %v8779_v0 }
 0x1e5   :  { %703 = vadd.xlane.f32.xlu1 %v702_v4 }
 0x1e6   :  { %v8786_v7 = vsub.f32 %v645_v35, %v676_v3  ;;  %v699_v8 = vsel %vm59_vm2, %v688_v5, 0.0 }
 0x1e7   :  { %700 = vadd.xlane.f32.xlu0 %v699_v8 }
 0x1e8   :  { %v690_v9 = vmul.f32 %v8786_v7, %v8786_v7 }
 0x1ea   :  { %v705_v10 = vsel %vm59_vm2, %v690_v9, 0.0 }
 0x1eb   :  { %706 = vadd.xlane.f32.xlu0 %v705_v10 }
 0x1f5   :  { %v667_v12 = vpop.xlane.xlu0 %666 }
 0x1f6   :  { %v670_v11 = vpop.xlane.xlu1 %669  ;;  %v677_v14 = vmul.f32 0.03125, %v667_v12 }
 0x1f7   :  { %v678_v13 = vmul.f32 0.03125, %v670_v11 }
 0x1f8   :  { %v8794_v16 = vsub.f32 %v646_v45, %v677_v14 }
 0x1f9   :  { %v8792_v15 = vsub.f32 %v647_v46, %v678_v13 }
 0x1fa   :  { %v691_v22 = vmul.f32 %v8794_v16, %v8794_v16 }
 0x1fb   :  { %v692_v21 = vmul.f32 %v8792_v15, %v8792_v15 }
 0x1fc   :  { %v708_v25 = vsel %vm59_vm2, %v691_v22, 0.0 }
 0x1fd   :  { %v711_v24 = vsel %vm59_vm2, %v692_v21, 0.0  ;;  %709 = vadd.xlane.f32.xlu1 %v708_v25 }
 0x1fe   :  { %712 = vadd.xlane.f32.xlu0 %v711_v24 }
 0x269   :  { %v698_v31 = vpop.xlane.xlu1 %697 }
 0x26a   :  { %v715_v32 = vmul.f32 0.03125, %v698_v31 }
 0x26b   :  { %v695_v33 = vpop.xlane.xlu0 %694 }
 0x26c   :  { %v722_v34 = vadd.f32 1e-05, %v715_v32  ;;  %v714_v35 = vmul.f32 0.03125, %v695_v33 }
 0x26e   :  { %8238 = vrsqrt.f32 %v722_v34  ;;  %v721_v36 = vadd.f32 1e-05, %v714_v35  ;;  %v704_v37 = vpop.xlane.xlu1 %703 }
 0x26f   :  { %v717_v38 = vmul.f32 0.03125, %v704_v37 }
 0x270   :  { %8240 = vrsqrt.f32 %v721_v36  ;;  %v701_v39 = vpop.xlane.xlu0 %700 }
 0x271   :  { %v724_v40 = vadd.f32 1e-05, %v717_v38  ;;  %v716_v41 = vmul.f32 0.03125, %v701_v39 }
 0x273   :  { %v723_v42 = vadd.f32 1e-05, %v716_v41  ;;  %8242 = vrsqrt.f32 %v724_v40 }
 0x274   :  { %v707_v43 = vpop.xlane.xlu0 %706 }
 0x275   :  { %8244 = vrsqrt.f32 %v723_v42  ;;  %v718_v44 = vmul.f32 0.03125, %v707_v43 }
 0x277   :  { %v725_v45 = vadd.f32 1e-05, %v718_v44 }
 0x279   :  { %8246 = vrsqrt.f32 %v725_v45 }
 0x27b   :  { %v8239_v46 = vpop.eup %8238 }
 0x27c   :  { %v736_v49 = vmul.f32 %v8239_v46, %v8767_v52 }
 0x27d   :  { %v8241_v47 = vpop.eup %8240 }
 0x27e   :  { %v735_v48 = vmul.f32 %v8241_v47, %v8769_v54  ;;  %v749_v58 = vmul.f32 %v7250_v50, %v736_v49  ;;  %v8982_v49 = vshrl.u32 %v33_v26, 7 }
 0x280   :  { %v748_v51 = vmul.f32 %v7250_v50, %v735_v48  ;;  %v8243_v53 = vpop.eup %8242  ;;  %v8842_v54 = vadd.f32 %v7251_v55, %v749_v58  ;;  %v527_v26 = vadd.s32 24, %v8982_v49 }
 0x281   :  { %v738_v52 = vmul.f32 %v8243_v53, %v8776_v61  ;;  %v525_v53 = vadd.s32 8, %v8982_v49 }
 0x282   :  { %v8245_v56 = vpop.eup %8244  ;;  %v8835_v57 = vadd.f32 %v7251_v55, %v748_v51  ;;  %v535_v51 = vand.u32 7, %v8982_v49 }
 0x283   :  { %v737_v59 = vmul.f32 %v8245_v56, %v8779_v0  ;;  %v751_v0 = vmul.f32 %v7250_v50, %v738_v52  ;;  %v526_v56 = vadd.s32 16, %v8982_v49 }
 0x284   :  { %7252 = vmatmul.mubr.msk.f32.vlgmr.msra.gmra.mxu0 %vm59_vm2, %v8835_v57 }
 0x285   :  { %867 = vmatprep.mubr.f32.mxu0 %v8455_v6  ;;  %v750_v60 = vmul.f32 %v7250_v50, %v737_v59  ;;  %v8853_v9 = vadd.f32 %v7251_v55, %v751_v0  ;;  %v8460_v59 = vmov -1e+09  }
 0x286   :  { %v8247_v62 = vpop.eup %8246  ;;  %v710_v63 = vpop.xlane.xlu1 %709 }
 0x287   :  { %v713_v1 = vpop.xlane.xlu0 %712  ;;  %v719_v2 = vmul.f32 0.03125, %v710_v63  ;;  %v8847_v8 = vadd.f32 %v7251_v55, %v750_v60  ;;  %v739_v61 = vmul.f32 %v8247_v62, %v8786_v7  ;;  %v549_v62 = vand.u32 7, %v526_v56 }
 0x288   :  { %v720_v3 = vmul.f32 0.03125, %v713_v1  ;;  %7253 = vmatmul.mubr.msk.f32.gmra.mxu0 %vm59_vm2, %v8842_v54 }
 0x289   :  { %873 = vmatprep.mubr.f32.mxu0 %v8455_v6  ;;  %v726_v4 = vadd.f32 1e-05, %v719_v2  ;;  %v752_v10 = vmul.f32 %v7250_v50, %v739_v61 }
 0x28a   :  { %v727_v5 = vadd.f32 1e-05, %v720_v3  ;;  %v528_v3 = vadd.s32 32, %v8982_v49 }
 0x28b   :  { %8248 = vrsqrt.f32 %v726_v4  ;;  %v8858_v11 = vadd.f32 %v7251_v55, %v752_v10 }
 0x28c   :  { %7254 = vmatmul.mubr.msk.f32.gmra.mxu0 %vm59_vm2, %v8847_v8  ;;  %8250 = vrsqrt.f32 %v727_v5  ;;  %v556_v5 = vand.u32 7, %v527_v26 }
 0x28d   :  { %879 = vmatprep.mubr.f32.mxu0 %v8455_v6 }
 0x290   :  { %7255 = vmatmul.mubr.msk.f32.gmra.mxu0 %vm59_vm2, %v8853_v9 }
 0x291   :  { %885 = vmatprep.mubr.f32.mxu0 %v8455_v6 }
 0x294   :  { %7256 = vmatmul.mubr.msk.f32.gmra.mxu0 %vm59_vm2, %v8858_v11 }
 0x295   :  { %891 = vmatprep.mubr.f32.mxu0 %v8455_v6 }
 0x298   :  { %v8249_v7 = vpop.eup %8248 }
 0x299   :  { %v8251_v12 = vpop.eup %8250  ;;  %v740_v13 = vmul.f32 %v8249_v7, %v8794_v16 }
 0x29a   :  { %v741_v14 = vmul.f32 %v8251_v12, %v8792_v15 }
 0x29b   :  { %v753_v17 = vmul.f32 %v7250_v50, %v740_v13  ;;  %v563_v13 = vand.u32 7, %v528_v3 }
 0x29c   :  { %v754_v19 = vmul.f32 %v7250_v50, %v741_v14  ;;  %v619_v50 = vand.u32 7, %v8597_v27 }
 0x29d   :  { %v8865_v18 = vadd.f32 %v7251_v55, %v753_v17 }
 0x29e   :  { %v8870_v20 = vadd.f32 %v7251_v55, %v754_v19  ;;  %vm627_vm10 = vcmp.eq.s32.totalorder %v535_v51, %v619_v50  ;;  %v542_v55 = vand.u32 7, %v525_v53  ;;  %vm629_vm13 = vcmp.eq.s32.totalorder %v549_v62, %v619_v50 }
 0x29f   :  { %7257 = vmatmul.mubr.msk.f32.gmra.mxu0 %vm59_vm2, %v8865_v18  ;;  %v8988_v52 = vsel %vm627_vm10, 0.0, %v8460_v59  ;;  %v9000_v12 = vsel %vm629_vm13, 0.0, %v8460_v59  ;;  %vm630_vm14 = vcmp.eq.s32.totalorder %v556_v5, %v619_v50  ;;  %v529_v19 = vadd.s32 40, %v8982_v49 }
 0x2a0   :  { %897 = vmatprep.mubr.f32.mxu0 %v8455_v6  ;;  %vm628_vm11 = vcmp.eq.s32.totalorder %v542_v55, %v619_v50  ;;  %vm631_vm15 = vcmp.eq.s32.totalorder %v563_v13, %v619_v50 }
 0x2a1   :  { %v8994_v2 = vsel %vm628_vm11, 0.0, %v8460_v59 }
 0x2a3   :  { %7258 = vmatmul.mubr.msk.f32.gmra.mxu0 %vm59_vm2, %v8870_v20 }
 0x2a4   :  { %7825 = vmatprep.mubr.msk.f32.mxu0 %vm8456_vm1, %v8455_v6 }
 0x344   :  { %v8876_v16 = vpop.f32.mrf.mxu0 }
 0x346   :  { %v865_v15 = vpop.f32.mrf.mxu0 }
 0x347   :  { %906 = vst.msk [vmem:[#allocation4 + $0x8] sm:$0xff] %vm905_vm8, %v865_v15 }
 0x348   :  { %v8879_v21 = vpop.f32.mrf.mxu0 }
 0x34a   :  { %v871_v22 = vpop.f32.mrf.mxu0 }
 0x34b   :  { %908 = vst.msk [vmem:[#allocation4 + $0x18] sm:$0xff] %vm905_vm8, %v871_v22 }
 0x34c   :  { %v8882_v23 = vpop.f32.mrf.mxu0 }
 0x34e   :  { %v877_v24 = vpop.f32.mrf.mxu0  ;;  %v8935_v41 = vld [vmem:[#allocation4 + $0x8] sm:$0xff] }
 0x34f   :  { %910 = vst.msk [vmem:[#allocation4 + $0x28] sm:$0xff] %vm905_vm8, %v877_v24 }
 0x350   :  { %v8885_v25 = vpop.f32.mrf.mxu0 }
 0x352   :  { %v883_v28 = vpop.f32.mrf.mxu0  ;;  %v8931_v40 = vld [vmem:[#allocation4 + $0x18] sm:$0xff] }
 0x353   :  { %912 = vst.msk [vmem:[#allocation4 + $0x38] sm:$0xff] %vm905_vm8, %v883_v28  ;;  %v9005_v28 = vsel %vm630_vm14, 0.0, %v8460_v59 }
 0x354   :  { %v8888_v29 = vpop.f32.mrf.mxu0 }
 0x356   :  { %v889_v30 = vpop.f32.mrf.mxu0  ;;  %v8927_v39 = vld [vmem:[#allocation4 + $0x28] sm:$0xff] }
 0x357   :  { %914 = vst.msk [vmem:[#allocation4 + $0x48] sm:$0xff] %vm905_vm8, %v889_v30 }
 0x35a   :  { %v8923_v38 = vld [vmem:[#allocation4 + $0x38] sm:$0xff] }
 0x35e   :  { %v8919_v37 = vld [vmem:[#allocation4 + $0x48] sm:$0xff] }
 0x35f   :  { %v8891_v31 = vpop.f32.mrf.mxu0 }
 0x360   :  { %950 = vrot.lane.b32.xlu0 %v8891_v31, %s8459_s18 }
 0x361   :  { %v895_v32 = vpop.f32.mrf.mxu0 }
 0x362   :  { %916 = vst.msk [vmem:[#allocation4 + $0x58] sm:$0xff] %vm905_vm8, %v895_v32 }
 0x363   :  { %v8896_v33 = vpop.f32.mrf.mxu0 }
 0x364   :  { %944 = vrot.lane.b32.xlu0 %v8882_v23, %s8459_s18  ;;  %952 = vrot.lane.b32.xlu1 %v8896_v33, %s8459_s18 }
 0x365   :  { %v901_v34 = vpop.f32.mrf.mxu0 }
 0x366   :  { %918 = vst.msk [vmem:[#allocation4 + $0x68] sm:$0xff] %vm905_vm8, %v901_v34  ;;  %v570_v34 = vand.u32 7, %v529_v19 }
 0x368   :  { %940 = vrot.lane.b32.xlu0 %v8876_v16, %s8459_s18  ;;  %948 = vrot.lane.b32.xlu1 %v8888_v29, %s8459_s18  ;;  %vm632_vm0 = vcmp.eq.s32.totalorder %v570_v34, %v619_v50 }
 0x369   :  { %v8913_v36 = vld [vmem:[#allocation4 + $0x58] sm:$0xff] }
 0x36c   :  { %946 = vrot.lane.b32.xlu1 %v8885_v25, %s8459_s18 }
 0x36d   :  { %v8909_v35 = vld [vmem:[#allocation4 + $0x68] sm:$0xff] }
 0x36e   :  { %7847 = vmatpush3.msra.mxu1 %v8909_v35 }
 0x36f   :  { %7848 = vmatprep.subr.mxu1 %v8455_v6 }
 0x370   :  { %7849 = vmatpush3.msra.mxu1 %v8913_v36  ;;  %942 = vrot.lane.b32.xlu1 %v8879_v21, %s8459_s18 }
 0x371   :  { %7850 = vmatprep.subr.mxu1 %v8455_v6 }
 0x372   :  { %7851 = vmatpush3.msra.mxu1 %v8919_v37 }
 0x373   :  { %7852 = vmatprep.subr.mxu1 %v8455_v6 }
 0x374   :  { %7853 = vmatpush3.msra.mxu1 %v8923_v38 }
 0x375   :  { %7854 = vmatprep.subr.mxu1 %v8455_v6 }
 0x376   :  { %7855 = vmatpush3.msra.mxu1 %v8927_v39 }
 0x377   :  { %7856 = vmatprep.subr.mxu1 %v8455_v6 }
 0x378   :  { %7857 = vmatpush3.msra.mxu1 %v8931_v40 }
 0x379   :  { %7858 = vmatprep.subr.mxu1 %v8455_v6 }
 0x37a   :  { %7859 = vmatpush3.msra.mxu1 %v8935_v41 }
 0x37b   :  { %7881 = vmatprep.subr.mxu1 %v8455_v6 }
 0x3d2   :  { %v951_v43 = vpop.permute.xlu0 %950 }
 0x3d6   :  { %v953_v42 = vpop.permute.xlu1 %952  ;;  %v945_v46 = vpop.permute.xlu0 %944 }
 0x3d7   :  { %7812 = vmatpush3.xpose.msk.msra.mxu0 %vm954_vm9, %v953_v42  ;;  %v530_v42 = vadd.s32 48, %v8982_v49 }
 0x3d8   :  { %7813 = vmatprep.subr.mxu0 %v8455_v6 }
 0x3d9   :  { %v577_v51 = vand.u32 7, %v530_v42 }
 0x3da   :  { %v949_v44 = vpop.permute.xlu1 %948  ;;  %v941_v48 = vpop.permute.xlu0 %940 }
 0x3db   :  { %7814 = vmatpush3.xpose.msk.msra.mxu0 %vm954_vm9, %v951_v43  ;;  %vm633_vm3 = vcmp.eq.s32.totalorder %v577_v51, %v619_v50 }
 0x3dc   :  { %7815 = vmatprep.subr.mxu0 %v8455_v6  ;;  %v9018_v3 = vsel %vm633_vm3, 0.0, %v8460_v59  ;;  %vm3433_vm3 = vcmask 1048320  }
 0x3de   :  { %v947_v45 = vpop.permute.xlu1 %946 }
 0x3df   :  { %7816 = vmatpush3.xpose.msk.msra.mxu0 %vm954_vm9, %v949_v44 }
 0x3e0   :  { %7817 = vmatprep.subr.mxu0 %v8455_v6 }
 0x3e2   :  { %v943_v47 = vpop.permute.xlu1 %942 }
 0x3e3   :  { %7818 = vmatpush3.xpose.msk.msra.mxu0 %vm954_vm9, %v947_v45 }
 0x3e4   :  { %7819 = vmatprep.subr.mxu0 %v8455_v6 }
 0x3e7   :  { %7820 = vmatpush3.xpose.msk.msra.mxu0 %vm954_vm9, %v945_v46  ;;  %v9010_v46 = vsel %vm631_vm15, 0.0, %v8460_v59  ;;  %vm3419_vm15 = vcmask 523520  }
 0x3e8   :  { %7821 = vmatprep.subr.mxu0 %v8455_v6 }
 0x3eb   :  { %7822 = vmatpush3.xpose.msk.msra.mxu0 %vm954_vm9, %v943_v47 }
 0x3ec   :  { %7823 = vmatprep.subr.mxu0 %v8455_v6 }
 0x3ef   :  { %7824 = vmatpush3.xpose.msk.msra.mxu0 %vm954_vm9, %v941_v48 }
 0x3f0   :  { %7916 = vmatprep.subr.mxu0 %v8455_v6 }
 0x3f2   :  { %7826 = vmatmul.mubr.msk.f32.vlgmr.msra.gmra.mxu0 %vm954_vm9, %v8876_v16 }
 0x3f3   :  { %7828 = vmatprep.mubr.msk.f32.mxu0 %vm8456_vm1, %v8455_v6 }
 0x3f6   :  { %7829 = vmatmul.mubr.msk.f32.gmra.mxu0 %vm954_vm9, %v8879_v21 }
 0x3f7   :  { %7831 = vmatprep.mubr.msk.f32.mxu0 %vm8456_vm1, %v8455_v6 }
 0x3fa   :  { %7832 = vmatmul.mubr.msk.f32.gmra.mxu0 %vm954_vm9, %v8882_v23 }
 0x3fb   :  { %7834 = vmatprep.mubr.msk.f32.mxu0 %vm8456_vm1, %v8455_v6 }
 0x3fe   :  { %7835 = vmatmul.mubr.msk.f32.gmra.mxu0 %vm954_vm9, %v8885_v25 }
 0x3ff   :  { %7837 = vmatprep.mubr.msk.f32.mxu0 %vm8456_vm1, %v8455_v6 }
 0x402   :  { %7838 = vmatmul.mubr.msk.f32.gmra.mxu0 %vm954_vm9, %v8888_v29 }
 0x403   :  { %7840 = vmatprep.mubr.msk.f32.mxu0 %vm8456_vm1, %v8455_v6 }
 0x406   :  { %7841 = vmatmul.mubr.msk.f32.gmra.mxu0 %vm954_vm9, %v8891_v31 }
 0x407   :  { %7843 = vmatprep.mubr.msk.f32.mxu0 %vm8456_vm1, %v8455_v6 }
 0x40a   :  { %7844 = vmatmul.mubr.msk.f32.gmra.mxu0 %vm954_vm9, %v8896_v33 }
 0x40b   :  { %7930 = vmatprep.mubr.msk.f32.mxu0 %vm8456_vm1, %v8455_v6 }
 0x4b2   :  { %v1049_v58 = vpop.f32.mrf.mxu0 }
 0x4b3   :  { %v1083_v60 = vmul.f32 0.25, %v1049_v58  ;;  %v9014_v58 = vsel %vm632_vm0, 0.0, %v8460_v59  ;;  %vm3426_vm0 = vcmask 785920  }
 0x4b4   :  { %v7827_v63 = vpop.f32.mrf.mxu0 }
 0x4b5   :  { %v8992_v27 = vadd.f32 %v1083_v60, %v8988_v52 }
 0x4b6   :  { %v1054_v1 = vpop.f32.mrf.mxu0 }
 0x4b7   :  { %v1084_v0 = vmul.f32 0.25, %v1054_v1  ;;  %v1098_v4 = vsel %vm1097_vm12, %v8992_v27, -inf }
 0x4b8   :  { %1099 = vmax.xlane.f32.xlu1 %v1098_v4  ;;  %v7830_v61 = vpop.f32.mrf.mxu0 }
 0x4b9   :  { %v1091_v10 = vadd.f32 %v1084_v0, %v8994_v2 }
 0x4ba   :  { %v1059_v7 = vpop.f32.mrf.mxu0 }
 0x4bb   :  { %v1085_v14 = vmul.f32 0.25, %v1059_v7  ;;  %v1101_v17 = vsel %vm1097_vm12, %v1091_v10, -inf }
 0x4bc   :  { %1102 = vmax.xlane.f32.xlu0 %v1101_v17  ;;  %v7833_v15 = vpop.f32.mrf.mxu0 }
 0x4bd   :  { %v1092_v22 = vadd.f32 %v1085_v14, %v9000_v12 }
 0x4be   :  { %v1064_v24 = vpop.f32.mrf.mxu0 }
 0x4bf   :  { %v1086_v30 = vmul.f32 0.25, %v1064_v24  ;;  %v1104_v32 = vsel %vm1097_vm12, %v1092_v22, -inf }
 0x4c0   :  { %1105 = vmax.xlane.f32.xlu0 %v1104_v32  ;;  %v7836_v43 = vpop.f32.mrf.mxu0 }
 0x4c1   :  { %v1093_v44 = vadd.f32 %v1086_v30, %v9005_v28 }
 0x4c2   :  { %v1069_v45 = vpop.f32.mrf.mxu0 }
 0x4c3   :  { %v1087_v47 = vmul.f32 0.25, %v1069_v45  ;;  %v1107_v48 = vsel %vm1097_vm12, %v1093_v44, -inf }
 0x4c4   :  { %1108 = vmax.xlane.f32.xlu1 %v1107_v48  ;;  %v7839_v53 = vpop.f32.mrf.mxu0 }
 0x4c5   :  { %v1094_v55 = vadd.f32 %v1087_v47, %v9010_v46 }
 0x4c6   :  { %v1074_v56 = vpop.f32.mrf.mxu0 }
 0x4c7   :  { %v1088_v60 = vmul.f32 0.25, %v1074_v56  ;;  %v1110_v62 = vsel %vm1097_vm12, %v1094_v55, -inf }
 0x4c8   :  { %1111 = vmax.xlane.f32.xlu0 %v1110_v62  ;;  %v7842_v26 = vpop.f32.mrf.mxu0 }
 0x4c9   :  { %v1095_v63 = vadd.f32 %v1088_v60, %v9014_v58 }
 0x4ca   :  { %v1079_v1 = vpop.f32.mrf.mxu0 }
 0x4cb   :  { %v1089_v0 = vmul.f32 0.25, %v1079_v1  ;;  %v1113_v4 = vsel %vm1097_vm12, %v1095_v63, -inf }
 0x4cc   :  { %1114 = vmax.xlane.f32.xlu1 %v1113_v4  ;;  %v7845_v5 = vpop.f32.mrf.mxu0 }
 0x4cd   :  { %v1096_v61 = vadd.f32 %v1089_v0, %v9018_v3 }
 0x4cf   :  { %v1116_v7 = vsel %vm1097_vm12, %v1096_v61, -inf }
 0x4d0   :  { %1117 = vmax.xlane.f32.xlu0 %v1116_v7 }
 0x4dd   :  { %1348 = vrot.lane.b32.xlu1 %v8891_v31, %s8461_s19 }
 0x4e1   :  { %1346 = vrot.lane.b32.xlu1 %v8888_v29, %s8461_s19 }
 0x4e6   :  { %1350 = vrot.lane.b32.xlu0 %v8896_v33, %s8461_s19 }
 0x541   :  { %v1100_v50 = vpop.xlane.xlu1 %1099 }
 0x542   :  { %v1119_v59 = vsub.f32 %v8992_v27, %v1100_v50 }
 0x544   :  { %v1126_v13 = vmul.f32 1.442695, %v1119_v59 }
 0x545   :  { %v1103_v14 = vpop.xlane.xlu0 %1102 }
 0x546   :  { %8252 = vpow2.f32 %v1126_v13  ;;  %v1120_v17 = vsub.f32 %v1091_v10, %v1103_v14 }
 0x548   :  { %v1128_v19 = vmul.f32 1.442695, %v1120_v17 }
 0x549   :  { %v1106_v15 = vpop.xlane.xlu0 %1105 }
 0x54a   :  { %8254 = vpow2.f32 %v1128_v19  ;;  %v1121_v24 = vsub.f32 %v1092_v22, %v1106_v15 }
 0x54c   :  { %v1130_v30 = vmul.f32 1.442695, %v1121_v24 }
 0x54d   :  { %v1109_v32 = vpop.xlane.xlu1 %1108 }
 0x54e   :  { %8256 = vpow2.f32 %v1130_v30  ;;  %v1122_v34 = vsub.f32 %v1093_v44, %v1109_v32 }
 0x550   :  { %v1132_v42 = vmul.f32 1.442695, %v1122_v34 }
 0x551   :  { %v1112_v51 = vpop.xlane.xlu0 %1111 }
 0x552   :  { %8258 = vpow2.f32 %v1132_v42  ;;  %v1123_v53 = vsub.f32 %v1094_v55, %v1112_v51 }
 0x553   :  { %v9030_v43 = vpop.eup %8252 }
 0x554   :  { %v1140_v45 = vsel %vm1097_vm12, %v9030_v43, 0.0  ;;  %v1134_v60 = vmul.f32 1.442695, %v1123_v53 }
 0x555   :  { %1141 = vadd.xlane.f32.xlu1 %v1140_v45  ;;  %v1115_v56 = vpop.xlane.xlu1 %1114 }
 0x556   :  { %v1124_v62 = vsub.f32 %v1095_v63, %v1115_v56  ;;  %8260 = vpow2.f32 %v1134_v60 }
 0x557   :  { %v9034_v27 = vpop.eup %8254 }
 0x558   :  { %v1143_v10 = vsel %vm1097_vm12, %v9034_v27, 0.0  ;;  %v1136_v26 = vmul.f32 1.442695, %v1124_v62 }
 0x559   :  { %1144 = vadd.xlane.f32.xlu0 %v1143_v10  ;;  %v1118_v55 = vpop.xlane.xlu0 %1117  ;;  %v1349_v59 = vpop.permute.xlu1 %1348 }
 0x55a   :  { %8262 = vpow2.f32 %v1136_v26  ;;  %v1125_v63 = vsub.f32 %v1096_v61, %v1118_v55 }
 0x55b   :  { %v9038_v47 = vpop.eup %8256 }
 0x55c   :  { %v1146_v22 = vsel %vm1097_vm12, %v9038_v47, 0.0  ;;  %v1138_v7 = vmul.f32 1.442695, %v1125_v63 }
 0x55d   :  { %1147 = vadd.xlane.f32.xlu1 %v1146_v22  ;;  %v1347_v13 = vpop.permute.xlu1 %1346  ;;  %v1351_v14 = vpop.permute.xlu0 %1350 }
 0x55e   :  { %8264 = vpow2.f32 %v1138_v7 }
 0x55f   :  { %v9042_v44 = vpop.eup %8258 }
 0x560   :  { %v1149_v48 = vsel %vm1097_vm12, %v9042_v44, 0.0 }
 0x561   :  { %1150 = vadd.xlane.f32.xlu0 %v1149_v48 }
 0x563   :  { %v9050_v1 = vpop.eup %8260 }
 0x564   :  { %v1152_v0 = vsel %vm1097_vm12, %v9050_v1, 0.0 }
 0x567   :  { %v9054_v4 = vpop.eup %8262 }
 0x568   :  { %v1155_v5 = vsel %vm1097_vm12, %v9054_v4, 0.0 }
 0x56b   :  { %v9072_v50 = vpop.eup %8264 }
 0x56c   :  { %v1158_v61 = vsel %vm1097_vm12, %v9072_v50, 0.0 }
 0x56e   :  { %1342 = vrot.lane.b32.xlu1 %v8882_v23, %s8461_s19 }
 0x577   :  { %1344 = vrot.lane.b32.xlu0 %v8885_v25, %s8461_s19 }
 0x592   :  { %1153 = vadd.xlane.f32.xlu1 %v1152_v0 }
 0x596   :  { %1156 = vadd.xlane.f32.xlu0 %v1155_v5 }
 0x5a3   :  { %1338 = vrot.lane.b32.xlu1 %v8876_v16, %s8461_s19 }
 0x5ac   :  { %1340 = vrot.lane.b32.xlu0 %v8879_v21, %s8461_s19 }
 0x5b0   :  { %1324 = vrot.lane.b32.xlu0 %v8876_v16, %s8462_s20 }
 0x5b4   :  { %1326 = vrot.lane.b32.xlu0 %v8879_v21, %s8462_s20 }
 0x5b8   :  { %1328 = vrot.lane.b32.xlu0 %v8882_v23, %s8462_s20 }
 0x5bc   :  { %1330 = vrot.lane.b32.xlu0 %v8885_v25, %s8462_s20 }
 0x5c0   :  { %1332 = vrot.lane.b32.xlu0 %v8888_v29, %s8462_s20 }
 0x5c4   :  { %1334 = vrot.lane.b32.xlu0 %v8891_v31, %s8462_s20 }
 0x5c7   :  { %1159 = vadd.xlane.f32.xlu1 %v1158_v61 }
 0x5c8   :  { %1336 = vrot.lane.b32.xlu0 %v8896_v33, %s8462_s20 }
 0x5cc   :  { %1777 = vrot.lane.b32.xlu0 %v8876_v16, %s8463_s21 }
 0x5d0   :  { %1779 = vrot.lane.b32.xlu0 %v8879_v21, %s8463_s21 }
 0x5d4   :  { %1781 = vrot.lane.b32.xlu0 %v8882_v23, %s8463_s21 }
 0x5d8   :  { %1783 = vrot.lane.b32.xlu0 %v8885_v25, %s8463_s21  ;;  %1803 = vrot.lane.b32.xlu1 %v8896_v33, %s8464_s22 }
 0x5dc   :  { %1785 = vrot.lane.b32.xlu0 %v8888_v29, %s8463_s21  ;;  %1801 = vrot.lane.b32.xlu1 %v8891_v31, %s8464_s22 }
 0x5de   :  { %v1142_v17 = vpop.xlane.xlu1 %1141 }
 0x5df   :  { %8266 = vrcp.f32 %v1142_v17 }
 0x5e0   :  { %1787 = vrot.lane.b32.xlu0 %v8891_v31, %s8463_s21  ;;  %1799 = vrot.lane.b32.xlu1 %v8888_v29, %s8464_s22 }
 0x5e2   :  { %v1145_v19 = vpop.xlane.xlu0 %1144 }
 0x5e3   :  { %8268 = vrcp.f32 %v1145_v19 }
 0x5e4   :  { %1789 = vrot.lane.b32.xlu0 %v8896_v33, %s8463_s21  ;;  %1797 = vrot.lane.b32.xlu1 %v8885_v25, %s8464_s22 }
 0x5e6   :  { %v1148_v15 = vpop.xlane.xlu1 %1147 }
 0x5e7   :  { %8270 = vrcp.f32 %v1148_v15 }
 0x5e8   :  { %2230 = vrot.lane.b32.xlu0 %v8876_v16, %s8465_s23  ;;  %1795 = vrot.lane.b32.xlu1 %v8882_v23, %s8464_s22 }
 0x5ea   :  { %v1151_v24 = vpop.xlane.xlu0 %1150 }
 0x5eb   :  { %8272 = vrcp.f32 %v1151_v24 }
 0x5ec   :  { %v8267_v30 = vpop.eup %8266  ;;  %2234 = vrot.lane.b32.xlu0 %v8882_v23, %s8465_s23  ;;  %1793 = vrot.lane.b32.xlu1 %v8879_v21, %s8464_s22 }
 0x5ed   :  { %v1168_v32 = vmul.f32 %v8267_v30, %v9030_v43 }
 0x5ee   :  { %v1345_v10 = vpop.permute.xlu0 %1344 }
 0x5ef   :  { %7861 = vmatmul.mubr.msk.f32.vlgmr.msra.gmra.mxu1 %vm1097_vm12, %v1168_v32 }
 0x5f0   :  { %v8269_v34 = vpop.eup %8268  ;;  %7882 = vmatpush3.xpose.msk.msra.mxu1 %vm954_vm9, %v1351_v14  ;;  %2238 = vrot.lane.b32.xlu0 %v8888_v29, %s8465_s23 }
 0x5f1   :  { %1791 = vrot.lane.b32.xlu1 %v8876_v16, %s8464_s22  ;;  %7863 = vmatprep.mubr.msk.f32.mxu1 %vm8456_vm1, %v8455_v6  ;;  %v1169_v42 = vmul.f32 %v8269_v34, %v9034_v27 }
 0x5f2   :  { %7883 = vmatprep.subr.mxu1 %v8455_v6 }
 0x5f3   :  { %7864 = vmatmul.mubr.msk.f32.gmra.mxu1 %vm1097_vm12, %v1169_v42 }
 0x5f4   :  { %v8271_v43 = vpop.eup %8270  ;;  %7884 = vmatpush3.xpose.msk.msra.mxu1 %vm954_vm9, %v1349_v59  ;;  %2242 = vrot.lane.b32.xlu0 %v8896_v33, %s8465_s23 }
 0x5f5   :  { %2256 = vrot.lane.b32.xlu1 %v8896_v33, %s8466_s24  ;;  %7866 = vmatprep.mubr.msk.f32.mxu1 %vm8456_vm1, %v8455_v6  ;;  %v1170_v45 = vmul.f32 %v8271_v43, %v9038_v47  ;;  %v1343_v47 = vpop.permute.xlu1 %1342 }
 0x5f6   :  { %7885 = vmatprep.subr.mxu1 %v8455_v6 }
 0x5f7   :  { %7867 = vmatmul.mubr.msk.f32.gmra.mxu1 %vm1097_vm12, %v1170_v45 }
 0x5f8   :  { %v8273_v27 = vpop.eup %8272  ;;  %7886 = vmatpush3.xpose.msk.msra.mxu1 %vm954_vm9, %v1347_v13  ;;  %1588 = vrot.lane.b32.xlu0 %v8913_v36, %s8462_s20 }
 0x5f9   :  { %2254 = vrot.lane.b32.xlu1 %v8891_v31, %s8466_s24  ;;  %7869 = vmatprep.mubr.msk.f32.mxu1 %vm8456_vm1, %v8455_v6  ;;  %v1171_v33 = vmul.f32 %v8273_v27, %v9042_v44 }
 0x5fa   :  { %7887 = vmatprep.subr.mxu1 %v8455_v6 }
 0x5fb   :  { %7870 = vmatmul.mubr.msk.f32.gmra.mxu1 %vm1097_vm12, %v1171_v33 }
 0x5fc   :  { %7888 = vmatpush3.xpose.msk.msra.mxu1 %vm954_vm9, %v1345_v10  ;;  %1584 = vrot.lane.b32.xlu0 %v8923_v38, %s8462_s20 }
 0x5fd   :  { %2252 = vrot.lane.b32.xlu1 %v8888_v29, %s8466_s24  ;;  %7889 = vmatprep.subr.mxu1 %v8455_v6 }
 0x5fe   :  { %7872 = vmatprep.mubr.msk.f32.mxu1 %vm8456_vm1, %v8455_v6 }
 0x600   :  { %7890 = vmatpush3.xpose.msk.msra.mxu1 %vm954_vm9, %v1343_v47  ;;  %1582 = vrot.lane.b32.xlu0 %v8927_v39, %s8462_s20 }
 0x601   :  { %2250 = vrot.lane.b32.xlu1 %v8885_v25, %s8466_s24  ;;  %7891 = vmatprep.subr.mxu1 %v8455_v6 }
 0x604   :  { %1578 = vrot.lane.b32.xlu0 %v8935_v41, %s8462_s20 }
 0x605   :  { %2248 = vrot.lane.b32.xlu1 %v8882_v23, %s8466_s24 }
 0x608   :  { %2041 = vrot.lane.b32.xlu0 %v8913_v36, %s8463_s21 }
 0x609   :  { %2246 = vrot.lane.b32.xlu1 %v8879_v21, %s8466_s24 }
 0x60c   :  { %2037 = vrot.lane.b32.xlu0 %v8923_v38, %s8463_s21 }
 0x60d   :  { %2244 = vrot.lane.b32.xlu1 %v8876_v16, %s8466_s24 }
 0x610   :  { %2035 = vrot.lane.b32.xlu0 %v8927_v39, %s8463_s21 }
 0x611   :  { %2232 = vrot.lane.b32.xlu1 %v8879_v21, %s8465_s23 }
 0x614   :  { %2031 = vrot.lane.b32.xlu0 %v8935_v41, %s8463_s21 }
 0x615   :  { %2236 = vrot.lane.b32.xlu1 %v8885_v25, %s8465_s23 }
 0x618   :  { %2494 = vrot.lane.b32.xlu0 %v8913_v36, %s8465_s23 }
 0x619   :  { %2240 = vrot.lane.b32.xlu1 %v8891_v31, %s8465_s23 }
 0x61b   :  { %v1154_v23 = vpop.xlane.xlu1 %1153 }
 0x61c   :  { %8274 = vrcp.f32 %v1154_v23 }
 0x61d   :  { %1590 = vrot.lane.b32.xlu1 %v8909_v35, %s8462_s20 }
 0x61f   :  { %v1157_v16 = vpop.xlane.xlu0 %1156  ;;  %v1339_v25 = vpop.permute.xlu1 %1338 }
 0x620   :  { %8276 = vrcp.f32 %v1157_v16 }
 0x621   :  { %1586 = vrot.lane.b32.xlu1 %v8919_v37, %s8462_s20 }
 0x623   :  { %v1341_v21 = vpop.permute.xlu0 %1340 }
 0x624   :  { %7892 = vmatpush3.xpose.msk.msra.mxu1 %vm954_vm9, %v1341_v21 }
 0x625   :  { %1580 = vrot.lane.b32.xlu1 %v8931_v40, %s8462_s20  ;;  %7893 = vmatprep.subr.mxu1 %v8455_v6 }
 0x627   :  { %v1325_v29 = vpop.permute.xlu0 %1324 }
 0x628   :  { %7894 = vmatpush3.xpose.msk.msra.mxu1 %vm954_vm9, %v1339_v25 }
 0x629   :  { %v8275_v31 = vpop.eup %8274  ;;  %2043 = vrot.lane.b32.xlu1 %v8909_v35, %s8463_s21  ;;  %7951 = vmatprep.subr.mxu1 %v8455_v6 }
 0x62a   :  { %v1172_v36 = vmul.f32 %v8275_v31, %v9050_v1 }
 0x62b   :  { %v1327_v38 = vpop.permute.xlu0 %1326 }
 0x62c   :  { %7873 = vmatmul.mubr.msk.f32.gmra.mxu1 %vm1097_vm12, %v1172_v36 }
 0x62d   :  { %v8277_v39 = vpop.eup %8276  ;;  %2039 = vrot.lane.b32.xlu1 %v8919_v37, %s8463_s21  ;;  %7875 = vmatprep.mubr.msk.f32.mxu1 %vm8456_vm1, %v8455_v6 }
 0x62e   :  { %v1173_v41 = vmul.f32 %v8277_v39, %v9054_v4 }
 0x62f   :  { %v1329_v35 = vpop.permute.xlu0 %1328 }
 0x630   :  { %7876 = vmatmul.mubr.msk.f32.gmra.mxu1 %vm1097_vm12, %v1173_v41 }
 0x631   :  { %2033 = vrot.lane.b32.xlu1 %v8931_v40, %s8463_s21  ;;  %7878 = vmatprep.mubr.msk.f32.mxu1 %vm8456_vm1, %v8455_v6 }
 0x633   :  { %v1331_v22 = vpop.permute.xlu0 %1330 }
 0x637   :  { %v1333_v44 = vpop.permute.xlu0 %1332 }
 0x63b   :  { %v1335_v48 = vpop.permute.xlu0 %1334 }
 0x63f   :  { %v1337_v51 = vpop.permute.xlu0 %1336 }
 0x643   :  { %v1778_v53 = vpop.permute.xlu0 %1777 }
 0x647   :  { %v1780_v60 = vpop.permute.xlu0 %1779 }
 0x64b   :  { %v1782_v26 = vpop.permute.xlu0 %1781 }
 0x64f   :  { %v1784_v5 = vpop.permute.xlu0 %1783 }
 0x650   :  { %v1160_v37 = vpop.xlane.xlu1 %1159 }
 0x651   :  { %8278 = vrcp.f32 %v1160_v37 }
 0x653   :  { %v1786_v63 = vpop.permute.xlu0 %1785 }
 0x654   :  { %v1804_v56 = vpop.permute.xlu1 %1803 }
 0x657   :  { %v1788_v61 = vpop.permute.xlu0 %1787 }
 0x658   :  { %v1802_v62 = vpop.permute.xlu1 %1801 }
 0x65b   :  { %v1790_v13 = vpop.permute.xlu0 %1789 }
 0x65c   :  { %v1800_v1 = vpop.permute.xlu1 %1799 }
 0x65e   :  { %v8279_v0 = vpop.eup %8278 }
 0x65f   :  { %v1174_v4 = vmul.f32 %v8279_v0, %v9072_v50  ;;  %v2231_v19 = vpop.permute.xlu0 %2230 }
 0x660   :  { %v1798_v40 = vpop.permute.xlu1 %1797 }
 0x661   :  { %7879 = vmatmul.mubr.msk.f32.gmra.mxu1 %vm1097_vm12, %v1174_v4 }
 0x662   :  { %7895 = vmatprep.mubr.msk.f32.mxu1 %vm8456_vm1, %v8455_v6 }
 0x663   :  { %v2235_v24 = vpop.permute.xlu0 %2234 }
 0x664   :  { %v1796_v55 = vpop.permute.xlu1 %1795 }
 0x665   :  { %7896 = vmatmul.mubr.msk.f32.vlgmr.msra.gmra.mxu1 %vm954_vm9, %v1325_v29 }
 0x666   :  { %7952 = vmatpush3.xpose.msk.msra.mxu1 %vm954_vm9, %v1804_v56  ;;  %7898 = vmatprep.mubr.msk.f32.mxu1 %vm8456_vm1, %v8455_v6 }
 0x667   :  { %7953 = vmatprep.subr.mxu1 %v8455_v6  ;;  %v2239_v34 = vpop.permute.xlu0 %2238 }
 0x668   :  { %v1794_v7 = vpop.permute.xlu1 %1793 }
 0x669   :  { %7899 = vmatmul.mubr.msk.f32.gmra.mxu1 %vm954_vm9, %v1327_v38 }
 0x66a   :  { %7954 = vmatpush3.xpose.msk.msra.mxu1 %vm954_vm9, %v1802_v62  ;;  %7901 = vmatprep.mubr.msk.f32.mxu1 %vm8456_vm1, %v8455_v6 }
 0x66b   :  { %7955 = vmatprep.subr.mxu1 %v8455_v6  ;;  %v2243_v43 = vpop.permute.xlu0 %2242 }
 0x66c   :  { %v1792_v50 = vpop.permute.xlu1 %1791 }
 0x66d   :  { %7902 = vmatmul.mubr.msk.f32.gmra.mxu1 %vm954_vm9, %v1329_v35 }
 0x66e   :  { %7956 = vmatpush3.xpose.msk.msra.mxu1 %vm954_vm9, %v1800_v1  ;;  %7904 = vmatprep.mubr.msk.f32.mxu1 %vm8456_vm1, %v8455_v6 }
 0x66f   :  { %7957 = vmatprep.subr.mxu1 %v8455_v6  ;;  %v1589_v33 = vpop.permute.xlu0 %1588 }
 0x670   :  { %v2257_v59 = vpop.permute.xlu1 %2256 }
 0x671   :  { %7905 = vmatmul.mubr.msk.f32.gmra.mxu1 %vm954_vm9, %v1331_v22 }
 0x672   :  { %7958 = vmatpush3.xpose.msk.msra.mxu1 %vm954_vm9, %v1798_v40  ;;  %7907 = vmatprep.mubr.msk.f32.mxu1 %vm8456_vm1, %v8455_v6 }
 0x673   :  { %7959 = vmatprep.subr.mxu1 %v8455_v6  ;;  %v1585_v47 = vpop.permute.xlu0 %1584 }
 0x674   :  { %v2255_v14 = vpop.permute.xlu1 %2254 }
 0x675   :  { %7908 = vmatmul.mubr.msk.f32.gmra.mxu1 %vm954_vm9, %v1333_v44 }
 0x676   :  { %7960 = vmatpush3.xpose.msk.msra.mxu1 %vm954_vm9, %v1796_v55  ;;  %7910 = vmatprep.mubr.msk.f32.mxu1 %vm8456_vm1, %v8455_v6 }
 0x677   :  { %7961 = vmatprep.subr.mxu1 %v8455_v6  ;;  %v1583_v21 = vpop.permute.xlu0 %1582 }
 0x678   :  { %v2253_v17 = vpop.permute.xlu1 %2252 }
 0x679   :  { %7911 = vmatmul.mubr.msk.f32.gmra.mxu1 %vm954_vm9, %v1335_v48 }
 0x67a   :  { %7962 = vmatpush3.xpose.msk.msra.mxu1 %vm954_vm9, %v1794_v7  ;;  %7913 = vmatprep.mubr.msk.f32.mxu1 %vm8456_vm1, %v8455_v6 }
 0x67b   :  { %7963 = vmatprep.subr.mxu1 %v8455_v6  ;;  %v1579_v29 = vpop.permute.xlu0 %1578 }
 0x67c   :  { %v2251_v15 = vpop.permute.xlu1 %2250 }
 0x67d   :  { %7914 = vmatmul.mubr.msk.f32.gmra.mxu1 %vm954_vm9, %v1337_v51 }
 0x67e   :  { %7964 = vmatpush3.xpose.msk.msra.mxu1 %vm954_vm9, %v1792_v50  ;;  %7965 = vmatprep.mubr.msk.f32.mxu1 %vm8456_vm1, %v8455_v6 }
 0x67f   :  { %8021 = vmatprep.subr.mxu1 %v8455_v6 }
 0x680   :  { %v2249_v30 = vpop.permute.xlu1 %2248 }
 0x681   :  { %7966 = vmatmul.mubr.msk.f32.vlgmr.msra.gmra.mxu1 %vm954_vm9, %v1778_v53 }
 0x682   :  { %8022 = vmatpush3.xpose.msk.msra.mxu1 %vm954_vm9, %v2257_v59  ;;  %7968 = vmatprep.mubr.msk.f32.mxu1 %vm8456_vm1, %v8455_v6 }
 0x683   :  { %8023 = vmatprep.subr.mxu1 %v8455_v6 }
 0x684   :  { %v2247_v32 = vpop.permute.xlu1 %2246 }
 0x685   :  { %7969 = vmatmul.mubr.msk.f32.gmra.mxu1 %vm954_vm9, %v1780_v60 }
 0x686   :  { %8024 = vmatpush3.xpose.msk.msra.mxu1 %vm954_vm9, %v2255_v14  ;;  %7971 = vmatprep.mubr.msk.f32.mxu1 %vm8456_vm1, %v8455_v6 }
 0x687   :  { %8025 = vmatprep.subr.mxu1 %v8455_v6 }
 0x688   :  { %v2245_v42 = vpop.permute.xlu1 %2244 }
 0x689   :  { %7972 = vmatmul.mubr.msk.f32.gmra.mxu1 %vm954_vm9, %v1782_v26 }
 0x68a   :  { %8026 = vmatpush3.xpose.msk.msra.mxu1 %vm954_vm9, %v2253_v17  ;;  %7974 = vmatprep.mubr.msk.f32.mxu1 %vm8456_vm1, %v8455_v6 }
 0x68b   :  { %8027 = vmatprep.subr.mxu1 %v8455_v6 }
 0x68c   :  { %v2233_v45 = vpop.permute.xlu1 %2232 }
 0x68d   :  { %7975 = vmatmul.mubr.msk.f32.gmra.mxu1 %vm954_vm9, %v1784_v5 }
 0x68e   :  { %8028 = vmatpush3.xpose.msk.msra.mxu1 %vm954_vm9, %v2251_v15  ;;  %7977 = vmatprep.mubr.msk.f32.mxu1 %vm8456_vm1, %v8455_v6 }
 0x68f   :  { %8029 = vmatprep.subr.mxu1 %v8455_v6 }
 0x690   :  { %v2237_v27 = vpop.permute.xlu1 %2236 }
 0x691   :  { %7978 = vmatmul.mubr.msk.f32.gmra.mxu1 %vm954_vm9, %v1786_v63 }
 0x692   :  { %8030 = vmatpush3.xpose.msk.msra.mxu1 %vm954_vm9, %v2249_v30  ;;  %7980 = vmatprep.mubr.msk.f32.mxu1 %vm8456_vm1, %v8455_v6 }
 0x693   :  { %8031 = vmatprep.subr.mxu1 %v8455_v6 }
 0x694   :  { %v2241_v10 = vpop.permute.xlu1 %2240 }
 0x695   :  { %7981 = vmatmul.mubr.msk.f32.gmra.mxu1 %vm954_vm9, %v1788_v61 }
 0x696   :  { %8032 = vmatpush3.xpose.msk.msra.mxu1 %vm954_vm9, %v2247_v32  ;;  %7983 = vmatprep.mubr.msk.f32.mxu1 %vm8456_vm1, %v8455_v6 }
 0x697   :  { %8033 = vmatprep.subr.mxu1 %v8455_v6 }
 0x698   :  { %v1591_v23 = vpop.permute.xlu1 %1590 }
 0x699   :  { %7917 = vmatpush3.msra.mxu0 %v1591_v23  ;;  %7984 = vmatmul.mubr.msk.f32.gmra.mxu1 %vm954_vm9, %v1790_v13 }
 0x69a   :  { %8034 = vmatpush3.xpose.msk.msra.mxu1 %vm954_vm9, %v2245_v42  ;;  %7918 = vmatprep.subr.mxu0 %v8455_v6 }
 0x69b   :  { %7919 = vmatpush3.msra.mxu0 %v1589_v33  ;;  %8035 = vmatprep.mubr.msk.f32.mxu1 %vm8456_vm1, %v8455_v6 }
 0x69c   :  { %v1587_v16 = vpop.permute.xlu1 %1586  ;;  %7920 = vmatprep.subr.mxu0 %v8455_v6  ;;  %8091 = vmatprep.subr.mxu1 %v8455_v6 }
 0x69d   :  { %7921 = vmatpush3.msra.mxu0 %v1587_v16  ;;  %8036 = vmatmul.mubr.msk.f32.vlgmr.msra.gmra.mxu1 %vm954_vm9, %v2231_v19 }
 0x69e   :  { %7922 = vmatprep.subr.mxu0 %v8455_v6  ;;  %8038 = vmatprep.mubr.msk.f32.mxu1 %vm8456_vm1, %v8455_v6 }
 0x69f   :  { %7923 = vmatpush3.msra.mxu0 %v1585_v47 }
 0x6a0   :  { %7924 = vmatprep.subr.mxu0 %v8455_v6  ;;  %v1581_v25 = vpop.permute.xlu1 %1580 }
 0x6a1   :  { %7925 = vmatpush3.msra.mxu0 %v1583_v21  ;;  %8039 = vmatmul.mubr.msk.f32.gmra.mxu1 %vm954_vm9, %v2233_v45  ;;  %v2222_v45 = vld [vmem:[#allocation4 + $0x68] sm:$0xff] }
 0x6a2   :  { %7926 = vmatprep.subr.mxu0 %v8455_v6  ;;  %8041 = vmatprep.mubr.msk.f32.mxu1 %vm8456_vm1, %v8455_v6 }
 0x6a3   :  { %7927 = vmatpush3.msra.mxu0 %v1581_v25 }
 0x6a4   :  { %7928 = vmatprep.subr.mxu0 %v8455_v6 }
 0x6a5   :  { %7929 = vmatpush3.msra.mxu0 %v1579_v29  ;;  %8042 = vmatmul.mubr.msk.f32.gmra.mxu1 %vm954_vm9, %v2235_v24 }
 0x6a6   :  { %8044 = vmatprep.mubr.msk.f32.mxu1 %vm8456_vm1, %v8455_v6  ;;  %7986 = vmatprep.subr.mxu0 %v8455_v6 }
 0x6a9   :  { %8045 = vmatmul.mubr.msk.f32.gmra.mxu1 %vm954_vm9, %v2237_v27 }
 0x6aa   :  { %8047 = vmatprep.mubr.msk.f32.mxu1 %vm8456_vm1, %v8455_v6 }
 0x6ad   :  { %8048 = vmatmul.mubr.msk.f32.gmra.mxu1 %vm954_vm9, %v2239_v34 }
 0x6ae   :  { %8050 = vmatprep.mubr.msk.f32.mxu1 %vm8456_vm1, %v8455_v6 }
 0x6af   :  { %v1262_v31 = vpop.f32.mrf.mxu1 }
 0x6b0   :  { %1296 = vst.msk [vmem:[#allocation5] sm:$0xff] %vm954_vm9, %v1262_v31 }
 0x6b1   :  { %v7862_v36 = vpop.f32.mrf.mxu1  ;;  %8051 = vmatmul.mubr.msk.f32.gmra.mxu1 %vm954_vm9, %v2241_v10 }
 0x6b2   :  { %8053 = vmatprep.mubr.msk.f32.mxu1 %vm8456_vm1, %v8455_v6 }
 0x6b3   :  { %v1267_v38 = vpop.f32.mrf.mxu1 }
 0x6b4   :  { %1297 = vst.msk [vmem:[#allocation5 + $0x8] sm:$0xff] %vm954_vm9, %v1267_v38 }
 0x6b5   :  { %v7865_v39 = vpop.f32.mrf.mxu1  ;;  %8054 = vmatmul.mubr.msk.f32.gmra.mxu1 %vm954_vm9, %v2243_v43 }
 0x6b6   :  { %8107 = vmatprep.mubr.msk.f32.mxu1 %vm8456_vm1, %v8455_v6 }
 0x6b7   :  { %v1272_v41 = vpop.f32.mrf.mxu1 }
 0x6b8   :  { %1298 = vst.msk [vmem:[#allocation5 + $0x10] sm:$0xff] %vm954_vm9, %v1272_v41 }
 0x6b9   :  { %v7868_v35 = vpop.f32.mrf.mxu1 }
 0x6bb   :  { %v1277_v22 = vpop.f32.mrf.mxu1 }
 0x6bc   :  { %1299 = vst.msk [vmem:[#allocation5 + $0x18] sm:$0xff] %vm954_vm9, %v1277_v22 }
 0x6bd   :  { %v7871_v44 = vpop.f32.mrf.mxu1 }
 0x6ec   :  { %v1282_v48 = vpop.f32.mrf.mxu1 }
 0x6ed   :  { %1300 = vst.msk [vmem:[#allocation5 + $0x20] sm:$0xff] %vm954_vm9, %v1282_v48 }
 0x6ee   :  { %v7874_v51 = vpop.f32.mrf.mxu1 }
 0x6f0   :  { %v1287_v53 = vpop.f32.mrf.mxu1 }
 0x6f1   :  { %1301 = vst.msk [vmem:[#allocation5 + $0x28] sm:$0xff] %vm954_vm9, %v1287_v53 }
 0x6f2   :  { %v7877_v37 = vpop.f32.mrf.mxu1 }
 0x721   :  { %v1292_v56 = vpop.f32.mrf.mxu1 }
 0x722   :  { %1302 = vst.msk [vmem:[#allocation5 + $0x30] sm:$0xff] %vm954_vm9, %v1292_v56 }
 0x723   :  { %v7880_v60 = vpop.f32.mrf.mxu1 }
 0x725   :  { %v1446_v62 = vpop.f32.mrf.mxu1 }
 0x726   :  { %v1480_v26 = vmul.f32 0.25, %v1446_v62 }
 0x727   :  { %v7897_v1 = vpop.f32.mrf.mxu1 }
 0x728   :  { %v9314_v0 = vadd.f32 %v1480_v26, %v8988_v52 }
 0x729   :  { %v1451_v4 = vpop.f32.mrf.mxu1 }
 0x72a   :  { %v1481_v40 = vmul.f32 0.25, %v1451_v4  ;;  %v1494_v5 = vsel %vm1097_vm12, %v9314_v0, -inf }
 0x72b   :  { %1495 = vmax.xlane.f32.xlu1 %v1494_v5  ;;  %v7900_v55 = vpop.f32.mrf.mxu1 }
 0x72c   :  { %v9319_v63 = vadd.f32 %v1481_v40, %v8994_v2 }
 0x72d   :  { %v1456_v7 = vpop.f32.mrf.mxu1 }
 0x72e   :  { %v1482_v50 = vmul.f32 0.25, %v1456_v7  ;;  %v1497_v61 = vsel %vm1097_vm12, %v9319_v63, -inf }
 0x72f   :  { %1498 = vmax.xlane.f32.xlu0 %v1497_v61  ;;  %v7903_v59 = vpop.f32.mrf.mxu1 }
 0x730   :  { %v9324_v13 = vadd.f32 %v1482_v50, %v9000_v12 }
 0x731   :  { %v1461_v14 = vpop.f32.mrf.mxu1 }
 0x732   :  { %v1500_v17 = vsel %vm1097_vm12, %v9324_v13, -inf  ;;  %v1483_v62 = vmul.f32 0.25, %v1461_v14 }
 0x733   :  { %1501 = vmax.xlane.f32.xlu0 %v1500_v17  ;;  %v7906_v19 = vpop.f32.mrf.mxu1 }
 0x734   :  { %v9355_v5 = vadd.f32 %v1483_v62, %v9005_v28 }
 0x735   :  { %v1466_v15 = vpop.f32.mrf.mxu1 }
 0x736   :  { %v1484_v24 = vmul.f32 0.25, %v1466_v15  ;;  %v1503_v19 = vsel %vm1097_vm12, %v9355_v5, -inf }
 0x737   :  { %v7909_v30 = vpop.f32.mrf.mxu1 }
 0x738   :  { %v9329_v32 = vadd.f32 %v1484_v24, %v9010_v46 }
 0x739   :  { %v1471_v34 = vpop.f32.mrf.mxu1 }
 0x73a   :  { %v1506_v42 = vsel %vm1097_vm12, %v9329_v32, -inf  ;;  %v1485_v55 = vmul.f32 0.25, %v1471_v34 }
 0x73b   :  { %1507 = vmax.xlane.f32.xlu0 %v1506_v42  ;;  %v7912_v43 = vpop.f32.mrf.mxu1 }
 0x73c   :  { %2496 = vrot.lane.b32.xlu1 %v2222_v45, %s8465_s23  ;;  %v9358_v59 = vadd.f32 %v1485_v55, %v9014_v58 }
 0x73d   :  { %v1476_v27 = vpop.f32.mrf.mxu1 }
 0x73e   :  { %v1486_v33 = vmul.f32 0.25, %v1476_v27  ;;  %v1509_v45 = vsel %vm1097_vm12, %v9358_v59, -inf }
 0x73f   :  { %v7915_v10 = vpop.f32.mrf.mxu1 }
 0x740   :  { %v9335_v47 = vadd.f32 %v1486_v33, %v9018_v3 }
 0x741   :  { %v1899_v23 = vpop.f32.mrf.mxu1 }
 0x742   :  { %v1512_v16 = vsel %vm1097_vm12, %v9335_v47, -inf  ;;  %v1933_v14 = vmul.f32 0.25, %v1899_v23 }
 0x743   :  { %1513 = vmax.xlane.f32.xlu0 %v1512_v16  ;;  %v7967_v21 = vpop.f32.mrf.mxu1 }
 0x744   :  { %v9368_v34 = vadd.f32 %v1933_v14, %v8988_v52 }
 0x745   :  { %v1904_v25 = vpop.f32.mrf.mxu1 }
 0x746   :  { %v1934_v29 = vmul.f32 0.25, %v1904_v25  ;;  %v1947_v21 = vsel %vm1097_vm12, %v9368_v34, -inf }
 0x747   :  { %v7970_v31 = vpop.f32.mrf.mxu1 }
 0x748   :  { %v9340_v36 = vadd.f32 %v1934_v29, %v8994_v2 }
 0x749   :  { %v1909_v38 = vpop.f32.mrf.mxu1 }
 0x74a   :  { %v1950_v39 = vsel %vm1097_vm12, %v9340_v36, -inf  ;;  %v1935_v42 = vmul.f32 0.25, %v1909_v38 }
 0x74b   :  { %1951 = vmax.xlane.f32.xlu0 %v1950_v39  ;;  %v7973_v41 = vpop.f32.mrf.mxu1 }
 0x74c   :  { %v9373_v10 = vadd.f32 %v1935_v42, %v9000_v12  ;;  %v9423_v42 = vpop.permute.xlu1 %2043 }
 0x74d   :  { %v1914_v35 = vpop.f32.mrf.mxu1 }
 0x74e   :  { %v1936_v22 = vmul.f32 0.25, %v1914_v35  ;;  %v1953_v41 = vsel %vm1097_vm12, %v9373_v10, -inf }
 0x74f   :  { %v7976_v44 = vpop.f32.mrf.mxu1 }
 0x750   :  { %v9345_v48 = vadd.f32 %v1936_v22, %v9005_v28 }
 0x751   :  { %v1919_v51 = vpop.f32.mrf.mxu1 }
 0x752   :  { %v1956_v53 = vsel %vm1097_vm12, %v9345_v48, -inf  ;;  %v1937_v23 = vmul.f32 0.25, %v1919_v51 }
 0x753   :  { %1957 = vmax.xlane.f32.xlu0 %v1956_v53  ;;  %v7979_v37 = vpop.f32.mrf.mxu1 }
 0x754   :  { %v9383_v31 = vadd.f32 %v1937_v23, %v9010_v46 }
 0x755   :  { %v1924_v56 = vpop.f32.mrf.mxu1 }
 0x756   :  { %v1938_v60 = vmul.f32 0.25, %v1924_v56  ;;  %v1959_v53 = vsel %vm1097_vm12, %v9383_v31, -inf }
 0x757   :  { %v7982_v26 = vpop.f32.mrf.mxu1 }
 0x758   :  { %v9350_v1 = vadd.f32 %v1938_v60, %v9014_v58 }
 0x759   :  { %v1929_v4 = vpop.f32.mrf.mxu1 }
 0x75a   :  { %v1962_v40 = vsel %vm1097_vm12, %v9350_v1, -inf  ;;  %v1939_v38 = vmul.f32 0.25, %v1929_v4 }
 0x75b   :  { %1963 = vmax.xlane.f32.xlu0 %v1962_v40  ;;  %v7985_v7 = vpop.f32.mrf.mxu1 }
 0x75d   :  { %v2352_v50 = vpop.f32.mrf.mxu1 }
 0x75e   :  { %v2386_v61 = vmul.f32 0.25, %v2352_v50 }
 0x75f   :  { %v8037_v17 = vpop.f32.mrf.mxu1 }
 0x760   :  { %v9363_v15 = vadd.f32 %v2386_v61, %v8988_v52  ;;  %1504 = vmax.xlane.f32.xlu1 %v1503_v19 }
 0x761   :  { %v2357_v24 = vpop.f32.mrf.mxu1 }
 0x762   :  { %v2400_v30 = vsel %vm1097_vm12, %v9363_v15, -inf  ;;  %v2387_v44 = vmul.f32 0.25, %v2357_v24 }
 0x763   :  { %2401 = vmax.xlane.f32.xlu0 %v2400_v30  ;;  %v8040_v43 = vpop.f32.mrf.mxu1  ;;  %v9419_v30 = vpop.permute.xlu0 %2041 }
 0x764   :  { %1510 = vmax.xlane.f32.xlu1 %v1509_v45  ;;  %v9398_v62 = vadd.f32 %v2387_v44, %v8994_v2  ;;  %v9427_v45 = vpop.permute.xlu1 %2039 }
 0x765   :  { %v2362_v27 = vpop.f32.mrf.mxu1 }
 0x766   :  { %v2388_v33 = vmul.f32 0.25, %v2362_v27  ;;  %v2403_v14 = vsel %vm1097_vm12, %v9398_v62, -inf }
 0x767   :  { %v8043_v16 = vpop.f32.mrf.mxu1 }
 0x768   :  { %v9378_v52 = vadd.f32 %v2388_v33, %v9000_v12  ;;  %1948 = vmax.xlane.f32.xlu1 %v1947_v21  ;;  %v9388_v12 = vadd.f32 %v1939_v38, %v9018_v3  ;;  %v9431_v27 = vpop.permute.xlu1 %2033 }
 0x769   :  { %v2367_v25 = vpop.f32.mrf.mxu1 }
 0x76a   :  { %v2406_v29 = vsel %vm1097_vm12, %v9378_v52, -inf  ;;  %v2389_v26 = vmul.f32 0.25, %v2367_v25  ;;  %v1965_v40 = vsel %vm1097_vm12, %v9388_v12, -inf }
 0x76b   :  { %2407 = vmax.xlane.f32.xlu0 %v2406_v29  ;;  %v8046_v39 = vpop.f32.mrf.mxu1 }
 0x76c   :  { %1954 = vmax.xlane.f32.xlu1 %v1953_v41 }
 0x76d   :  { %v2372_v35 = vpop.f32.mrf.mxu1 }
 0x76e   :  { %v2390_v22 = vmul.f32 0.25, %v2372_v35 }
 0x76f   :  { %v8049_v51 = vpop.f32.mrf.mxu1 }
 0x770   :  { %v9393_v37 = vadd.f32 %v2390_v22, %v9010_v46  ;;  %1960 = vmax.xlane.f32.xlu1 %v1959_v53  ;;  %v9403_v46 = vadd.f32 %v2389_v26, %v9005_v28 }
 0x771   :  { %v2377_v56 = vpop.f32.mrf.mxu1 }
 0x772   :  { %v2412_v60 = vsel %vm1097_vm12, %v9393_v37, -inf  ;;  %v2391_v50 = vmul.f32 0.25, %v2377_v56  ;;  %v2409_v28 = vsel %vm1097_vm12, %v9403_v46, -inf  ;;  %v2219_v56 = vld [vmem:[#allocation4 + $0x38] sm:$0xff] }
 0x773   :  { %2413 = vmax.xlane.f32.xlu0 %v2412_v60  ;;  %v8052_v4 = vpop.f32.mrf.mxu1 }
 0x774   :  { %1966 = vmax.xlane.f32.xlu1 %v1965_v40  ;;  %v9413_v19 = vadd.f32 %v2391_v50, %v9014_v58 }
 0x775   :  { %v2382_v55 = vpop.f32.mrf.mxu1 }
 0x776   :  { %v2392_v7 = vmul.f32 0.25, %v2382_v55  ;;  %v2415_v24 = vsel %vm1097_vm12, %v9413_v19, -inf }
 0x777   :  { %v8055_v61 = vpop.f32.mrf.mxu1 }
 0x778   :  { %v9408_v2 = vadd.f32 %v2392_v7, %v9018_v3  ;;  %2404 = vmax.xlane.f32.xlu1 %v2403_v14  ;;  %v9421_v3 = vpop.permute.xlu0 %2037 }
 0x77a   :  { %v2418_v17 = vsel %vm1097_vm12, %v9408_v2, -inf }
 0x77b   :  { %2419 = vmax.xlane.f32.xlu0 %v2418_v17 }
 0x77c   :  { %2410 = vmax.xlane.f32.xlu1 %v2409_v28  ;;  %v9425_v43 = vpop.permute.xlu0 %2035 }
 0x780   :  { %2416 = vmax.xlane.f32.xlu1 %v2415_v24  ;;  %v9429_v58 = vpop.permute.xlu0 %2031 }
 0x784   :  { %v9433_v33 = vpop.permute.xlu0 %2494 }
 0x7b4   :  { %v1496_v23 = vpop.xlane.xlu1 %1495 }
 0x7b5   :  { %v1515_v16 = vsub.f32 %v9314_v0, %v1496_v23 }
 0x7b7   :  { %v1522_v21 = vmul.f32 1.442695, %v1515_v16 }
 0x7b8   :  { %v1499_v25 = vpop.xlane.xlu0 %1498  ;;  %v9452_v60 = vpop.permute.xlu1 %2496 }
 0x7b9   :  { %8280 = vpow2.f32 %v1522_v21  ;;  %v1516_v29 = vsub.f32 %v9319_v63, %v1499_v25 }
 0x7bb   :  { %v1524_v38 = vmul.f32 1.442695, %v1516_v29 }
 0x7bc   :  { %v1502_v39 = vpop.xlane.xlu0 %1501 }
 0x7bd   :  { %8282 = vpow2.f32 %v1524_v38  ;;  %v1517_v41 = vsub.f32 %v9324_v13, %v1502_v39  ;;  %v2220_v13 = vld [vmem:[#allocation4 + $0x48] sm:$0xff] }
 0x7bf   :  { %v1526_v35 = vmul.f32 1.442695, %v1517_v41 }
 0x7c1   :  { %8284 = vpow2.f32 %v1526_v35 }
 0x7c4   :  { %v1508_v26 = vpop.xlane.xlu0 %1507 }
 0x7c5   :  { %v1519_v55 = vsub.f32 %v9329_v32, %v1508_v26 }
 0x7c6   :  { %v9438_v22 = vpop.eup %8280 }
 0x7c7   :  { %v1536_v44 = vsel %vm1097_vm12, %v9438_v22, 0.0  ;;  %v1530_v17 = vmul.f32 1.442695, %v1519_v55 }
 0x7c8   :  { %1537 = vadd.xlane.f32.xlu1 %v1536_v44 }
 0x7ca   :  { %v9442_v51 = vpop.eup %8282 }
 0x7cb   :  { %v1539_v0 = vsel %vm1097_vm12, %v9442_v51, 0.0 }
 0x7cc   :  { %1540 = vadd.xlane.f32.xlu0 %v1539_v0  ;;  %v1514_v7 = vpop.xlane.xlu0 %1513 }
 0x7cd   :  { %v1521_v28 = vsub.f32 %v9335_v47, %v1514_v7 }
 0x7ce   :  { %v9446_v63 = vpop.eup %8284 }
 0x7cf   :  { %v1542_v53 = vsel %vm1097_vm12, %v9446_v63, 0.0  ;;  %v1534_v25 = vmul.f32 1.442695, %v1521_v28 }
 0x7d0   :  { %1543 = vadd.xlane.f32.xlu1 %v1542_v53 }
 0x7d4   :  { %v9458_v23 = vpop.xlane.xlu0 %1951 }
 0x7dc   :  { %v1958_v32 = vpop.xlane.xlu0 %1957 }
 0x7e1   :  { %2492 = vrot.lane.b32.xlu1 %v2220_v13, %s8465_s23 }
 0x7e2   :  { %2490 = vrot.lane.b32.xlu0 %v2219_v56, %s8465_s23 }
 0x7e4   :  { %v1964_v39 = vpop.xlane.xlu0 %1963 }
 0x7e5   :  { %v1973_v44 = vsub.f32 %v9350_v1, %v1964_v39 }
 0x7e9   :  { %v1505_v4 = vpop.xlane.xlu1 %1504 }
 0x7ea   :  { %v1518_v40 = vsub.f32 %v9355_v5, %v1505_v4 }
 0x7ec   :  { %v1528_v50 = vmul.f32 1.442695, %v1518_v40  ;;  %v2402_v0 = vpop.xlane.xlu0 %2401 }
 0x7ed   :  { %v1511_v61 = vpop.xlane.xlu1 %1510 }
 0x7ee   :  { %v1520_v14 = vsub.f32 %v9358_v59, %v1511_v61  ;;  %8286 = vpow2.f32 %v1528_v50  ;;  %v1971_v59 = vsub.f32 %v9345_v48, %v1958_v32  ;;  %v2421_v48 = vsub.f32 %v9363_v15, %v2402_v0 }
 0x7ef   :  { %8288 = vpow2.f32 %v1530_v17 }
 0x7f0   :  { %v1532_v24 = vmul.f32 1.442695, %v1520_v14  ;;  %v1981_v35 = vmul.f32 1.442695, %v1971_v59  ;;  %v2428_v7 = vmul.f32 1.442695, %v2421_v48 }
 0x7f1   :  { %v1949_v16 = vpop.xlane.xlu1 %1948 }
 0x7f2   :  { %v1968_v21 = vsub.f32 %v9368_v34, %v1949_v16  ;;  %8290 = vpow2.f32 %v1532_v24 }
 0x7f3   :  { %8292 = vpow2.f32 %v1534_v25 }
 0x7f4   :  { %v1975_v5 = vmul.f32 1.442695, %v1968_v21  ;;  %v2408_v4 = vpop.xlane.xlu0 %2407 }
 0x7f5   :  { %v1955_v29 = vpop.xlane.xlu1 %1954  ;;  %v2423_v50 = vsub.f32 %v9378_v52, %v2408_v4 }
 0x7f6   :  { %v1970_v38 = vsub.f32 %v9373_v10, %v1955_v29  ;;  %8294 = vpow2.f32 %v1975_v5  ;;  %v1985_v10 = vmul.f32 1.442695, %v1973_v44 }
 0x7f7   :  { %v2432_v28 = vmul.f32 1.442695, %v2423_v50 }
 0x7f8   :  { %v1979_v47 = vmul.f32 1.442695, %v1970_v38 }
 0x7f9   :  { %v9463_v41 = vpop.xlane.xlu1 %1960 }
 0x7fa   :  { %8296 = vpow2.f32 %v1979_v47  ;;  %v1972_v50 = vsub.f32 %v9383_v31, %v9463_v41 }
 0x7fb   :  { %v9466_v34 = vpop.eup %8286  ;;  %8298 = vpow2.f32 %v1981_v35 }
 0x7fc   :  { %v9470_v13 = vpop.eup %8288  ;;  %v1545_v56 = vsel %vm1097_vm12, %v9466_v34, 0.0  ;;  %8300 = vpow2.f32 %v1985_v10  ;;  %v2218_v10 = vld [vmem:[#allocation4 + $0x28] sm:$0xff] }
 0x7fd   :  { %v9468_v53 = vpop.xlane.xlu1 %1966  ;;  %v1548_v1 = vsel %vm1097_vm12, %v9470_v13, 0.0  ;;  %8302 = vpow2.f32 %v2428_v7 }
 0x7fe   :  { %8304 = vpow2.f32 %v2432_v28 }
 0x7ff   :  { %v9475_v26 = vpop.eup %8290 }
 0x800   :  { %v9479_v55 = vpop.eup %8292  ;;  %v1551_v15 = vsel %vm1097_vm12, %v9475_v26, 0.0 }
 0x801   :  { %v2405_v40 = vpop.xlane.xlu1 %2404  ;;  %1546 = vadd.xlane.f32.xlu0 %v1545_v56  ;;  %v1554_v17 = vsel %vm1097_vm12, %v9479_v55, 0.0 }
 0x802   :  { %v2422_v28 = vsub.f32 %v9398_v62, %v2405_v40 }
 0x803   :  { %v9484_v61 = vpop.eup %8294 }
 0x804   :  { %v1989_v16 = vsel %vm1097_vm12, %v9484_v61, 0.0 }
 0x805   :  { %v2411_v14 = vpop.xlane.xlu1 %2410  ;;  %1552 = vadd.xlane.f32.xlu1 %v1551_v15  ;;  %1549 = vadd.xlane.f32.xlu0 %v1548_v1  ;;  %v1969_v1 = vsub.f32 %v9340_v36, %v9458_v23  ;;  %v1983_v15 = vmul.f32 1.442695, %v1972_v50  ;;  %v2217_v36 = vld [vmem:[#allocation4 + $0x18] sm:$0xff] }
 0x806   :  { %v2424_v24 = vsub.f32 %v9403_v46, %v2411_v14  ;;  %v1974_v14 = vsub.f32 %v9388_v12, %v9468_v53 }
 0x807   :  { %v9491_v21 = vpop.eup %8296  ;;  %v1977_v7 = vmul.f32 1.442695, %v1969_v1 }
 0x808   :  { %v2434_v25 = vmul.f32 1.442695, %v2424_v24  ;;  %v1995_v32 = vsel %vm1097_vm12, %v9491_v21, 0.0  ;;  %v9496_v29 = vpop.eup %8298  ;;  %v2414_v24 = vpop.xlane.xlu0 %2413 }
 0x809   :  { %v2417_v52 = vpop.xlane.xlu1 %2416  ;;  %1990 = vadd.xlane.f32.xlu1 %v1989_v16  ;;  %1555 = vadd.xlane.f32.xlu0 %v1554_v17  ;;  %v1998_v38 = vsel %vm1097_vm12, %v9496_v29, 0.0  ;;  %v9500_v59 = vpop.eup %8300  ;;  %v1987_v17 = vmul.f32 1.442695, %v1974_v14  ;;  %v2425_v16 = vsub.f32 %v9393_v37, %v2414_v24 }
 0x80a   :  { %v2426_v5 = vsub.f32 %v9413_v19, %v2417_v52  ;;  %8306 = vpow2.f32 %v2434_v25  ;;  %v2004_v47 = vsel %vm1097_vm12, %v9500_v59, 0.0  ;;  %v9504_v39 = vpop.eup %8302  ;;  %v2430_v52 = vmul.f32 1.442695, %v2422_v28 }
 0x80b   :  { %v2442_v19 = vsel %vm1097_vm12, %v9504_v39, 0.0  ;;  %v9508_v35 = vpop.eup %8304  ;;  %v2436_v25 = vmul.f32 1.442695, %v2425_v16 }
 0x80c   :  { %v2438_v46 = vmul.f32 1.442695, %v2426_v5  ;;  %v2448_v44 = vsel %vm1097_vm12, %v9508_v35, 0.0  ;;  %v2420_v23 = vpop.xlane.xlu0 %2419 }
 0x80d   :  { %1996 = vadd.xlane.f32.xlu1 %v1995_v32  ;;  %v2427_v31 = vsub.f32 %v9408_v2, %v2420_v23 }
 0x80e   :  { %8308 = vpow2.f32 %v2438_v46 }
 0x80f   :  { %8310 = vpow2.f32 %v1977_v7  ;;  %v2440_v12 = vmul.f32 1.442695, %v2427_v31 }
 0x810   :  { %8312 = vpow2.f32 %v1983_v15 }
 0x811   :  { %1999 = vadd.xlane.f32.xlu1 %v1998_v38  ;;  %8314 = vpow2.f32 %v1987_v17 }
 0x812   :  { %8316 = vpow2.f32 %v2430_v52 }
 0x813   :  { %8318 = vpow2.f32 %v2436_v25 }
 0x814   :  { %8320 = vpow2.f32 %v2440_v12 }
 0x815   :  { %2005 = vadd.xlane.f32.xlu1 %v2004_v47 }
 0x817   :  { %v9512_v0 = vpop.eup %8306 }
 0x818   :  { %v2451_v48 = vsel %vm1097_vm12, %v9512_v0, 0.0 }
 0x819   :  { %2443 = vadd.xlane.f32.xlu1 %v2442_v19 }
 0x81b   :  { %v9517_v56 = vpop.eup %8308 }
 0x81c   :  { %v2457_v4 = vsel %vm1097_vm12, %v9517_v56, 0.0  ;;  %v9531_v41 = vpop.eup %8310 }
 0x81d   :  { %2449 = vadd.xlane.f32.xlu1 %v2448_v44  ;;  %v1992_v62 = vsel %vm1097_vm12, %v9531_v41, 0.0  ;;  %v9535_v53 = vpop.eup %8312 }
 0x81e   :  { %v2001_v37 = vsel %vm1097_vm12, %v9535_v53, 0.0  ;;  %v9539_v40 = vpop.eup %8314 }
 0x81f   :  { %2488 = vrot.lane.b32.xlu0 %v2218_v10, %s8465_s23  ;;  %v2007_v2 = vsel %vm1097_vm12, %v9539_v40, 0.0  ;;  %v9543_v5 = vpop.eup %8316 }
 0x820   :  { %v2445_v32 = vsel %vm1097_vm12, %v9543_v5, 0.0  ;;  %v9547_v46 = vpop.eup %8318 }
 0x821   :  { %2452 = vadd.xlane.f32.xlu1 %v2451_v48  ;;  %v2454_v38 = vsel %vm1097_vm12, %v9547_v46, 0.0  ;;  %v9551_v47 = vpop.eup %8320 }
 0x822   :  { %v2460_v44 = vsel %vm1097_vm12, %v9551_v47, 0.0 }
 0x825   :  { %2458 = vadd.xlane.f32.xlu1 %v2457_v4 }
 0x836   :  { %2486 = vrot.lane.b32.xlu1 %v2217_v36, %s8465_s23 }
 0x83e   :  { %1993 = vadd.xlane.f32.xlu0 %v1992_v62 }
 0x842   :  { %2002 = vadd.xlane.f32.xlu0 %v2001_v37 }
 0x846   :  { %2008 = vadd.xlane.f32.xlu0 %v2007_v2 }
 0x84a   :  { %2446 = vadd.xlane.f32.xlu0 %v2445_v32 }
 0x84e   :  { %2455 = vadd.xlane.f32.xlu0 %v2454_v38 }
 0x851   :  { %v1538_v19 = vpop.xlane.xlu1 %1537 }
 0x852   :  { %8322 = vrcp.f32 %v1538_v19  ;;  %2461 = vadd.xlane.f32.xlu0 %v2460_v44 }
 0x855   :  { %v1541_v10 = vpop.xlane.xlu0 %1540 }
 0x856   :  { %8324 = vrcp.f32 %v1541_v10 }
 0x859   :  { %v1544_v48 = vpop.xlane.xlu1 %1543 }
 0x85a   :  { %8326 = vrcp.f32 %v1544_v48 }
 0x85f   :  { %v8323_v4 = vpop.eup %8322 }
 0x860   :  { %v1564_v1 = vmul.f32 %v8323_v4, %v9438_v22  ;;  %v2216_v22 = vld [vmem:[#allocation4 + $0x8] sm:$0xff] }
 0x862   :  { %7931 = vmatmul.mubr.msk.f32.vlgmr.msra.gmra.mxu0 %vm1097_vm12, %v1564_v1 }
 0x863   :  { %v8325_v7 = vpop.eup %8324  ;;  %7987 = vmatpush3.msra.mxu0 %v9423_v42  ;;  %7933 = vmatprep.mubr.msk.f32.mxu0 %vm8456_vm1, %v8455_v6 }
 0x864   :  { %7988 = vmatprep.subr.mxu0 %v8455_v6  ;;  %v1565_v50 = vmul.f32 %v8325_v7, %v9442_v51 }
 0x865   :  { %7989 = vmatpush3.msra.mxu0 %v9419_v30  ;;  %v2491_v30 = vpop.permute.xlu0 %2490 }
 0x866   :  { %7990 = vmatprep.subr.mxu0 %v8455_v6  ;;  %7934 = vmatmul.mubr.msk.f32.gmra.mxu0 %vm1097_vm12, %v1565_v50 }
 0x867   :  { %v8327_v15 = vpop.eup %8326  ;;  %7991 = vmatpush3.msra.mxu0 %v9427_v45  ;;  %7936 = vmatprep.mubr.msk.f32.mxu0 %vm8456_vm1, %v8455_v6 }
 0x868   :  { %7992 = vmatprep.subr.mxu0 %v8455_v6  ;;  %2484 = vrot.lane.b32.xlu0 %v2216_v22, %s8465_s23  ;;  %v1566_v42 = vmul.f32 %v8327_v15, %v9446_v63 }
 0x869   :  { %7993 = vmatpush3.msra.mxu0 %v9421_v3  ;;  %v2493_v3 = vpop.permute.xlu1 %2492 }
 0x86a   :  { %7994 = vmatprep.subr.mxu0 %v8455_v6  ;;  %7937 = vmatmul.mubr.msk.f32.gmra.mxu0 %vm1097_vm12, %v1566_v42 }
 0x86b   :  { %7995 = vmatpush3.msra.mxu0 %v9425_v43  ;;  %7939 = vmatprep.mubr.msk.f32.mxu0 %vm8456_vm1, %v8455_v6 }
 0x86c   :  { %7996 = vmatprep.subr.mxu0 %v8455_v6 }
 0x86d   :  { %7997 = vmatpush3.msra.mxu0 %v9431_v27 }
 0x86e   :  { %7998 = vmatprep.subr.mxu0 %v8455_v6 }
 0x86f   :  { %7999 = vmatpush3.msra.mxu0 %v9429_v58 }
 0x870   :  { %8056 = vmatprep.subr.mxu0 %v8455_v6 }
 0x88a   :  { %v1547_v45 = vpop.xlane.xlu0 %1546 }
 0x88b   :  { %8328 = vrcp.f32 %v1547_v45 }
 0x88e   :  { %v1553_v51 = vpop.xlane.xlu1 %1552  ;;  %v1550_v63 = vpop.xlane.xlu0 %1549 }
 0x88f   :  { %8330 = vrcp.f32 %v1550_v63 }
 0x890   :  { %8332 = vrcp.f32 %v1553_v51 }
 0x892   :  { %v1991_v43 = vpop.xlane.xlu1 %1990  ;;  %v1556_v14 = vpop.xlane.xlu0 %1555 }
 0x893   :  { %8334 = vrcp.f32 %v1556_v14 }
 0x894   :  { %8336 = vrcp.f32 %v1991_v43 }
 0x896   :  { %v1997_v17 = vpop.xlane.xlu1 %1996 }
 0x898   :  { %v8329_v28 = vpop.eup %8328 }
 0x899   :  { %v1567_v27 = vmul.f32 %v8329_v28, %v9466_v34 }
 0x89a   :  { %v2000_v24 = vpop.xlane.xlu1 %1999 }
 0x89b   :  { %7940 = vmatmul.mubr.msk.f32.gmra.mxu0 %vm1097_vm12, %v1567_v27 }
 0x89c   :  { %7942 = vmatprep.mubr.msk.f32.mxu0 %vm8456_vm1, %v8455_v6  ;;  %v8331_v58 = vpop.eup %8330 }
 0x89d   :  { %v1568_v52 = vmul.f32 %v8331_v58, %v9470_v13  ;;  %v8333_v36 = vpop.eup %8332 }
 0x89e   :  { %v2006_v16 = vpop.xlane.xlu1 %2005  ;;  %v1569_v34 = vmul.f32 %v8333_v36, %v9475_v26 }
 0x89f   :  { %7943 = vmatmul.mubr.msk.f32.gmra.mxu0 %vm1097_vm12, %v1568_v52 }
 0x8a0   :  { %7945 = vmatprep.mubr.msk.f32.mxu0 %vm8456_vm1, %v8455_v6  ;;  %v8335_v25 = vpop.eup %8334 }
 0x8a1   :  { %v1570_v12 = vmul.f32 %v8335_v25, %v9479_v55  ;;  %v8337_v62 = vpop.eup %8336  ;;  %v2489_v55 = vpop.permute.xlu0 %2488 }
 0x8a2   :  { %v2444_v23 = vpop.xlane.xlu1 %2443  ;;  %v2017_v13 = vmul.f32 %v8337_v62, %v9484_v61  ;;  %v2676_v62 = vld [vmem:[%s13552_s4 + $0x170] sm:$0xff] }
 0x8a3   :  { %7946 = vmatmul.mubr.msk.f32.gmra.mxu0 %vm1097_vm12, %v1569_v34  ;;  %8092 = vmatpush3.msra.mxu1 %v2676_v62 }
 0x8a4   :  { %7948 = vmatprep.mubr.msk.f32.mxu0 %vm8456_vm1, %v8455_v6  ;;  %8093 = vmatprep.subr.mxu1 %v8455_v6 }
 0x8a6   :  { %v2450_v31 = vpop.xlane.xlu1 %2449 }
 0x8a7   :  { %7949 = vmatmul.mubr.msk.f32.gmra.mxu0 %vm1097_vm12, %v1570_v12 }
 0x8a8   :  { %8000 = vmatprep.mubr.msk.f32.mxu0 %vm8456_vm1, %v8455_v6 }
 0x8aa   :  { %v2453_v37 = vpop.xlane.xlu1 %2452 }
 0x8ab   :  { %8001 = vmatmul.mubr.msk.f32.vlgmr.msra.gmra.mxu0 %vm1097_vm12, %v2017_v13  ;;  %v2675_v13 = vld [vmem:[%s13552_s4 + $0x168] sm:$0xff] }
 0x8ac   :  { %8057 = vmatpush3.msra.mxu0 %v9452_v60  ;;  %8003 = vmatprep.mubr.msk.f32.mxu0 %vm8456_vm1, %v8455_v6 }
 0x8ad   :  { %8058 = vmatprep.subr.mxu0 %v8455_v6  ;;  %8094 = vmatpush3.msra.mxu1 %v2675_v13 }
 0x8ae   :  { %8059 = vmatpush3.msra.mxu0 %v9433_v33  ;;  %v2459_v26 = vpop.xlane.xlu1 %2458  ;;  %8095 = vmatprep.subr.mxu1 %v8455_v6 }
 0x8af   :  { %8060 = vmatprep.subr.mxu0 %v8455_v6 }
 0x8b0   :  { %8061 = vmatpush3.msra.mxu0 %v2493_v3 }
 0x8b1   :  { %8062 = vmatprep.subr.mxu0 %v8455_v6 }
 0x8b2   :  { %8063 = vmatpush3.msra.mxu0 %v2491_v30  ;;  %v2487_v61 = vpop.permute.xlu1 %2486 }
 0x8b3   :  { %8064 = vmatprep.subr.mxu0 %v8455_v6 }
 0x8b4   :  { %8065 = vmatpush3.msra.mxu0 %v2489_v55  ;;  %v2673_v55 = vld [vmem:[%s13552_s4 + $0x158] sm:$0xff] }
 0x8b5   :  { %8066 = vmatprep.subr.mxu0 %v8455_v6 }
 0x8b6   :  { %8067 = vmatpush3.msra.mxu0 %v2487_v61 }
 0x8b7   :  { %8068 = vmatprep.subr.mxu0 %v8455_v6 }
 0x8c7   :  { %v1994_v60 = vpop.xlane.xlu0 %1993 }
 0x8c8   :  { %8338 = vrcp.f32 %v1994_v60  ;;  %v2672_v60 = vld [vmem:[%s13552_s4 + $0x150] sm:$0xff] }
 0x8c9   :  { %8340 = vrcp.f32 %v1997_v17 }
 0x8ca   :  { %8342 = vrcp.f32 %v2000_v24 }
 0x8cb   :  { %v2003_v33 = vpop.xlane.xlu0 %2002 }
 0x8cc   :  { %8344 = vrcp.f32 %v2003_v33 }
 0x8cd   :  { %8346 = vrcp.f32 %v2006_v16 }
 0x8cf   :  { %v2009_v2 = vpop.xlane.xlu0 %2008 }
 0x8d0   :  { %8348 = vrcp.f32 %v2009_v2 }
 0x8d1   :  { %8350 = vrcp.f32 %v2444_v23 }
 0x8d3   :  { %v2447_v32 = vpop.xlane.xlu0 %2446 }
 0x8d4   :  { %8352 = vrcp.f32 %v2447_v32 }
 0x8d5   :  { %v8339_v38 = vpop.eup %8338  ;;  %8354 = vrcp.f32 %v2450_v31 }
 0x8d6   :  { %v2018_v19 = vmul.f32 %v8339_v38, %v9531_v41  ;;  %v8341_v44 = vpop.eup %8340  ;;  %8356 = vrcp.f32 %v2453_v37  ;;  %v2674_v37 = vld [vmem:[%s13552_s4 + $0x160] sm:$0xff] }
 0x8d7   :  { %v2456_v10 = vpop.xlane.xlu0 %2455  ;;  %v2019_v48 = vmul.f32 %v8341_v44, %v9491_v21  ;;  %v8343_v4 = vpop.eup %8342  ;;  %8096 = vmatpush3.msra.mxu1 %v2674_v37 }
 0x8d8   :  { %8004 = vmatmul.mubr.msk.f32.gmra.mxu0 %vm1097_vm12, %v2018_v19  ;;  %v2020_v41 = vmul.f32 %v8343_v4, %v9496_v29  ;;  %8358 = vrcp.f32 %v2456_v10  ;;  %8097 = vmatprep.subr.mxu1 %v8455_v6  ;;  %v2671_v4 = vld [vmem:[%s13552_s4 + $0x148] sm:$0xff] }
 0x8d9   :  { %8006 = vmatprep.mubr.msk.f32.mxu0 %vm8456_vm1, %v8455_v6  ;;  %v8345_v7 = vpop.eup %8344  ;;  %8360 = vrcp.f32 %v2459_v26  ;;  %8098 = vmatpush3.msra.mxu1 %v2673_v55 }
 0x8da   :  { %v2021_v21 = vmul.f32 %v8345_v7, %v9535_v53  ;;  %v8347_v15 = vpop.eup %8346  ;;  %8099 = vmatprep.subr.mxu1 %v8455_v6 }
 0x8db   :  { %v2462_v1 = vpop.xlane.xlu0 %2461  ;;  %v2022_v29 = vmul.f32 %v8347_v15, %v9500_v59  ;;  %8100 = vmatpush3.msra.mxu1 %v2672_v60 }
 0x8dc   :  { %8007 = vmatmul.mubr.msk.f32.gmra.mxu0 %vm1097_vm12, %v2019_v48  ;;  %8362 = vrcp.f32 %v2462_v1  ;;  %8101 = vmatprep.subr.mxu1 %v8455_v6  ;;  %v2670_v1 = vld [vmem:[%s13552_s4 + $0x140] sm:$0xff] }
 0x8dd   :  { %8009 = vmatprep.mubr.msk.f32.mxu0 %vm8456_vm1, %v8455_v6  ;;  %v8349_v22 = vpop.eup %8348  ;;  %8102 = vmatpush3.msra.mxu1 %v2671_v4 }
 0x8de   :  { %v2023_v42 = vmul.f32 %v8349_v22, %v9539_v40  ;;  %v8351_v30 = vpop.eup %8350  ;;  %8103 = vmatprep.subr.mxu1 %v8455_v6 }
 0x8df   :  { %v2485_v50 = vpop.permute.xlu0 %2484  ;;  %v2470_v53 = vmul.f32 %v8351_v30, %v9504_v39  ;;  %8104 = vmatpush3.msra.mxu1 %v2670_v1 }
 0x8e0   :  { %8010 = vmatmul.mubr.msk.f32.gmra.mxu0 %vm1097_vm12, %v2020_v41  ;;  %8105 = vmatprep.subr.mxu1 %v8455_v6 }
 0x8e1   :  { %8069 = vmatpush3.msra.mxu0 %v2485_v50  ;;  %8012 = vmatprep.mubr.msk.f32.mxu0 %vm8456_vm1, %v8455_v6  ;;  %v8353_v3 = vpop.eup %8352  ;;  %v2669_v50 = vld [vmem:[%s13552_s4 + $0x138] sm:$0xff] }
 0x8e2   :  { %v2471_v59 = vmul.f32 %v8353_v3, %v9543_v5  ;;  %v8355_v45 = vpop.eup %8354  ;;  %8106 = vmatpush3.msra.mxu1 %v2669_v50 }
 0x8e3   :  { %v2472_v40 = vmul.f32 %v8355_v45, %v9508_v35  ;;  %v8357_v39 = vpop.eup %8356  ;;  %8128 = vmatprep.subr.mxu1 %v8455_v6 }
 0x8e4   :  { %8013 = vmatmul.mubr.msk.f32.gmra.mxu0 %vm1097_vm12, %v2021_v21  ;;  %v2473_v51 = vmul.f32 %v8357_v39, %v9512_v0 }
 0x8e5   :  { %8015 = vmatprep.mubr.msk.f32.mxu0 %vm8456_vm1, %v8455_v6  ;;  %v8359_v63 = vpop.eup %8358 }
 0x8e6   :  { %v2474_v5 = vmul.f32 %v8359_v63, %v9547_v46  ;;  %v8361_v43 = vpop.eup %8360 }
 0x8e7   :  { %v2475_v35 = vmul.f32 %v8361_v43, %v9517_v56 }
 0x8e8   :  { %8016 = vmatmul.mubr.msk.f32.gmra.mxu0 %vm1097_vm12, %v2022_v29 }
 0x8e9   :  { %8018 = vmatprep.mubr.msk.f32.mxu0 %vm8456_vm1, %v8455_v6  ;;  %v8363_v14 = vpop.eup %8362 }
 0x8ea   :  { %v2476_v0 = vmul.f32 %v8363_v14, %v9551_v47 }
 0x8ec   :  { %8019 = vmatmul.mubr.msk.f32.gmra.mxu0 %vm1097_vm12, %v2023_v42 }
 0x8ed   :  { %8070 = vmatprep.mubr.msk.f32.mxu0 %vm8456_vm1, %v8455_v6 }
 0x8f0   :  { %8071 = vmatmul.mubr.msk.f32.vlgmr.msra.gmra.mxu0 %vm1097_vm12, %v2470_v53 }
 0x8f1   :  { %8073 = vmatprep.mubr.msk.f32.mxu0 %vm8456_vm1, %v8455_v6 }
 0x8f4   :  { %8074 = vmatmul.mubr.msk.f32.gmra.mxu0 %vm1097_vm12, %v2471_v59 }
 0x8f5   :  { %8076 = vmatprep.mubr.msk.f32.mxu0 %vm8456_vm1, %v8455_v6 }
 0x8f8   :  { %8077 = vmatmul.mubr.msk.f32.gmra.mxu0 %vm1097_vm12, %v2472_v40 }
 0x8f9   :  { %8079 = vmatprep.mubr.msk.f32.mxu0 %vm8456_vm1, %v8455_v6 }
 0x8fc   :  { %8080 = vmatmul.mubr.msk.f32.gmra.mxu0 %vm1097_vm12, %v2473_v51 }
 0x8fd   :  { %8082 = vmatprep.mubr.msk.f32.mxu0 %vm8456_vm1, %v8455_v6 }
 0x900   :  { %8083 = vmatmul.mubr.msk.f32.gmra.mxu0 %vm1097_vm12, %v2474_v5 }
 0x901   :  { %8085 = vmatprep.mubr.msk.f32.mxu0 %vm8456_vm1, %v8455_v6 }
 0x904   :  { %8086 = vmatmul.mubr.msk.f32.gmra.mxu0 %vm1097_vm12, %v2475_v35 }
 0x905   :  { %8088 = vmatprep.mubr.msk.f32.mxu0 %vm8456_vm1, %v8455_v6 }
 0x908   :  { %8089 = vmatmul.mubr.msk.f32.gmra.mxu0 %vm1097_vm12, %v2476_v0 }
 0x909   :  { %3036 = vmatprep.mubr.f32.mxu0 %v8455_v6 }
 0x922   :  { %v1686_v46 = vpop.f32.mrf.mxu0 }
 0x923   :  { %1727 = vrot.lane.b32.xlu1 %v1686_v46, %s8466_s24 }
 0x924   :  { %v7932_v17 = vpop.f32.mrf.mxu0 }
 0x926   :  { %v1691_v28 = vpop.f32.mrf.mxu0 }
 0x927   :  { %1729 = vrot.lane.b32.xlu1 %v1691_v28, %s8466_s24 }
 0x928   :  { %v7935_v56 = vpop.f32.mrf.mxu0 }
 0x92a   :  { %v1696_v27 = vpop.f32.mrf.mxu0 }
 0x92b   :  { %1731 = vrot.lane.b32.xlu0 %v1696_v27, %s8466_s24 }
 0x92c   :  { %v7938_v24 = vpop.f32.mrf.mxu0 }
 0x95b   :  { %v1701_v58 = vpop.f32.mrf.mxu0 }
 0x95c   :  { %1733 = vrot.lane.b32.xlu1 %v1701_v58, %s8466_s24 }
 0x95d   :  { %v7941_v47 = vpop.f32.mrf.mxu0 }
 0x95f   :  { %v1706_v16 = vpop.f32.mrf.mxu0 }
 0x960   :  { %1735 = vrot.lane.b32.xlu0 %v1706_v16, %s8466_s24 }
 0x961   :  { %v7944_v52 = vpop.f32.mrf.mxu0 }
 0x963   :  { %v9666_v36 = vpop.f32.mrf.mxu0 }
 0x965   :  { %v7947_v23 = vpop.f32.mrf.mxu0 }
 0x967   :  { %v9668_v34 = vpop.f32.mrf.mxu0 }
 0x969   :  { %v7950_v25 = vpop.f32.mrf.mxu0 }
 0x96b   :  { %v2139_v31 = vpop.f32.mrf.mxu0 }
 0x96c   :  { %2180 = vrot.lane.b32.xlu1 %v2139_v31, %s8464_s22 }
 0x96d   :  { %v8002_v12 = vpop.f32.mrf.mxu0 }
 0x995   :  { %v1728_v26 = vpop.permute.xlu1 %1727 }
 0x996   :  { %1749 = vst.msk [vmem:[#allocation5] sm:$0xff] %vm1748_vm4, %v1728_v26 }
 0x998   :  { %v2144_v61 = vpop.f32.mrf.mxu0 }
 0x999   :  { %v1730_v33 = vpop.permute.xlu1 %1729  ;;  %2182 = vrot.lane.b32.xlu0 %v2144_v61, %s8464_s22 }
 0x99a   :  { %1750 = vst.msk [vmem:[#allocation5 + $0x8] sm:$0xff] %vm1748_vm4, %v1730_v33  ;;  %v8005_v2 = vpop.f32.mrf.mxu0  ;;  %v7343_v33 = vld [vmem:[%s13554_s2 + $0xb] ss:$0 sm:$0xff] }
 0x99c   :  { %v2149_v32 = vpop.f32.mrf.mxu0 }
 0x99d   :  { %v1732_v38 = vpop.permute.xlu0 %1731  ;;  %2184 = vrot.lane.b32.xlu1 %v2149_v32, %s8464_s22 }
 0x99e   :  { %1751 = vst.msk [vmem:[#allocation5 + $0x10] sm:$0xff] %vm1748_vm4, %v1732_v38  ;;  %v8008_v19 = vpop.f32.mrf.mxu0 }
 0x9a0   :  { %v2154_v44 = vpop.f32.mrf.mxu0 }
 0x9a1   :  { %2186 = vrot.lane.b32.xlu0 %v2154_v44, %s8464_s22 }
 0x9a2   :  { %v8011_v10 = vpop.f32.mrf.mxu0 }
 0x9a4   :  { %v2159_v48 = vpop.f32.mrf.mxu0 }
 0x9a6   :  { %v8014_v41 = vpop.f32.mrf.mxu0 }
 0x9a8   :  { %v2164_v7 = vpop.f32.mrf.mxu0 }
 0x9aa   :  { %v8017_v21 = vpop.f32.mrf.mxu0 }
 0x9ac   :  { %v2169_v15 = vpop.f32.mrf.mxu0 }
 0x9ae   :  { %v8020_v29 = vpop.f32.mrf.mxu0 }
 0x9b0   :  { %v2592_v22 = vpop.f32.mrf.mxu0 }
 0x9b1   :  { %2633 = vrot.lane.b32.xlu1 %v2592_v22, %s8461_s19 }
 0x9b2   :  { %v8072_v42 = vpop.f32.mrf.mxu0 }
 0x9b4   :  { %v2597_v30 = vpop.f32.mrf.mxu0 }
 0x9b5   :  { %2635 = vrot.lane.b32.xlu1 %v2597_v30, %s8461_s19 }
 0x9b6   :  { %v8075_v53 = vpop.f32.mrf.mxu0 }
 0x9b8   :  { %v2602_v3 = vpop.f32.mrf.mxu0 }
 0x9b9   :  { %2188 = vrot.lane.b32.xlu1 %v2159_v48, %s8464_s22  ;;  %2637 = vrot.lane.b32.xlu0 %v2602_v3, %s8461_s19 }
 0x9ba   :  { %v8078_v59 = vpop.f32.mrf.mxu0 }
 0x9bc   :  { %v2607_v45 = vpop.f32.mrf.mxu0 }
 0x9bd   :  { %2190 = vrot.lane.b32.xlu0 %v2164_v7, %s8464_s22  ;;  %2639 = vrot.lane.b32.xlu1 %v2607_v45, %s8461_s19 }
 0x9be   :  { %v8081_v40 = vpop.f32.mrf.mxu0 }
 0x9c0   :  { %v2612_v39 = vpop.f32.mrf.mxu0 }
 0x9c1   :  { %1737 = vrot.lane.b32.xlu1 %v9666_v36, %s8466_s24  ;;  %2641 = vrot.lane.b32.xlu0 %v2612_v39, %s8461_s19 }
 0x9c2   :  { %v8084_v51 = vpop.f32.mrf.mxu0 }
 0x9c4   :  { %v2617_v63 = vpop.f32.mrf.mxu0 }
 0x9c5   :  { %1739 = vrot.lane.b32.xlu0 %v9668_v34, %s8466_s24  ;;  %2643 = vrot.lane.b32.xlu1 %v2617_v63, %s8461_s19 }
 0x9c6   :  { %v8087_v5 = vpop.f32.mrf.mxu0 }
 0x9c8   :  { %v2622_v43 = vpop.f32.mrf.mxu0 }
 0x9c9   :  { %2192 = vrot.lane.b32.xlu1 %v2169_v15, %s8464_s22  ;;  %2645 = vrot.lane.b32.xlu0 %v2622_v43, %s8461_s19 }
 0x9ca   :  { %v8090_v35 = vpop.f32.mrf.mxu0 }
 0x9ce   :  { %v1734_v14 = vpop.permute.xlu1 %1733 }
 0x9cf   :  { %1752 = vst.msk [vmem:[#allocation5 + $0x18] sm:$0xff] %vm1748_vm4, %v1734_v14 }
 0x9d2   :  { %v1736_v0 = vpop.permute.xlu0 %1735 }
 0x9d3   :  { %1753 = vst.msk [vmem:[#allocation5 + $0x20] sm:$0xff] %vm1748_vm4, %v1736_v0 }
 0x9de   :  { %v2181_v46 = vpop.permute.xlu1 %2180 }
 0x9df   :  { %2202 = vst.msk [vmem:[#allocation5] sm:$0xff] %vm2201_vm5, %v2181_v46  ;;  %v2937_v46 = vld [vmem:[%s13553_s3 + $0x150] sm:$0xff] }
 0xa0b   :  { %v2183_v17 = vpop.permute.xlu0 %2182 }
 0xa0c   :  { %2203 = vst.msk [vmem:[#allocation5 + $0x8] sm:$0xff] %vm2201_vm5, %v2183_v17 }
 0xa0f   :  { %v2185_v28 = vpop.permute.xlu1 %2184 }
 0xa10   :  { %2204 = vst.msk [vmem:[#allocation5 + $0x10] sm:$0xff] %vm2201_vm5, %v2185_v28 }
 0xa13   :  { %v2187_v56 = vpop.permute.xlu0 %2186 }
 0xa14   :  { %2205 = vst.msk [vmem:[#allocation5 + $0x18] sm:$0xff] %vm2201_vm5, %v2187_v56 }
 0xa23   :  { %v2634_v27 = vpop.permute.xlu1 %2633 }
 0xa24   :  { %2655 = vst.msk [vmem:[#allocation5] sm:$0xff] %vm2654_vm6, %v2634_v27 }
 0xa27   :  { %v2636_v24 = vpop.permute.xlu1 %2635 }
 0xa28   :  { %2656 = vst.msk [vmem:[#allocation5 + $0x8] sm:$0xff] %vm2654_vm6, %v2636_v24 }
 0xa2b   :  { %v2189_v58 = vpop.permute.xlu1 %2188  ;;  %v2638_v47 = vpop.permute.xlu0 %2637  ;;  %v2662_v16 = vld [vmem:[#allocation5] sm:$0xff] }
 0xa2c   :  { %2206 = vst.msk [vmem:[#allocation5 + $0x20] sm:$0xff] %vm2201_vm5, %v2189_v58  ;;  %8108 = vmatmul.mubr.msk.f32.vlgmr.msra.gmra.mxu1 %vm905_vm8, %v2662_v16 }
 0xa2d   :  { %2657 = vst.msk [vmem:[#allocation5 + $0x10] sm:$0xff] %vm2654_vm6, %v2638_v47  ;;  %8110 = vmatprep.mubr.msk.f32.mxu1 %vm8456_vm1, %v8455_v6 }
 0xa2f   :  { %v2191_v52 = vpop.permute.xlu0 %2190  ;;  %v2640_v36 = vpop.permute.xlu1 %2639  ;;  %v2663_v23 = vld [vmem:[#allocation5 + $0x8] sm:$0xff] }
 0xa30   :  { %2658 = vst.msk [vmem:[#allocation5 + $0x18] sm:$0xff] %vm2654_vm6, %v2640_v36  ;;  %8111 = vmatmul.mubr.msk.f32.gmra.mxu1 %vm905_vm8, %v2663_v23 }
 0xa31   :  { %8113 = vmatprep.mubr.msk.f32.mxu1 %vm8456_vm1, %v8455_v6 }
 0xa33   :  { %v1738_v34 = vpop.permute.xlu1 %1737  ;;  %v2642_v25 = vpop.permute.xlu0 %2641 }
 0xa34   :  { %v2664_v31 = vld [vmem:[#allocation5 + $0x10] sm:$0xff]  ;;  %1754 = vst.msk [vmem:[#allocation5 + $0x28] sm:$0xff] %vm1748_vm4, %v1738_v34 }
 0xa35   :  { %2659 = vst.msk [vmem:[#allocation5 + $0x20] sm:$0xff] %vm2654_vm6, %v2642_v25  ;;  %8114 = vmatmul.mubr.msk.f32.gmra.mxu1 %vm905_vm8, %v2664_v31 }
 0xa36   :  { %2207 = vst.msk [vmem:[#allocation5 + $0x28] sm:$0xff] %vm2201_vm5, %v2191_v52  ;;  %8116 = vmatprep.mubr.msk.f32.mxu1 %vm8456_vm1, %v8455_v6 }
 0xa37   :  { %v1740_v12 = vpop.permute.xlu0 %1739  ;;  %v2644_v62 = vpop.permute.xlu1 %2643  ;;  %v2665_v13 = vld [vmem:[#allocation5 + $0x18] sm:$0xff] }
 0xa38   :  { %1755 = vst.msk [vmem:[#allocation5 + $0x30] sm:$0xff] %vm1748_vm4, %v1740_v12  ;;  %vm3453_vm4 = vcmask 785408  }
 0xa39   :  { %2660 = vst.msk [vmem:[#allocation5 + $0x28] sm:$0xff] %vm2654_vm6, %v2644_v62  ;;  %8117 = vmatmul.mubr.msk.f32.gmra.mxu1 %vm905_vm8, %v2665_v13 }
 0xa3a   :  { %8119 = vmatprep.mubr.msk.f32.mxu1 %vm8456_vm1, %v8455_v6 }
 0xa3b   :  { %v2193_v37 = vpop.permute.xlu1 %2192  ;;  %v2646_v26 = vpop.permute.xlu0 %2645 }
 0xa3c   :  { %v2666_v55 = vld [vmem:[#allocation5 + $0x20] sm:$0xff]  ;;  %2208 = vst.msk [vmem:[#allocation5 + $0x30] sm:$0xff] %vm2201_vm5, %v2193_v37  ;;  %vm3969_vm5 = vcmask 64512  }
 0xa3d   :  { %8120 = vmatmul.mubr.msk.f32.gmra.mxu1 %vm905_vm8, %v2666_v55  ;;  %2661 = vst.msk [vmem:[#allocation5 + $0x30] sm:$0xff] %vm2654_vm6, %v2646_v26 }
 0xa3e   :  { %8122 = vmatprep.mubr.msk.f32.mxu1 %vm8456_vm1, %v8455_v6 }
 0xa40   :  { %v2667_v61 = vld [vmem:[#allocation5 + $0x28] sm:$0xff] }
 0xa41   :  { %8123 = vmatmul.mubr.msk.f32.gmra.mxu1 %vm905_vm8, %v2667_v61 }
 0xa42   :  { %8125 = vmatprep.mubr.msk.f32.mxu1 %vm8456_vm1, %v8455_v6 }
 0xa44   :  { %v2668_v60 = vld [vmem:[#allocation5 + $0x30] sm:$0xff] }
 0xa45   :  { %8126 = vmatmul.mubr.msk.f32.gmra.mxu1 %vm905_vm8, %v2668_v60 }
 0xa46   :  { %8160 = vmatprep.mubr.msk.f32.mxu1 %vm8456_vm1, %v8455_v6 }
 0xaec   :  { %v2771_v2 = vpop.f32.mrf.mxu1 }
 0xaed   :  { %v2772_v32 = vadd.f32 %v7343_v33, %v2771_v2 }
 0xaee   :  { %v8109_v38 = vpop.f32.mrf.mxu1 }
 0xaef   :  { %v2805_v19 = vadd.f32 %v2772_v32, %v8835_v57 }
 0xaf0   :  { %v2776_v44 = vpop.f32.mrf.mxu1 }
 0xaf1   :  { %v2777_v10 = vadd.f32 %v7343_v33, %v2776_v44  ;;  %v2814_v48 = vsel %vm59_vm2, %v2805_v19, 0.0 }
 0xaf2   :  { %v8112_v4 = vpop.f32.mrf.mxu1  ;;  %2815 = vadd.xlane.f32.xlu1 %v2814_v48 }
 0xaf3   :  { %v2806_v1 = vadd.f32 %v2777_v10, %v8842_v54 }
 0xaf5   :  { %v2781_v41 = vpop.f32.mrf.mxu1  ;;  %v2817_v50 = vsel %vm59_vm2, %v2806_v1, 0.0 }
 0xaf6   :  { %v2782_v7 = vadd.f32 %v7343_v33, %v2781_v41  ;;  %2818 = vadd.xlane.f32.xlu0 %v2817_v50  ;;  %v2935_v50 = vld [vmem:[%s13553_s3 + $0xe8] sm:$0xff] }
 0xaf7   :  { %v8115_v21 = vpop.f32.mrf.mxu1 }
 0xaf8   :  { %v2807_v15 = vadd.f32 %v2782_v7, %v8847_v8  ;;  %v2936_v7 = vld [vmem:[%s13553_s3 + $0xf0] sm:$0xff]  ;;  %v2934_v21 = vld [vmem:[%s13553_s3 + $0x88] sm:$0xff] }
 0xaf9   :  { %v2786_v29 = vpop.f32.mrf.mxu1 }
 0xafa   :  { %v2787_v22 = vadd.f32 %v7343_v33, %v2786_v29  ;;  %v2820_v57 = vsel %vm59_vm2, %v2807_v15, 0.0  ;;  %v2932_v29 = vld [vmem:[%s13553_s3 + $0x20] sm:$0xff] }
 0xafb   :  { %v8118_v42 = vpop.f32.mrf.mxu1  ;;  %2821 = vadd.xlane.f32.xlu0 %v2820_v57 }
 0xafc   :  { %v2808_v30 = vadd.f32 %v2787_v22, %v8853_v9  ;;  %v2931_v22 = vld [vmem:[%s13553_s3 + $0x18] sm:$0xff] }
 0xafd   :  { %v2791_v53 = vpop.f32.mrf.mxu1 }
 0xafe   :  { %v2792_v3 = vadd.f32 %v7343_v33, %v2791_v53  ;;  %v2823_v54 = vsel %vm59_vm2, %v2808_v30, 0.0 }
 0xaff   :  { %v8121_v59 = vpop.f32.mrf.mxu1  ;;  %2824 = vadd.xlane.f32.xlu1 %v2823_v54 }
 0xb00   :  { %v2809_v45 = vadd.f32 %v2792_v3, %v8858_v11  ;;  %v2938_v11 = vld [vmem:[%s13553_s3 + $0x158] sm:$0xff] }
 0xb01   :  { %v2796_v40 = vpop.f32.mrf.mxu1  ;;  %2996 = vmatprep.subr.mxu0 %v2938_v11  ;;  %v7352_v11 = vld [vmem:[%s13554_s2 + $0xd] ss:$0 sm:$0xff] }
 0xb02   :  { %v2797_v39 = vadd.f32 %v7343_v33, %v2796_v40  ;;  %v2826_v8 = vsel %vm59_vm2, %v2809_v45, 0.0  ;;  %2997 = vmatpush1.msra.mxu0 %v2937_v46 }
 0xb03   :  { %v8124_v51 = vpop.f32.mrf.mxu1  ;;  %2827 = vadd.xlane.f32.xlu0 %v2826_v8  ;;  %2998 = vmatprep.subr.mxu0 %v2936_v7  ;;  %v3285_v7 = vld [vmem:[%s13552_s4 + $0x1c8] sm:$0xff] }
 0xb04   :  { %v2810_v63 = vadd.f32 %v2797_v39, %v8865_v18  ;;  %2999 = vmatpush1.msra.mxu0 %v2935_v50  ;;  %v3284_v50 = vld [vmem:[%s13552_s4 + $0x1c0] sm:$0xff] }
 0xb05   :  { %v2801_v5 = vpop.f32.mrf.mxu1  ;;  %3000 = vmatprep.subr.mxu0 %v2934_v21  ;;  %v3283_v21 = vld [vmem:[%s13552_s4 + $0x1b8] sm:$0xff] }
 0xb06   :  { %v2829_v43 = vsel %vm59_vm2, %v2810_v63, 0.0  ;;  %v2802_v9 = vadd.f32 %v7343_v33, %v2801_v5 }
 0xb07   :  { %2830 = vadd.xlane.f32.xlu1 %v2829_v43  ;;  %v8127_v35 = vpop.f32.mrf.mxu1 }
 0xb08   :  { %v2811_v14 = vadd.f32 %v2802_v9, %v8870_v20  ;;  %v7351_v9 = vld [vmem:[%s13554_s2 + $0xc] ss:$0 sm:$0xff] }
 0xb0a   :  { %v2832_v0 = vsel %vm59_vm2, %v2811_v14, 0.0 }
 0xb0b   :  { %2833 = vadd.xlane.f32.xlu0 %v2832_v0 }
 0xb7b   :  { %v2816_v18 = vpop.xlane.xlu1 %2815 }
 0xb7c   :  { %v2835_v17 = vmul.f32 0.03125, %v2816_v18 }
 0xb7e   :  { %v9785_v28 = vsub.f32 %v2805_v19, %v2835_v17 }
 0xb7f   :  { %v2819_v56 = vpop.xlane.xlu0 %2818 }
 0xb80   :  { %v2836_v27 = vmul.f32 0.03125, %v2819_v56  ;;  %v2849_v20 = vmul.f32 %v9785_v28, %v9785_v28 }
 0xb82   :  { %v9789_v24 = vsub.f32 %v2806_v1, %v2836_v27  ;;  %v2856_v58 = vsel %vm59_vm2, %v2849_v20, 0.0 }
 0xb83   :  { %2857 = vadd.xlane.f32.xlu1 %v2856_v58 }
 0xb84   :  { %v2822_v47 = vpop.xlane.xlu0 %2821  ;;  %v2850_v52 = vmul.f32 %v9789_v24, %v9789_v24 }
 0xb85   :  { %v2837_v16 = vmul.f32 0.03125, %v2822_v47 }
 0xb86   :  { %v2859_v23 = vsel %vm59_vm2, %v2850_v52, 0.0 }
 0xb87   :  { %v9794_v36 = vsub.f32 %v2807_v15, %v2837_v16  ;;  %2860 = vadd.xlane.f32.xlu0 %v2859_v23  ;;  %v2933_v15 = vld [vmem:[%s13553_s3 + $0x80] sm:$0xff] }
 0xb88   :  { %v2825_v34 = vpop.xlane.xlu1 %2824  ;;  %3001 = vmatpush1.msra.mxu0 %v2933_v15  ;;  %v3282_v15 = vld [vmem:[%s13552_s4 + $0x1b0] sm:$0xff] }
 0xb89   :  { %v2838_v25 = vmul.f32 0.03125, %v2825_v34  ;;  %v2851_v31 = vmul.f32 %v9794_v36, %v9794_v36  ;;  %3002 = vmatprep.subr.mxu0 %v2932_v29  ;;  %v3281_v29 = vld [vmem:[%s13552_s4 + $0x1a8] sm:$0xff] }
 0xb8a   :  { %3003 = vmatpush1.msra.mxu0 %v2931_v22  ;;  %v3280_v22 = vld [vmem:[%s13552_s4 + $0x1a0] sm:$0xff] }
 0xb8b   :  { %v9799_v12 = vsub.f32 %v2808_v30, %v2838_v25  ;;  %v2862_v62 = vsel %vm59_vm2, %v2851_v31, 0.0 }
 0xb8c   :  { %2863 = vadd.xlane.f32.xlu1 %v2862_v62  ;;  %v2828_v13 = vpop.xlane.xlu0 %2827 }
 0xb8d   :  { %v2839_v37 = vmul.f32 0.03125, %v2828_v13  ;;  %v2852_v26 = vmul.f32 %v9799_v12, %v9799_v12 }
 0xb8f   :  { %v9804_v55 = vsub.f32 %v2809_v45, %v2839_v37  ;;  %v2865_v61 = vsel %vm59_vm2, %v2852_v26, 0.0 }
 0xb90   :  { %v2831_v60 = vpop.xlane.xlu1 %2830  ;;  %2866 = vadd.xlane.f32.xlu0 %v2865_v61 }
 0xb91   :  { %v2840_v33 = vmul.f32 0.03125, %v2831_v60  ;;  %v2853_v2 = vmul.f32 %v9804_v55, %v9804_v55 }
 0xb93   :  { %v9809_v32 = vsub.f32 %v2810_v63, %v2840_v33  ;;  %v2868_v38 = vsel %vm59_vm2, %v2853_v2, 0.0 }
 0xb94   :  { %2869 = vadd.xlane.f32.xlu1 %v2868_v38  ;;  %v2834_v19 = vpop.xlane.xlu0 %2833 }
 0xb95   :  { %v2854_v44 = vmul.f32 %v9809_v32, %v9809_v32  ;;  %v2841_v10 = vmul.f32 0.03125, %v2834_v19 }
 0xb97   :  { %v2871_v48 = vsel %vm59_vm2, %v2854_v44, 0.0  ;;  %v9815_v4 = vsub.f32 %v2811_v14, %v2841_v10 }
 0xb98   :  { %2872 = vadd.xlane.f32.xlu0 %v2871_v48  ;;  %v3289_v48 = vld [vmem:[%s13552_s4 + $0x1e8] sm:$0xff] }
 0xb99   :  { %v2855_v1 = vmul.f32 %v9815_v4, %v9815_v4 }
 0xb9b   :  { %v2874_v41 = vsel %vm59_vm2, %v2855_v1, 0.0  ;;  %v3287_v1 = vld [vmem:[%s13552_s4 + $0x1d8] sm:$0xff] }
 0xb9c   :  { %2875 = vadd.xlane.f32.xlu1 %v2874_v41  ;;  %v3286_v41 = vld [vmem:[%s13552_s4 + $0x1d0] sm:$0xff] }
 0xc0c   :  { %v2858_v57 = vpop.xlane.xlu1 %2857 }
 0xc0d   :  { %v2877_v42 = vmul.f32 0.03125, %v2858_v57  ;;  %v3279_v57 = vld [vmem:[%s13552_s4 + $0x198] sm:$0xff] }
 0xc0f   :  { %v2884_v30 = vadd.f32 1e-05, %v2877_v42  ;;  %v3278_v42 = vld [vmem:[%s13552_s4 + $0x190] sm:$0xff] }
 0xc10   :  { %v2861_v53 = vpop.xlane.xlu0 %2860 }
 0xc11   :  { %8364 = vrsqrt.f32 %v2884_v30  ;;  %v2878_v3 = vmul.f32 0.03125, %v2861_v53  ;;  %v3277_v30 = vld [vmem:[%s13552_s4 + $0x188] sm:$0xff]  ;;  %v3276_v53 = vld [vmem:[%s13552_s4 + $0x180] sm:$0xff] }
 0xc13   :  { %v2885_v54 = vadd.f32 1e-05, %v2878_v3  ;;  %v3275_v3 = vld [vmem:[%s13552_s4 + $0x178] sm:$0xff] }
 0xc15   :  { %v2864_v59 = vpop.xlane.xlu1 %2863  ;;  %8366 = vrsqrt.f32 %v2885_v54  ;;  %v9949_v54 = vsub.s32 1, %v8982_v49 }
 0xc16   :  { %v2879_v45 = vmul.f32 0.03125, %v2864_v59  ;;  %v9954_v59 = vld [vmem:[%s13554_s2 + $0xe] sm:$0x3] }
 0xc18   :  { %v2886_v40 = vadd.f32 1e-05, %v2879_v45  ;;  %v2948_v45 = vrot.slane %v9954_v59, %v9949_v54 }
 0xc19   :  { %v2867_v39 = vpop.xlane.xlu0 %2866 }
 0xc1a   :  { %8368 = vrsqrt.f32 %v2886_v40  ;;  %v2880_v8 = vmul.f32 0.03125, %v2867_v39 }
 0xc1c   :  { %v2887_v51 = vadd.f32 1e-05, %v2880_v8 }
 0xc1d   :  { %v2870_v63 = vpop.xlane.xlu1 %2869 }
 0xc1e   :  { %8370 = vrsqrt.f32 %v2887_v51  ;;  %v2881_v5 = vmul.f32 0.03125, %v2870_v63  ;;  %v8365_v43 = vpop.eup %8364 }
 0xc1f   :  { %v2898_v35 = vmul.f32 %v8365_v43, %v9785_v28 }
 0xc20   :  { %v2888_v14 = vadd.f32 1e-05, %v2881_v5 }
 0xc21   :  { %v2873_v0 = vpop.xlane.xlu0 %2872  ;;  %v2911_v46 = vmul.f32 %v7351_v9, %v2898_v35 }
 0xc22   :  { %8372 = vrsqrt.f32 %v2888_v14  ;;  %v2882_v18 = vmul.f32 0.03125, %v2873_v0  ;;  %v8367_v17 = vpop.eup %8366 }
 0xc23   :  { %v9845_v27 = vadd.f32 %v7352_v11, %v2911_v46  ;;  %v2899_v20 = vmul.f32 %v8367_v17, %v9789_v24 }
 0xc24   :  { %v2889_v56 = vadd.f32 1e-05, %v2882_v18 }
 0xc25   :  { %7353 = vmatmul.mubr.msk.f32.vlgmr.msra.gmra.mxu0 %vm59_vm2, %v9845_v27  ;;  %v2876_v28 = vpop.xlane.xlu1 %2875  ;;  %v2912_v58 = vmul.f32 %v7351_v9, %v2899_v20 }
 0xc26   :  { %8374 = vrsqrt.f32 %v2889_v56  ;;  %v2883_v16 = vmul.f32 0.03125, %v2876_v28  ;;  %3042 = vmatprep.mubr.f32.mxu0 %v8455_v6 }
 0xc27   :  { %v8369_v47 = vpop.eup %8368  ;;  %v9851_v52 = vadd.f32 %v7352_v11, %v2912_v58 }
 0xc28   :  { %v2900_v23 = vmul.f32 %v8369_v47, %v9794_v36  ;;  %v2890_v34 = vadd.f32 1e-05, %v2883_v16 }
 0xc29   :  { %7354 = vmatmul.mubr.msk.f32.gmra.mxu0 %vm59_vm2, %v9851_v52 }
 0xc2a   :  { %v2913_v25 = vmul.f32 %v7351_v9, %v2900_v23  ;;  %8376 = vrsqrt.f32 %v2890_v34  ;;  %3048 = vmatprep.mubr.f32.mxu0 %v8455_v6 }
 0xc2b   :  { %v8371_v24 = vpop.eup %8370 }
 0xc2c   :  { %v9857_v31 = vadd.f32 %v7352_v11, %v2913_v25  ;;  %v2901_v62 = vmul.f32 %v8371_v24, %v9799_v12 }
 0xc2e   :  { %7355 = vmatmul.mubr.msk.f32.gmra.mxu0 %vm59_vm2, %v9857_v31  ;;  %v2914_v13 = vmul.f32 %v7351_v9, %v2901_v62 }
 0xc2f   :  { %v8373_v37 = vpop.eup %8372  ;;  %3054 = vmatprep.mubr.f32.mxu0 %v8455_v6 }
 0xc30   :  { %v9863_v36 = vadd.f32 %v7352_v11, %v2914_v13  ;;  %v2902_v26 = vmul.f32 %v8373_v37, %v9804_v55 }
 0xc32   :  { %7356 = vmatmul.mubr.msk.f32.gmra.mxu0 %vm59_vm2, %v9863_v36  ;;  %v2915_v61 = vmul.f32 %v7351_v9, %v2902_v26 }
 0xc33   :  { %v8375_v60 = vpop.eup %8374  ;;  %3060 = vmatprep.mubr.f32.mxu0 %v8455_v6 }
 0xc34   :  { %v9869_v33 = vadd.f32 %v7352_v11, %v2915_v61  ;;  %v2903_v12 = vmul.f32 %v8375_v60, %v9809_v32  ;;  %v3290_v32 = vld [vmem:[%s13552_s4 + $0x1f0] sm:$0xff] }
 0xc35   :  { %8129 = vmatpush3.msra.mxu1 %v3290_v32 }
 0xc36   :  { %7357 = vmatmul.mubr.msk.f32.gmra.mxu0 %vm59_vm2, %v9869_v33  ;;  %v2916_v2 = vmul.f32 %v7351_v9, %v2903_v12  ;;  %8130 = vmatprep.subr.mxu1 %v8455_v6 }
 0xc37   :  { %3066 = vmatprep.mubr.f32.mxu0 %v8455_v6  ;;  %v8377_v38 = vpop.eup %8376  ;;  %8131 = vmatpush3.msra.mxu1 %v3289_v48 }
 0xc38   :  { %v9875_v19 = vadd.f32 %v7352_v11, %v2916_v2  ;;  %v2904_v55 = vmul.f32 %v8377_v38, %v9815_v4  ;;  %8132 = vmatprep.subr.mxu1 %v8455_v6  ;;  %v3288_v4 = vld [vmem:[%s13552_s4 + $0x1e0] sm:$0xff] }
 0xc39   :  { %8133 = vmatpush3.msra.mxu1 %v3288_v4 }
 0xc3a   :  { %7358 = vmatmul.mubr.msk.f32.gmra.mxu0 %vm59_vm2, %v9875_v19  ;;  %v2917_v44 = vmul.f32 %v7351_v9, %v2904_v55  ;;  %8134 = vmatprep.subr.mxu1 %v8455_v6 }
 0xc3b   :  { %3072 = vmatprep.mubr.f32.mxu0 %v8455_v6  ;;  %8135 = vmatpush3.msra.mxu1 %v3287_v1 }
 0xc3c   :  { %v9881_v10 = vadd.f32 %v7352_v11, %v2917_v44  ;;  %8136 = vmatprep.subr.mxu1 %v8455_v6 }
 0xc3d   :  { %8137 = vmatpush3.msra.mxu1 %v3286_v41 }
 0xc3e   :  { %7359 = vmatmul.mubr.msk.f32.gmra.mxu0 %vm59_vm2, %v9881_v10  ;;  %8138 = vmatprep.subr.mxu1 %v8455_v6 }
 0xc3f   :  { %8139 = vmatpush3.msra.mxu1 %v3285_v7 }
 0xc40   :  { %8140 = vmatprep.subr.mxu1 %v8455_v6 }
 0xc41   :  { %8141 = vmatpush3.msra.mxu1 %v3284_v50 }
 0xc42   :  { %8142 = vmatprep.subr.mxu1 %v8455_v6 }
 0xc43   :  { %8143 = vmatpush3.msra.mxu1 %v3283_v21 }
 0xc44   :  { %8144 = vmatprep.subr.mxu1 %v8455_v6 }
 0xc45   :  { %8145 = vmatpush3.msra.mxu1 %v3282_v15 }
 0xc46   :  { %8146 = vmatprep.subr.mxu1 %v8455_v6 }
 0xc47   :  { %8147 = vmatpush3.msra.mxu1 %v3281_v29 }
 0xc48   :  { %8148 = vmatprep.subr.mxu1 %v8455_v6 }
 0xc49   :  { %8149 = vmatpush3.msra.mxu1 %v3280_v22 }
 0xc4a   :  { %8150 = vmatprep.subr.mxu1 %v8455_v6 }
 0xc4b   :  { %8151 = vmatpush3.msra.mxu1 %v3279_v57 }
 0xc4c   :  { %8152 = vmatprep.subr.mxu1 %v8455_v6 }
 0xc4d   :  { %8153 = vmatpush3.msra.mxu1 %v3278_v42 }
 0xc4e   :  { %8154 = vmatprep.subr.mxu1 %v8455_v6 }
 0xc4f   :  { %8155 = vmatpush3.msra.mxu1 %v3277_v30 }
 0xc50   :  { %8156 = vmatprep.subr.mxu1 %v8455_v6 }
 0xc51   :  { %8157 = vmatpush3.msra.mxu1 %v3276_v53 }
 0xc52   :  { %8158 = vmatprep.subr.mxu1 %v8455_v6 }
 0xc53   :  { %8159 = vmatpush3.msra.mxu1 %v3275_v3 }
 0xce5   :  { %v9958_v40 = vpop.f32.mrf.mxu0 }
 0xce7   :  { %v3040_v39 = vpop.f32.mrf.mxu0 }
 0xce8   :  { %v9960_v8 = vadd.f32 %v3040_v39, %v2948_v45 }
 0xce9   :  { %v9962_v51 = vpop.f32.mrf.mxu0 }
 0xcea   :  { %v9965_v63 = vmul.f32 0.70710677, %v9960_v8 }
 0xceb   :  { %v3046_v5 = vpop.f32.mrf.mxu0 }
 0xcec   :  { %v3093_v43 = vand.u32 2147483647, %v9965_v63  ;;  %v9968_v9 = vadd.f32 %v3046_v5, %v2948_v45  ;;  %v3191_v24 = vmul.f32 %v9965_v63, %v9965_v63  ;;  %vm3233_vm7 = vcmp.ge.f32.partialorder %v9965_v63, 0.0 }
 0xcee   :  { %v9970_v35 = vpop.f32.mrf.mxu0  ;;  %v3100_v14 = vmul.f32 0.3275911, %v3093_v43  ;;  %v9973_v0 = vmul.f32 0.70710677, %v9968_v9  ;;  %v3198_v38 = vsub.f32 0.0, %v3191_v24 }
 0xcf0   :  { %v3052_v11 = vpop.f32.mrf.mxu0  ;;  %v3107_v46 = vadd.f32 1.0, %v3100_v14  ;;  %v3094_v18 = vand.u32 2147483647, %v9973_v0  ;;  %v3192_v44 = vmul.f32 %v9973_v0, %v9973_v0  ;;  %v3205_v50 = vmul.f32 1.442695, %v3198_v38 }
 0xcf1   :  { %v9976_v17 = vadd.f32 %v3052_v11, %v2948_v45  ;;  %v10031_v38 = vsub.s32 0, %v8982_v49  ;;  %vm3234_vm9 = vcmp.ge.f32.partialorder %v9973_v0, 0.0 }
 0xcf2   :  { %v9978_v56 = vpop.f32.mrf.mxu0  ;;  %8378 = vrcp.f32 %v3107_v46  ;;  %v3101_v20 = vmul.f32 0.3275911, %v3094_v18  ;;  %v3199_v29 = vsub.f32 0.0, %v3192_v44 }
 0xcf3   :  { %v9981_v28 = vmul.f32 0.70710677, %v9976_v17 }
 0xcf4   :  { %v3058_v58 = vpop.f32.mrf.mxu0  ;;  %v3108_v47 = vadd.f32 1.0, %v3101_v20  ;;  %v3207_v46 = vmul.f32 1.442695, %v3199_v29 }
 0xcf5   :  { %v9983_v16 = vadd.f32 %v3058_v58, %v2948_v45  ;;  %v3095_v23 = vand.u32 2147483647, %v9981_v28  ;;  %v3193_v42 = vmul.f32 %v9981_v28, %v9981_v28  ;;  %vm3235_vm10 = vcmp.ge.f32.partialorder %v9981_v28, 0.0 }
 0xcf6   :  { %v9986_v34 = vpop.f32.mrf.mxu0  ;;  %8380 = vrcp.f32 %v3108_v47 }
 0xcf7   :  { %v9989_v25 = vmul.f32 0.70710677, %v9983_v16  ;;  %v3102_v62 = vmul.f32 0.3275911, %v3095_v23  ;;  %v3200_v20 = vsub.f32 0.0, %v3193_v42 }
 0xcf8   :  { %v3064_v13 = vpop.f32.mrf.mxu0 }
 0xcf9   :  { %v3096_v37 = vand.u32 2147483647, %v9989_v25  ;;  %v9994_v26 = vadd.f32 %v3064_v13, %v2948_v45  ;;  %v3109_v61 = vadd.f32 1.0, %v3102_v62  ;;  %v3194_v5 = vmul.f32 %v9989_v25, %v9989_v25 }
 0xcfa   :  { %v9996_v60 = vpop.f32.mrf.mxu0  ;;  %v3209_v44 = vmul.f32 1.442695, %v3200_v20  ;;  %vm3236_vm11 = vcmp.ge.f32.partialorder %v9989_v25, 0.0 }
 0xcfb   :  { %v3103_v12 = vmul.f32 0.3275911, %v3096_v37  ;;  %v9999_v2 = vmul.f32 0.70710677, %v9994_v26  ;;  %8382 = vrcp.f32 %v3109_v61  ;;  %v3201_v24 = vsub.f32 0.0, %v3194_v5 }
 0xcfc   :  { %v3070_v55 = vpop.f32.mrf.mxu0 }
 0xcfd   :  { %v3110_v32 = vadd.f32 1.0, %v3103_v12  ;;  %v3097_v48 = vand.u32 2147483647, %v9999_v2  ;;  %v10004_v4 = vadd.f32 %v3070_v55, %v2948_v45  ;;  %v3195_v62 = vmul.f32 %v9999_v2, %v9999_v2 }
 0xcfe   :  { %v10006_v41 = vpop.f32.mrf.mxu0  ;;  %v3211_v29 = vmul.f32 1.442695, %v3201_v24  ;;  %vm3237_vm12 = vcmp.ge.f32.partialorder %v9999_v2, 0.0 }
 0xcff   :  { %8384 = vrcp.f32 %v3110_v32  ;;  %v3104_v1 = vmul.f32 0.3275911, %v3097_v48  ;;  %v8379_v7 = vpop.eup %8378  ;;  %v10009_v21 = vmul.f32 0.70710677, %v10004_v4 }
 0xd00   :  { %v3128_v15 = vmul.f32 1.0614054, %v8379_v7  ;;  %v3076_v57 = vpop.f32.mrf.mxu0 }
 0xd01   :  { %v3111_v22 = vadd.f32 1.0, %v3104_v1  ;;  %v3098_v30 = vand.u32 2147483647, %v10009_v21  ;;  %v10014_v3 = vadd.f32 %v3076_v57, %v2948_v45  ;;  %vm3238_vm13 = vcmp.ge.f32.partialorder %v10009_v21, 0.0 }
 0xd02   :  { %v3135_v53 = vadd.f32 -1.4531521, %v3128_v15 }
 0xd03   :  { %8386 = vrcp.f32 %v3111_v22  ;;  %v10016_v39 = vpop.eup %8380  ;;  %v3105_v43 = vmul.f32 0.3275911, %v3098_v30  ;;  %v10022_v18 = vmul.f32 0.70710677, %v10014_v3  ;;  %v3202_v22 = vsub.f32 0.0, %v3195_v62 }
 0xd04   :  { %8388 = vpow2.f32 %v3205_v50  ;;  %v3142_v14 = vmul.f32 %v8379_v7, %v3135_v53  ;;  %v3129_v11 = vmul.f32 1.0614054, %v10016_v39  ;;  %v10040_v53 = vrot.slane %v9954_v59, %v10031_v38 }
 0xd05   :  { %v3112_v58 = vadd.f32 1.0, %v3105_v43  ;;  %v3099_v45 = vand.u32 2147483647, %v10022_v18  ;;  %v3196_v43 = vmul.f32 %v10009_v21, %v10009_v21  ;;  %vm3239_vm14 = vcmp.ge.f32.partialorder %v10022_v18, 0.0 }
 0xd06   :  { %v3149_v47 = vadd.f32 1.4214138, %v3142_v14  ;;  %v3136_v23 = vadd.f32 -1.4531521, %v3129_v11  ;;  %v3057_v25 = vadd.f32 %v9978_v56, %v10040_v53  ;;  %v3063_v56 = vadd.f32 %v9986_v34, %v10040_v53 }
 0xd07   :  { %8390 = vrcp.f32 %v3112_v58  ;;  %v3106_v12 = vmul.f32 0.3275911, %v3099_v45  ;;  %v3069_v34 = vadd.f32 %v9996_v60, %v10040_v53  ;;  %v3075_v60 = vadd.f32 %v10006_v41, %v10040_v53 }
 0xd08   :  { %v10027_v13 = vpop.eup %8382  ;;  %v3156_v37 = vmul.f32 %v8379_v7, %v3149_v47  ;;  %v3143_v61 = vmul.f32 %v10016_v39, %v3136_v23  ;;  %8392 = vpow2.f32 %v3207_v46  ;;  %v3213_v47 = vmul.f32 1.442695, %v3202_v22 }
 0xd09   :  { %v3130_v55 = vmul.f32 1.0614054, %v10027_v13  ;;  %v3113_v1 = vadd.f32 1.0, %v3106_v12  ;;  %v3203_v12 = vsub.f32 0.0, %v3196_v43 }
 0xd0a   :  { %v3163_v32 = vadd.f32 -0.28449672, %v3156_v37  ;;  %v3150_v48 = vadd.f32 1.4214138, %v3143_v61  ;;  %v3039_v37 = vadd.f32 %v9958_v40, %v10040_v53 }
 0xd0b   :  { %v3137_v15 = vadd.f32 -1.4531521, %v3130_v55  ;;  %8394 = vrcp.f32 %v3113_v1  ;;  %v3079_v1 = vmul.f32 0.5, %v9960_v8  ;;  %v3215_v43 = vmul.f32 1.442695, %v3203_v12 }
 0xd0c   :  { %v10034_v50 = vpop.eup %8384  ;;  %v3170_v57 = vmul.f32 %v8379_v7, %v3163_v32  ;;  %v3157_v42 = vmul.f32 %v10016_v39, %v3150_v48  ;;  %8396 = vpow2.f32 %v3209_v44 }
 0xd0d   :  { %v3131_v30 = vmul.f32 1.0614054, %v10034_v50  ;;  %v3144_v5 = vmul.f32 %v10027_v13, %v3137_v15  ;;  %8398 = vpow2.f32 %v3211_v29 }
 0xd0e   :  { %v3177_v14 = vadd.f32 0.2548296, %v3170_v57  ;;  %v3164_v11 = vadd.f32 -0.28449672, %v3157_v42  ;;  %8400 = vpow2.f32 %v3213_v47  ;;  %v3080_v47 = vmul.f32 0.5, %v9968_v9 }
 0xd0f   :  { %v3138_v46 = vadd.f32 -1.4531521, %v3131_v30  ;;  %v3151_v58 = vadd.f32 1.4214138, %v3144_v5  ;;  %8402 = vpow2.f32 %v3215_v43 }
 0xd10   :  { %v10045_v20 = vpop.eup %8386  ;;  %v3184_v45 = vmul.f32 %v8379_v7, %v3177_v14  ;;  %v3171_v24 = vmul.f32 %v10016_v39, %v3164_v11  ;;  %v3197_v7 = vmul.f32 %v10022_v18, %v10022_v18 }
 0xd11   :  { %v8389_v23 = vpop.eup %8388  ;;  %v3145_v59 = vmul.f32 %v10034_v50, %v3138_v46  ;;  %v3132_v62 = vmul.f32 1.0614054, %v10045_v20  ;;  %v3158_v61 = vmul.f32 %v10027_v13, %v3151_v58 }
 0xd12   :  { %v3219_v55 = vmul.f32 %v8389_v23, %v3184_v45  ;;  %v3178_v44 = vadd.f32 0.2548296, %v3171_v24  ;;  %v3204_v45 = vsub.f32 0.0, %v3197_v7 }
 0xd13   :  { %v3152_v32 = vadd.f32 1.4214138, %v3145_v59  ;;  %v3139_v48 = vadd.f32 -1.4531521, %v3132_v62  ;;  %v3165_v15 = vadd.f32 -0.28449672, %v3158_v61 }
 0xd14   :  { %v10056_v29 = vpop.eup %8390  ;;  %v3226_v22 = vsub.f32 1.0, %v3219_v55  ;;  %v3185_v57 = vmul.f32 %v10016_v39, %v3178_v44 }
 0xd15   :  { %v3159_v40 = vmul.f32 %v10034_v50, %v3152_v32  ;;  %v3146_v42 = vmul.f32 %v10045_v20, %v3139_v48  ;;  %v8393_v30 = vpop.eup %8392  ;;  %v3172_v5 = vmul.f32 %v10027_v13, %v3165_v15  ;;  %v3133_v8 = vmul.f32 1.0614054, %v10056_v29 }
 0xd16   :  { %v3240_v14 = vsub.f32 0.0, %v3226_v22  ;;  %v3220_v11 = vmul.f32 %v8393_v30, %v3185_v57 }
 0xd17   :  { %v3166_v46 = vadd.f32 -0.28449672, %v3159_v40  ;;  %v3153_v58 = vadd.f32 1.4214138, %v3146_v42  ;;  %v3179_v23 = vadd.f32 0.2548296, %v3172_v5 }
 0xd18   :  { %v3140_v39 = vadd.f32 -1.4531521, %v3133_v8  ;;  %v3247_v24 = vsel %vm3233_vm7, %v3226_v22, %v3240_v14  ;;  %v3227_v59 = vsub.f32 1.0, %v3220_v11  ;;  %v10067_v61 = vpop.eup %8394  ;;  %v3217_v8 = vmul.f32 1.442695, %v3204_v45 }
 0xd19   :  { %v3173_v62 = vmul.f32 %v10034_v50, %v3166_v46  ;;  %v3160_v63 = vmul.f32 %v10045_v20, %v3153_v58  ;;  %v3254_v55 = vadd.f32 1.0, %v3247_v24  ;;  %v3186_v12 = vmul.f32 %v10027_v13, %v3179_v23  ;;  %v8397_v32 = vpop.eup %8396 }
 0xd1a   :  { %v3147_v44 = vmul.f32 %v10056_v29, %v3140_v39  ;;  %v3241_v9 = vsub.f32 0.0, %v3227_v59  ;;  %v3134_v40 = vmul.f32 1.0614054, %v10067_v61  ;;  %v8399_v42 = vpop.eup %8398  ;;  %v3045_v46 = vadd.f32 %v9962_v51, %v10040_v53 }
 0xd1b   :  { %v3180_v48 = vadd.f32 0.2548296, %v3173_v62  ;;  %v3167_v15 = vadd.f32 -0.28449672, %v3160_v63  ;;  %v3261_v7 = vmul.f32 %v3254_v55, %v3079_v1  ;;  %v3221_v22 = vmul.f32 %v8397_v32, %v3186_v12 }
 0xd1c   :  { %v3154_v57 = vadd.f32 1.4214138, %v3147_v44  ;;  %v3248_v30 = vsel %vm3234_vm9, %v3227_v59, %v3241_v9  ;;  %v3141_v23 = vadd.f32 -1.4531521, %v3134_v40  ;;  %8404 = vpow2.f32 %v3217_v8 }
 0xd1d   :  { %v3187_v5 = vmul.f32 %v10034_v50, %v3180_v48  ;;  %v3174_v13 = vmul.f32 %v10045_v20, %v3167_v15  ;;  %v3268_v14 = vmul.f32 %v3261_v7, %v3039_v37  ;;  %v3255_v43 = vadd.f32 1.0, %v3248_v30  ;;  %v8401_v50 = vpop.eup %8400 }
 0xd1e   :  { %v3228_v11 = vsub.f32 1.0, %v3221_v22  ;;  %v3161_v0 = vmul.f32 %v10056_v29, %v3154_v57  ;;  %v3148_v45 = vmul.f32 %v10067_v61, %v3141_v23  ;;  %v3081_v51 = vmul.f32 0.5, %v9976_v17 }
 0xd1f   :  { %v3222_v1 = vmul.f32 %v8399_v42, %v3187_v5  ;;  %v3181_v58 = vadd.f32 0.2548296, %v3174_v13  ;;  %v3262_v39 = vmul.f32 %v3255_v43, %v3080_v47  ;;  %8161 = vmatmul.mubr.f32.vlgmr.msra.gmra.mxu1 %v3268_v14  ;;  %v3051_v9 = vadd.f32 %v9970_v35, %v10040_v53  ;;  %v8403_v42 = vpop.eup %8402 }
 0xd20   :  { %v3242_v24 = vsub.f32 0.0, %v3228_v11  ;;  %v3168_v59 = vadd.f32 -0.28449672, %v3161_v0  ;;  %8163 = vmatprep.mubr.msk.f32.mxu1 %vm8456_vm1, %v8455_v6  ;;  %v3155_v32 = vadd.f32 1.4214138, %v3148_v45  ;;  %v3082_v22 = vmul.f32 0.5, %v9983_v16 }
 0xd21   :  { %v3229_v62 = vsub.f32 1.0, %v3222_v1  ;;  %v3188_v37 = vmul.f32 %v10045_v20, %v3181_v58  ;;  %v3269_v55 = vmul.f32 %v3262_v39, %v3045_v46  ;;  %v3083_v16 = vmul.f32 0.5, %v9994_v26 }
 0xd22   :  { %v3249_v63 = vsel %vm3235_vm10, %v3228_v11, %v3242_v24  ;;  %v3175_v47 = vmul.f32 %v10056_v29, %v3168_v59  ;;  %v3162_v17 = vmul.f32 %v10067_v61, %v3155_v32  ;;  %v3084_v24 = vmul.f32 0.5, %v10004_v4 }
 0xd23   :  { %v3256_v28 = vadd.f32 1.0, %v3249_v63  ;;  %v3243_v12 = vsub.f32 0.0, %v3229_v62  ;;  %v3223_v44 = vmul.f32 %v8401_v50, %v3188_v37  ;;  %8164 = vmatmul.mubr.f32.gmra.mxu1 %v3269_v55  ;;  %v7360_v55 = vld [vmem:[%s13554_s2 + $0x10] ss:$0 sm:$0xff] }
 0xd24   :  { %v3182_v20 = vadd.f32 0.2548296, %v3175_v47  ;;  %8166 = vmatprep.mubr.msk.f32.mxu1 %vm8456_vm1, %v8455_v6  ;;  %v3169_v35 = vadd.f32 -0.28449672, %v3162_v17 }
 0xd25   :  { %v3263_v48 = vmul.f32 %v3256_v28, %v3081_v51  ;;  %v3250_v15 = vsel %vm3236_vm11, %v3229_v62, %v3243_v12  ;;  %v3230_v7 = vsub.f32 1.0, %v3223_v44  ;;  %v3085_v51 = vmul.f32 0.5, %v10014_v3 }
 0xd26   :  { %v3257_v57 = vadd.f32 1.0, %v3250_v15  ;;  %v3189_v40 = vmul.f32 %v10056_v29, %v3182_v20  ;;  %v3176_v43 = vmul.f32 %v10067_v61, %v3169_v35 }
 0xd27   :  { %v3244_v30 = vsub.f32 0.0, %v3230_v7  ;;  %v3270_v5 = vmul.f32 %v3263_v48, %v3051_v9 }
 0xd28   :  { %v3264_v13 = vmul.f32 %v3257_v57, %v3082_v22  ;;  %v3224_v8 = vmul.f32 %v8403_v42, %v3189_v40  ;;  %v3183_v46 = vadd.f32 0.2548296, %v3176_v43 }
 0xd29   :  { %v3251_v14 = vsel %vm3237_vm12, %v3230_v7, %v3244_v30  ;;  %8167 = vmatmul.mubr.f32.gmra.mxu1 %v3270_v5  ;;  %v8405_v23 = vpop.eup %8404 }
 0xd2a   :  { %v3258_v11 = vadd.f32 1.0, %v3251_v14  ;;  %v3231_v0 = vsub.f32 1.0, %v3224_v8  ;;  %8169 = vmatprep.mubr.msk.f32.mxu1 %vm8456_vm1, %v8455_v6  ;;  %v3271_v29 = vmul.f32 %v3264_v13, %v3057_v25  ;;  %v3190_v2 = vmul.f32 %v10067_v61, %v3183_v46 }
 0xd2c   :  { %v3265_v1 = vmul.f32 %v3258_v11, %v3083_v16  ;;  %v3245_v58 = vsub.f32 0.0, %v3231_v0  ;;  %v3225_v50 = vmul.f32 %v8405_v23, %v3190_v2 }
 0xd2d   :  { %8170 = vmatmul.mubr.f32.gmra.mxu1 %v3271_v29 }
 0xd2e   :  { %v3252_v39 = vsel %vm3238_vm13, %v3231_v0, %v3245_v58  ;;  %8172 = vmatprep.mubr.msk.f32.mxu1 %vm8456_vm1, %v8455_v6  ;;  %v3272_v26 = vmul.f32 %v3265_v1, %v3063_v56  ;;  %v3232_v37 = vsub.f32 1.0, %v3225_v50  ;;  %v3584_v50 = vld [vmem:[%s13555_s5 + $0x8c8] sm:$0xff] }
 0xd2f   :  { %v3259_v59 = vadd.f32 1.0, %v3252_v39 }
 0xd30   :  { %v3246_v21 = vsub.f32 0.0, %v3232_v37 }
 0xd31   :  { %v3266_v62 = vmul.f32 %v3259_v59, %v3084_v24  ;;  %8173 = vmatmul.mubr.f32.gmra.mxu1 %v3272_v26  ;;  %v3590_v26 = vld [vmem:[%s13555_s5 + $0x968] sm:$0xff]  ;;  %v3589_v24 = vld [vmem:[%s13555_s5 + $0x960] sm:$0xff]  ;;  %v3592_v59 = vld [vmem:[%s13555_s5 + $0x978] sm:$0xff] }
 0xd32   :  { %8175 = vmatprep.mubr.msk.f32.mxu1 %vm8456_vm1, %v8455_v6  ;;  %v3253_v45 = vsel %vm3239_vm14, %v3232_v37, %v3246_v21  ;;  %3670 = vmatprep.subr.mxu0 %v3590_v26  ;;  %v3586_v37 = vld [vmem:[%s13555_s5 + $0x8d8] sm:$0xff]  ;;  %v3578_v21 = vld [vmem:[%s13555_s5 + $0x828] sm:$0xff]  ;;  %v3505_v26 = vld [vmem:[%s13555_s5 + $0xa0] sm:$0xff] }
 0xd33   :  { %v3273_v61 = vmul.f32 %v3266_v62, %v3069_v34  ;;  %v3260_v4 = vadd.f32 1.0, %v3253_v45  ;;  %3741 = vmatprep.subr.mxu1 %v3592_v59  ;;  %v3591_v34 = vld [vmem:[%s13555_s5 + $0x970] sm:$0xff]  ;;  %v3583_v62 = vld [vmem:[%s13555_s5 + $0x8c0] sm:$0xff]  ;;  %3671 = vmatpush1.msra.mxu0 %v3589_v24  ;;  %v3500_v59 = vld [vmem:[%s13555_s5 + $0x8] sm:$0xff] }
 0xd34   :  { %3742 = vmatpush1.msra.mxu1 %v3591_v34  ;;  %3672 = vmatprep.subr.mxu0 %v3584_v50  ;;  %v3577_v45 = vld [vmem:[%s13555_s5 + $0x820] sm:$0xff]  ;;  %v3507_v24 = vld [vmem:[%s13555_s5 + $0xb0] sm:$0xff]  ;;  %v3502_v50 = vld [vmem:[%s13555_s5 + $0x18] sm:$0xff] }
 0xd35   :  { %8176 = vmatmul.mubr.f32.gmra.mxu1 %v3273_v61  ;;  %v3267_v63 = vmul.f32 %v3260_v4, %v3085_v51  ;;  %v3585_v61 = vld [vmem:[%s13555_s5 + $0x8d0] sm:$0xff]  ;;  %3743 = vmatprep.subr.mxu1 %v3586_v37  ;;  %v3580_v51 = vld [vmem:[%s13555_s5 + $0x838] sm:$0xff]  ;;  %v3572_v4 = vld [vmem:[%s13555_s5 + $0x788] sm:$0xff] }
 0xd36   :  { %8178 = vmatprep.mubr.msk.f32.mxu1 %vm8456_vm1, %v8455_v6  ;;  %3673 = vmatpush1.msra.mxu0 %v3583_v62  ;;  %v3499_v34 = vld [vmem:[%s13555_s5] sm:$0xff] }
 0xd37   :  { %v3274_v47 = vmul.f32 %v3267_v63, %v3075_v60  ;;  %3744 = vmatpush1.msra.mxu1 %v3585_v61  ;;  %v3579_v60 = vld [vmem:[%s13555_s5 + $0x830] sm:$0xff]  ;;  %v3574_v63 = vld [vmem:[%s13555_s5 + $0x798] sm:$0xff]  ;;  %3674 = vmatprep.subr.mxu0 %v3578_v21 }
 0xd38   :  { %3745 = vmatprep.subr.mxu1 %v3580_v51  ;;  %3675 = vmatpush1.msra.mxu0 %v3577_v45 }
 0xd39   :  { %8179 = vmatmul.mubr.f32.gmra.mxu1 %v3274_v47  ;;  %v3571_v47 = vld [vmem:[%s13555_s5 + $0x780] sm:$0xff]  ;;  %3676 = vmatprep.subr.mxu0 %v3572_v4 }
 0xd3a   :  { %3746 = vmatpush1.msra.mxu1 %v3579_v60  ;;  %3677 = vmatpush1.msra.mxu0 %v3571_v47  ;;  %v3664_v47 = vld [vmem:[%s13555_s5 + $0x10f8] sm:$0xff] }
 0xd3b   :  { %3747 = vmatprep.subr.mxu1 %v3574_v63  ;;  %v3662_v63 = vld [vmem:[%s13555_s5 + $0x10e8] sm:$0xff] }
 0xddf   :  { %v3364_v28 = vpop.f32.mrf.mxu1 }
 0xde0   :  { %v3365_v18 = vadd.f32 %v7360_v55, %v3364_v28  ;;  %v3566_v28 = vld [vmem:[%s13555_s5 + $0x6e8] sm:$0xff] }
 0xde1   :  { %v8162_v12 = vpop.f32.mrf.mxu1  ;;  %3678 = vmatprep.subr.mxu0 %v3566_v28  ;;  %v3663_v28 = vld [vmem:[%s13555_s5 + $0x10f0] sm:$0xff] }
 0xde2   :  { %v3398_v44 = vadd.f32 %v3365_v18, %v9845_v27  ;;  %v3568_v18 = vld [vmem:[%s13555_s5 + $0x6f8] sm:$0xff]  ;;  %v3565_v12 = vld [vmem:[%s13555_s5 + $0x6e0] sm:$0xff] }
 0xde3   :  { %v3369_v3 = vpop.f32.mrf.mxu1  ;;  %3679 = vmatpush1.msra.mxu0 %v3565_v12  ;;  %v3658_v12 = vld [vmem:[%s13555_s5 + $0x1058] sm:$0xff] }
 0xde4   :  { %3405 = vst.msk [vmem:[#allocation2] sm:$0xff] %vm59_vm2, %v3398_v44  ;;  %v3370_v32 = vadd.f32 %v7360_v55, %v3369_v3  ;;  %v3567_v44 = vld [vmem:[%s13555_s5 + $0x6f0] sm:$0xff]  ;;  %v3560_v3 = vld [vmem:[%s13555_s5 + $0x648] sm:$0xff] }
 0xde5   :  { %v8165_v9 = vpop.f32.mrf.mxu1  ;;  %3680 = vmatprep.subr.mxu0 %v3560_v3  ;;  %v3657_v3 = vld [vmem:[%s13555_s5 + $0x1050] sm:$0xff] }
 0xde6   :  { %v3399_v20 = vadd.f32 %v3370_v32, %v9851_v52  ;;  %v3562_v32 = vld [vmem:[%s13555_s5 + $0x658] sm:$0xff]  ;;  %v3559_v9 = vld [vmem:[%s13555_s5 + $0x640] sm:$0xff] }
 0xde7   :  { %3681 = vmatpush1.msra.mxu0 %v3559_v9  ;;  %v3652_v9 = vld [vmem:[%s13555_s5 + $0xfb8] sm:$0xff] }
 0xde8   :  { %3406 = vst.msk [vmem:[#allocation2 + $0x8] sm:$0xff] %vm59_vm2, %v3399_v20  ;;  %v3561_v20 = vld [vmem:[%s13555_s5 + $0x650] sm:$0xff] }
 0xde9   :  { %v3374_v41 = vpop.f32.mrf.mxu1 }
 0xdea   :  { %v3375_v53 = vadd.f32 %v7360_v55, %v3374_v41  ;;  %v3554_v41 = vld [vmem:[%s13555_s5 + $0x5a8] sm:$0xff] }
 0xdeb   :  { %v8168_v48 = vpop.f32.mrf.mxu1  ;;  %v3412_v7 = vld [vmem:[#allocation2] sm:$0xff]  ;;  %3682 = vmatprep.subr.mxu0 %v3554_v41  ;;  %v3651_v41 = vld [vmem:[%s13555_s5 + $0xfb0] sm:$0xff] }
 0xdec   :  { %v3400_v15 = vadd.f32 %v3375_v53, %v9857_v31  ;;  %3413 = vst.msk [vmem:[#allocation3] sm:$0xff] %vm59_vm2, %v3412_v7  ;;  %v3556_v53 = vld [vmem:[%s13555_s5 + $0x5b8] sm:$0xff]  ;;  %v3553_v48 = vld [vmem:[%s13555_s5 + $0x5a0] sm:$0xff]  ;;  %v3548_v7 = vld [vmem:[%s13555_s5 + $0x508] sm:$0xff] }
 0xded   :  { %v3379_v17 = vpop.f32.mrf.mxu1  ;;  %3683 = vmatpush1.msra.mxu0 %v3553_v48  ;;  %v3646_v48 = vld [vmem:[%s13555_s5 + $0xf18] sm:$0xff] }
 0xdee   :  { %3407 = vst.msk [vmem:[#allocation2 + $0x10] sm:$0xff] %vm59_vm2, %v3400_v15  ;;  %v3380_v27 = vadd.f32 %v7360_v55, %v3379_v17  ;;  %v3555_v15 = vld [vmem:[%s13555_s5 + $0x5b0] sm:$0xff]  ;;  %v3550_v17 = vld [vmem:[%s13555_s5 + $0x518] sm:$0xff]  ;;  %3684 = vmatprep.subr.mxu0 %v3548_v7 }
 0xdef   :  { %v8171_v22 = vpop.f32.mrf.mxu1  ;;  %v3414_v40 = vld [vmem:[#allocation2 + $0x8] sm:$0xff]  ;;  %v3645_v7 = vld [vmem:[%s13555_s5 + $0xf10] sm:$0xff] }
 0xdf0   :  { %v3401_v57 = vadd.f32 %v3380_v27, %v9863_v36  ;;  %3416 = vrot.lane.b32.xlu0 %v3414_v40, %s8464_s22  ;;  %v3547_v27 = vld [vmem:[%s13555_s5 + $0x500] sm:$0xff]  ;;  %v3549_v22 = vld [vmem:[%s13555_s5 + $0x510] sm:$0xff]  ;;  %v3544_v40 = vld [vmem:[%s13555_s5 + $0x478] sm:$0xff] }
 0xdf1   :  { %v3384_v42 = vpop.f32.mrf.mxu1  ;;  %3685 = vmatpush1.msra.mxu0 %v3547_v27  ;;  %v3640_v27 = vld [vmem:[%s13555_s5 + $0xe78] sm:$0xff] }
 0xdf2   :  { %3408 = vst.msk [vmem:[#allocation2 + $0x18] sm:$0xff] %vm59_vm2, %v3401_v57  ;;  %v3385_v52 = vadd.f32 %v7360_v55, %v3384_v42  ;;  %v3542_v57 = vld [vmem:[%s13555_s5 + $0x468] sm:$0xff]  ;;  %v3541_v42 = vld [vmem:[%s13555_s5 + $0x460] sm:$0xff] }
 0xdf3   :  { %v8174_v30 = vpop.f32.mrf.mxu1  ;;  %3686 = vmatprep.subr.mxu0 %v3542_v57  ;;  %v3639_v57 = vld [vmem:[%s13555_s5 + $0xe70] sm:$0xff] }
 0xdf4   :  { %v3402_v31 = vadd.f32 %v3385_v52, %v9869_v33  ;;  %v3543_v52 = vld [vmem:[%s13555_s5 + $0x470] sm:$0xff]  ;;  %v3536_v30 = vld [vmem:[%s13555_s5 + $0x3c8] sm:$0xff]  ;;  %3687 = vmatpush1.msra.mxu0 %v3541_v42  ;;  %v3634_v42 = vld [vmem:[%s13555_s5 + $0xdd8] sm:$0xff] }
 0xdf5   :  { %v3389_v35 = vpop.f32.mrf.mxu1  ;;  %v3421_v5 = vld [vmem:[#allocation2 + $0x10] sm:$0xff]  ;;  %3688 = vmatprep.subr.mxu0 %v3536_v30 }
 0xdf6   :  { %3409 = vst.msk [vmem:[#allocation2 + $0x20] sm:$0xff] %vm59_vm2, %v3402_v31  ;;  %v3390_v25 = vadd.f32 %v7360_v55, %v3389_v35  ;;  %3423 = vrot.lane.b32.xlu1 %v3421_v5, %s8459_s18  ;;  %v3538_v31 = vld [vmem:[%s13555_s5 + $0x3d8] sm:$0xff]  ;;  %v3535_v35 = vld [vmem:[%s13555_s5 + $0x3c0] sm:$0xff]  ;;  %v3537_v5 = vld [vmem:[%s13555_s5 + $0x3d0] sm:$0xff] }
 0xdf7   :  { %v8177_v13 = vpop.f32.mrf.mxu1  ;;  %3689 = vmatpush1.msra.mxu0 %v3535_v35  ;;  %v3633_v30 = vld [vmem:[%s13555_s5 + $0xdd0] sm:$0xff]  ;;  %v3628_v35 = vld [vmem:[%s13555_s5 + $0xd38] sm:$0xff] }
 0xdf8   :  { %v3403_v36 = vadd.f32 %v3390_v25, %v9875_v19  ;;  %v3530_v25 = vld [vmem:[%s13555_s5 + $0x328] sm:$0xff]  ;;  %v3532_v13 = vld [vmem:[%s13555_s5 + $0x338] sm:$0xff] }
 0xdf9   :  { %v3394_v8 = vpop.f32.mrf.mxu1  ;;  %v3428_v0 = vld [vmem:[#allocation2 + $0x18] sm:$0xff]  ;;  %3690 = vmatprep.subr.mxu0 %v3530_v25  ;;  %v3627_v25 = vld [vmem:[%s13555_s5 + $0xd30] sm:$0xff] }
 0xdfa   :  { %3410 = vst.msk [vmem:[#allocation2 + $0x28] sm:$0xff] %vm59_vm2, %v3403_v36  ;;  %v3395_v14 = vadd.f32 %v7360_v55, %v3394_v8  ;;  %v3573_v55 = vld [vmem:[%s13555_s5 + $0x790] sm:$0xff]  ;;  %v3529_v36 = vld [vmem:[%s13555_s5 + $0x320] sm:$0xff] }
 0xdfb   :  { %v8180_v16 = vpop.f32.mrf.mxu1  ;;  %3748 = vmatpush1.msra.mxu1 %v3573_v55  ;;  %v3531_v8 = vld [vmem:[%s13555_s5 + $0x330] sm:$0xff]  ;;  %3691 = vmatpush1.msra.mxu0 %v3529_v36  ;;  %v3656_v55 = vld [vmem:[%s13555_s5 + $0x1048] sm:$0xff]  ;;  %v3622_v36 = vld [vmem:[%s13555_s5 + $0xc98] sm:$0xff] }
 0xdfc   :  { %v3404_v33 = vadd.f32 %v3395_v14, %v9881_v10  ;;  %3749 = vmatprep.subr.mxu1 %v3568_v18  ;;  %v3524_v14 = vld [vmem:[%s13555_s5 + $0x288] sm:$0xff]  ;;  %v3523_v16 = vld [vmem:[%s13555_s5 + $0x280] sm:$0xff] }
 0xdfd   :  { %v3435_v43 = vld [vmem:[#allocation2 + $0x20] sm:$0xff]  ;;  %3750 = vmatpush1.msra.mxu1 %v3567_v44  ;;  %3692 = vmatprep.subr.mxu0 %v3524_v14  ;;  %v3650_v44 = vld [vmem:[%s13555_s5 + $0xfa8] sm:$0xff]  ;;  %v3621_v14 = vld [vmem:[%s13555_s5 + $0xc90] sm:$0xff] }
 0xdfe   :  { %3436 = vst.msk [vmem:[#allocation3 + $0x8] sm:$0xff] %vm59_vm2, %v3435_v43  ;;  %3411 = vst.msk [vmem:[#allocation2 + $0x30] sm:$0xff] %vm59_vm2, %v3404_v33  ;;  %3751 = vmatprep.subr.mxu1 %v3562_v32  ;;  %v3526_v43 = vld [vmem:[%s13555_s5 + $0x298] sm:$0xff]  ;;  %v3525_v33 = vld [vmem:[%s13555_s5 + $0x290] sm:$0xff]  ;;  %3693 = vmatpush1.msra.mxu0 %v3523_v16 }
 0xdff   :  { %3752 = vmatpush1.msra.mxu1 %v3561_v20  ;;  %v3655_v18 = vld [vmem:[%s13555_s5 + $0x1040] sm:$0xff]  ;;  %v3644_v20 = vld [vmem:[%s13555_s5 + $0xf08] sm:$0xff]  ;;  %v3616_v16 = vld [vmem:[%s13555_s5 + $0xbf8] sm:$0xff] }
 0xe00   :  { %3753 = vmatprep.subr.mxu1 %v3556_v53  ;;  %v3649_v32 = vld [vmem:[%s13555_s5 + $0xfa0] sm:$0xff] }
 0xe01   :  { %v3437_v11 = vld [vmem:[#allocation2 + $0x28] sm:$0xff]  ;;  %3754 = vmatpush1.msra.mxu1 %v3555_v15  ;;  %v3643_v53 = vld [vmem:[%s13555_s5 + $0xf00] sm:$0xff] }
 0xe02   :  { %3439 = vrot.lane.b32.xlu1 %v3437_v11, %s8464_s22  ;;  %3755 = vmatprep.subr.mxu1 %v3550_v17  ;;  %v3518_v11 = vld [vmem:[%s13555_s5 + $0x1e8] sm:$0xff]  ;;  %v3637_v17 = vld [vmem:[%s13555_s5 + $0xe60] sm:$0xff] }
 0xe03   :  { %3756 = vmatpush1.msra.mxu1 %v3549_v22  ;;  %3694 = vmatprep.subr.mxu0 %v3518_v11  ;;  %v3638_v15 = vld [vmem:[%s13555_s5 + $0xe68] sm:$0xff]  ;;  %v3615_v11 = vld [vmem:[%s13555_s5 + $0xbf0] sm:$0xff] }
 0xe04   :  { %3757 = vmatprep.subr.mxu1 %v3544_v40  ;;  %v3632_v22 = vld [vmem:[%s13555_s5 + $0xdc8] sm:$0xff]  ;;  %v3631_v40 = vld [vmem:[%s13555_s5 + $0xdc0] sm:$0xff] }
 0xe05   :  { %v3443_v29 = vld [vmem:[#allocation2 + $0x30] sm:$0xff]  ;;  %3758 = vmatpush1.msra.mxu1 %v3543_v52  ;;  %v3626_v52 = vld [vmem:[%s13555_s5 + $0xd28] sm:$0xff] }
 0xe06   :  { %3430 = vrot.lane.b32.xlu1 %v3428_v0, %s8463_s21  ;;  %3445 = vrot.lane.b32.xlu0 %v3443_v29, %s8459_s18  ;;  %v3520_v0 = vld [vmem:[%s13555_s5 + $0x1f8] sm:$0xff]  ;;  %v3517_v29 = vld [vmem:[%s13555_s5 + $0x1e0] sm:$0xff] }
 0xe07   :  { %3759 = vmatprep.subr.mxu1 %v3538_v31  ;;  %3695 = vmatpush1.msra.mxu0 %v3517_v29  ;;  %v3625_v31 = vld [vmem:[%s13555_s5 + $0xd20] sm:$0xff]  ;;  %v3610_v29 = vld [vmem:[%s13555_s5 + $0xb58] sm:$0xff] }
 0xe08   :  { %3760 = vmatpush1.msra.mxu1 %v3537_v5  ;;  %v3620_v5 = vld [vmem:[%s13555_s5 + $0xc88] sm:$0xff] }
 0xe09   :  { %3761 = vmatprep.subr.mxu1 %v3532_v13  ;;  %v3619_v13 = vld [vmem:[%s13555_s5 + $0xc80] sm:$0xff] }
 0xe0a   :  { %3762 = vmatpush1.msra.mxu1 %v3531_v8  ;;  %v3614_v8 = vld [vmem:[%s13555_s5 + $0xbe8] sm:$0xff] }
 0xe0b   :  { %3763 = vmatprep.subr.mxu1 %v3526_v43  ;;  %v3613_v43 = vld [vmem:[%s13555_s5 + $0xbe0] sm:$0xff] }
 0xe0c   :  { %3764 = vmatpush1.msra.mxu1 %v3525_v33  ;;  %v3608_v33 = vld [vmem:[%s13555_s5 + $0xb48] sm:$0xff] }
 0xe0d   :  { %3765 = vmatprep.subr.mxu1 %v3520_v0  ;;  %v3607_v0 = vld [vmem:[%s13555_s5 + $0xb40] sm:$0xff] }
 0xe62   :  { %v3417_v19 = vpop.permute.xlu0 %3416 }
 0xe63   :  { %3420 = vst.msk [vmem:[#allocation3] sm:$0xff] %vm3419_vm15, %v3417_v19  ;;  %v3519_v19 = vld [vmem:[%s13555_s5 + $0x1f0] sm:$0xff] }
 0xe64   :  { %3766 = vmatpush1.msra.mxu1 %v3519_v19  ;;  %v3602_v19 = vld [vmem:[%s13555_s5 + $0xaa8] sm:$0xff] }
 0xe68   :  { %v3424_v46 = vpop.permute.xlu1 %3423 }
 0xe69   :  { %3427 = vst.msk [vmem:[#allocation3] sm:$0xff] %vm3426_vm0, %v3424_v46  ;;  %v3512_v46 = vld [vmem:[%s13555_s5 + $0x148] sm:$0xff] }
 0xe6a   :  { %3696 = vmatprep.subr.mxu0 %v3512_v46  ;;  %v3609_v46 = vld [vmem:[%s13555_s5 + $0xb50] sm:$0xff] }
 0xe74   :  { %v3440_v56 = vpop.permute.xlu1 %3439 }
 0xe75   :  { %3442 = vst.msk [vmem:[#allocation3 + $0x8] sm:$0xff] %vm3419_vm15, %v3440_v56  ;;  %v3514_v56 = vld [vmem:[%s13555_s5 + $0x158] sm:$0xff] }
 0xe76   :  { %3767 = vmatprep.subr.mxu1 %v3514_v56  ;;  %v3601_v56 = vld [vmem:[%s13555_s5 + $0xaa0] sm:$0xff] }
 0xe78   :  { %v3431_v10 = vpop.permute.xlu1 %3430  ;;  %v3446_v1 = vpop.permute.xlu0 %3445 }
 0xe79   :  { %3434 = vst.msk [vmem:[#allocation3] sm:$0xff] %vm3433_vm3, %v3431_v10  ;;  %v3511_v10 = vld [vmem:[%s13555_s5 + $0x140] sm:$0xff] }
 0xe7a   :  { %3448 = vst.msk [vmem:[#allocation3 + $0x8] sm:$0xff] %vm3426_vm0, %v3446_v1  ;;  %v3513_v1 = vld [vmem:[%s13555_s5 + $0x150] sm:$0xff]  ;;  %3697 = vmatpush1.msra.mxu0 %v3511_v10  ;;  %v3604_v10 = vld [vmem:[%s13555_s5 + $0xab8] sm:$0xff] }
 0xe7b   :  { %3768 = vmatpush1.msra.mxu1 %v3513_v1  ;;  %v3596_v1 = vld [vmem:[%s13555_s5 + $0xa08] sm:$0xff] }
 0xe80   :  { %v10143_v2 = vld [vmem:[#allocation3] sm:$0xff] }
 0xe81   :  { %v10141_v58 = vld [vmem:[#allocation3 + $0x8] sm:$0xff] }
 0xe82   :  { %v3454_v23 = vsel %vm3453_vm4, %v10141_v58, 0.0 }
 0xe83   :  { %v3455_v39 = vadd.f32 %v3454_v23, %v10143_v2  ;;  %v3506_v23 = vld [vmem:[%s13555_s5 + $0xa8] sm:$0xff] }
 0xe84   :  { %3698 = vmatprep.subr.mxu0 %v3506_v23  ;;  %v3603_v23 = vld [vmem:[%s13555_s5 + $0xab0] sm:$0xff] }
 0xe85   :  { %3456 = vadd.xlane.f32.xlu0 %v3455_v39  ;;  %v3508_v39 = vld [vmem:[%s13555_s5 + $0xb8] sm:$0xff]  ;;  %3699 = vmatpush1.msra.mxu0 %v3505_v26 }
 0xe86   :  { %3769 = vmatprep.subr.mxu1 %v3508_v39  ;;  %3700 = vmatprep.subr.mxu0 %v3500_v59  ;;  %v3595_v39 = vld [vmem:[%s13555_s5 + $0xa00] sm:$0xff]  ;;  %v3598_v26 = vld [vmem:[%s13555_s5 + $0xa18] sm:$0xff]  ;;  %v3594_v59 = vld [vmem:[%s13555_s5 + $0x988] sm:$0xff] }
 0xe87   :  { %3770 = vmatpush1.msra.mxu1 %v3507_v24  ;;  %3701 = vmatpush1.msra.mxu0 %v3499_v34  ;;  %v3597_v24 = vld [vmem:[%s13555_s5 + $0xa10] sm:$0xff] }
 0xe88   :  { %3771 = vmatprep.subr.mxu1 %v3502_v50  ;;  %3710 = vmatprep.subr.mxu0 %v3662_v63 }
 0xf0e   :  { %v3457_v62 = vpop.xlane.xlu0 %3456 }
 0xf0f   :  { %v3459_v37 = vmul.f32 0.004464286, %v3457_v62 }
 0xf11   :  { %v10338_v21 = vsub.f32 %v10143_v2, %v3459_v37  ;;  %v10341_v61 = vsub.f32 %v10141_v58, %v3459_v37  ;;  %v3501_v2 = vld [vmem:[%s13555_s5 + $0x10] sm:$0xff]  ;;  %v3661_v58 = vld [vmem:[%s13555_s5 + $0x10e0] sm:$0xff] }
 0xf12   :  { %3772 = vmatpush1.msra.mxu1 %v3501_v2  ;;  %3711 = vmatpush2.msra.mxu0 %v3661_v58  ;;  %v3451_v37 = vld [vmem:[%s13554_s2 + $0x11] sm:$0x3] }
 0xf13   :  { %v3462_v45 = vmul.f32 %v10338_v21, %v10338_v21  ;;  %v3463_v51 = vmul.f32 %v10341_v61, %v10341_v61  ;;  %3781 = vmatprep.subr.mxu1 %v3664_v47  ;;  %3712 = vmatprep.subr.mxu0 %v3656_v55 }
 0xf14   :  { %3782 = vmatpush2.msra.mxu1 %v3663_v28  ;;  %3713 = vmatpush2.msra.mxu0 %v3655_v18 }
 0xf15   :  { %v3464_v4 = vsel %vm3453_vm4, %v3463_v51, 0.0  ;;  %3783 = vmatprep.subr.mxu1 %v3658_v12  ;;  %3714 = vmatprep.subr.mxu0 %v3650_v44  ;;  %v3477_v51 = vrot.slane %v3451_v37, %v10031_v38  ;;  %v3593_v44 = vld [vmem:[%s13555_s5 + $0x980] sm:$0xff] }
 0xf16   :  { %v3465_v60 = vadd.f32 %v3464_v4, %v3462_v45  ;;  %3784 = vmatpush2.msra.mxu1 %v3657_v3  ;;  %3715 = vmatpush2.msra.mxu0 %v3649_v32  ;;  %v3452_v45 = vld [vmem:[%s13554_s2 + $0x13] sm:$0x3]  ;;  %v3481_v4 = vrot.slane %v3451_v37, %v9949_v54  ;;  %v3582_v3 = vld [vmem:[%s13555_s5 + $0x848] sm:$0xff]  ;;  %v3581_v32 = vld [vmem:[%s13555_s5 + $0x840] sm:$0xff] }
 0xf17   :  { %3785 = vmatprep.subr.mxu1 %v3652_v9  ;;  %3716 = vmatprep.subr.mxu0 %v3644_v20  ;;  %v3490_v58 = vrot.slane %v3452_v45, %v10031_v38  ;;  %v3494_v47 = vrot.slane %v3452_v45, %v9949_v54  ;;  %v3576_v9 = vld [vmem:[%s13555_s5 + $0x7a8] sm:$0xff]  ;;  %v3575_v20 = vld [vmem:[%s13555_s5 + $0x7a0] sm:$0xff] }
 0xf18   :  { %3466 = vadd.xlane.f32.xlu1 %v3465_v60  ;;  %3786 = vmatpush2.msra.mxu1 %v3651_v41  ;;  %v3570_v41 = vld [vmem:[%s13555_s5 + $0x708] sm:$0xff]  ;;  %v3617_v45 = vld [vmem:[%s13555_s5 + $0xc00] sm:$0xff] }
 0xf19   :  { %3717 = vmatpush2.msra.mxu0 %v3643_v53  ;;  %3787 = vmatprep.subr.mxu1 %v3646_v48  ;;  %v3569_v53 = vld [vmem:[%s13555_s5 + $0x700] sm:$0xff]  ;;  %v3564_v48 = vld [vmem:[%s13555_s5 + $0x668] sm:$0xff] }
 0xf1a   :  { %3718 = vmatprep.subr.mxu0 %v3638_v15  ;;  %3788 = vmatpush2.msra.mxu1 %v3645_v7  ;;  %v3563_v15 = vld [vmem:[%s13555_s5 + $0x660] sm:$0xff]  ;;  %v3558_v7 = vld [vmem:[%s13555_s5 + $0x5c8] sm:$0xff] }
 0xf1b   :  { %3719 = vmatpush2.msra.mxu0 %v3637_v17  ;;  %3789 = vmatprep.subr.mxu1 %v3640_v27  ;;  %v3557_v17 = vld [vmem:[%s13555_s5 + $0x5c0] sm:$0xff]  ;;  %v3552_v27 = vld [vmem:[%s13555_s5 + $0x528] sm:$0xff] }
 0xf1c   :  { %3720 = vmatprep.subr.mxu0 %v3632_v22  ;;  %3790 = vmatpush2.msra.mxu1 %v3639_v57  ;;  %v3551_v22 = vld [vmem:[%s13555_s5 + $0x520] sm:$0xff]  ;;  %v3546_v57 = vld [vmem:[%s13555_s5 + $0x488] sm:$0xff] }
 0xf1d   :  { %3721 = vmatpush2.msra.mxu0 %v3631_v40  ;;  %3791 = vmatprep.subr.mxu1 %v3634_v42  ;;  %v3545_v40 = vld [vmem:[%s13555_s5 + $0x480] sm:$0xff]  ;;  %v3540_v42 = vld [vmem:[%s13555_s5 + $0x3e8] sm:$0xff] }
 0xf1e   :  { %3722 = vmatprep.subr.mxu0 %v3626_v52  ;;  %3792 = vmatpush2.msra.mxu1 %v3633_v30  ;;  %v3539_v52 = vld [vmem:[%s13555_s5 + $0x3e0] sm:$0xff]  ;;  %v3534_v30 = vld [vmem:[%s13555_s5 + $0x348] sm:$0xff] }
 0xf1f   :  { %3723 = vmatpush2.msra.mxu0 %v3625_v31  ;;  %3793 = vmatprep.subr.mxu1 %v3628_v35  ;;  %v3533_v31 = vld [vmem:[%s13555_s5 + $0x340] sm:$0xff]  ;;  %v3528_v35 = vld [vmem:[%s13555_s5 + $0x2a8] sm:$0xff] }
 0xf20   :  { %3724 = vmatprep.subr.mxu0 %v3620_v5  ;;  %3794 = vmatpush2.msra.mxu1 %v3627_v25  ;;  %v3527_v5 = vld [vmem:[%s13555_s5 + $0x2a0] sm:$0xff]  ;;  %v3522_v25 = vld [vmem:[%s13555_s5 + $0x208] sm:$0xff] }
 0xf21   :  { %3725 = vmatpush2.msra.mxu0 %v3619_v13  ;;  %3795 = vmatprep.subr.mxu1 %v3622_v36  ;;  %v3521_v13 = vld [vmem:[%s13555_s5 + $0x200] sm:$0xff]  ;;  %v3516_v36 = vld [vmem:[%s13555_s5 + $0x168] sm:$0xff] }
 0xf22   :  { %3726 = vmatprep.subr.mxu0 %v3614_v8  ;;  %3796 = vmatpush2.msra.mxu1 %v3621_v14  ;;  %v3515_v8 = vld [vmem:[%s13555_s5 + $0x160] sm:$0xff]  ;;  %v3510_v14 = vld [vmem:[%s13555_s5 + $0xc8] sm:$0xff] }
 0xf23   :  { %3727 = vmatpush2.msra.mxu0 %v3613_v43  ;;  %3797 = vmatprep.subr.mxu1 %v3616_v16  ;;  %v3509_v43 = vld [vmem:[%s13555_s5 + $0xc0] sm:$0xff]  ;;  %v3504_v16 = vld [vmem:[%s13555_s5 + $0x28] sm:$0xff] }
 0xf24   :  { %3728 = vmatprep.subr.mxu0 %v3608_v33  ;;  %3798 = vmatpush2.msra.mxu1 %v3615_v11  ;;  %v3503_v33 = vld [vmem:[%s13555_s5 + $0x20] sm:$0xff]  ;;  %v3666_v11 = vld [vmem:[%s13555_s5 + $0x1108] sm:$0xff] }
 0xf25   :  { %3729 = vmatpush2.msra.mxu0 %v3607_v0  ;;  %3799 = vmatprep.subr.mxu1 %v3610_v29  ;;  %v3665_v0 = vld [vmem:[%s13555_s5 + $0x1100] sm:$0xff]  ;;  %v3660_v29 = vld [vmem:[%s13555_s5 + $0x1068] sm:$0xff] }
 0xf26   :  { %3730 = vmatprep.subr.mxu0 %v3602_v19  ;;  %3800 = vmatpush2.msra.mxu1 %v3609_v46  ;;  %v3659_v19 = vld [vmem:[%s13555_s5 + $0x1060] sm:$0xff]  ;;  %v3654_v46 = vld [vmem:[%s13555_s5 + $0xfc8] sm:$0xff] }
 0xf27   :  { %3731 = vmatpush2.msra.mxu0 %v3601_v56  ;;  %3801 = vmatprep.subr.mxu1 %v3604_v10  ;;  %v3653_v56 = vld [vmem:[%s13555_s5 + $0xfc0] sm:$0xff]  ;;  %v3648_v10 = vld [vmem:[%s13555_s5 + $0xf28] sm:$0xff] }
 0xf28   :  { %3732 = vmatprep.subr.mxu0 %v3596_v1  ;;  %3802 = vmatpush2.msra.mxu1 %v3603_v23  ;;  %v3647_v1 = vld [vmem:[%s13555_s5 + $0xf20] sm:$0xff]  ;;  %v3642_v23 = vld [vmem:[%s13555_s5 + $0xe88] sm:$0xff] }
 0xf29   :  { %3733 = vmatpush2.msra.mxu0 %v3595_v39  ;;  %3803 = vmatprep.subr.mxu1 %v3598_v26  ;;  %v3641_v39 = vld [vmem:[%s13555_s5 + $0xe80] sm:$0xff]  ;;  %v3636_v26 = vld [vmem:[%s13555_s5 + $0xde8] sm:$0xff] }
 0xf2a   :  { %3804 = vmatpush2.msra.mxu1 %v3597_v24  ;;  %3812 = vmatprep.subr.mxu0 %v3594_v59  ;;  %v3635_v24 = vld [vmem:[%s13555_s5 + $0xde0] sm:$0xff]  ;;  %v3630_v59 = vld [vmem:[%s13555_s5 + $0xd48] sm:$0xff] }
 0xf2b   :  { %8181 = vmatprep.subr.mxu1 %v8455_v6  ;;  %v3618_v37 = vld [vmem:[%s13555_s5 + $0xc08] sm:$0xff] }
 0xfa1   :  { %v3467_v50 = vpop.xlane.xlu1 %3466 }
 0xfa2   :  { %v3468_v34 = vmul.f32 0.004464286, %v3467_v50  ;;  %v3629_v50 = vld [vmem:[%s13555_s5 + $0xd40] sm:$0xff] }
 0xfa4   :  { %v3469_v62 = vadd.f32 1e-05, %v3468_v34  ;;  %v3624_v34 = vld [vmem:[%s13555_s5 + $0xca8] sm:$0xff] }
 0xfa6   :  { %8406 = vrsqrt.f32 %v3469_v62  ;;  %v3623_v62 = vld [vmem:[%s13555_s5 + $0xca0] sm:$0xff] }
 0xfb3   :  { %v8407_v60 = vpop.eup %8406 }
 0xfb4   :  { %v3471_v63 = vmul.f32 %v8407_v60, %v10338_v21  ;;  %v3472_v2 = vmul.f32 %v8407_v60, %v10341_v61  ;;  %v3588_v21 = vld [vmem:[%s13555_s5 + $0x8e8] sm:$0xff]  ;;  %v3587_v61 = vld [vmem:[%s13555_s5 + $0x8e0] sm:$0xff] }
 0xfb5   :  { %v3606_v60 = vld [vmem:[%s13555_s5 + $0xac8] sm:$0xff] }
 0xfb6   :  { %v3485_v55 = vmul.f32 %v3481_v4, %v3472_v2  ;;  %v3484_v28 = vmul.f32 %v3477_v51, %v3471_v63  ;;  %v3612_v51 = vld [vmem:[%s13555_s5 + $0xb68] sm:$0xff]  ;;  %v3611_v4 = vld [vmem:[%s13555_s5 + $0xb60] sm:$0xff] }
 0xfb7   :  { %v3605_v63 = vld [vmem:[%s13555_s5 + $0xac0] sm:$0xff]  ;;  %v3600_v2 = vld [vmem:[%s13555_s5 + $0xa28] sm:$0xff] }
 0xfb8   :  { %v10511_v18 = vadd.f32 %v3494_v47, %v3485_v55  ;;  %v10513_v12 = vadd.f32 %v3490_v58, %v3484_v28  ;;  %v3599_v58 = vld [vmem:[%s13555_s5 + $0xa20] sm:$0xff] }
 0xfba   :  { %7361 = vmatprep.mubr.msk.f32.mxu0 %vm3453_vm4, %v10511_v18  ;;  %7362 = vmatprep.mubr.msk.f32.mxu1 %vm3453_vm4, %v10511_v18 }
 0xfbb   :  { %3735 = vmatmul.mubr.f32.vlgmr.msra.gmra.mxu0 %v10513_v12  ;;  %3806 = vmatmul.mubr.f32.vlgmr.msra.gmra.mxu1 %v10513_v12 }
 0xfbc   :  { %3813 = vmatpush1.msra.mxu0 %v3593_v44  ;;  %7363 = vmatprep.mubr.msk.f32.mxu0 %vm3453_vm4, %v10511_v18 }
 0xfbd   :  { %3814 = vmatprep.subr.mxu0 %v3588_v21  ;;  %8183 = vmatprep.mubr.msk.f32.mxu1 %vm8456_vm1, %v8455_v6 }
 0xfbe   :  { %3815 = vmatpush1.msra.mxu0 %v3587_v61 }
 0xfbf   :  { %3816 = vmatprep.subr.mxu0 %v3582_v3 }
 0xfc0   :  { %3817 = vmatpush1.msra.mxu0 %v3581_v32 }
 0xfc1   :  { %3818 = vmatprep.subr.mxu0 %v3576_v9 }
 0xfc2   :  { %3819 = vmatpush1.msra.mxu0 %v3575_v20 }
 0xfc3   :  { %3820 = vmatprep.subr.mxu0 %v3570_v41 }
 0xfc4   :  { %3821 = vmatpush1.msra.mxu0 %v3569_v53 }
 0xfc5   :  { %3822 = vmatprep.subr.mxu0 %v3564_v48 }
 0xfc6   :  { %3823 = vmatpush1.msra.mxu0 %v3563_v15 }
 0xfc7   :  { %3824 = vmatprep.subr.mxu0 %v3558_v7 }
 0xfc8   :  { %3825 = vmatpush1.msra.mxu0 %v3557_v17 }
 0xfc9   :  { %3826 = vmatprep.subr.mxu0 %v3552_v27 }
 0xfca   :  { %3827 = vmatpush1.msra.mxu0 %v3551_v22 }
 0xfcb   :  { %3828 = vmatprep.subr.mxu0 %v3546_v57 }
 0xfcc   :  { %3829 = vmatpush1.msra.mxu0 %v3545_v40 }
 0xfcd   :  { %3830 = vmatprep.subr.mxu0 %v3540_v42 }
 0xfce   :  { %3831 = vmatpush1.msra.mxu0 %v3539_v52 }
 0xfcf   :  { %3832 = vmatprep.subr.mxu0 %v3534_v30 }
 0xfd0   :  { %3833 = vmatpush1.msra.mxu0 %v3533_v31 }
 0xfd1   :  { %3834 = vmatprep.subr.mxu0 %v3528_v35 }
 0xfd2   :  { %3835 = vmatpush1.msra.mxu0 %v3527_v5 }
 0xfd3   :  { %3836 = vmatprep.subr.mxu0 %v3522_v25 }
 0xfd4   :  { %3837 = vmatpush1.msra.mxu0 %v3521_v13 }
 0xfd5   :  { %3838 = vmatprep.subr.mxu0 %v3516_v36 }
 0xfd6   :  { %3839 = vmatpush1.msra.mxu0 %v3515_v8 }
 0xfd7   :  { %3840 = vmatprep.subr.mxu0 %v3510_v14 }
 0xfd8   :  { %3841 = vmatpush1.msra.mxu0 %v3509_v43 }
 0xfd9   :  { %3842 = vmatprep.subr.mxu0 %v3504_v16 }
 0xfda   :  { %3843 = vmatpush1.msra.mxu0 %v3503_v33 }
 0xfdb   :  { %3852 = vmatprep.subr.mxu0 %v3666_v11 }
 0xfdc   :  { %3853 = vmatpush2.msra.mxu0 %v3665_v0 }
 0xfdd   :  { %3854 = vmatprep.subr.mxu0 %v3660_v29 }
 0xfde   :  { %3855 = vmatpush2.msra.mxu0 %v3659_v19 }
 0xfdf   :  { %3856 = vmatprep.subr.mxu0 %v3654_v46 }
 0xfe0   :  { %3857 = vmatpush2.msra.mxu0 %v3653_v56 }
 0xfe1   :  { %3858 = vmatprep.subr.mxu0 %v3648_v10 }
 0xfe2   :  { %3859 = vmatpush2.msra.mxu0 %v3647_v1 }
 0xfe3   :  { %3860 = vmatprep.subr.mxu0 %v3642_v23 }
 0xfe4   :  { %3861 = vmatpush2.msra.mxu0 %v3641_v39 }
 0xfe5   :  { %3862 = vmatprep.subr.mxu0 %v3636_v26 }
 0xfe6   :  { %3863 = vmatpush2.msra.mxu0 %v3635_v24 }
 0xfe7   :  { %3864 = vmatprep.subr.mxu0 %v3630_v59 }
 0xfe8   :  { %3865 = vmatpush2.msra.mxu0 %v3629_v50 }
 0xfe9   :  { %3866 = vmatprep.subr.mxu0 %v3624_v34 }
 0xfea   :  { %3867 = vmatpush2.msra.mxu0 %v3623_v62 }
 0xfeb   :  { %3868 = vmatprep.subr.mxu0 %v3618_v37 }
 0xfec   :  { %3869 = vmatpush2.msra.mxu0 %v3617_v45 }
 0xfed   :  { %3870 = vmatprep.subr.mxu0 %v3612_v51 }
 0xfee   :  { %3871 = vmatpush2.msra.mxu0 %v3611_v4 }
 0xfef   :  { %3872 = vmatprep.subr.mxu0 %v3606_v60 }
 0xff0   :  { %3873 = vmatpush2.msra.mxu0 %v3605_v63 }
 0xff1   :  { %3874 = vmatprep.subr.mxu0 %v3600_v2 }
 0xff2   :  { %3875 = vmatpush2.msra.mxu0 %v3599_v58 }
 0xff3   :  { %3877 = vmatmul.mubr.f32.vlgmr.msra.gmra.mxu0 %v10513_v12  ;;  %8216 = vmatprep.subr.mxu0 %v8455_v6 }
 0xff4   :  { %8218 = vmatprep.mubr.msk.f32.mxu0 %vm8456_vm1, %v8455_v6 }
0x107b   :  { %v3807_v47 = vpop.f32.mrf.mxu1  ;;  %v3736_v55 = vpop.f32.mrf.mxu0 }
0x107c   :  { %4062 = vrot.lane.b32.xlu1 %v3807_v47, %s8459_s18  ;;  %8182 = vmatpush3.xpose.msk.msra.mxu1 %vm905_vm8, %v3807_v47 }
0x107d   :  { %8186 = vmatprep.subr.mxu1 %v8455_v6  ;;  %v3738_v28 = vpop.f32.mrf.mxu0  ;;  %v10701_v21 = vpop.f32.mrf.mxu1 }
0x107f   :  { %8184 = vmatmul.mubr.msk.f32.vlgmr.msra.gmra.mxu1 %vm905_vm8, %v3736_v55 }
0x1080   :  { %8188 = vmatprep.mubr.msk.f32.mxu1 %vm8456_vm1, %v8455_v6 }
0x10b3   :  { %v3878_v44 = vpop.f32.mrf.mxu0 }
0x10b4   :  { %8187 = vmatpush3.msra.mxu1 %v3878_v44 }
0x10b5   :  { %8191 = vmatprep.subr.mxu1 %v8455_v6  ;;  %v3880_v11 = vpop.f32.mrf.mxu0 }
0x10ee   :  { %v4063_v22 = vpop.permute.xlu1 %4062 }
0x113f   :  { %v3964_v61 = vpop.f32.mrf.mxu1 }
0x1140   :  { %v3968_v3 = vmul.f32 0.125, %v3964_v61 }
0x1141   :  { %v8185_v32 = vpop.f32.mrf.mxu1 }
0x1142   :  { %v3970_v9 = vsel %vm3969_vm5, %v3968_v3, -inf }
0x1143   :  { %3971 = vmax.xlane.f32.xlu0 %v3970_v9 }
0x11cc   :  { %v3972_v20 = vpop.xlane.xlu0 %3971 }
0x11cd   :  { %v3973_v41 = vsub.f32 %v3968_v3, %v3972_v20  ;;  %v4608_v20 = vld [vmem:[%s13556_s6 + $0xf8] sm:$0xff] }
0x11cf   :  { %v3974_v53 = vmul.f32 1.442695, %v3973_v41  ;;  %v4607_v41 = vld [vmem:[%s13556_s6 + $0xf0] sm:$0xff] }
0x11d1   :  { %8408 = vpow2.f32 %v3974_v53  ;;  %v4606_v53 = vld [vmem:[%s13556_s6 + $0xe8] sm:$0xff] }
0x11de   :  { %v8409_v48 = vpop.eup %8408 }
0x11df   :  { %v3976_v15 = vsel %vm3969_vm5, %v8409_v48, 0.0 }
0x11e0   :  { %3977 = vadd.xlane.f32.xlu0 %v3976_v15  ;;  %v4604_v15 = vld [vmem:[%s13556_s6 + $0xd8] sm:$0xff] }
0x11f6   :  { %4059 = vrot.lane.b32.xlu0 %v3736_v55, %s8459_s18 }
0x1269   :  { %v3978_v7 = vpop.xlane.xlu0 %3977 }
0x126a   :  { %8410 = vrcp.f32 %v3978_v7  ;;  %v4603_v7 = vld [vmem:[%s13556_s6 + $0xd0] sm:$0xff] }
0x126d   :  { %v4060_v57 = vpop.permute.xlu0 %4059 }
0x1277   :  { %v8411_v17 = vpop.eup %8410 }
0x1278   :  { %v3980_v27 = vmul.f32 %v8411_v17, %v8409_v48  ;;  %v4605_v48 = vld [vmem:[%s13556_s6 + $0xe0] sm:$0xff]  ;;  %v4602_v17 = vld [vmem:[%s13556_s6 + $0xc8] sm:$0xff] }
0x127a   :  { %8189 = vmatmul.mubr.msk.f32.vlgmr.msra.gmra.mxu1 %vm3969_vm5, %v3980_v27  ;;  %v4601_v27 = vld [vmem:[%s13556_s6 + $0xc0] sm:$0xff] }
0x127b   :  { %8192 = vmatpush3.xpose.msk.msra.mxu1 %vm905_vm8, %v4063_v22  ;;  %8193 = vmatprep.mubr.msk.f32.mxu1 %vm8456_vm1, %v8455_v6  ;;  %v4600_v22 = vld [vmem:[%s13556_s6 + $0xb8] sm:$0xff] }
0x127c   :  { %8196 = vmatprep.subr.mxu1 %v8455_v6 }
0x127e   :  { %8194 = vmatmul.mubr.msk.f32.vlgmr.msra.gmra.mxu1 %vm905_vm8, %v4060_v57  ;;  %v4599_v57 = vld [vmem:[%s13556_s6 + $0xb0] sm:$0xff] }
0x127f   :  { %8198 = vmatprep.mubr.msk.f32.mxu1 %vm8456_vm1, %v8455_v6 }
0x133a   :  { %v4050_v40 = vpop.f32.mrf.mxu1 }
0x133b   :  { %4054 = vst.msk [vmem:[#allocation7] sm:$0xff] %vm905_vm8, %v4050_v40  ;;  %v4598_v40 = vld [vmem:[%s13556_s6 + $0xa8] sm:$0xff] }
0x133c   :  { %v8190_v42 = vpop.f32.mrf.mxu1 }
0x133d   :  { %v4597_v42 = vld [vmem:[%s13556_s6 + $0xa0] sm:$0xff] }
0x133e   :  { %v4134_v52 = vpop.f32.mrf.mxu1 }
0x133f   :  { %v4138_v30 = vmul.f32 0.125, %v4134_v52  ;;  %v4596_v52 = vld [vmem:[%s13556_s6 + $0x98] sm:$0xff] }
0x1340   :  { %v8195_v31 = vpop.f32.mrf.mxu1 }
0x1341   :  { %v4139_v35 = vsel %vm3969_vm5, %v4138_v30, -inf  ;;  %v4594_v31 = vld [vmem:[%s13556_s6 + $0x88] sm:$0xff] }
0x1342   :  { %4140 = vmax.xlane.f32.xlu1 %v4139_v35  ;;  %v4593_v35 = vld [vmem:[%s13556_s6 + $0x80] sm:$0xff] }
0x1353   :  { %4151 = vrot.lane.b32.xlu1 %v3878_v44, %s8459_s18 }
0x1357   :  { %4402 = vrot.lane.b32.xlu1 %v3738_v28, %s8459_s18 }
0x13cb   :  { %v4141_v5 = vpop.xlane.xlu1 %4140 }
0x13cc   :  { %v4142_v25 = vsub.f32 %v4138_v30, %v4141_v5  ;;  %v4595_v30 = vld [vmem:[%s13556_s6 + $0x90] sm:$0xff]  ;;  %v4592_v5 = vld [vmem:[%s13556_s6 + $0x78] sm:$0xff] }
0x13ce   :  { %v4143_v13 = vmul.f32 1.442695, %v4142_v25  ;;  %v4591_v25 = vld [vmem:[%s13556_s6 + $0x70] sm:$0xff] }
0x13cf   :  { %v4152_v36 = vpop.permute.xlu1 %4151 }
0x13d0   :  { %8412 = vpow2.f32 %v4143_v13  ;;  %8197 = vmatpush3.msra.mxu1 %v4152_v36  ;;  %v4590_v13 = vld [vmem:[%s13556_s6 + $0x68] sm:$0xff]  ;;  %v4589_v36 = vld [vmem:[%s13556_s6 + $0x60] sm:$0xff] }
0x13d1   :  { %8201 = vmatprep.subr.mxu1 %v8455_v6 }
0x13d3   :  { %v4403_v37 = vpop.permute.xlu1 %4402 }
0x13dd   :  { %v8413_v8 = vpop.eup %8412 }
0x13de   :  { %v4145_v14 = vsel %vm3969_vm5, %v8413_v8, 0.0 }
0x13df   :  { %4146 = vadd.xlane.f32.xlu0 %v4145_v14  ;;  %v4587_v14 = vld [vmem:[%s13556_s6 + $0x50] sm:$0xff] }
0x1468   :  { %v4147_v43 = vpop.xlane.xlu0 %4146 }
0x1469   :  { %8414 = vrcp.f32 %v4147_v43  ;;  %v4586_v43 = vld [vmem:[%s13556_s6 + $0x48] sm:$0xff] }
0x1476   :  { %v8415_v16 = vpop.eup %8414 }
0x1477   :  { %v4149_v33 = vmul.f32 %v8415_v16, %v8413_v8  ;;  %v4588_v8 = vld [vmem:[%s13556_s6 + $0x58] sm:$0xff]  ;;  %v4585_v16 = vld [vmem:[%s13556_s6 + $0x40] sm:$0xff] }
0x1479   :  { %8199 = vmatmul.mubr.msk.f32.vlgmr.msra.gmra.mxu1 %vm3969_vm5, %v4149_v33  ;;  %v4584_v33 = vld [vmem:[%s13556_s6 + $0x38] sm:$0xff] }
0x147a   :  { %8202 = vmatpush3.xpose.msk.msra.mxu1 %vm905_vm8, %v10701_v21  ;;  %8203 = vmatprep.mubr.msk.f32.mxu1 %vm8456_vm1, %v8455_v6 }
0x147b   :  { %8206 = vmatprep.subr.mxu1 %v8455_v6 }
0x147d   :  { %8204 = vmatmul.mubr.msk.f32.vlgmr.msra.gmra.mxu1 %vm905_vm8, %v3738_v28 }
0x147e   :  { %8207 = vmatpush3.msra.mxu1 %v3880_v11  ;;  %8208 = vmatprep.mubr.msk.f32.mxu1 %vm8456_vm1, %v8455_v6 }
0x147f   :  { %8211 = vmatprep.subr.mxu1 %v8455_v6 }
0x1539   :  { %v4223_v0 = vpop.f32.mrf.mxu1 }
0x153b   :  { %v8200_v29 = vpop.f32.mrf.mxu1 }
0x153c   :  { %v4581_v29 = vld [vmem:[%s13556_s6 + $0x20] sm:$0xff] }
0x153d   :  { %v4308_v19 = vpop.f32.mrf.mxu1 }
0x153e   :  { %v4312_v46 = vmul.f32 0.125, %v4308_v19  ;;  %v4580_v19 = vld [vmem:[%s13556_s6 + $0x18] sm:$0xff] }
0x153f   :  { %v8205_v56 = vpop.f32.mrf.mxu1 }
0x1540   :  { %v4313_v10 = vsel %vm3969_vm5, %v4312_v46, -inf  ;;  %v4578_v56 = vld [vmem:[%s13556_s6 + $0x8] sm:$0xff] }
0x1541   :  { %4314 = vmax.xlane.f32.xlu0 %v4313_v10  ;;  %v4577_v10 = vld [vmem:[%s13556_s6] sm:$0xff] }
0x15ca   :  { %v4315_v1 = vpop.xlane.xlu0 %4314 }
0x15cb   :  { %v4316_v23 = vsub.f32 %v4312_v46, %v4315_v1  ;;  %v4579_v46 = vld [vmem:[%s13556_s6 + $0x10] sm:$0xff]  ;;  %v4640_v1 = vld [vmem:[%s13556_s6 + $0x1f8] sm:$0xff] }
0x15cd   :  { %v4317_v39 = vmul.f32 1.442695, %v4316_v23  ;;  %v4639_v23 = vld [vmem:[%s13556_s6 + $0x1f0] sm:$0xff] }
0x15cf   :  { %8416 = vpow2.f32 %v4317_v39  ;;  %v4638_v39 = vld [vmem:[%s13556_s6 + $0x1e8] sm:$0xff] }
0x15dc   :  { %v8417_v26 = vpop.eup %8416 }
0x15dd   :  { %v4319_v24 = vsel %vm3969_vm5, %v8417_v26, 0.0 }
0x15de   :  { %4320 = vadd.xlane.f32.xlu0 %v4319_v24  ;;  %v4636_v24 = vld [vmem:[%s13556_s6 + $0x1d8] sm:$0xff] }
0x15f4   :  { %4405 = vrot.lane.b32.xlu0 %v10701_v21, %s8459_s18 }
0x1667   :  { %v4321_v59 = vpop.xlane.xlu0 %4320 }
0x1668   :  { %8418 = vrcp.f32 %v4321_v59  ;;  %v4635_v59 = vld [vmem:[%s13556_s6 + $0x1d0] sm:$0xff] }
0x166b   :  { %v4406_v62 = vpop.permute.xlu0 %4405 }
0x1675   :  { %v8419_v50 = vpop.eup %8418 }
0x1676   :  { %v4323_v34 = vmul.f32 %v8419_v50, %v8417_v26  ;;  %v4637_v26 = vld [vmem:[%s13556_s6 + $0x1e0] sm:$0xff]  ;;  %v4634_v50 = vld [vmem:[%s13556_s6 + $0x1c8] sm:$0xff] }
0x1678   :  { %8209 = vmatmul.mubr.msk.f32.vlgmr.msra.gmra.mxu1 %vm3969_vm5, %v4323_v34  ;;  %v4633_v34 = vld [vmem:[%s13556_s6 + $0x1c0] sm:$0xff] }
0x1679   :  { %8212 = vmatpush3.xpose.msk.msra.mxu1 %vm905_vm8, %v4406_v62  ;;  %8213 = vmatprep.mubr.msk.f32.mxu1 %vm8456_vm1, %v8455_v6  ;;  %vm4231_vm1 = vcmask 1048064   ;;  %v4632_v62 = vld [vmem:[%s13556_s6 + $0x1b8] sm:$0xff] }
0x167a   :  { %4653 = vmatprep.subr.mxu1 %v4608_v20  ;;  %v4614_v20 = vld [vmem:[%s13556_s6 + $0x128] sm:$0xff] }
0x167c   :  { %8214 = vmatmul.mubr.msk.f32.vlgmr.msra.gmra.mxu1 %vm905_vm8, %v4403_v37  ;;  %v4631_v37 = vld [vmem:[%s13556_s6 + $0x1b0] sm:$0xff] }
0x167d   :  { %4654 = vmatpush1.msra.mxu1 %v4607_v41  ;;  %v4613_v41 = vld [vmem:[%s13556_s6 + $0x120] sm:$0xff] }
0x167e   :  { %4655 = vmatprep.subr.mxu1 %v4606_v53  ;;  %v4612_v53 = vld [vmem:[%s13556_s6 + $0x118] sm:$0xff] }
0x167f   :  { %4656 = vmatpush1.msra.mxu1 %v4605_v48  ;;  %v4611_v48 = vld [vmem:[%s13556_s6 + $0x110] sm:$0xff] }
0x1680   :  { %4657 = vmatprep.subr.mxu1 %v4604_v15  ;;  %v4610_v15 = vld [vmem:[%s13556_s6 + $0x108] sm:$0xff] }
0x1681   :  { %4658 = vmatpush1.msra.mxu1 %v4603_v7  ;;  %v4609_v7 = vld [vmem:[%s13556_s6 + $0x100] sm:$0xff] }
0x1682   :  { %4659 = vmatprep.subr.mxu1 %v4602_v17 }
0x1683   :  { %4660 = vmatpush1.msra.mxu1 %v4601_v27 }
0x1684   :  { %4661 = vmatprep.subr.mxu1 %v4600_v22 }
0x1685   :  { %4662 = vmatpush1.msra.mxu1 %v4599_v57 }
0x1686   :  { %4663 = vmatprep.subr.mxu1 %v4598_v40 }
0x1687   :  { %4664 = vmatpush1.msra.mxu1 %v4597_v42  ;;  %v4641_v42 = vld [vmem:[%s13554_s2 + $0x15] sm:$0x3] }
0x1688   :  { %4665 = vmatprep.subr.mxu1 %v4596_v52  ;;  %v4646_v52 = vrot.slane %v4641_v42, %v10031_v38 }
0x1689   :  { %4666 = vmatpush1.msra.mxu1 %v4595_v30  ;;  %v4650_v30 = vrot.slane %v4641_v42, %v9949_v54  ;;  %v4819_v42 = vld [vmem:[%s13555_s5 + $0x238] sm:$0xff] }
0x168a   :  { %4667 = vmatprep.subr.mxu1 %v4594_v31 }
0x168b   :  { %4668 = vmatpush1.msra.mxu1 %v4593_v35 }
0x168c   :  { %4669 = vmatprep.subr.mxu1 %v4592_v5 }
0x168d   :  { %4670 = vmatpush1.msra.mxu1 %v4591_v25 }
0x168e   :  { %4671 = vmatprep.subr.mxu1 %v4590_v13 }
0x168f   :  { %4672 = vmatpush1.msra.mxu1 %v4589_v36 }
0x1690   :  { %4673 = vmatprep.subr.mxu1 %v4588_v8 }
0x1691   :  { %4674 = vmatpush1.msra.mxu1 %v4587_v14 }
0x1692   :  { %4675 = vmatprep.subr.mxu1 %v4586_v43  ;;  %v4983_v43 = vld [vmem:[%s13555_s5 + $0x998] sm:$0xff] }
0x1693   :  { %4676 = vmatpush1.msra.mxu1 %v4585_v16  ;;  %v4987_v16 = vld [vmem:[%s13555_s5 + $0x9b8] sm:$0xff] }
0x1694   :  { %4677 = vmatprep.subr.mxu1 %v4584_v33  ;;  %v4969_v33 = vld [vmem:[%s13555_s5 + $0x8f8] sm:$0xff] }
0x1738   :  { %v4393_v45 = vpop.f32.mrf.mxu1 }
0x1739   :  { %4397 = vst.msk [vmem:[#allocation7 + $0x8] sm:$0xff] %vm905_vm8, %v4393_v45  ;;  %v4630_v45 = vld [vmem:[%s13556_s6 + $0x1a8] sm:$0xff] }
0x173a   :  { %v8210_v51 = vpop.f32.mrf.mxu1 }
0x173b   :  { %v4629_v51 = vld [vmem:[%s13556_s6 + $0x1a0] sm:$0xff] }
0x173c   :  { %v4477_v4 = vpop.f32.mrf.mxu1 }
0x173d   :  { %v4481_v60 = vmul.f32 0.125, %v4477_v4  ;;  %v4628_v4 = vld [vmem:[%s13556_s6 + $0x198] sm:$0xff] }
0x173e   :  { %v8215_v63 = vpop.f32.mrf.mxu1 }
0x173f   :  { %v4482_v2 = vsel %vm3969_vm5, %v4481_v60, -inf  ;;  %v4626_v63 = vld [vmem:[%s13556_s6 + $0x188] sm:$0xff] }
0x1740   :  { %4483 = vmax.xlane.f32.xlu1 %v4482_v2  ;;  %v4625_v2 = vld [vmem:[%s13556_s6 + $0x180] sm:$0xff] }
0x1751   :  { %4494 = vrot.lane.b32.xlu1 %v3880_v11, %s8459_s18  ;;  %v4583_v11 = vld [vmem:[%s13556_s6 + $0x30] sm:$0xff] }
0x1752   :  { %4678 = vmatpush1.msra.mxu1 %v4583_v11  ;;  %v4973_v11 = vld [vmem:[%s13555_s5 + $0x918] sm:$0xff] }
0x1755   :  { %4228 = vrot.lane.b32.xlu1 %v4223_v0, %s8459_s18  ;;  %v4582_v0 = vld [vmem:[%s13556_s6 + $0x28] sm:$0xff] }
0x1756   :  { %4679 = vmatprep.subr.mxu1 %v4582_v0  ;;  %v4968_v0 = vld [vmem:[%s13555_s5 + $0x8f0] sm:$0xff] }
0x1757   :  { %4680 = vmatpush1.msra.mxu1 %v4581_v29  ;;  %v4972_v29 = vld [vmem:[%s13555_s5 + $0x910] sm:$0xff] }
0x1758   :  { %4681 = vmatprep.subr.mxu1 %v4580_v19  ;;  %v4955_v19 = vld [vmem:[%s13555_s5 + $0x858] sm:$0xff] }
0x1759   :  { %4682 = vmatpush1.msra.mxu1 %v4579_v46  ;;  %v4959_v46 = vld [vmem:[%s13555_s5 + $0x878] sm:$0xff] }
0x175a   :  { %4683 = vmatprep.subr.mxu1 %v4578_v56  ;;  %v4954_v56 = vld [vmem:[%s13555_s5 + $0x850] sm:$0xff] }
0x175b   :  { %4684 = vmatpush1.msra.mxu1 %v4577_v10  ;;  %v4958_v10 = vld [vmem:[%s13555_s5 + $0x870] sm:$0xff] }
0x175c   :  { %4685 = vmatprep.subr.mxu1 %v4640_v1  ;;  %v4941_v1 = vld [vmem:[%s13555_s5 + $0x7b8] sm:$0xff] }
0x175d   :  { %4686 = vmatpush2.msra.mxu1 %v4639_v23  ;;  %v4945_v23 = vld [vmem:[%s13555_s5 + $0x7d8] sm:$0xff] }
0x175e   :  { %4687 = vmatprep.subr.mxu1 %v4638_v39  ;;  %v4940_v39 = vld [vmem:[%s13555_s5 + $0x7b0] sm:$0xff] }
0x175f   :  { %4688 = vmatpush2.msra.mxu1 %v4637_v26  ;;  %v4944_v26 = vld [vmem:[%s13555_s5 + $0x7d0] sm:$0xff] }
0x1760   :  { %4689 = vmatprep.subr.mxu1 %v4636_v24  ;;  %v4927_v24 = vld [vmem:[%s13555_s5 + $0x718] sm:$0xff] }
0x1761   :  { %4690 = vmatpush2.msra.mxu1 %v4635_v59  ;;  %v4931_v59 = vld [vmem:[%s13555_s5 + $0x738] sm:$0xff] }
0x1762   :  { %4691 = vmatprep.subr.mxu1 %v4634_v50  ;;  %v4926_v50 = vld [vmem:[%s13555_s5 + $0x710] sm:$0xff] }
0x1763   :  { %4692 = vmatpush2.msra.mxu1 %v4633_v34  ;;  %v4930_v34 = vld [vmem:[%s13555_s5 + $0x730] sm:$0xff] }
0x1764   :  { %4693 = vmatprep.subr.mxu1 %v4632_v62  ;;  %v4913_v62 = vld [vmem:[%s13555_s5 + $0x678] sm:$0xff] }
0x1765   :  { %4694 = vmatpush2.msra.mxu1 %v4631_v37  ;;  %v4917_v37 = vld [vmem:[%s13555_s5 + $0x698] sm:$0xff] }
0x1766   :  { %4695 = vmatprep.subr.mxu1 %v4630_v45  ;;  %v4912_v45 = vld [vmem:[%s13555_s5 + $0x670] sm:$0xff] }
0x1767   :  { %4696 = vmatpush2.msra.mxu1 %v4629_v51  ;;  %v4916_v51 = vld [vmem:[%s13555_s5 + $0x690] sm:$0xff] }
0x1768   :  { %4697 = vmatprep.subr.mxu1 %v4628_v4  ;;  %v4899_v4 = vld [vmem:[%s13555_s5 + $0x5d8] sm:$0xff] }
0x17c9   :  { %v4484_v58 = vpop.xlane.xlu1 %4483 }
0x17ca   :  { %v4485_v47 = vsub.f32 %v4481_v60, %v4484_v58  ;;  %v4627_v60 = vld [vmem:[%s13556_s6 + $0x190] sm:$0xff]  ;;  %v4624_v58 = vld [vmem:[%s13556_s6 + $0x178] sm:$0xff] }
0x17cb   :  { %4698 = vmatpush2.msra.mxu1 %v4627_v60  ;;  %v4903_v60 = vld [vmem:[%s13555_s5 + $0x5f8] sm:$0xff] }
0x17cc   :  { %v4486_v55 = vmul.f32 1.442695, %v4485_v47  ;;  %4699 = vmatprep.subr.mxu1 %v4626_v63  ;;  %v4623_v47 = vld [vmem:[%s13556_s6 + $0x170] sm:$0xff] }
0x17cd   :  { %v4495_v28 = vpop.permute.xlu1 %4494  ;;  %4700 = vmatpush2.msra.mxu1 %v4625_v2  ;;  %v4898_v63 = vld [vmem:[%s13555_s5 + $0x5d0] sm:$0xff] }
0x17ce   :  { %8420 = vpow2.f32 %v4486_v55  ;;  %8217 = vmatpush3.msra.mxu0 %v4495_v28  ;;  %v4622_v55 = vld [vmem:[%s13556_s6 + $0x168] sm:$0xff]  ;;  %4701 = vmatprep.subr.mxu1 %v4624_v58  ;;  %v4621_v28 = vld [vmem:[%s13556_s6 + $0x160] sm:$0xff]  ;;  %v4902_v2 = vld [vmem:[%s13555_s5 + $0x5f0] sm:$0xff] }
0x17cf   :  { %4702 = vmatpush2.msra.mxu1 %v4623_v47  ;;  %5241 = vmatprep.subr.mxu0 %v4983_v43  ;;  %v4885_v58 = vld [vmem:[%s13555_s5 + $0x538] sm:$0xff]  ;;  %v4786_v43 = vld [vmem:[%s13555_s5 + $0xd0] sm:$0xff] }
0x17d0   :  { %4703 = vmatprep.subr.mxu1 %v4622_v55  ;;  %v4889_v47 = vld [vmem:[%s13555_s5 + $0x558] sm:$0xff]  ;;  %v4884_v55 = vld [vmem:[%s13555_s5 + $0x530] sm:$0xff] }
0x17d1   :  { %v4229_v44 = vpop.permute.xlu1 %4228  ;;  %4704 = vmatpush2.msra.mxu1 %v4621_v28  ;;  %v4888_v28 = vld [vmem:[%s13555_s5 + $0x550] sm:$0xff] }
0x17d2   :  { %4232 = vst.msk [vmem:[#allocation7] sm:$0xff] %vm4231_vm1, %v4229_v44  ;;  %v4620_v44 = vld [vmem:[%s13556_s6 + $0x158] sm:$0xff] }
0x17d3   :  { %4705 = vmatprep.subr.mxu1 %v4620_v44  ;;  %v4871_v44 = vld [vmem:[%s13555_s5 + $0x498] sm:$0xff] }
0x17d9   :  { %v4575_v40 = vld [vmem:[#allocation7] sm:$0xff] }
0x17db   :  { %v8421_v21 = vpop.eup %8420 }
0x17dc   :  { %v4488_v61 = vsel %vm3969_vm5, %v8421_v21, 0.0 }
0x17dd   :  { %4489 = vadd.xlane.f32.xlu0 %v4488_v61  ;;  %v4618_v61 = vld [vmem:[%s13556_s6 + $0x148] sm:$0xff] }
0x1866   :  { %v4490_v3 = vpop.xlane.xlu0 %4489 }
0x1867   :  { %8422 = vrcp.f32 %v4490_v3  ;;  %v4617_v3 = vld [vmem:[%s13556_s6 + $0x140] sm:$0xff] }
0x1874   :  { %v8423_v32 = vpop.eup %8422 }
0x1875   :  { %v4492_v9 = vmul.f32 %v8423_v32, %v8421_v21  ;;  %v4619_v21 = vld [vmem:[%s13556_s6 + $0x150] sm:$0xff]  ;;  %v4616_v32 = vld [vmem:[%s13556_s6 + $0x138] sm:$0xff] }
0x1876   :  { %4706 = vmatpush2.msra.mxu1 %v4619_v21  ;;  %v4875_v21 = vld [vmem:[%s13555_s5 + $0x4b8] sm:$0xff] }
0x1877   :  { %8219 = vmatmul.mubr.msk.f32.vlgmr.msra.gmra.mxu0 %vm3969_vm5, %v4492_v9  ;;  %4707 = vmatprep.subr.mxu1 %v4618_v61  ;;  %v4615_v9 = vld [vmem:[%s13556_s6 + $0x130] sm:$0xff] }
0x1878   :  { %4708 = vmatpush2.msra.mxu1 %v4617_v3  ;;  %v4870_v61 = vld [vmem:[%s13555_s5 + $0x490] sm:$0xff] }
0x1879   :  { %4709 = vmatprep.subr.mxu1 %v4616_v32  ;;  %v4874_v3 = vld [vmem:[%s13555_s5 + $0x4b0] sm:$0xff]  ;;  %v4857_v32 = vld [vmem:[%s13555_s5 + $0x3f8] sm:$0xff] }
0x187a   :  { %4710 = vmatpush2.msra.mxu1 %v4615_v9  ;;  %v4861_v9 = vld [vmem:[%s13555_s5 + $0x418] sm:$0xff] }
0x187b   :  { %4711 = vmatprep.subr.mxu1 %v4614_v20  ;;  %v4856_v20 = vld [vmem:[%s13555_s5 + $0x3f0] sm:$0xff] }
0x187c   :  { %4712 = vmatpush2.msra.mxu1 %v4613_v41  ;;  %v4860_v41 = vld [vmem:[%s13555_s5 + $0x410] sm:$0xff] }
0x187d   :  { %4713 = vmatprep.subr.mxu1 %v4612_v53  ;;  %v4843_v53 = vld [vmem:[%s13555_s5 + $0x358] sm:$0xff] }
0x187e   :  { %4714 = vmatpush2.msra.mxu1 %v4611_v48  ;;  %v4847_v48 = vld [vmem:[%s13555_s5 + $0x378] sm:$0xff] }
0x187f   :  { %4715 = vmatprep.subr.mxu1 %v4610_v15  ;;  %v4842_v15 = vld [vmem:[%s13555_s5 + $0x350] sm:$0xff] }
0x1880   :  { %4716 = vmatpush2.msra.mxu1 %v4609_v7  ;;  %v4846_v7 = vld [vmem:[%s13555_s5 + $0x370] sm:$0xff] }
0x1881   :  { %5383 = vmatprep.subr.mxu1 %v4987_v16  ;;  %v4790_v16 = vld [vmem:[%s13555_s5 + $0xf0] sm:$0xff] }
0x1937   :  { %v4566_v17 = vpop.f32.mrf.mxu0 }
0x1938   :  { %4571 = vrot.lane.b32.xlu0 %v4566_v17, %s8459_s18  ;;  %v4829_v17 = vld [vmem:[%s13555_s5 + $0x2b8] sm:$0xff] }
0x1939   :  { %v8220_v27 = vpop.f32.mrf.mxu0 }
0x193a   :  { %v4833_v27 = vld [vmem:[%s13555_s5 + $0x2d8] sm:$0xff] }
0x19aa   :  { %v4572_v22 = vpop.permute.xlu0 %4571 }
0x19ab   :  { %4574 = vst.msk [vmem:[#allocation7 + $0x8] sm:$0xff] %vm4231_vm1, %v4572_v22  ;;  %v4828_v22 = vld [vmem:[%s13555_s5 + $0x2b0] sm:$0xff] }
0x19b2   :  { %v4576_v57 = vld [vmem:[#allocation7 + $0x8] sm:$0xff] }
0x19b3   :  { %4717 = vmatprep.mubr.f32.mxu1 %v4576_v57  ;;  %v4832_v57 = vld [vmem:[%s13555_s5 + $0x2d0] sm:$0xff] }
0x19b4   :  { %4718 = vmatmul.mubr.f32.vlgmr.msra.gmra.mxu1 %v4575_v40  ;;  %v4815_v40 = vld [vmem:[%s13555_s5 + $0x218] sm:$0xff] }
0x1a74   :  { %v4719_v31 = vpop.f32.mrf.mxu1 }
0x1a75   :  { %v4720_v35 = vadd.f32 %v4719_v31, %v4646_v52  ;;  %v4814_v52 = vld [vmem:[%s13555_s5 + $0x210] sm:$0xff]  ;;  %v4801_v31 = vld [vmem:[%s13555_s5 + $0x178] sm:$0xff] }
0x1a76   :  { %v4721_v5 = vpop.f32.mrf.mxu1 }
0x1a77   :  { %v4722_v25 = vadd.f32 %v4721_v5, %v4650_v30  ;;  %v10949_v36 = vadd.f32 %v4720_v35, %v10513_v12  ;;  %v4986_v12 = vld [vmem:[%s13555_s5 + $0x9b0] sm:$0xff]  ;;  %v4805_v35 = vld [vmem:[%s13555_s5 + $0x198] sm:$0xff] }
0x1a78   :  { %5384 = vmatpush1.msra.mxu1 %v4986_v12  ;;  %v4818_v30 = vld [vmem:[%s13555_s5 + $0x230] sm:$0xff]  ;;  %v4777_v12 = vld [vmem:[%s13555_s5 + $0x58] sm:$0xff] }
0x1a79   :  { %v10946_v13 = vadd.f32 %v4722_v25, %v10511_v18  ;;  %v4982_v18 = vld [vmem:[%s13555_s5 + $0x990] sm:$0xff]  ;;  %5385 = vmatprep.subr.mxu1 %v4973_v11 }
0x1a7a   :  { %5242 = vmatpush1.msra.mxu0 %v4982_v18  ;;  %5386 = vmatpush1.msra.mxu1 %v4972_v29  ;;  %v4800_v5 = vld [vmem:[%s13555_s5 + $0x170] sm:$0xff]  ;;  %v4773_v18 = vld [vmem:[%s13555_s5 + $0x38] sm:$0xff] }
0x1a7b   :  { %v4728_v8 = vsel %vm3453_vm4, %v10946_v13, 0.0  ;;  %5243 = vmatprep.subr.mxu0 %v4969_v33  ;;  %5387 = vmatprep.subr.mxu1 %v4959_v46  ;;  %v4804_v25 = vld [vmem:[%s13555_s5 + $0x190] sm:$0xff] }
0x1a7c   :  { %v4729_v14 = vadd.f32 %v4728_v8, %v10949_v36  ;;  %5244 = vmatpush1.msra.mxu0 %v4968_v0  ;;  %5388 = vmatpush1.msra.mxu1 %v4958_v10  ;;  %v4787_v8 = vld [vmem:[%s13555_s5 + $0xd8] sm:$0xff]  ;;  %v4772_v33 = vld [vmem:[%s13555_s5 + $0x30] sm:$0xff] }
0x1a7d   :  { %5245 = vmatprep.subr.mxu0 %v4955_v19  ;;  %5389 = vmatprep.subr.mxu1 %v4945_v23  ;;  %v4776_v11 = vld [vmem:[%s13555_s5 + $0x50] sm:$0xff] }
0x1a7e   :  { %4730 = vadd.xlane.f32.xlu1 %v4729_v14  ;;  %5246 = vmatpush1.msra.mxu0 %v4954_v56  ;;  %v4791_v14 = vld [vmem:[%s13555_s5 + $0xf8] sm:$0xff] }
0x1a7f   :  { %5247 = vmatprep.subr.mxu0 %v4941_v1  ;;  %5390 = vmatpush1.msra.mxu1 %v4944_v26  ;;  %v5154_v26 = vld [vmem:[%s13555_s5 + $0x1130] sm:$0xff] }
0x1a80   :  { %5248 = vmatpush1.msra.mxu0 %v4940_v39  ;;  %5391 = vmatprep.subr.mxu1 %v4931_v59  ;;  %v5151_v39 = vld [vmem:[%s13555_s5 + $0x1118] sm:$0xff] }
0x1a81   :  { %5249 = vmatprep.subr.mxu0 %v4927_v24  ;;  %5392 = vmatpush1.msra.mxu1 %v4930_v34  ;;  %v5137_v24 = vld [vmem:[%s13555_s5 + $0x1078] sm:$0xff]  ;;  %v5140_v34 = vld [vmem:[%s13555_s5 + $0x1090] sm:$0xff] }
0x1a82   :  { %5250 = vmatpush1.msra.mxu0 %v4926_v50  ;;  %5393 = vmatprep.subr.mxu1 %v4917_v37  ;;  %v5141_v59 = vld [vmem:[%s13555_s5 + $0x1098] sm:$0xff]  ;;  %v5136_v50 = vld [vmem:[%s13555_s5 + $0x1070] sm:$0xff] }
0x1a83   :  { %5251 = vmatprep.subr.mxu0 %v4913_v62  ;;  %5394 = vmatpush1.msra.mxu1 %v4916_v51  ;;  %v5123_v62 = vld [vmem:[%s13555_s5 + $0xfd8] sm:$0xff]  ;;  %v5126_v51 = vld [vmem:[%s13555_s5 + $0xff0] sm:$0xff] }
0x1a84   :  { %5252 = vmatpush1.msra.mxu0 %v4912_v45  ;;  %5395 = vmatprep.subr.mxu1 %v4903_v60  ;;  %v5127_v37 = vld [vmem:[%s13555_s5 + $0xff8] sm:$0xff]  ;;  %v5122_v45 = vld [vmem:[%s13555_s5 + $0xfd0] sm:$0xff] }
0x1a85   :  { %5253 = vmatprep.subr.mxu0 %v4899_v4  ;;  %5396 = vmatpush1.msra.mxu1 %v4902_v2  ;;  %v5109_v4 = vld [vmem:[%s13555_s5 + $0xf38] sm:$0xff]  ;;  %v5112_v2 = vld [vmem:[%s13555_s5 + $0xf50] sm:$0xff] }
0x1a86   :  { %5254 = vmatpush1.msra.mxu0 %v4898_v63  ;;  %5397 = vmatprep.subr.mxu1 %v4889_v47  ;;  %v5113_v60 = vld [vmem:[%s13555_s5 + $0xf58] sm:$0xff]  ;;  %v5108_v63 = vld [vmem:[%s13555_s5 + $0xf30] sm:$0xff] }
0x1a87   :  { %5255 = vmatprep.subr.mxu0 %v4885_v58  ;;  %5398 = vmatpush1.msra.mxu1 %v4888_v28  ;;  %v5095_v58 = vld [vmem:[%s13555_s5 + $0xe98] sm:$0xff]  ;;  %v5098_v28 = vld [vmem:[%s13555_s5 + $0xeb0] sm:$0xff] }
0x1a88   :  { %5256 = vmatpush1.msra.mxu0 %v4884_v55  ;;  %5399 = vmatprep.subr.mxu1 %v4875_v21  ;;  %v5099_v47 = vld [vmem:[%s13555_s5 + $0xeb8] sm:$0xff]  ;;  %v5094_v55 = vld [vmem:[%s13555_s5 + $0xe90] sm:$0xff] }
0x1a89   :  { %5257 = vmatprep.subr.mxu0 %v4871_v44  ;;  %5400 = vmatpush1.msra.mxu1 %v4874_v3  ;;  %v5081_v44 = vld [vmem:[%s13555_s5 + $0xdf8] sm:$0xff]  ;;  %v5084_v3 = vld [vmem:[%s13555_s5 + $0xe10] sm:$0xff] }
0x1a8a   :  { %5258 = vmatpush1.msra.mxu0 %v4870_v61  ;;  %5401 = vmatprep.subr.mxu1 %v4861_v9  ;;  %v5085_v21 = vld [vmem:[%s13555_s5 + $0xe18] sm:$0xff]  ;;  %v5080_v61 = vld [vmem:[%s13555_s5 + $0xdf0] sm:$0xff] }
0x1a8b   :  { %5259 = vmatprep.subr.mxu0 %v4857_v32  ;;  %5402 = vmatpush1.msra.mxu1 %v4860_v41  ;;  %v5067_v32 = vld [vmem:[%s13555_s5 + $0xd58] sm:$0xff]  ;;  %v5070_v41 = vld [vmem:[%s13555_s5 + $0xd70] sm:$0xff] }
0x1a8c   :  { %5260 = vmatpush1.msra.mxu0 %v4856_v20  ;;  %5403 = vmatprep.subr.mxu1 %v4847_v48  ;;  %v5071_v9 = vld [vmem:[%s13555_s5 + $0xd78] sm:$0xff]  ;;  %v5066_v20 = vld [vmem:[%s13555_s5 + $0xd50] sm:$0xff] }
0x1a8d   :  { %5261 = vmatprep.subr.mxu0 %v4843_v53  ;;  %5404 = vmatpush1.msra.mxu1 %v4846_v7  ;;  %v5053_v53 = vld [vmem:[%s13555_s5 + $0xcb8] sm:$0xff]  ;;  %v5056_v7 = vld [vmem:[%s13555_s5 + $0xcd0] sm:$0xff] }
0x1a8e   :  { %5262 = vmatpush1.msra.mxu0 %v4842_v15  ;;  %5405 = vmatprep.subr.mxu1 %v4833_v27  ;;  %v5057_v48 = vld [vmem:[%s13555_s5 + $0xcd8] sm:$0xff]  ;;  %v5052_v15 = vld [vmem:[%s13555_s5 + $0xcb0] sm:$0xff] }
0x1a8f   :  { %5263 = vmatprep.subr.mxu0 %v4829_v17  ;;  %5406 = vmatpush1.msra.mxu1 %v4832_v57  ;;  %v5039_v17 = vld [vmem:[%s13555_s5 + $0xc18] sm:$0xff]  ;;  %v5042_v57 = vld [vmem:[%s13555_s5 + $0xc30] sm:$0xff] }
0x1a90   :  { %5264 = vmatpush1.msra.mxu0 %v4828_v22  ;;  %5407 = vmatprep.subr.mxu1 %v4819_v42  ;;  %v5043_v27 = vld [vmem:[%s13555_s5 + $0xc38] sm:$0xff]  ;;  %v5038_v22 = vld [vmem:[%s13555_s5 + $0xc10] sm:$0xff] }
0x1a91   :  { %5265 = vmatprep.subr.mxu0 %v4815_v40  ;;  %5408 = vmatpush1.msra.mxu1 %v4818_v30  ;;  %v5025_v40 = vld [vmem:[%s13555_s5 + $0xb78] sm:$0xff]  ;;  %v5028_v30 = vld [vmem:[%s13555_s5 + $0xb90] sm:$0xff] }
0x1a92   :  { %5266 = vmatpush1.msra.mxu0 %v4814_v52  ;;  %5409 = vmatprep.subr.mxu1 %v4805_v35  ;;  %v5029_v42 = vld [vmem:[%s13555_s5 + $0xb98] sm:$0xff]  ;;  %v5024_v52 = vld [vmem:[%s13555_s5 + $0xb70] sm:$0xff] }
0x1a93   :  { %5267 = vmatprep.subr.mxu0 %v4801_v31  ;;  %5410 = vmatpush1.msra.mxu1 %v4804_v25  ;;  %v5011_v31 = vld [vmem:[%s13555_s5 + $0xad8] sm:$0xff]  ;;  %v5014_v25 = vld [vmem:[%s13555_s5 + $0xaf0] sm:$0xff] }
0x1a94   :  { %5268 = vmatpush1.msra.mxu0 %v4800_v5  ;;  %5411 = vmatprep.subr.mxu1 %v4791_v14  ;;  %v5015_v35 = vld [vmem:[%s13555_s5 + $0xaf8] sm:$0xff]  ;;  %v5010_v5 = vld [vmem:[%s13555_s5 + $0xad0] sm:$0xff] }
0x1a95   :  { %5269 = vmatprep.subr.mxu0 %v4787_v8  ;;  %5412 = vmatpush1.msra.mxu1 %v4790_v16  ;;  %v4997_v8 = vld [vmem:[%s13555_s5 + $0xa38] sm:$0xff]  ;;  %v5000_v16 = vld [vmem:[%s13555_s5 + $0xa50] sm:$0xff] }
0x1a96   :  { %5270 = vmatpush1.msra.mxu0 %v4786_v43  ;;  %5413 = vmatprep.subr.mxu1 %v4777_v12  ;;  %v5001_v14 = vld [vmem:[%s13555_s5 + $0xa58] sm:$0xff]  ;;  %v4996_v43 = vld [vmem:[%s13555_s5 + $0xa30] sm:$0xff] }
0x1a97   :  { %5271 = vmatprep.subr.mxu0 %v4773_v18  ;;  %5414 = vmatpush1.msra.mxu1 %v4776_v11  ;;  %v4985_v18 = vld [vmem:[%s13555_s5 + $0x9a8] sm:$0xff]  ;;  %v4991_v12 = vld [vmem:[%s13555_s5 + $0x9d8] sm:$0xff] }
0x1a98   :  { %5272 = vmatpush1.msra.mxu0 %v4772_v33 }
0x1a99   :  { %5281 = vmatprep.subr.mxu0 %v5151_v39 }
0x1b07   :  { %v4731_v0 = vpop.xlane.xlu1 %4730 }
0x1b08   :  { %v4732_v29 = vmul.f32 0.004464286, %v4731_v0 }
0x1b0a   :  { %v11147_v19 = vsub.f32 %v10949_v36, %v4732_v29  ;;  %v11150_v46 = vsub.f32 %v10946_v13, %v4732_v29  ;;  %v5155_v36 = vld [vmem:[%s13555_s5 + $0x1138] sm:$0xff]  ;;  %v5150_v13 = vld [vmem:[%s13555_s5 + $0x1110] sm:$0xff] }
0x1b0b   :  { %5423 = vmatprep.subr.mxu1 %v5155_v36  ;;  %5282 = vmatpush2.msra.mxu0 %v5150_v13  ;;  %v4726_v29 = vld [vmem:[%s13554_s2 + $0x17] sm:$0x3] }
0x1b0c   :  { %v4735_v56 = vmul.f32 %v11147_v19, %v11147_v19  ;;  %v4736_v10 = vmul.f32 %v11150_v46, %v11150_v46  ;;  %5424 = vmatpush2.msra.mxu1 %v5154_v26  ;;  %5283 = vmatprep.subr.mxu0 %v5137_v24 }
0x1b0d   :  { %5425 = vmatprep.subr.mxu1 %v5141_v59  ;;  %5284 = vmatpush2.msra.mxu0 %v5136_v50 }
0x1b0e   :  { %v4737_v1 = vsel %vm3453_vm4, %v4736_v10, 0.0  ;;  %5426 = vmatpush2.msra.mxu1 %v5140_v34  ;;  %5285 = vmatprep.subr.mxu0 %v5123_v62  ;;  %v4750_v10 = vrot.slane %v4726_v29, %v10031_v38  ;;  %v4984_v62 = vld [vmem:[%s13555_s5 + $0x9a0] sm:$0xff] }
0x1b0f   :  { %v4738_v23 = vadd.f32 %v4737_v1, %v4735_v56  ;;  %5427 = vmatprep.subr.mxu1 %v5127_v37  ;;  %5286 = vmatpush2.msra.mxu0 %v5122_v45  ;;  %v4727_v56 = vld [vmem:[%s13554_s2 + $0x19] sm:$0x3]  ;;  %v4754_v1 = vrot.slane %v4726_v29, %v9949_v54  ;;  %v4990_v37 = vld [vmem:[%s13555_s5 + $0x9d0] sm:$0xff]  ;;  %v4970_v45 = vld [vmem:[%s13555_s5 + $0x900] sm:$0xff] }
0x1b10   :  { %5428 = vmatpush2.msra.mxu1 %v5126_v51  ;;  %5287 = vmatprep.subr.mxu0 %v5109_v4  ;;  %v4763_v39 = vrot.slane %v4727_v56, %v10031_v38  ;;  %v4767_v36 = vrot.slane %v4727_v56, %v9949_v54  ;;  %v4976_v51 = vld [vmem:[%s13555_s5 + $0x930] sm:$0xff]  ;;  %v4957_v4 = vld [vmem:[%s13555_s5 + $0x868] sm:$0xff]  ;;  %v4823_v29 = vld [vmem:[%s13555_s5 + $0x258] sm:$0xff] }
0x1b11   :  { %4739 = vadd.xlane.f32.xlu0 %v4738_v23  ;;  %5429 = vmatprep.subr.mxu1 %v5113_v60  ;;  %v4963_v60 = vld [vmem:[%s13555_s5 + $0x898] sm:$0xff]  ;;  %v4816_v56 = vld [vmem:[%s13555_s5 + $0x220] sm:$0xff] }
0x1b12   :  { %5288 = vmatpush2.msra.mxu0 %v5108_v63  ;;  %5430 = vmatpush2.msra.mxu1 %v5112_v2  ;;  %v4956_v63 = vld [vmem:[%s13555_s5 + $0x860] sm:$0xff]  ;;  %v4962_v2 = vld [vmem:[%s13555_s5 + $0x890] sm:$0xff] }
0x1b13   :  { %5289 = vmatprep.subr.mxu0 %v5095_v58  ;;  %5431 = vmatprep.subr.mxu1 %v5099_v47  ;;  %v4943_v58 = vld [vmem:[%s13555_s5 + $0x7c8] sm:$0xff]  ;;  %v4949_v47 = vld [vmem:[%s13555_s5 + $0x7f8] sm:$0xff] }
0x1b14   :  { %5290 = vmatpush2.msra.mxu0 %v5094_v55  ;;  %5432 = vmatpush2.msra.mxu1 %v5098_v28  ;;  %v4942_v55 = vld [vmem:[%s13555_s5 + $0x7c0] sm:$0xff]  ;;  %v4948_v28 = vld [vmem:[%s13555_s5 + $0x7f0] sm:$0xff] }
0x1b15   :  { %5291 = vmatprep.subr.mxu0 %v5081_v44  ;;  %5433 = vmatprep.subr.mxu1 %v5085_v21  ;;  %v4929_v44 = vld [vmem:[%s13555_s5 + $0x728] sm:$0xff]  ;;  %v4935_v21 = vld [vmem:[%s13555_s5 + $0x758] sm:$0xff] }
0x1b16   :  { %5292 = vmatpush2.msra.mxu0 %v5080_v61  ;;  %5434 = vmatpush2.msra.mxu1 %v5084_v3  ;;  %v4928_v61 = vld [vmem:[%s13555_s5 + $0x720] sm:$0xff]  ;;  %v4934_v3 = vld [vmem:[%s13555_s5 + $0x750] sm:$0xff] }
0x1b17   :  { %5293 = vmatprep.subr.mxu0 %v5067_v32  ;;  %5435 = vmatprep.subr.mxu1 %v5071_v9  ;;  %v4915_v32 = vld [vmem:[%s13555_s5 + $0x688] sm:$0xff]  ;;  %v4921_v9 = vld [vmem:[%s13555_s5 + $0x6b8] sm:$0xff] }
0x1b18   :  { %5294 = vmatpush2.msra.mxu0 %v5066_v20  ;;  %5436 = vmatpush2.msra.mxu1 %v5070_v41  ;;  %v4914_v20 = vld [vmem:[%s13555_s5 + $0x680] sm:$0xff]  ;;  %v4920_v41 = vld [vmem:[%s13555_s5 + $0x6b0] sm:$0xff] }
0x1b19   :  { %5295 = vmatprep.subr.mxu0 %v5053_v53  ;;  %5437 = vmatprep.subr.mxu1 %v5057_v48  ;;  %v4901_v53 = vld [vmem:[%s13555_s5 + $0x5e8] sm:$0xff]  ;;  %v4907_v48 = vld [vmem:[%s13555_s5 + $0x618] sm:$0xff] }
0x1b1a   :  { %5296 = vmatpush2.msra.mxu0 %v5052_v15  ;;  %5438 = vmatpush2.msra.mxu1 %v5056_v7  ;;  %v4900_v15 = vld [vmem:[%s13555_s5 + $0x5e0] sm:$0xff]  ;;  %v4906_v7 = vld [vmem:[%s13555_s5 + $0x610] sm:$0xff] }
0x1b1b   :  { %5297 = vmatprep.subr.mxu0 %v5039_v17  ;;  %5439 = vmatprep.subr.mxu1 %v5043_v27  ;;  %v4887_v17 = vld [vmem:[%s13555_s5 + $0x548] sm:$0xff]  ;;  %v4893_v27 = vld [vmem:[%s13555_s5 + $0x578] sm:$0xff] }
0x1b1c   :  { %5298 = vmatpush2.msra.mxu0 %v5038_v22  ;;  %5440 = vmatpush2.msra.mxu1 %v5042_v57  ;;  %v4886_v22 = vld [vmem:[%s13555_s5 + $0x540] sm:$0xff]  ;;  %v4892_v57 = vld [vmem:[%s13555_s5 + $0x570] sm:$0xff] }
0x1b1d   :  { %5299 = vmatprep.subr.mxu0 %v5025_v40  ;;  %5441 = vmatprep.subr.mxu1 %v5029_v42  ;;  %v4873_v40 = vld [vmem:[%s13555_s5 + $0x4a8] sm:$0xff]  ;;  %v4879_v42 = vld [vmem:[%s13555_s5 + $0x4d8] sm:$0xff] }
0x1b1e   :  { %5300 = vmatpush2.msra.mxu0 %v5024_v52  ;;  %5442 = vmatpush2.msra.mxu1 %v5028_v30  ;;  %v4872_v52 = vld [vmem:[%s13555_s5 + $0x4a0] sm:$0xff]  ;;  %v4878_v30 = vld [vmem:[%s13555_s5 + $0x4d0] sm:$0xff] }
0x1b1f   :  { %5301 = vmatprep.subr.mxu0 %v5011_v31  ;;  %5443 = vmatprep.subr.mxu1 %v5015_v35  ;;  %v4859_v31 = vld [vmem:[%s13555_s5 + $0x408] sm:$0xff]  ;;  %v4865_v35 = vld [vmem:[%s13555_s5 + $0x438] sm:$0xff] }
0x1b20   :  { %5302 = vmatpush2.msra.mxu0 %v5010_v5  ;;  %5444 = vmatpush2.msra.mxu1 %v5014_v25  ;;  %v4858_v5 = vld [vmem:[%s13555_s5 + $0x400] sm:$0xff]  ;;  %v4864_v25 = vld [vmem:[%s13555_s5 + $0x430] sm:$0xff] }
0x1b21   :  { %5303 = vmatprep.subr.mxu0 %v4997_v8  ;;  %5445 = vmatprep.subr.mxu1 %v5001_v14  ;;  %v4845_v8 = vld [vmem:[%s13555_s5 + $0x368] sm:$0xff]  ;;  %v4851_v14 = vld [vmem:[%s13555_s5 + $0x398] sm:$0xff] }
0x1b22   :  { %5304 = vmatpush2.msra.mxu0 %v4996_v43  ;;  %5446 = vmatpush2.msra.mxu1 %v5000_v16  ;;  %v4844_v43 = vld [vmem:[%s13555_s5 + $0x360] sm:$0xff]  ;;  %v4850_v16 = vld [vmem:[%s13555_s5 + $0x390] sm:$0xff] }
0x1b23   :  { %5312 = vmatprep.subr.mxu0 %v4985_v18  ;;  %5525 = vmatprep.subr.mxu1 %v4991_v12  ;;  %v4831_v18 = vld [vmem:[%s13555_s5 + $0x2c8] sm:$0xff]  ;;  %v4837_v12 = vld [vmem:[%s13555_s5 + $0x2f8] sm:$0xff] }
0x1b9a   :  { %v4740_v33 = vpop.xlane.xlu0 %4739 }
0x1b9b   :  { %v4741_v11 = vmul.f32 0.004464286, %v4740_v33  ;;  %v4830_v33 = vld [vmem:[%s13555_s5 + $0x2c0] sm:$0xff] }
0x1b9d   :  { %v4742_v0 = vadd.f32 1e-05, %v4741_v11  ;;  %v4836_v11 = vld [vmem:[%s13555_s5 + $0x2f0] sm:$0xff] }
0x1b9f   :  { %8424 = vrsqrt.f32 %v4742_v0  ;;  %v4817_v0 = vld [vmem:[%s13555_s5 + $0x228] sm:$0xff] }
0x1bac   :  { %v8425_v23 = vpop.eup %8424 }
0x1bad   :  { %v4744_v13 = vmul.f32 %v8425_v23, %v11147_v19  ;;  %v4745_v26 = vmul.f32 %v8425_v23, %v11150_v46  ;;  %v4971_v19 = vld [vmem:[%s13555_s5 + $0x908] sm:$0xff]  ;;  %v4977_v46 = vld [vmem:[%s13555_s5 + $0x938] sm:$0xff] }
0x1bae   :  { %v4809_v23 = vld [vmem:[%s13555_s5 + $0x1b8] sm:$0xff] }
0x1baf   :  { %v4757_v24 = vmul.f32 %v4750_v10, %v4744_v13  ;;  %v4758_v59 = vmul.f32 %v4754_v1, %v4745_v26  ;;  %v4822_v10 = vld [vmem:[%s13555_s5 + $0x250] sm:$0xff]  ;;  %v4803_v1 = vld [vmem:[%s13555_s5 + $0x188] sm:$0xff]  ;;  %v4795_v26 = vld [vmem:[%s13555_s5 + $0x118] sm:$0xff] }
0x1bb0   :  { %v4789_v13 = vld [vmem:[%s13555_s5 + $0xe8] sm:$0xff] }
0x1bb1   :  { %v11319_v50 = vadd.f32 %v4763_v39, %v4757_v24  ;;  %v11321_v34 = vadd.f32 %v4767_v36, %v4758_v59  ;;  %v4802_v39 = vld [vmem:[%s13555_s5 + $0x180] sm:$0xff]  ;;  %v4808_v36 = vld [vmem:[%s13555_s5 + $0x1b0] sm:$0xff] }
0x1bb2   :  { %v4788_v24 = vld [vmem:[%s13555_s5 + $0xe0] sm:$0xff]  ;;  %v4794_v59 = vld [vmem:[%s13555_s5 + $0x110] sm:$0xff] }
0x1bb3   :  { %7376 = vmatprep.mubr.msk.f32.mxu0 %vm3453_vm4, %v11321_v34  ;;  %7378 = vmatprep.mubr.msk.f32.mxu1 %vm3453_vm4, %v11321_v34 }
0x1bb4   :  { %5306 = vmatmul.mubr.f32.vlgmr.msra.gmra.mxu0 %v11319_v50  ;;  %5448 = vmatmul.mubr.f32.vlgmr.msra.gmra.mxu1 %v11319_v50 }
0x1bb5   :  { %5313 = vmatpush1.msra.mxu0 %v4984_v62  ;;  %5526 = vmatpush1.msra.mxu1 %v4990_v37  ;;  %v4775_v62 = vld [vmem:[%s13555_s5 + $0x48] sm:$0xff]  ;;  %v4781_v37 = vld [vmem:[%s13555_s5 + $0x78] sm:$0xff] }
0x1bb6   :  { %5314 = vmatprep.subr.mxu0 %v4971_v19  ;;  %7377 = vmatprep.mubr.msk.f32.mxu0 %vm3453_vm4, %v11321_v34  ;;  %v4774_v19 = vld [vmem:[%s13555_s5 + $0x40] sm:$0xff] }
0x1bb7   :  { %5527 = vmatprep.subr.mxu1 %v4977_v46  ;;  %7380 = vmatprep.mubr.msk.f32.mxu1 %vm3453_vm4, %v11321_v34  ;;  %v4780_v46 = vld [vmem:[%s13555_s5 + $0x70] sm:$0xff] }
0x1bb8   :  { %5315 = vmatpush1.msra.mxu0 %v4970_v45  ;;  %5528 = vmatpush1.msra.mxu1 %v4976_v51  ;;  %v5153_v45 = vld [vmem:[%s13555_s5 + $0x1128] sm:$0xff]  ;;  %v5159_v51 = vld [vmem:[%s13555_s5 + $0x1158] sm:$0xff] }
0x1bb9   :  { %5316 = vmatprep.subr.mxu0 %v4957_v4  ;;  %5529 = vmatprep.subr.mxu1 %v4963_v60  ;;  %v5152_v4 = vld [vmem:[%s13555_s5 + $0x1120] sm:$0xff]  ;;  %v5158_v60 = vld [vmem:[%s13555_s5 + $0x1150] sm:$0xff] }
0x1bba   :  { %5317 = vmatpush1.msra.mxu0 %v4956_v63  ;;  %5530 = vmatpush1.msra.mxu1 %v4962_v2  ;;  %v5139_v63 = vld [vmem:[%s13555_s5 + $0x1088] sm:$0xff]  ;;  %v5145_v2 = vld [vmem:[%s13555_s5 + $0x10b8] sm:$0xff] }
0x1bbb   :  { %5318 = vmatprep.subr.mxu0 %v4943_v58  ;;  %5531 = vmatprep.subr.mxu1 %v4949_v47  ;;  %v5138_v58 = vld [vmem:[%s13555_s5 + $0x1080] sm:$0xff]  ;;  %v5144_v47 = vld [vmem:[%s13555_s5 + $0x10b0] sm:$0xff] }
0x1bbc   :  { %5319 = vmatpush1.msra.mxu0 %v4942_v55  ;;  %5532 = vmatpush1.msra.mxu1 %v4948_v28  ;;  %v5125_v55 = vld [vmem:[%s13555_s5 + $0xfe8] sm:$0xff]  ;;  %v5131_v28 = vld [vmem:[%s13555_s5 + $0x1018] sm:$0xff] }
0x1bbd   :  { %5320 = vmatprep.subr.mxu0 %v4929_v44  ;;  %5533 = vmatprep.subr.mxu1 %v4935_v21  ;;  %v5124_v44 = vld [vmem:[%s13555_s5 + $0xfe0] sm:$0xff]  ;;  %v5130_v21 = vld [vmem:[%s13555_s5 + $0x1010] sm:$0xff] }
0x1bbe   :  { %5321 = vmatpush1.msra.mxu0 %v4928_v61  ;;  %5534 = vmatpush1.msra.mxu1 %v4934_v3  ;;  %v5111_v61 = vld [vmem:[%s13555_s5 + $0xf48] sm:$0xff]  ;;  %v5117_v3 = vld [vmem:[%s13555_s5 + $0xf78] sm:$0xff] }
0x1bbf   :  { %5322 = vmatprep.subr.mxu0 %v4915_v32  ;;  %5535 = vmatprep.subr.mxu1 %v4921_v9  ;;  %v5110_v32 = vld [vmem:[%s13555_s5 + $0xf40] sm:$0xff]  ;;  %v5116_v9 = vld [vmem:[%s13555_s5 + $0xf70] sm:$0xff] }
0x1bc0   :  { %5323 = vmatpush1.msra.mxu0 %v4914_v20  ;;  %5536 = vmatpush1.msra.mxu1 %v4920_v41  ;;  %v5097_v20 = vld [vmem:[%s13555_s5 + $0xea8] sm:$0xff]  ;;  %v5103_v41 = vld [vmem:[%s13555_s5 + $0xed8] sm:$0xff] }
0x1bc1   :  { %5324 = vmatprep.subr.mxu0 %v4901_v53  ;;  %5537 = vmatprep.subr.mxu1 %v4907_v48  ;;  %v5096_v53 = vld [vmem:[%s13555_s5 + $0xea0] sm:$0xff]  ;;  %v5102_v48 = vld [vmem:[%s13555_s5 + $0xed0] sm:$0xff] }
0x1bc2   :  { %5325 = vmatpush1.msra.mxu0 %v4900_v15  ;;  %5538 = vmatpush1.msra.mxu1 %v4906_v7  ;;  %v5083_v15 = vld [vmem:[%s13555_s5 + $0xe08] sm:$0xff]  ;;  %v5089_v7 = vld [vmem:[%s13555_s5 + $0xe38] sm:$0xff] }
0x1bc3   :  { %5326 = vmatprep.subr.mxu0 %v4887_v17  ;;  %5539 = vmatprep.subr.mxu1 %v4893_v27  ;;  %v5082_v17 = vld [vmem:[%s13555_s5 + $0xe00] sm:$0xff]  ;;  %v5088_v27 = vld [vmem:[%s13555_s5 + $0xe30] sm:$0xff] }
0x1bc4   :  { %5327 = vmatpush1.msra.mxu0 %v4886_v22  ;;  %5540 = vmatpush1.msra.mxu1 %v4892_v57  ;;  %v5069_v22 = vld [vmem:[%s13555_s5 + $0xd68] sm:$0xff]  ;;  %v5075_v57 = vld [vmem:[%s13555_s5 + $0xd98] sm:$0xff] }
0x1bc5   :  { %5328 = vmatprep.subr.mxu0 %v4873_v40  ;;  %5541 = vmatprep.subr.mxu1 %v4879_v42  ;;  %v5068_v40 = vld [vmem:[%s13555_s5 + $0xd60] sm:$0xff]  ;;  %v5074_v42 = vld [vmem:[%s13555_s5 + $0xd90] sm:$0xff] }
0x1bc6   :  { %5329 = vmatpush1.msra.mxu0 %v4872_v52  ;;  %5542 = vmatpush1.msra.mxu1 %v4878_v30  ;;  %v5055_v52 = vld [vmem:[%s13555_s5 + $0xcc8] sm:$0xff]  ;;  %v5061_v30 = vld [vmem:[%s13555_s5 + $0xcf8] sm:$0xff] }
0x1bc7   :  { %5330 = vmatprep.subr.mxu0 %v4859_v31  ;;  %5543 = vmatprep.subr.mxu1 %v4865_v35  ;;  %v5054_v31 = vld [vmem:[%s13555_s5 + $0xcc0] sm:$0xff]  ;;  %v5060_v35 = vld [vmem:[%s13555_s5 + $0xcf0] sm:$0xff] }
0x1bc8   :  { %5331 = vmatpush1.msra.mxu0 %v4858_v5  ;;  %5544 = vmatpush1.msra.mxu1 %v4864_v25  ;;  %v5041_v5 = vld [vmem:[%s13555_s5 + $0xc28] sm:$0xff]  ;;  %v5047_v25 = vld [vmem:[%s13555_s5 + $0xc58] sm:$0xff] }
0x1bc9   :  { %5332 = vmatprep.subr.mxu0 %v4845_v8  ;;  %5545 = vmatprep.subr.mxu1 %v4851_v14  ;;  %v5040_v8 = vld [vmem:[%s13555_s5 + $0xc20] sm:$0xff]  ;;  %v5046_v14 = vld [vmem:[%s13555_s5 + $0xc50] sm:$0xff] }
0x1bca   :  { %5333 = vmatpush1.msra.mxu0 %v4844_v43  ;;  %5546 = vmatpush1.msra.mxu1 %v4850_v16  ;;  %v5027_v43 = vld [vmem:[%s13555_s5 + $0xb88] sm:$0xff]  ;;  %v5033_v16 = vld [vmem:[%s13555_s5 + $0xbb8] sm:$0xff] }
0x1bcb   :  { %5334 = vmatprep.subr.mxu0 %v4831_v18  ;;  %5547 = vmatprep.subr.mxu1 %v4837_v12  ;;  %v5026_v18 = vld [vmem:[%s13555_s5 + $0xb80] sm:$0xff]  ;;  %v5032_v12 = vld [vmem:[%s13555_s5 + $0xbb0] sm:$0xff] }
0x1bcc   :  { %5335 = vmatpush1.msra.mxu0 %v4830_v33  ;;  %5548 = vmatpush1.msra.mxu1 %v4836_v11  ;;  %v5013_v33 = vld [vmem:[%s13555_s5 + $0xae8] sm:$0xff]  ;;  %v5019_v11 = vld [vmem:[%s13555_s5 + $0xb18] sm:$0xff] }
0x1bcd   :  { %5336 = vmatprep.subr.mxu0 %v4817_v0  ;;  %5549 = vmatprep.subr.mxu1 %v4823_v29  ;;  %v5012_v0 = vld [vmem:[%s13555_s5 + $0xae0] sm:$0xff]  ;;  %v5018_v29 = vld [vmem:[%s13555_s5 + $0xb10] sm:$0xff] }
0x1bce   :  { %5337 = vmatpush1.msra.mxu0 %v4816_v56  ;;  %5550 = vmatpush1.msra.mxu1 %v4822_v10  ;;  %v4999_v56 = vld [vmem:[%s13555_s5 + $0xa48] sm:$0xff]  ;;  %v5005_v10 = vld [vmem:[%s13555_s5 + $0xa78] sm:$0xff] }
0x1bcf   :  { %5338 = vmatprep.subr.mxu0 %v4803_v1  ;;  %5551 = vmatprep.subr.mxu1 %v4809_v23  ;;  %v4998_v1 = vld [vmem:[%s13555_s5 + $0xa40] sm:$0xff]  ;;  %v5004_v23 = vld [vmem:[%s13555_s5 + $0xa70] sm:$0xff] }
0x1bd0   :  { %5339 = vmatpush1.msra.mxu0 %v4802_v39  ;;  %5552 = vmatpush1.msra.mxu1 %v4808_v36  ;;  %v4989_v39 = vld [vmem:[%s13555_s5 + $0x9c8] sm:$0xff]  ;;  %v4995_v36 = vld [vmem:[%s13555_s5 + $0x9f8] sm:$0xff] }
0x1bd1   :  { %5340 = vmatprep.subr.mxu0 %v4789_v13  ;;  %5553 = vmatprep.subr.mxu1 %v4795_v26  ;;  %v4988_v13 = vld [vmem:[%s13555_s5 + $0x9c0] sm:$0xff]  ;;  %v4994_v26 = vld [vmem:[%s13555_s5 + $0x9f0] sm:$0xff] }
0x1bd2   :  { %5341 = vmatpush1.msra.mxu0 %v4788_v24  ;;  %5554 = vmatpush1.msra.mxu1 %v4794_v59  ;;  %v4975_v24 = vld [vmem:[%s13555_s5 + $0x928] sm:$0xff]  ;;  %v4981_v59 = vld [vmem:[%s13555_s5 + $0x958] sm:$0xff] }
0x1bd3   :  { %5342 = vmatprep.subr.mxu0 %v4775_v62  ;;  %5555 = vmatprep.subr.mxu1 %v4781_v37  ;;  %v4974_v62 = vld [vmem:[%s13555_s5 + $0x920] sm:$0xff]  ;;  %v4980_v37 = vld [vmem:[%s13555_s5 + $0x950] sm:$0xff] }
0x1bd4   :  { %5343 = vmatpush1.msra.mxu0 %v4774_v19  ;;  %5556 = vmatpush1.msra.mxu1 %v4780_v46  ;;  %v4961_v19 = vld [vmem:[%s13555_s5 + $0x888] sm:$0xff]  ;;  %v4967_v46 = vld [vmem:[%s13555_s5 + $0x8b8] sm:$0xff] }
0x1bd5   :  { %5352 = vmatprep.subr.mxu0 %v5153_v45  ;;  %5565 = vmatprep.subr.mxu1 %v5159_v51  ;;  %v4960_v45 = vld [vmem:[%s13555_s5 + $0x880] sm:$0xff]  ;;  %v4966_v51 = vld [vmem:[%s13555_s5 + $0x8b0] sm:$0xff] }
0x1bd6   :  { %5353 = vmatpush2.msra.mxu0 %v5152_v4  ;;  %5566 = vmatpush2.msra.mxu1 %v5158_v60  ;;  %v4947_v4 = vld [vmem:[%s13555_s5 + $0x7e8] sm:$0xff]  ;;  %v4953_v60 = vld [vmem:[%s13555_s5 + $0x818] sm:$0xff] }
0x1bd7   :  { %5354 = vmatprep.subr.mxu0 %v5139_v63  ;;  %5567 = vmatprep.subr.mxu1 %v5145_v2  ;;  %v4946_v63 = vld [vmem:[%s13555_s5 + $0x7e0] sm:$0xff]  ;;  %v4952_v2 = vld [vmem:[%s13555_s5 + $0x810] sm:$0xff] }
0x1bd8   :  { %5355 = vmatpush2.msra.mxu0 %v5138_v58  ;;  %5568 = vmatpush2.msra.mxu1 %v5144_v47  ;;  %v4933_v58 = vld [vmem:[%s13555_s5 + $0x748] sm:$0xff]  ;;  %v4939_v47 = vld [vmem:[%s13555_s5 + $0x778] sm:$0xff] }
0x1bd9   :  { %5356 = vmatprep.subr.mxu0 %v5125_v55  ;;  %5569 = vmatprep.subr.mxu1 %v5131_v28  ;;  %v4932_v55 = vld [vmem:[%s13555_s5 + $0x740] sm:$0xff]  ;;  %v4938_v28 = vld [vmem:[%s13555_s5 + $0x770] sm:$0xff] }
0x1bda   :  { %5357 = vmatpush2.msra.mxu0 %v5124_v44  ;;  %5570 = vmatpush2.msra.mxu1 %v5130_v21  ;;  %v4919_v44 = vld [vmem:[%s13555_s5 + $0x6a8] sm:$0xff]  ;;  %v4925_v21 = vld [vmem:[%s13555_s5 + $0x6d8] sm:$0xff] }
0x1bdb   :  { %5358 = vmatprep.subr.mxu0 %v5111_v61  ;;  %5571 = vmatprep.subr.mxu1 %v5117_v3  ;;  %v4918_v61 = vld [vmem:[%s13555_s5 + $0x6a0] sm:$0xff]  ;;  %v4924_v3 = vld [vmem:[%s13555_s5 + $0x6d0] sm:$0xff] }
0x1bdc   :  { %5359 = vmatpush2.msra.mxu0 %v5110_v32  ;;  %5572 = vmatpush2.msra.mxu1 %v5116_v9  ;;  %v4905_v32 = vld [vmem:[%s13555_s5 + $0x608] sm:$0xff]  ;;  %v4911_v9 = vld [vmem:[%s13555_s5 + $0x638] sm:$0xff] }
0x1bdd   :  { %5360 = vmatprep.subr.mxu0 %v5097_v20  ;;  %5573 = vmatprep.subr.mxu1 %v5103_v41  ;;  %v4904_v20 = vld [vmem:[%s13555_s5 + $0x600] sm:$0xff]  ;;  %v4910_v41 = vld [vmem:[%s13555_s5 + $0x630] sm:$0xff] }
0x1bde   :  { %5361 = vmatpush2.msra.mxu0 %v5096_v53  ;;  %5574 = vmatpush2.msra.mxu1 %v5102_v48  ;;  %v4891_v53 = vld [vmem:[%s13555_s5 + $0x568] sm:$0xff]  ;;  %v4897_v48 = vld [vmem:[%s13555_s5 + $0x598] sm:$0xff] }
0x1bdf   :  { %5362 = vmatprep.subr.mxu0 %v5083_v15  ;;  %5575 = vmatprep.subr.mxu1 %v5089_v7  ;;  %v4890_v15 = vld [vmem:[%s13555_s5 + $0x560] sm:$0xff]  ;;  %v4896_v7 = vld [vmem:[%s13555_s5 + $0x590] sm:$0xff] }
0x1be0   :  { %5363 = vmatpush2.msra.mxu0 %v5082_v17  ;;  %5576 = vmatpush2.msra.mxu1 %v5088_v27  ;;  %v4877_v17 = vld [vmem:[%s13555_s5 + $0x4c8] sm:$0xff]  ;;  %v4883_v27 = vld [vmem:[%s13555_s5 + $0x4f8] sm:$0xff] }
0x1be1   :  { %5364 = vmatprep.subr.mxu0 %v5069_v22  ;;  %5577 = vmatprep.subr.mxu1 %v5075_v57  ;;  %v4876_v22 = vld [vmem:[%s13555_s5 + $0x4c0] sm:$0xff]  ;;  %v4882_v57 = vld [vmem:[%s13555_s5 + $0x4f0] sm:$0xff] }
0x1be2   :  { %5365 = vmatpush2.msra.mxu0 %v5068_v40  ;;  %5578 = vmatpush2.msra.mxu1 %v5074_v42  ;;  %v4863_v40 = vld [vmem:[%s13555_s5 + $0x428] sm:$0xff]  ;;  %v4869_v42 = vld [vmem:[%s13555_s5 + $0x458] sm:$0xff] }
0x1be3   :  { %5366 = vmatprep.subr.mxu0 %v5055_v52  ;;  %5579 = vmatprep.subr.mxu1 %v5061_v30  ;;  %v4862_v52 = vld [vmem:[%s13555_s5 + $0x420] sm:$0xff]  ;;  %v4868_v30 = vld [vmem:[%s13555_s5 + $0x450] sm:$0xff] }
0x1be4   :  { %5367 = vmatpush2.msra.mxu0 %v5054_v31  ;;  %5580 = vmatpush2.msra.mxu1 %v5060_v35  ;;  %v4849_v31 = vld [vmem:[%s13555_s5 + $0x388] sm:$0xff]  ;;  %v4855_v35 = vld [vmem:[%s13555_s5 + $0x3b8] sm:$0xff] }
0x1be5   :  { %5368 = vmatprep.subr.mxu0 %v5041_v5  ;;  %5581 = vmatprep.subr.mxu1 %v5047_v25  ;;  %v4848_v5 = vld [vmem:[%s13555_s5 + $0x380] sm:$0xff]  ;;  %v4854_v25 = vld [vmem:[%s13555_s5 + $0x3b0] sm:$0xff] }
0x1be6   :  { %5369 = vmatpush2.msra.mxu0 %v5040_v8  ;;  %5582 = vmatpush2.msra.mxu1 %v5046_v14  ;;  %v4835_v8 = vld [vmem:[%s13555_s5 + $0x2e8] sm:$0xff]  ;;  %v4841_v14 = vld [vmem:[%s13555_s5 + $0x318] sm:$0xff] }
0x1be7   :  { %5370 = vmatprep.subr.mxu0 %v5027_v43  ;;  %5583 = vmatprep.subr.mxu1 %v5033_v16  ;;  %v4834_v43 = vld [vmem:[%s13555_s5 + $0x2e0] sm:$0xff]  ;;  %v4840_v16 = vld [vmem:[%s13555_s5 + $0x310] sm:$0xff] }
0x1be8   :  { %5371 = vmatpush2.msra.mxu0 %v5026_v18  ;;  %5584 = vmatpush2.msra.mxu1 %v5032_v12  ;;  %v4821_v18 = vld [vmem:[%s13555_s5 + $0x248] sm:$0xff]  ;;  %v4827_v12 = vld [vmem:[%s13555_s5 + $0x278] sm:$0xff] }
0x1be9   :  { %5372 = vmatprep.subr.mxu0 %v5013_v33  ;;  %5585 = vmatprep.subr.mxu1 %v5019_v11  ;;  %v4820_v33 = vld [vmem:[%s13555_s5 + $0x240] sm:$0xff]  ;;  %v4826_v11 = vld [vmem:[%s13555_s5 + $0x270] sm:$0xff] }
0x1bea   :  { %5373 = vmatpush2.msra.mxu0 %v5012_v0  ;;  %5586 = vmatpush2.msra.mxu1 %v5018_v29  ;;  %v4807_v0 = vld [vmem:[%s13555_s5 + $0x1a8] sm:$0xff]  ;;  %v4813_v29 = vld [vmem:[%s13555_s5 + $0x1d8] sm:$0xff] }
0x1beb   :  { %5374 = vmatprep.subr.mxu0 %v4999_v56  ;;  %5587 = vmatprep.subr.mxu1 %v5005_v10  ;;  %v4806_v56 = vld [vmem:[%s13555_s5 + $0x1a0] sm:$0xff]  ;;  %v4812_v10 = vld [vmem:[%s13555_s5 + $0x1d0] sm:$0xff] }
0x1bec   :  { %5375 = vmatpush2.msra.mxu0 %v4998_v1  ;;  %5588 = vmatpush2.msra.mxu1 %v5004_v23  ;;  %v4793_v1 = vld [vmem:[%s13555_s5 + $0x108] sm:$0xff]  ;;  %v4799_v23 = vld [vmem:[%s13555_s5 + $0x138] sm:$0xff] }
0x1bed   :  { %5377 = vmatmul.mubr.f32.vlgmr.msra.gmra.mxu0 %v11319_v50  ;;  %5454 = vmatprep.subr.mxu0 %v4989_v39  ;;  %v4792_v39 = vld [vmem:[%s13555_s5 + $0x100] sm:$0xff] }
0x1bee   :  { %5590 = vmatmul.mubr.f32.vlgmr.msra.gmra.mxu1 %v11319_v50  ;;  %5667 = vmatprep.subr.mxu1 %v4995_v36  ;;  %v4798_v36 = vld [vmem:[%s13555_s5 + $0x130] sm:$0xff] }
0x1bef   :  { %5455 = vmatpush1.msra.mxu0 %v4988_v13  ;;  %7379 = vmatprep.mubr.msk.f32.mxu0 %vm3453_vm4, %v11321_v34  ;;  %v4779_v13 = vld [vmem:[%s13555_s5 + $0x68] sm:$0xff] }
0x1bf0   :  { %5668 = vmatpush1.msra.mxu1 %v4994_v26  ;;  %7382 = vmatprep.mubr.msk.f32.mxu1 %vm3453_vm4, %v11321_v34  ;;  %v4785_v26 = vld [vmem:[%s13555_s5 + $0x98] sm:$0xff] }
0x1bf1   :  { %5456 = vmatprep.subr.mxu0 %v4975_v24  ;;  %5669 = vmatprep.subr.mxu1 %v4981_v59  ;;  %v4778_v24 = vld [vmem:[%s13555_s5 + $0x60] sm:$0xff]  ;;  %v4784_v59 = vld [vmem:[%s13555_s5 + $0x90] sm:$0xff] }
0x1bf2   :  { %5457 = vmatpush1.msra.mxu0 %v4974_v62  ;;  %5670 = vmatpush1.msra.mxu1 %v4980_v37  ;;  %v5157_v62 = vld [vmem:[%s13555_s5 + $0x1148] sm:$0xff]  ;;  %v5163_v37 = vld [vmem:[%s13555_s5 + $0x1178] sm:$0xff] }
0x1bf3   :  { %5458 = vmatprep.subr.mxu0 %v4961_v19  ;;  %5671 = vmatprep.subr.mxu1 %v4967_v46  ;;  %v5156_v19 = vld [vmem:[%s13555_s5 + $0x1140] sm:$0xff]  ;;  %v5162_v46 = vld [vmem:[%s13555_s5 + $0x1170] sm:$0xff] }
0x1bf4   :  { %5459 = vmatpush1.msra.mxu0 %v4960_v45  ;;  %5672 = vmatpush1.msra.mxu1 %v4966_v51  ;;  %v5143_v45 = vld [vmem:[%s13555_s5 + $0x10a8] sm:$0xff]  ;;  %v5149_v51 = vld [vmem:[%s13555_s5 + $0x10d8] sm:$0xff] }
0x1bf5   :  { %5460 = vmatprep.subr.mxu0 %v4947_v4  ;;  %5673 = vmatprep.subr.mxu1 %v4953_v60  ;;  %v5142_v4 = vld [vmem:[%s13555_s5 + $0x10a0] sm:$0xff]  ;;  %v5148_v60 = vld [vmem:[%s13555_s5 + $0x10d0] sm:$0xff] }
0x1bf6   :  { %5461 = vmatpush1.msra.mxu0 %v4946_v63  ;;  %5674 = vmatpush1.msra.mxu1 %v4952_v2  ;;  %v5129_v63 = vld [vmem:[%s13555_s5 + $0x1008] sm:$0xff]  ;;  %v5135_v2 = vld [vmem:[%s13555_s5 + $0x1038] sm:$0xff] }
0x1bf7   :  { %5462 = vmatprep.subr.mxu0 %v4933_v58  ;;  %5675 = vmatprep.subr.mxu1 %v4939_v47  ;;  %v5128_v58 = vld [vmem:[%s13555_s5 + $0x1000] sm:$0xff]  ;;  %v5134_v47 = vld [vmem:[%s13555_s5 + $0x1030] sm:$0xff] }
0x1bf8   :  { %5463 = vmatpush1.msra.mxu0 %v4932_v55  ;;  %5676 = vmatpush1.msra.mxu1 %v4938_v28  ;;  %v5115_v55 = vld [vmem:[%s13555_s5 + $0xf68] sm:$0xff]  ;;  %v5121_v28 = vld [vmem:[%s13555_s5 + $0xf98] sm:$0xff] }
0x1bf9   :  { %5464 = vmatprep.subr.mxu0 %v4919_v44  ;;  %5677 = vmatprep.subr.mxu1 %v4925_v21  ;;  %v5114_v44 = vld [vmem:[%s13555_s5 + $0xf60] sm:$0xff]  ;;  %v5120_v21 = vld [vmem:[%s13555_s5 + $0xf90] sm:$0xff] }
0x1bfa   :  { %5465 = vmatpush1.msra.mxu0 %v4918_v61  ;;  %5678 = vmatpush1.msra.mxu1 %v4924_v3  ;;  %v5101_v61 = vld [vmem:[%s13555_s5 + $0xec8] sm:$0xff]  ;;  %v5107_v3 = vld [vmem:[%s13555_s5 + $0xef8] sm:$0xff] }
0x1bfb   :  { %5466 = vmatprep.subr.mxu0 %v4905_v32  ;;  %5679 = vmatprep.subr.mxu1 %v4911_v9  ;;  %v5100_v32 = vld [vmem:[%s13555_s5 + $0xec0] sm:$0xff]  ;;  %v5106_v9 = vld [vmem:[%s13555_s5 + $0xef0] sm:$0xff] }
0x1bfc   :  { %5467 = vmatpush1.msra.mxu0 %v4904_v20  ;;  %5680 = vmatpush1.msra.mxu1 %v4910_v41  ;;  %v5087_v20 = vld [vmem:[%s13555_s5 + $0xe28] sm:$0xff]  ;;  %v5093_v41 = vld [vmem:[%s13555_s5 + $0xe58] sm:$0xff] }
0x1bfd   :  { %5468 = vmatprep.subr.mxu0 %v4891_v53  ;;  %5681 = vmatprep.subr.mxu1 %v4897_v48  ;;  %v5086_v53 = vld [vmem:[%s13555_s5 + $0xe20] sm:$0xff]  ;;  %v5092_v48 = vld [vmem:[%s13555_s5 + $0xe50] sm:$0xff] }
0x1bfe   :  { %5469 = vmatpush1.msra.mxu0 %v4890_v15  ;;  %5682 = vmatpush1.msra.mxu1 %v4896_v7  ;;  %v5073_v15 = vld [vmem:[%s13555_s5 + $0xd88] sm:$0xff]  ;;  %v5079_v7 = vld [vmem:[%s13555_s5 + $0xdb8] sm:$0xff] }
0x1bff   :  { %5470 = vmatprep.subr.mxu0 %v4877_v17  ;;  %5683 = vmatprep.subr.mxu1 %v4883_v27  ;;  %v5072_v17 = vld [vmem:[%s13555_s5 + $0xd80] sm:$0xff]  ;;  %v5078_v27 = vld [vmem:[%s13555_s5 + $0xdb0] sm:$0xff] }
0x1c00   :  { %5471 = vmatpush1.msra.mxu0 %v4876_v22  ;;  %5684 = vmatpush1.msra.mxu1 %v4882_v57  ;;  %v5059_v22 = vld [vmem:[%s13555_s5 + $0xce8] sm:$0xff]  ;;  %v5065_v57 = vld [vmem:[%s13555_s5 + $0xd18] sm:$0xff] }
0x1c01   :  { %5472 = vmatprep.subr.mxu0 %v4863_v40  ;;  %5685 = vmatprep.subr.mxu1 %v4869_v42  ;;  %v5058_v40 = vld [vmem:[%s13555_s5 + $0xce0] sm:$0xff]  ;;  %v5064_v42 = vld [vmem:[%s13555_s5 + $0xd10] sm:$0xff] }
0x1c02   :  { %5473 = vmatpush1.msra.mxu0 %v4862_v52  ;;  %5686 = vmatpush1.msra.mxu1 %v4868_v30  ;;  %v5045_v52 = vld [vmem:[%s13555_s5 + $0xc48] sm:$0xff]  ;;  %v5051_v30 = vld [vmem:[%s13555_s5 + $0xc78] sm:$0xff] }
0x1c03   :  { %5474 = vmatprep.subr.mxu0 %v4849_v31  ;;  %5687 = vmatprep.subr.mxu1 %v4855_v35  ;;  %v5044_v31 = vld [vmem:[%s13555_s5 + $0xc40] sm:$0xff]  ;;  %v5050_v35 = vld [vmem:[%s13555_s5 + $0xc70] sm:$0xff] }
0x1c04   :  { %5475 = vmatpush1.msra.mxu0 %v4848_v5  ;;  %5688 = vmatpush1.msra.mxu1 %v4854_v25  ;;  %v5031_v5 = vld [vmem:[%s13555_s5 + $0xba8] sm:$0xff]  ;;  %v5037_v25 = vld [vmem:[%s13555_s5 + $0xbd8] sm:$0xff] }
0x1c05   :  { %5476 = vmatprep.subr.mxu0 %v4835_v8  ;;  %5689 = vmatprep.subr.mxu1 %v4841_v14  ;;  %v5030_v8 = vld [vmem:[%s13555_s5 + $0xba0] sm:$0xff]  ;;  %v5036_v14 = vld [vmem:[%s13555_s5 + $0xbd0] sm:$0xff] }
0x1c06   :  { %5477 = vmatpush1.msra.mxu0 %v4834_v43  ;;  %5690 = vmatpush1.msra.mxu1 %v4840_v16  ;;  %v5017_v43 = vld [vmem:[%s13555_s5 + $0xb08] sm:$0xff]  ;;  %v5023_v16 = vld [vmem:[%s13555_s5 + $0xb38] sm:$0xff] }
0x1c07   :  { %5478 = vmatprep.subr.mxu0 %v4821_v18  ;;  %5691 = vmatprep.subr.mxu1 %v4827_v12  ;;  %v5016_v18 = vld [vmem:[%s13555_s5 + $0xb00] sm:$0xff]  ;;  %v5022_v12 = vld [vmem:[%s13555_s5 + $0xb30] sm:$0xff] }
0x1c08   :  { %5479 = vmatpush1.msra.mxu0 %v4820_v33  ;;  %5692 = vmatpush1.msra.mxu1 %v4826_v11  ;;  %v5003_v33 = vld [vmem:[%s13555_s5 + $0xa68] sm:$0xff]  ;;  %v5009_v11 = vld [vmem:[%s13555_s5 + $0xa98] sm:$0xff] }
0x1c09   :  { %5480 = vmatprep.subr.mxu0 %v4807_v0  ;;  %5693 = vmatprep.subr.mxu1 %v4813_v29  ;;  %v5002_v0 = vld [vmem:[%s13555_s5 + $0xa60] sm:$0xff]  ;;  %v5008_v29 = vld [vmem:[%s13555_s5 + $0xa90] sm:$0xff] }
0x1c0a   :  { %5481 = vmatpush1.msra.mxu0 %v4806_v56  ;;  %5694 = vmatpush1.msra.mxu1 %v4812_v10  ;;  %v4993_v56 = vld [vmem:[%s13555_s5 + $0x9e8] sm:$0xff]  ;;  %v4992_v10 = vld [vmem:[%s13555_s5 + $0x9e0] sm:$0xff] }
0x1c0b   :  { %5482 = vmatprep.subr.mxu0 %v4793_v1  ;;  %5695 = vmatprep.subr.mxu1 %v4799_v23  ;;  %v4979_v1 = vld [vmem:[%s13555_s5 + $0x948] sm:$0xff]  ;;  %v4978_v23 = vld [vmem:[%s13555_s5 + $0x940] sm:$0xff] }
0x1c0c   :  { %5483 = vmatpush1.msra.mxu0 %v4792_v39  ;;  %5696 = vmatpush1.msra.mxu1 %v4798_v36  ;;  %v4965_v39 = vld [vmem:[%s13555_s5 + $0x8a8] sm:$0xff]  ;;  %v4964_v36 = vld [vmem:[%s13555_s5 + $0x8a0] sm:$0xff] }
0x1c0d   :  { %5484 = vmatprep.subr.mxu0 %v4779_v13  ;;  %5697 = vmatprep.subr.mxu1 %v4785_v26  ;;  %v4951_v13 = vld [vmem:[%s13555_s5 + $0x808] sm:$0xff]  ;;  %v4950_v26 = vld [vmem:[%s13555_s5 + $0x800] sm:$0xff] }
0x1c0e   :  { %5485 = vmatpush1.msra.mxu0 %v4778_v24  ;;  %5698 = vmatpush1.msra.mxu1 %v4784_v59  ;;  %v4936_v24 = vld [vmem:[%s13555_s5 + $0x760] sm:$0xff]  ;;  %v4923_v59 = vld [vmem:[%s13555_s5 + $0x6c8] sm:$0xff] }
0x1c0f   :  { %5494 = vmatprep.subr.mxu0 %v5157_v62  ;;  %5707 = vmatprep.subr.mxu1 %v5163_v37  ;;  %v4922_v62 = vld [vmem:[%s13555_s5 + $0x6c0] sm:$0xff]  ;;  %v4909_v37 = vld [vmem:[%s13555_s5 + $0x628] sm:$0xff] }
0x1c10   :  { %5495 = vmatpush2.msra.mxu0 %v5156_v19  ;;  %5708 = vmatpush2.msra.mxu1 %v5162_v46  ;;  %v4908_v19 = vld [vmem:[%s13555_s5 + $0x620] sm:$0xff]  ;;  %v4895_v46 = vld [vmem:[%s13555_s5 + $0x588] sm:$0xff] }
0x1c11   :  { %5496 = vmatprep.subr.mxu0 %v5143_v45  ;;  %5709 = vmatprep.subr.mxu1 %v5149_v51  ;;  %v4894_v45 = vld [vmem:[%s13555_s5 + $0x580] sm:$0xff]  ;;  %v4881_v51 = vld [vmem:[%s13555_s5 + $0x4e8] sm:$0xff] }
0x1c12   :  { %5497 = vmatpush2.msra.mxu0 %v5142_v4  ;;  %5710 = vmatpush2.msra.mxu1 %v5148_v60  ;;  %v4880_v4 = vld [vmem:[%s13555_s5 + $0x4e0] sm:$0xff]  ;;  %v4867_v60 = vld [vmem:[%s13555_s5 + $0x448] sm:$0xff] }
0x1c13   :  { %5498 = vmatprep.subr.mxu0 %v5129_v63  ;;  %5711 = vmatprep.subr.mxu1 %v5135_v2  ;;  %v4866_v63 = vld [vmem:[%s13555_s5 + $0x440] sm:$0xff]  ;;  %v4853_v2 = vld [vmem:[%s13555_s5 + $0x3a8] sm:$0xff] }
0x1c14   :  { %5499 = vmatpush2.msra.mxu0 %v5128_v58  ;;  %5712 = vmatpush2.msra.mxu1 %v5134_v47  ;;  %v4852_v58 = vld [vmem:[%s13555_s5 + $0x3a0] sm:$0xff]  ;;  %v4839_v47 = vld [vmem:[%s13555_s5 + $0x308] sm:$0xff] }
0x1c15   :  { %5500 = vmatprep.subr.mxu0 %v5115_v55  ;;  %5713 = vmatprep.subr.mxu1 %v5121_v28  ;;  %v4838_v55 = vld [vmem:[%s13555_s5 + $0x300] sm:$0xff]  ;;  %v4825_v28 = vld [vmem:[%s13555_s5 + $0x268] sm:$0xff] }
0x1c16   :  { %5501 = vmatpush2.msra.mxu0 %v5114_v44  ;;  %5714 = vmatpush2.msra.mxu1 %v5120_v21  ;;  %v4824_v44 = vld [vmem:[%s13555_s5 + $0x260] sm:$0xff]  ;;  %v4811_v21 = vld [vmem:[%s13555_s5 + $0x1c8] sm:$0xff] }
0x1c17   :  { %5502 = vmatprep.subr.mxu0 %v5101_v61  ;;  %5715 = vmatprep.subr.mxu1 %v5107_v3  ;;  %v4810_v61 = vld [vmem:[%s13555_s5 + $0x1c0] sm:$0xff]  ;;  %v4797_v3 = vld [vmem:[%s13555_s5 + $0x128] sm:$0xff] }
0x1c18   :  { %5503 = vmatpush2.msra.mxu0 %v5100_v32  ;;  %5716 = vmatpush2.msra.mxu1 %v5106_v9  ;;  %v4796_v32 = vld [vmem:[%s13555_s5 + $0x120] sm:$0xff]  ;;  %v4783_v9 = vld [vmem:[%s13555_s5 + $0x88] sm:$0xff] }
0x1c19   :  { %5504 = vmatprep.subr.mxu0 %v5087_v20  ;;  %5717 = vmatprep.subr.mxu1 %v5093_v41  ;;  %v4782_v20 = vld [vmem:[%s13555_s5 + $0x80] sm:$0xff]  ;;  %v5161_v41 = vld [vmem:[%s13555_s5 + $0x1168] sm:$0xff] }
0x1c1a   :  { %5505 = vmatpush2.msra.mxu0 %v5086_v53  ;;  %5718 = vmatpush2.msra.mxu1 %v5092_v48  ;;  %v5160_v53 = vld [vmem:[%s13555_s5 + $0x1160] sm:$0xff]  ;;  %v5147_v48 = vld [vmem:[%s13555_s5 + $0x10c8] sm:$0xff] }
0x1c1b   :  { %5506 = vmatprep.subr.mxu0 %v5073_v15  ;;  %5719 = vmatprep.subr.mxu1 %v5079_v7  ;;  %v5146_v15 = vld [vmem:[%s13555_s5 + $0x10c0] sm:$0xff]  ;;  %v5133_v7 = vld [vmem:[%s13555_s5 + $0x1028] sm:$0xff] }
0x1c1c   :  { %5507 = vmatpush2.msra.mxu0 %v5072_v17  ;;  %5720 = vmatpush2.msra.mxu1 %v5078_v27  ;;  %v5132_v17 = vld [vmem:[%s13555_s5 + $0x1020] sm:$0xff]  ;;  %v5119_v27 = vld [vmem:[%s13555_s5 + $0xf88] sm:$0xff] }
0x1c1d   :  { %5508 = vmatprep.subr.mxu0 %v5059_v22  ;;  %5721 = vmatprep.subr.mxu1 %v5065_v57  ;;  %v5118_v22 = vld [vmem:[%s13555_s5 + $0xf80] sm:$0xff]  ;;  %v5105_v57 = vld [vmem:[%s13555_s5 + $0xee8] sm:$0xff] }
0x1c1e   :  { %5509 = vmatpush2.msra.mxu0 %v5058_v40  ;;  %5722 = vmatpush2.msra.mxu1 %v5064_v42  ;;  %v5104_v40 = vld [vmem:[%s13555_s5 + $0xee0] sm:$0xff]  ;;  %v5091_v42 = vld [vmem:[%s13555_s5 + $0xe48] sm:$0xff] }
0x1c1f   :  { %5510 = vmatprep.subr.mxu0 %v5045_v52  ;;  %5723 = vmatprep.subr.mxu1 %v5051_v30  ;;  %v5090_v52 = vld [vmem:[%s13555_s5 + $0xe40] sm:$0xff]  ;;  %v5077_v30 = vld [vmem:[%s13555_s5 + $0xda8] sm:$0xff] }
0x1c20   :  { %5511 = vmatpush2.msra.mxu0 %v5044_v31  ;;  %5724 = vmatpush2.msra.mxu1 %v5050_v35  ;;  %v5076_v31 = vld [vmem:[%s13555_s5 + $0xda0] sm:$0xff]  ;;  %v5063_v35 = vld [vmem:[%s13555_s5 + $0xd08] sm:$0xff] }
0x1c21   :  { %5512 = vmatprep.subr.mxu0 %v5031_v5  ;;  %5725 = vmatprep.subr.mxu1 %v5037_v25  ;;  %v5062_v5 = vld [vmem:[%s13555_s5 + $0xd00] sm:$0xff]  ;;  %v5049_v25 = vld [vmem:[%s13555_s5 + $0xc68] sm:$0xff] }
0x1c22   :  { %5513 = vmatpush2.msra.mxu0 %v5030_v8  ;;  %5726 = vmatpush2.msra.mxu1 %v5036_v14  ;;  %v5048_v8 = vld [vmem:[%s13555_s5 + $0xc60] sm:$0xff]  ;;  %v5035_v14 = vld [vmem:[%s13555_s5 + $0xbc8] sm:$0xff] }
0x1c23   :  { %5514 = vmatprep.subr.mxu0 %v5017_v43  ;;  %5727 = vmatprep.subr.mxu1 %v5023_v16  ;;  %v5034_v43 = vld [vmem:[%s13555_s5 + $0xbc0] sm:$0xff]  ;;  %v5021_v16 = vld [vmem:[%s13555_s5 + $0xb28] sm:$0xff] }
0x1c24   :  { %5515 = vmatpush2.msra.mxu0 %v5016_v18  ;;  %5728 = vmatpush2.msra.mxu1 %v5022_v12  ;;  %v5020_v18 = vld [vmem:[%s13555_s5 + $0xb20] sm:$0xff]  ;;  %v5007_v12 = vld [vmem:[%s13555_s5 + $0xa88] sm:$0xff] }
0x1c25   :  { %5516 = vmatprep.subr.mxu0 %v5003_v33  ;;  %5729 = vmatprep.subr.mxu1 %v5009_v11  ;;  %v5006_v33 = vld [vmem:[%s13555_s5 + $0xa80] sm:$0xff]  ;;  %v5965_v11 = vld [vmem:[%s13556_s6 + $0x2f8] sm:$0xff] }
0x1c26   :  { %5517 = vmatpush2.msra.mxu0 %v5002_v0  ;;  %5730 = vmatpush2.msra.mxu1 %v5008_v29  ;;  %v5964_v0 = vld [vmem:[%s13556_s6 + $0x2f0] sm:$0xff]  ;;  %v5963_v29 = vld [vmem:[%s13556_s6 + $0x2e8] sm:$0xff] }
0x1c27   :  { %5519 = vmatmul.mubr.f32.vlgmr.msra.gmra.mxu0 %v11319_v50  ;;  %5596 = vmatprep.subr.mxu0 %v4993_v56  ;;  %v5962_v56 = vld [vmem:[%s13556_s6 + $0x2e0] sm:$0xff] }
0x1c28   :  { %5732 = vmatmul.mubr.f32.vlgmr.msra.gmra.mxu1 %v11319_v50  ;;  %5597 = vmatpush1.msra.mxu0 %v4992_v10  ;;  %v5961_v10 = vld [vmem:[%s13556_s6 + $0x2d8] sm:$0xff] }
0x1c29   :  { %7381 = vmatprep.mubr.msk.f32.mxu0 %vm3453_vm4, %v11321_v34  ;;  %5598 = vmatprep.subr.mxu0 %v4979_v1  ;;  %v4937_v34 = vld [vmem:[%s13555_s5 + $0x768] sm:$0xff]  ;;  %v5960_v1 = vld [vmem:[%s13556_s6 + $0x2d0] sm:$0xff] }
0x1c2a   :  { %5599 = vmatpush1.msra.mxu0 %v4978_v23  ;;  %v5959_v23 = vld [vmem:[%s13556_s6 + $0x2c8] sm:$0xff] }
0x1c2b   :  { %5600 = vmatprep.subr.mxu0 %v4965_v39  ;;  %v5958_v39 = vld [vmem:[%s13556_s6 + $0x2c0] sm:$0xff] }
0x1c2c   :  { %5601 = vmatpush1.msra.mxu0 %v4964_v36  ;;  %v5957_v36 = vld [vmem:[%s13556_s6 + $0x2b8] sm:$0xff] }
0x1c2d   :  { %5602 = vmatprep.subr.mxu0 %v4951_v13  ;;  %v5956_v13 = vld [vmem:[%s13556_s6 + $0x2b0] sm:$0xff] }
0x1c2e   :  { %5603 = vmatpush1.msra.mxu0 %v4950_v26  ;;  %v5955_v26 = vld [vmem:[%s13556_s6 + $0x2a8] sm:$0xff] }
0x1c2f   :  { %5604 = vmatprep.subr.mxu0 %v4937_v34  ;;  %v5954_v34 = vld [vmem:[%s13556_s6 + $0x2a0] sm:$0xff] }
0x1c30   :  { %5605 = vmatpush1.msra.mxu0 %v4936_v24  ;;  %v5953_v24 = vld [vmem:[%s13556_s6 + $0x298] sm:$0xff] }
0x1c31   :  { %5606 = vmatprep.subr.mxu0 %v4923_v59  ;;  %v5952_v59 = vld [vmem:[%s13556_s6 + $0x290] sm:$0xff] }
0x1c32   :  { %5607 = vmatpush1.msra.mxu0 %v4922_v62  ;;  %v5951_v62 = vld [vmem:[%s13556_s6 + $0x288] sm:$0xff] }
0x1c33   :  { %5608 = vmatprep.subr.mxu0 %v4909_v37  ;;  %v5950_v37 = vld [vmem:[%s13556_s6 + $0x280] sm:$0xff] }
0x1c34   :  { %5609 = vmatpush1.msra.mxu0 %v4908_v19  ;;  %v5949_v19 = vld [vmem:[%s13556_s6 + $0x278] sm:$0xff] }
0x1c35   :  { %5610 = vmatprep.subr.mxu0 %v4895_v46  ;;  %v5948_v46 = vld [vmem:[%s13556_s6 + $0x270] sm:$0xff] }
0x1c36   :  { %5611 = vmatpush1.msra.mxu0 %v4894_v45  ;;  %v5947_v45 = vld [vmem:[%s13556_s6 + $0x268] sm:$0xff] }
0x1c37   :  { %5612 = vmatprep.subr.mxu0 %v4881_v51  ;;  %v5946_v51 = vld [vmem:[%s13556_s6 + $0x260] sm:$0xff] }
0x1c38   :  { %5613 = vmatpush1.msra.mxu0 %v4880_v4  ;;  %v5945_v4 = vld [vmem:[%s13556_s6 + $0x258] sm:$0xff] }
0x1c39   :  { %5614 = vmatprep.subr.mxu0 %v4867_v60  ;;  %v5944_v60 = vld [vmem:[%s13556_s6 + $0x250] sm:$0xff] }
0x1c3a   :  { %5615 = vmatpush1.msra.mxu0 %v4866_v63  ;;  %v5943_v63 = vld [vmem:[%s13556_s6 + $0x248] sm:$0xff] }
0x1c3b   :  { %5616 = vmatprep.subr.mxu0 %v4853_v2  ;;  %v5942_v2 = vld [vmem:[%s13556_s6 + $0x240] sm:$0xff] }
0x1c3c   :  { %5617 = vmatpush1.msra.mxu0 %v4852_v58  ;;  %v5941_v58 = vld [vmem:[%s13556_s6 + $0x238] sm:$0xff] }
0x1c3d   :  { %5618 = vmatprep.subr.mxu0 %v4839_v47  ;;  %v5940_v47 = vld [vmem:[%s13556_s6 + $0x230] sm:$0xff] }
0x1c3e   :  { %5619 = vmatpush1.msra.mxu0 %v4838_v55  ;;  %v5939_v55 = vld [vmem:[%s13556_s6 + $0x228] sm:$0xff] }
0x1c3f   :  { %5620 = vmatprep.subr.mxu0 %v4825_v28  ;;  %v5938_v28 = vld [vmem:[%s13556_s6 + $0x220] sm:$0xff] }
0x1c40   :  { %5621 = vmatpush1.msra.mxu0 %v4824_v44  ;;  %v5937_v44 = vld [vmem:[%s13556_s6 + $0x218] sm:$0xff] }
0x1c41   :  { %5622 = vmatprep.subr.mxu0 %v4811_v21  ;;  %v5936_v21 = vld [vmem:[%s13556_s6 + $0x210] sm:$0xff] }
0x1c42   :  { %5623 = vmatpush1.msra.mxu0 %v4810_v61  ;;  %v5935_v61 = vld [vmem:[%s13556_s6 + $0x208] sm:$0xff] }
0x1c43   :  { %5624 = vmatprep.subr.mxu0 %v4797_v3  ;;  %v5934_v3 = vld [vmem:[%s13556_s6 + $0x200] sm:$0xff] }
0x1c44   :  { %5625 = vmatpush1.msra.mxu0 %v4796_v32  ;;  %v5997_v32 = vld [vmem:[%s13556_s6 + $0x3f8] sm:$0xff] }
0x1c45   :  { %5626 = vmatprep.subr.mxu0 %v4783_v9  ;;  %v5996_v9 = vld [vmem:[%s13556_s6 + $0x3f0] sm:$0xff] }
0x1c46   :  { %5627 = vmatpush1.msra.mxu0 %v4782_v20  ;;  %v5995_v20 = vld [vmem:[%s13556_s6 + $0x3e8] sm:$0xff] }
0x1c47   :  { %5636 = vmatprep.subr.mxu0 %v5161_v41  ;;  %v5994_v41 = vld [vmem:[%s13556_s6 + $0x3e0] sm:$0xff] }
0x1c48   :  { %5637 = vmatpush2.msra.mxu0 %v5160_v53  ;;  %v5993_v53 = vld [vmem:[%s13556_s6 + $0x3d8] sm:$0xff] }
0x1c49   :  { %5638 = vmatprep.subr.mxu0 %v5147_v48  ;;  %v5992_v48 = vld [vmem:[%s13556_s6 + $0x3d0] sm:$0xff] }
0x1c4a   :  { %5639 = vmatpush2.msra.mxu0 %v5146_v15  ;;  %v5991_v15 = vld [vmem:[%s13556_s6 + $0x3c8] sm:$0xff] }
0x1c4b   :  { %5640 = vmatprep.subr.mxu0 %v5133_v7  ;;  %v5990_v7 = vld [vmem:[%s13556_s6 + $0x3c0] sm:$0xff] }
0x1c4c   :  { %5641 = vmatpush2.msra.mxu0 %v5132_v17  ;;  %v5989_v17 = vld [vmem:[%s13556_s6 + $0x3b8] sm:$0xff] }
0x1c4d   :  { %5642 = vmatprep.subr.mxu0 %v5119_v27  ;;  %v5988_v27 = vld [vmem:[%s13556_s6 + $0x3b0] sm:$0xff] }
0x1c4e   :  { %5643 = vmatpush2.msra.mxu0 %v5118_v22  ;;  %v5987_v22 = vld [vmem:[%s13556_s6 + $0x3a8] sm:$0xff] }
0x1c4f   :  { %5644 = vmatprep.subr.mxu0 %v5105_v57  ;;  %v5986_v57 = vld [vmem:[%s13556_s6 + $0x3a0] sm:$0xff] }
0x1c50   :  { %5645 = vmatpush2.msra.mxu0 %v5104_v40  ;;  %v5985_v40 = vld [vmem:[%s13556_s6 + $0x398] sm:$0xff] }
0x1c51   :  { %5646 = vmatprep.subr.mxu0 %v5091_v42  ;;  %v5984_v42 = vld [vmem:[%s13556_s6 + $0x390] sm:$0xff] }
0x1c52   :  { %5647 = vmatpush2.msra.mxu0 %v5090_v52  ;;  %v5983_v52 = vld [vmem:[%s13556_s6 + $0x388] sm:$0xff] }
0x1c53   :  { %5648 = vmatprep.subr.mxu0 %v5077_v30  ;;  %v5982_v30 = vld [vmem:[%s13556_s6 + $0x380] sm:$0xff] }
0x1c54   :  { %5649 = vmatpush2.msra.mxu0 %v5076_v31  ;;  %v5981_v31 = vld [vmem:[%s13556_s6 + $0x378] sm:$0xff] }
0x1c55   :  { %5650 = vmatprep.subr.mxu0 %v5063_v35  ;;  %v5980_v35 = vld [vmem:[%s13556_s6 + $0x370] sm:$0xff] }
0x1c56   :  { %5651 = vmatpush2.msra.mxu0 %v5062_v5  ;;  %v5979_v5 = vld [vmem:[%s13556_s6 + $0x368] sm:$0xff] }
0x1c57   :  { %5652 = vmatprep.subr.mxu0 %v5049_v25  ;;  %v5978_v25 = vld [vmem:[%s13556_s6 + $0x360] sm:$0xff] }
0x1c58   :  { %5653 = vmatpush2.msra.mxu0 %v5048_v8  ;;  %v5977_v8 = vld [vmem:[%s13556_s6 + $0x358] sm:$0xff] }
0x1c59   :  { %5654 = vmatprep.subr.mxu0 %v5035_v14  ;;  %v5976_v14 = vld [vmem:[%s13556_s6 + $0x350] sm:$0xff] }
0x1c5a   :  { %5655 = vmatpush2.msra.mxu0 %v5034_v43  ;;  %v5975_v43 = vld [vmem:[%s13556_s6 + $0x348] sm:$0xff] }
0x1c5b   :  { %5656 = vmatprep.subr.mxu0 %v5021_v16  ;;  %v5974_v16 = vld [vmem:[%s13556_s6 + $0x340] sm:$0xff] }
0x1c5c   :  { %5657 = vmatpush2.msra.mxu0 %v5020_v18  ;;  %v6029_v18 = vld [vmem:[%s13556_s6 + $0x4f8] sm:$0xff] }
0x1c5d   :  { %5658 = vmatprep.subr.mxu0 %v5007_v12  ;;  %6235 = vmatprep.subr.mxu1 %v6029_v18  ;;  %v5973_v12 = vld [vmem:[%s13556_s6 + $0x338] sm:$0xff]  ;;  %v6054_v18 = vld [vmem:[%s13556_s6 + $0x5c0] sm:$0xff] }
0x1c5e   :  { %5659 = vmatpush2.msra.mxu0 %v5006_v33  ;;  %v6028_v33 = vld [vmem:[%s13556_s6 + $0x4f0] sm:$0xff] }
0x1c5f   :  { %5661 = vmatmul.mubr.f32.vlgmr.msra.gmra.mxu0 %v11319_v50  ;;  %6165 = vmatprep.subr.mxu0 %v5965_v11  ;;  %v5972_v11 = vld [vmem:[%s13556_s6 + $0x330] sm:$0xff] }
0x1c60   :  { %6166 = vmatpush1.msra.mxu0 %v5964_v0  ;;  %6236 = vmatpush1.msra.mxu1 %v6028_v33  ;;  %v6027_v0 = vld [vmem:[%s13556_s6 + $0x4e8] sm:$0xff] }
0x1c61   :  { %6167 = vmatprep.subr.mxu0 %v5963_v29  ;;  %6237 = vmatprep.subr.mxu1 %v6027_v0  ;;  %v5971_v29 = vld [vmem:[%s13556_s6 + $0x328] sm:$0xff] }
0x1c62   :  { %6168 = vmatpush1.msra.mxu0 %v5962_v56  ;;  %v6026_v56 = vld [vmem:[%s13556_s6 + $0x4e0] sm:$0xff]  ;;  %v6051_v0 = vld [vmem:[%s13556_s6 + $0x5a8] sm:$0xff] }
0x1c63   :  { %6169 = vmatprep.subr.mxu0 %v5961_v10  ;;  %6238 = vmatpush1.msra.mxu1 %v6026_v56  ;;  %v5970_v10 = vld [vmem:[%s13556_s6 + $0x320] sm:$0xff] }
0x1c64   :  { %6170 = vmatpush1.msra.mxu0 %v5960_v1  ;;  %v6025_v1 = vld [vmem:[%s13556_s6 + $0x4d8] sm:$0xff] }
0x1c65   :  { %6171 = vmatprep.subr.mxu0 %v5959_v23  ;;  %6239 = vmatprep.subr.mxu1 %v6025_v1  ;;  %v5969_v23 = vld [vmem:[%s13556_s6 + $0x318] sm:$0xff] }
0x1c66   :  { %6172 = vmatpush1.msra.mxu0 %v5958_v39  ;;  %v6024_v39 = vld [vmem:[%s13556_s6 + $0x4d0] sm:$0xff] }
0x1c67   :  { %6173 = vmatprep.subr.mxu0 %v5957_v36  ;;  %6240 = vmatpush1.msra.mxu1 %v6024_v39  ;;  %v5968_v36 = vld [vmem:[%s13556_s6 + $0x310] sm:$0xff] }
0x1c68   :  { %6174 = vmatpush1.msra.mxu0 %v5956_v13  ;;  %v6023_v13 = vld [vmem:[%s13556_s6 + $0x4c8] sm:$0xff]  ;;  %v6048_v39 = vld [vmem:[%s13556_s6 + $0x590] sm:$0xff] }
0x1c69   :  { %6175 = vmatprep.subr.mxu0 %v5955_v26  ;;  %6241 = vmatprep.subr.mxu1 %v6023_v13  ;;  %v5967_v26 = vld [vmem:[%s13556_s6 + $0x308] sm:$0xff] }
0x1c6a   :  { %6176 = vmatpush1.msra.mxu0 %v5954_v34  ;;  %v6022_v34 = vld [vmem:[%s13556_s6 + $0x4c0] sm:$0xff] }
0x1c6b   :  { %6177 = vmatprep.subr.mxu0 %v5953_v24  ;;  %6242 = vmatpush1.msra.mxu1 %v6022_v34  ;;  %v5966_v24 = vld [vmem:[%s13556_s6 + $0x300] sm:$0xff]  ;;  %v6045_v34 = vld [vmem:[%s13556_s6 + $0x578] sm:$0xff] }
0x1c6c   :  { %6178 = vmatpush1.msra.mxu0 %v5952_v59  ;;  %v6021_v59 = vld [vmem:[%s13556_s6 + $0x4b8] sm:$0xff] }
0x1c6d   :  { %6179 = vmatprep.subr.mxu0 %v5951_v62  ;;  %6243 = vmatprep.subr.mxu1 %v6021_v59  ;;  %v6020_v62 = vld [vmem:[%s13556_s6 + $0x4b0] sm:$0xff] }
0x1c6e   :  { %6180 = vmatpush1.msra.mxu0 %v5950_v37  ;;  %v6093_v37 = vld [vmem:[%s13556_s6 + $0x6f8] sm:$0xff]  ;;  %6244 = vmatpush1.msra.mxu1 %v6020_v62  ;;  %v6044_v59 = vld [vmem:[%s13556_s6 + $0x570] sm:$0xff]  ;;  %v6043_v62 = vld [vmem:[%s13556_s6 + $0x568] sm:$0xff] }
0x1c6f   :  { %6181 = vmatprep.subr.mxu0 %v5949_v19  ;;  %v6019_v19 = vld [vmem:[%s13556_s6 + $0x4a8] sm:$0xff] }
0x1c70   :  { %6182 = vmatpush1.msra.mxu0 %v5948_v46  ;;  %6245 = vmatprep.subr.mxu1 %v6019_v19  ;;  %v6018_v46 = vld [vmem:[%s13556_s6 + $0x4a0] sm:$0xff] }
0x1c71   :  { %6183 = vmatprep.subr.mxu0 %v5947_v45  ;;  %6246 = vmatpush1.msra.mxu1 %v6018_v46  ;;  %v6017_v45 = vld [vmem:[%s13556_s6 + $0x498] sm:$0xff]  ;;  %v6042_v19 = vld [vmem:[%s13556_s6 + $0x560] sm:$0xff] }
0x1c72   :  { %6184 = vmatpush1.msra.mxu0 %v5946_v51  ;;  %6247 = vmatprep.subr.mxu1 %v6017_v45  ;;  %v6016_v51 = vld [vmem:[%s13556_s6 + $0x490] sm:$0xff]  ;;  %v6041_v46 = vld [vmem:[%s13556_s6 + $0x558] sm:$0xff] }
0x1c73   :  { %6185 = vmatprep.subr.mxu0 %v5945_v4  ;;  %6248 = vmatpush1.msra.mxu1 %v6016_v51  ;;  %v6040_v51 = vld [vmem:[%s13556_s6 + $0x550] sm:$0xff] }
0x1c74   :  { %6186 = vmatpush1.msra.mxu0 %v5944_v60  ;;  %v12415_v4 = vpop.f32.mrf.mxu1  ;;  %v12420_v60 = vld [vmem:[%s13554_s2 + $0x23] sm:$0x3f] }
0x1c75   :  { %6187 = vmatprep.subr.mxu0 %v5943_v63  ;;  %v6015_v63 = vld [vmem:[%s13556_s6 + $0x488] sm:$0xff] }
0x1c76   :  { %6188 = vmatpush1.msra.mxu0 %v5942_v2  ;;  %6249 = vmatprep.subr.mxu1 %v6015_v63  ;;  %v6014_v2 = vld [vmem:[%s13556_s6 + $0x480] sm:$0xff]  ;;  %v6039_v63 = vld [vmem:[%s13556_s6 + $0x548] sm:$0xff] }
0x1c77   :  { %6189 = vmatprep.subr.mxu0 %v5941_v58  ;;  %6250 = vmatpush1.msra.mxu1 %v6014_v2  ;;  %v6013_v58 = vld [vmem:[%s13556_s6 + $0x478] sm:$0xff] }
0x1c78   :  { %6190 = vmatpush1.msra.mxu0 %v5940_v47  ;;  %v5203_v47 = vrot.slane %v12420_v60, %v10031_v38  ;;  %6251 = vmatprep.subr.mxu1 %v6013_v58  ;;  %v6038_v58 = vld [vmem:[%s13556_s6 + $0x540] sm:$0xff] }
0x1c79   :  { %6191 = vmatprep.subr.mxu0 %v5939_v55  ;;  %v6012_v55 = vld [vmem:[%s13556_s6 + $0x470] sm:$0xff] }
0x1c7a   :  { %6192 = vmatpush1.msra.mxu0 %v5938_v28  ;;  %v12436_v28 = vpop.f32.mrf.mxu1  ;;  %6252 = vmatpush1.msra.mxu1 %v6012_v55 }
0x1c7b   :  { %6193 = vmatprep.subr.mxu0 %v5937_v44  ;;  %v6011_v44 = vld [vmem:[%s13556_s6 + $0x468] sm:$0xff] }
0x1c7c   :  { %6194 = vmatpush1.msra.mxu0 %v5936_v21  ;;  %6253 = vmatprep.subr.mxu1 %v6011_v44  ;;  %v6010_v21 = vld [vmem:[%s13556_s6 + $0x460] sm:$0xff]  ;;  %v6036_v44 = vld [vmem:[%s13556_s6 + $0x530] sm:$0xff] }
0x1c7d   :  { %6195 = vmatprep.subr.mxu0 %v5935_v61  ;;  %6254 = vmatpush1.msra.mxu1 %v6010_v21  ;;  %v6035_v21 = vld [vmem:[%s13556_s6 + $0x528] sm:$0xff] }
0x1c7e   :  { %6196 = vmatpush1.msra.mxu0 %v5934_v3  ;;  %v6009_v3 = vld [vmem:[%s13556_s6 + $0x458] sm:$0xff] }
0x1c7f   :  { %6197 = vmatprep.subr.mxu0 %v5997_v32  ;;  %6255 = vmatprep.subr.mxu1 %v6009_v3  ;;  %v6034_v3 = vld [vmem:[%s13556_s6 + $0x520] sm:$0xff] }
0x1c80   :  { %6198 = vmatpush2.msra.mxu0 %v5996_v9  ;;  %v6008_v9 = vld [vmem:[%s13556_s6 + $0x450] sm:$0xff] }
0x1c81   :  { %6199 = vmatprep.subr.mxu0 %v5995_v20  ;;  %6256 = vmatpush1.msra.mxu1 %v6008_v9  ;;  %v6007_v20 = vld [vmem:[%s13556_s6 + $0x448] sm:$0xff]  ;;  %v6033_v9 = vld [vmem:[%s13556_s6 + $0x518] sm:$0xff] }
0x1c82   :  { %6200 = vmatpush2.msra.mxu0 %v5994_v41  ;;  %6257 = vmatprep.subr.mxu1 %v6007_v20 }
0x1c83   :  { %6201 = vmatprep.subr.mxu0 %v5993_v53  ;;  %v6006_v53 = vld [vmem:[%s13556_s6 + $0x440] sm:$0xff] }
0x1c84   :  { %6202 = vmatpush2.msra.mxu0 %v5992_v48  ;;  %6258 = vmatpush1.msra.mxu1 %v6006_v53  ;;  %v6005_v48 = vld [vmem:[%s13556_s6 + $0x438] sm:$0xff]  ;;  %v6032_v53 = vld [vmem:[%s13556_s6 + $0x510] sm:$0xff] }
0x1c85   :  { %6203 = vmatprep.subr.mxu0 %v5991_v15  ;;  %6259 = vmatprep.subr.mxu1 %v6005_v48 }
0x1c86   :  { %6204 = vmatpush2.msra.mxu0 %v5990_v7  ;;  %v6004_v7 = vld [vmem:[%s13556_s6 + $0x430] sm:$0xff] }
0x1c87   :  { %6205 = vmatprep.subr.mxu0 %v5989_v17  ;;  %6260 = vmatpush1.msra.mxu1 %v6004_v7  ;;  %v6003_v17 = vld [vmem:[%s13556_s6 + $0x428] sm:$0xff]  ;;  %v6030_v7 = vld [vmem:[%s13556_s6 + $0x500] sm:$0xff] }
0x1c88   :  { %6206 = vmatpush2.msra.mxu0 %v5988_v27  ;;  %6261 = vmatprep.subr.mxu1 %v6003_v17 }
0x1c89   :  { %6207 = vmatprep.subr.mxu0 %v5987_v22  ;;  %v6002_v22 = vld [vmem:[%s13556_s6 + $0x420] sm:$0xff] }
0x1c8a   :  { %6208 = vmatpush2.msra.mxu0 %v5986_v57  ;;  %6262 = vmatpush1.msra.mxu1 %v6002_v22  ;;  %v6001_v57 = vld [vmem:[%s13556_s6 + $0x418] sm:$0xff]  ;;  %v12587_v22 = vpop.f32.mrf.mxu0 }
0x1c8b   :  { %6209 = vmatprep.subr.mxu0 %v5985_v40  ;;  %6263 = vmatprep.subr.mxu1 %v6001_v57 }
0x1c8c   :  { %6210 = vmatpush2.msra.mxu0 %v5984_v42  ;;  %v6000_v42 = vld [vmem:[%s13556_s6 + $0x410] sm:$0xff] }
0x1c8d   :  { %6211 = vmatprep.subr.mxu0 %v5983_v52  ;;  %6264 = vmatpush1.msra.mxu1 %v6000_v42  ;;  %v5999_v52 = vld [vmem:[%s13556_s6 + $0x408] sm:$0xff] }
0x1c8e   :  { %6212 = vmatpush2.msra.mxu0 %v5982_v30  ;;  %6265 = vmatprep.subr.mxu1 %v5999_v52  ;;  %v5998_v30 = vld [vmem:[%s13556_s6 + $0x400] sm:$0xff] }
0x1c8f   :  { %6213 = vmatprep.subr.mxu0 %v5981_v31  ;;  %6266 = vmatpush1.msra.mxu1 %v5998_v30  ;;  %v6061_v31 = vld [vmem:[%s13556_s6 + $0x5f8] sm:$0xff]  ;;  %v5309_v30 = vpop.f32.mrf.mxu0 }
0x1c90   :  { %6214 = vmatpush2.msra.mxu0 %v5980_v35  ;;  %6267 = vmatprep.subr.mxu1 %v6061_v31  ;;  %v6060_v35 = vld [vmem:[%s13556_s6 + $0x5f0] sm:$0xff] }
0x1c91   :  { %6215 = vmatprep.subr.mxu0 %v5979_v5  ;;  %6268 = vmatpush2.msra.mxu1 %v6060_v35  ;;  %v6059_v5 = vld [vmem:[%s13556_s6 + $0x5e8] sm:$0xff] }
0x1c92   :  { %6216 = vmatpush2.msra.mxu0 %v5978_v25  ;;  %6269 = vmatprep.subr.mxu1 %v6059_v5  ;;  %v6058_v25 = vld [vmem:[%s13556_s6 + $0x5e0] sm:$0xff] }
0x1c93   :  { %6217 = vmatprep.subr.mxu0 %v5977_v8  ;;  %6270 = vmatpush2.msra.mxu1 %v6058_v25  ;;  %v6057_v8 = vld [vmem:[%s13556_s6 + $0x5d8] sm:$0xff] }
0x1c94   :  { %6218 = vmatpush2.msra.mxu0 %v5976_v14  ;;  %6271 = vmatprep.subr.mxu1 %v6057_v8 }
0x1c95   :  { %6219 = vmatprep.subr.mxu0 %v5975_v43  ;;  %v6056_v43 = vld [vmem:[%s13556_s6 + $0x5d0] sm:$0xff] }
0x1c96   :  { %6220 = vmatpush2.msra.mxu0 %v5974_v16  ;;  %6272 = vmatpush2.msra.mxu1 %v6056_v43  ;;  %v6055_v16 = vld [vmem:[%s13556_s6 + $0x5c8] sm:$0xff]  ;;  %v5198_v43 = vsub.s32 7, %v8982_v49 }
0x1c97   :  { %6221 = vmatprep.subr.mxu0 %v5973_v12  ;;  %6273 = vmatprep.subr.mxu1 %v6055_v16  ;;  %v6053_v12 = vld [vmem:[%s13556_s6 + $0x5b8] sm:$0xff]  ;;  %v12602_v16 = vsub.s32 4, %v8982_v49 }
0x1c98   :  { %6222 = vmatpush2.msra.mxu0 %v5972_v11  ;;  %6274 = vmatpush2.msra.mxu1 %v6054_v18  ;;  %v6052_v11 = vld [vmem:[%s13556_s6 + $0x5b0] sm:$0xff] }
0x1c99   :  { %6223 = vmatprep.subr.mxu0 %v5971_v29  ;;  %6275 = vmatprep.subr.mxu1 %v6053_v12  ;;  %v6050_v29 = vld [vmem:[%s13556_s6 + $0x5a0] sm:$0xff] }
0x1c9a   :  { %6224 = vmatpush2.msra.mxu0 %v5970_v10  ;;  %6276 = vmatpush2.msra.mxu1 %v6052_v11  ;;  %v6049_v10 = vld [vmem:[%s13556_s6 + $0x598] sm:$0xff] }
0x1c9b   :  { %6225 = vmatprep.subr.mxu0 %v5969_v23  ;;  %6277 = vmatprep.subr.mxu1 %v6051_v0 }
0x1c9c   :  { %6226 = vmatpush2.msra.mxu0 %v5968_v36  ;;  %6278 = vmatpush2.msra.mxu1 %v6050_v29  ;;  %v6047_v36 = vld [vmem:[%s13556_s6 + $0x588] sm:$0xff] }
0x1c9d   :  { %6227 = vmatprep.subr.mxu0 %v5967_v26  ;;  %6279 = vmatprep.subr.mxu1 %v6049_v10  ;;  %v6046_v26 = vld [vmem:[%s13556_s6 + $0x580] sm:$0xff] }
0x1c9e   :  { %6228 = vmatpush2.msra.mxu0 %v5966_v24  ;;  %6280 = vmatpush2.msra.mxu1 %v6048_v39 }
0x1c9f   :  { %6305 = vmatprep.subr.mxu0 %v6093_v37  ;;  %6281 = vmatprep.subr.mxu1 %v6047_v36 }
0x1ca0   :  { %6282 = vmatpush2.msra.mxu1 %v6046_v26 }
0x1ca1   :  { %6283 = vmatprep.subr.mxu1 %v6045_v34 }
0x1ca2   :  { %6284 = vmatpush2.msra.mxu1 %v6044_v59 }
0x1ca3   :  { %6285 = vmatprep.subr.mxu1 %v6043_v62 }
0x1ca4   :  { %6286 = vmatpush2.msra.mxu1 %v6042_v19 }
0x1ca5   :  { %6287 = vmatprep.subr.mxu1 %v6041_v46 }
0x1ca6   :  { %6288 = vmatpush2.msra.mxu1 %v6040_v51 }
0x1ca7   :  { %6289 = vmatprep.subr.mxu1 %v6039_v63 }
0x1ca8   :  { %6290 = vmatpush2.msra.mxu1 %v6038_v58 }
0x1cad   :  { %v12598_v25 = vpop.f32.mrf.mxu0 }
0x1cae   :  { %v5591_v61 = vpop.f32.mrf.mxu1 }
0x1caf   :  { %v12447_v32 = vadd.f32 %v5591_v61, %v5203_v47  ;;  %v6037_v47 = vld [vmem:[%s13556_s6 + $0x538] sm:$0xff]  ;;  %v12604_v12 = vpop.f32.mrf.mxu0 }
0x1cb0   :  { %6291 = vmatprep.subr.mxu1 %v6037_v47 }
0x1cb1   :  { %v12456_v41 = vmul.f32 0.70710677, %v12447_v32  ;;  %6292 = vmatpush2.msra.mxu1 %v6036_v44  ;;  %v5739_v35 = vmul.f32 0.5, %v12447_v32 }
0x1cb2   :  { %6293 = vmatprep.subr.mxu1 %v6035_v21 }
0x1cb3   :  { %v5753_v15 = vand.u32 2147483647, %v12456_v41  ;;  %v5851_v14 = vmul.f32 %v12456_v41, %v12456_v41  ;;  %6294 = vmatpush2.msra.mxu1 %v6034_v3  ;;  %vm5893_vm6 = vcmp.ge.f32.partialorder %v12456_v41, 0.0  ;;  %v5219_v41 = vrot.slane %v12420_v60, %v12602_v16 }
0x1cb4   :  { %6295 = vmatprep.subr.mxu1 %v6033_v9 }
0x1cb5   :  { %v5760_v27 = vmul.f32 0.3275911, %v5753_v15  ;;  %v5858_v33 = vsub.f32 0.0, %v5851_v14  ;;  %6296 = vmatpush2.msra.mxu1 %v6032_v53  ;;  %v6031_v15 = vld [vmem:[%s13556_s6 + $0x508] sm:$0xff] }
0x1cb6   :  { %6297 = vmatprep.subr.mxu1 %v6031_v15 }
0x1cb7   :  { %v5767_v40 = vadd.f32 1.0, %v5760_v27  ;;  %v5866_v23 = vmul.f32 1.442695, %v5858_v33  ;;  %v6157_v27 = vld [vmem:[%s13556_s6 + $0x8f8] sm:$0xff]  ;;  %6298 = vmatpush2.msra.mxu1 %v6030_v7  ;;  %v5593_v33 = vpop.f32.mrf.mxu1 }
0x1cb8   :  { %6375 = vmatprep.subr.mxu1 %v6157_v27 }
0x1cb9   :  { %8426 = vrcp.f32 %v5767_v40  ;;  %v12592_v40 = vld [vmem:[%s13554_s2 + $0x1b] sm:$0xff] }
0x1cba   :  { %8428 = vpow2.f32 %v5866_v23  ;;  %v5175_v52 = vrot.slane %v12592_v40, %v9949_v54  ;;  %v5199_v32 = vrot.slane %v12592_v40, %v5198_v43 }
0x1cbc   :  { %v5310_v8 = vadd.f32 %v5309_v30, %v5175_v52 }
0x1cc6   :  { %v8427_v56 = vpop.eup %8426 }
0x1cc7   :  { %v5788_v1 = vmul.f32 1.0614054, %v8427_v56  ;;  %v8429_v48 = vpop.eup %8428 }
0x1cc9   :  { %v5795_v13 = vadd.f32 -1.4531521, %v5788_v1 }
0x1ccb   :  { %v5802_v24 = vmul.f32 %v8427_v56, %v5795_v13 }
0x1ccd   :  { %v5809_v37 = vadd.f32 1.4214138, %v5802_v24  ;;  %v5207_v24 = vrot.slane %v12420_v60, %v9949_v54 }
0x1ccf   :  { %v5816_v45 = vmul.f32 %v8427_v56, %v5809_v37  ;;  %v12624_v62 = vadd.f32 %v5593_v33, %v5207_v24  ;;  %v5171_v24 = vrot.slane %v12592_v40, %v10031_v38 }
0x1cd1   :  { %v5823_v2 = vadd.f32 -0.28449672, %v5816_v45  ;;  %v12627_v19 = vmul.f32 0.70710677, %v12624_v62 }
0x1cd3   :  { %v5830_v55 = vmul.f32 %v8427_v56, %v5823_v2  ;;  %v5754_v51 = vand.u32 2147483647, %v12627_v19  ;;  %vm5894_vm10 = vcmp.ge.f32.partialorder %v12627_v19, 0.0 }
0x1cd5   :  { %v5837_v61 = vadd.f32 0.2548296, %v5830_v55  ;;  %v5761_v44 = vmul.f32 0.3275911, %v5754_v51 }
0x1cd7   :  { %v5844_v20 = vmul.f32 %v8427_v56, %v5837_v61  ;;  %v5768_v53 = vadd.f32 1.0, %v5761_v44 }
0x1cd9   :  { %v5879_v17 = vmul.f32 %v8429_v48, %v5844_v20 }
0x1cdb   :  { %v5886_v57 = vsub.f32 1.0, %v5879_v17 }
0x1cdd   :  { %v5900_v42 = vsub.f32 0.0, %v5886_v57 }
0x1cdf   :  { %v5907_v31 = vsel %vm5893_vm6, %v5886_v57, %v5900_v42 }
0x1ce0   :  { %v5914_v5 = vadd.f32 1.0, %v5907_v31 }
0x1ce2   :  { %v5921_v14 = vmul.f32 %v5914_v5, %v5739_v35  ;;  %v12633_v35 = vsub.s32 5, %v8982_v49 }
0x1ce4   :  { %v5928_v18 = vmul.f32 %v5921_v14, %v5310_v8  ;;  %v5223_v33 = vrot.slane %v12420_v60, %v12633_v35 }
0x1ce6   :  { %6229 = vmatprep.mubr.f32.mxu0 %v5928_v18 }
0x1ce7   :  { %v12611_v11 = vpop.f32.mrf.mxu0 }
0x1ce8   :  { %v5733_v0 = vpop.f32.mrf.mxu1 }
0x1ce9   :  { %v12613_v29 = vadd.f32 %v5733_v0, %v5219_v41  ;;  %v5522_v56 = vpop.f32.mrf.mxu0 }
0x1cea   :  { %v12615_v10 = vadd.f32 %v5522_v56, %v5199_v32  ;;  %v5735_v0 = vpop.f32.mrf.mxu1 }
0x1ceb   :  { %v5750_v1 = vmul.f32 0.70710677, %v12613_v29 }
0x1cec   :  { %v12619_v23 = vmul.f32 0.70710677, %v12615_v10 }
0x1ced   :  { %v5757_v39 = vand.u32 2147483647, %v5750_v1  ;;  %v5855_v37 = vmul.f32 %v5750_v1, %v5750_v1  ;;  %vm5897_vm7 = vcmp.ge.f32.partialorder %v5750_v1, 0.0 }
0x1cee   :  { %v5752_v36 = vand.u32 2147483647, %v12619_v23  ;;  %v5850_v46 = vmul.f32 %v12619_v23, %v12619_v23  ;;  %vm5892_vm9 = vcmp.ge.f32.partialorder %v12619_v23, 0.0  ;;  %v5308_v23 = vadd.f32 %v12587_v22, %v5171_v24  ;;  %v6091_v22 = vld [vmem:[%s13556_s6 + $0x6e8] sm:$0xff] }
0x1cef   :  { %v5764_v13 = vmul.f32 0.3275911, %v5757_v39  ;;  %v5862_v45 = vsub.f32 0.0, %v5855_v37 }
0x1cf0   :  { %v5759_v26 = vmul.f32 0.3275911, %v5752_v36  ;;  %v5857_v63 = vsub.f32 0.0, %v5850_v46  ;;  %v5191_v46 = vrot.slane %v12592_v40, %v12633_v35 }
0x1cf1   :  { %v5771_v34 = vadd.f32 1.0, %v5764_v13  ;;  %v5874_v47 = vmul.f32 1.442695, %v5862_v45  ;;  %v12646_v45 = vsub.s32 2, %v8982_v49 }
0x1cf2   :  { %v5766_v59 = vadd.f32 1.0, %v5759_v26  ;;  %v5864_v3 = vmul.f32 1.442695, %v5857_v63  ;;  %v12637_v26 = vadd.f32 %v5735_v0, %v5223_v33  ;;  %v6086_v33 = vld [vmem:[%s13556_s6 + $0x6c0] sm:$0xff] }
0x1cf3   :  { %8430 = vrcp.f32 %v5771_v34 }
0x1cf4   :  { %8432 = vrcp.f32 %v5766_v59  ;;  %v12652_v1 = vmul.f32 0.70710677, %v12637_v26 }
0x1cf5   :  { %8434 = vpow2.f32 %v5874_v47  ;;  %v12655_v47 = vsub.s32 3, %v8982_v49 }
0x1cf6   :  { %8436 = vpow2.f32 %v5864_v3  ;;  %vm5898_vm13 = vcmp.ge.f32.partialorder %v12652_v1, 0.0 }
0x1cf7   :  { %8438 = vrcp.f32 %v5768_v53  ;;  %v5758_v53 = vand.u32 2147483647, %v12652_v1 }
0x1d00   :  { %v8431_v2 = vpop.eup %8430 }
0x1d01   :  { %v5792_v58 = vmul.f32 1.0614054, %v8431_v2  ;;  %v8433_v55 = vpop.eup %8432 }
0x1d02   :  { %v5787_v61 = vmul.f32 1.0614054, %v8433_v55  ;;  %v8435_v14 = vpop.eup %8434 }
0x1d03   :  { %v5799_v21 = vadd.f32 -1.4531521, %v5792_v58  ;;  %v8437_v32 = vpop.eup %8436 }
0x1d04   :  { %v5794_v20 = vadd.f32 -1.4531521, %v5787_v61  ;;  %v12639_v34 = vpop.eup %8438 }
0x1d05   :  { %v5806_v9 = vmul.f32 %v8431_v2, %v5799_v21  ;;  %v5789_v63 = vmul.f32 1.0614054, %v12639_v34  ;;  %v5211_v21 = vrot.slane %v12420_v60, %v12646_v45 }
0x1d06   :  { %v5801_v15 = vmul.f32 %v8433_v55, %v5794_v20 }
0x1d07   :  { %v5813_v48 = vadd.f32 1.4214138, %v5806_v9  ;;  %v5452_v9 = vadd.f32 %v12436_v28, %v5191_v46  ;;  %v5796_v20 = vadd.f32 -1.4531521, %v5789_v63  ;;  %v6082_v46 = vld [vmem:[%s13556_s6 + $0x6a0] sm:$0xff] }
0x1d08   :  { %v5808_v17 = vadd.f32 1.4214138, %v5801_v15 }
0x1d09   :  { %v5820_v7 = vmul.f32 %v8431_v2, %v5813_v48 }
0x1d0a   :  { %v5815_v57 = vmul.f32 %v8433_v55, %v5808_v17 }
0x1d0b   :  { %v5827_v27 = vadd.f32 -0.28449672, %v5820_v7 }
0x1d0c   :  { %v5822_v52 = vadd.f32 -0.28449672, %v5815_v57  ;;  %v6090_v57 = vld [vmem:[%s13556_s6 + $0x6e0] sm:$0xff] }
0x1d0d   :  { %v5834_v42 = vmul.f32 %v8431_v2, %v5827_v27 }
0x1d0e   :  { %v5829_v31 = vmul.f32 %v8433_v55, %v5822_v52  ;;  %v5765_v52 = vmul.f32 0.3275911, %v5758_v53 }
0x1d0f   :  { %v5841_v30 = vadd.f32 0.2548296, %v5834_v42  ;;  %v5803_v42 = vmul.f32 %v12639_v34, %v5796_v20  ;;  %v6074_v20 = vld [vmem:[%s13556_s6 + $0x660] sm:$0xff] }
0x1d10   :  { %v5836_v8 = vadd.f32 0.2548296, %v5829_v31  ;;  %v5772_v0 = vadd.f32 1.0, %v5765_v52 }
0x1d11   :  { %v5848_v5 = vmul.f32 %v8431_v2, %v5841_v30  ;;  %v5743_v2 = vmul.f32 0.5, %v12613_v29  ;;  %v5215_v29 = vrot.slane %v12420_v60, %v12655_v47  ;;  %v6089_v30 = vld [vmem:[%s13556_s6 + $0x6d8] sm:$0xff] }
0x1d12   :  { %v5843_v41 = vmul.f32 %v8433_v55, %v5836_v8  ;;  %v5738_v55 = vmul.f32 0.5, %v12615_v10  ;;  %v6092_v10 = vld [vmem:[%s13556_s6 + $0x6f0] sm:$0xff]  ;;  %v5852_v8 = vmul.f32 %v12627_v19, %v12627_v19 }
0x1d13   :  { %v5883_v18 = vmul.f32 %v8435_v14, %v5848_v5  ;;  %v6088_v5 = vld [vmem:[%s13556_s6 + $0x6d0] sm:$0xff] }
0x1d14   :  { %v5878_v39 = vmul.f32 %v8437_v32, %v5843_v41  ;;  %v5810_v32 = vadd.f32 1.4214138, %v5803_v42  ;;  %v5859_v24 = vsub.f32 0.0, %v5852_v8  ;;  %v6112_v19 = vld [vmem:[%s13556_s6 + $0x790] sm:$0xff] }
0x1d15   :  { %v5890_v56 = vsub.f32 1.0, %v5883_v18  ;;  %v6087_v18 = vld [vmem:[%s13556_s6 + $0x6c8] sm:$0xff] }
0x1d16   :  { %v5885_v13 = vsub.f32 1.0, %v5878_v39  ;;  %v6085_v39 = vld [vmem:[%s13556_s6 + $0x6b8] sm:$0xff] }
0x1d17   :  { %v5904_v36 = vsub.f32 0.0, %v5890_v56 }
0x1d18   :  { %v5899_v37 = vsub.f32 0.0, %v5885_v13 }
0x1d19   :  { %v5911_v59 = vsel %vm5897_vm7, %v5890_v56, %v5904_v36 }
0x1d1a   :  { %v5918_v51 = vadd.f32 1.0, %v5911_v59  ;;  %v5906_v58 = vsel %vm5892_vm9, %v5885_v13, %v5899_v37  ;;  %v6084_v13 = vld [vmem:[%s13556_s6 + $0x6b0] sm:$0xff]  ;;  %v6083_v37 = vld [vmem:[%s13556_s6 + $0x6a8] sm:$0xff] }
0x1d1b   :  { %v5913_v44 = vadd.f32 1.0, %v5906_v58  ;;  %v6080_v58 = vld [vmem:[%s13556_s6 + $0x690] sm:$0xff] }
0x1d1c   :  { %v5925_v61 = vmul.f32 %v5918_v51, %v5743_v2  ;;  %v5817_v51 = vmul.f32 %v12639_v34, %v5810_v32  ;;  %v6081_v2 = vld [vmem:[%s13556_s6 + $0x698] sm:$0xff] }
0x1d1d   :  { %v5920_v3 = vmul.f32 %v5913_v44, %v5738_v55  ;;  %v5868_v55 = vmul.f32 1.442695, %v5859_v24  ;;  %v6079_v44 = vld [vmem:[%s13556_s6 + $0x688] sm:$0xff] }
0x1d1e   :  { %v5932_v27 = vmul.f32 %v5925_v61, %v5452_v9  ;;  %v5824_v61 = vadd.f32 -0.28449672, %v5817_v51  ;;  %v6075_v9 = vld [vmem:[%s13556_s6 + $0x668] sm:$0xff] }
0x1d1f   :  { %v5662_v48 = vpop.f32.mrf.mxu0  ;;  %v5927_v15 = vmul.f32 %v5920_v3, %v5308_v23  ;;  %v6077_v23 = vld [vmem:[%s13556_s6 + $0x678] sm:$0xff] }
0x1d20   :  { %v12665_v7 = vadd.f32 %v5662_v48, %v5211_v21  ;;  %v6078_v21 = vld [vmem:[%s13556_s6 + $0x680] sm:$0xff]  ;;  %v5831_v53 = vmul.f32 %v12639_v34, %v5824_v61 }
0x1d21   :  { %v5664_v17 = vpop.f32.mrf.mxu0  ;;  %6230 = vmatmul.mubr.f32.vlgmr.msra.gmra.mxu0 %v5927_v15  ;;  %v6073_v15 = vld [vmem:[%s13556_s6 + $0x658] sm:$0xff] }
0x1d22   :  { %v12674_v60 = vmul.f32 0.70710677, %v12665_v7  ;;  %v12676_v28 = vadd.f32 %v5664_v17, %v5215_v29  ;;  %6306 = vmatpush1.msra.mxu0 %v6092_v10  ;;  %6369 = vmatprep.mubr.f32.mxu0 %v5932_v27  ;;  %v6076_v29 = vld [vmem:[%s13556_s6 + $0x670] sm:$0xff]  ;;  %v6070_v27 = vld [vmem:[%s13556_s6 + $0x640] sm:$0xff]  ;;  %v5838_v42 = vadd.f32 0.2548296, %v5831_v53 }
0x1d23   :  { %6307 = vmatprep.subr.mxu0 %v6091_v22  ;;  %v6072_v17 = vld [vmem:[%s13556_s6 + $0x650] sm:$0xff]  ;;  %v6071_v22 = vld [vmem:[%s13556_s6 + $0x648] sm:$0xff] }
0x1d24   :  { %v5755_v31 = vand.u32 2147483647, %v12674_v60  ;;  %v12692_v14 = vmul.f32 0.70710677, %v12676_v28  ;;  %6308 = vmatpush1.msra.mxu0 %v6090_v57  ;;  %v5853_v3 = vmul.f32 %v12674_v60, %v12674_v60  ;;  %vm5895_vm11 = vcmp.ge.f32.partialorder %v12674_v60, 0.0 }
0x1d25   :  { %6309 = vmatprep.subr.mxu0 %v6089_v30  ;;  %v6069_v30 = vld [vmem:[%s13556_s6 + $0x638] sm:$0xff]  ;;  %v5741_v60 = vmul.f32 0.5, %v12665_v7 }
0x1d26   :  { %v5762_v41 = vmul.f32 0.3275911, %v5755_v31  ;;  %v5756_v56 = vand.u32 2147483647, %v12692_v14  ;;  %6310 = vmatpush1.msra.mxu0 %v6088_v5  ;;  %v5854_v48 = vmul.f32 %v12692_v14, %v12692_v14  ;;  %v5860_v10 = vsub.f32 0.0, %v5853_v3  ;;  %v6105_v7 = vld [vmem:[%s13556_s6 + $0x758] sm:$0xff] }
0x1d27   :  { %6311 = vmatprep.subr.mxu0 %v6087_v18  ;;  %v6068_v18 = vld [vmem:[%s13556_s6 + $0x630] sm:$0xff]  ;;  %vm5896_vm12 = vcmp.ge.f32.partialorder %v12692_v14, 0.0 }
0x1d28   :  { %v5769_v36 = vadd.f32 1.0, %v5762_v41  ;;  %v5763_v59 = vmul.f32 0.3275911, %v5756_v56  ;;  %6312 = vmatpush1.msra.mxu0 %v6086_v33  ;;  %v5861_v52 = vsub.f32 0.0, %v5854_v48  ;;  %v5870_v8 = vmul.f32 1.442695, %v5860_v10 }
0x1d29   :  { %6313 = vmatprep.subr.mxu0 %v6085_v39  ;;  %v6067_v41 = vld [vmem:[%s13556_s6 + $0x628] sm:$0xff]  ;;  %v6065_v56 = vld [vmem:[%s13556_s6 + $0x618] sm:$0xff]  ;;  %v5845_v39 = vmul.f32 %v12639_v34, %v5838_v42  ;;  %v6156_v14 = vld [vmem:[%s13556_s6 + $0x8f0] sm:$0xff] }
0x1d2a   :  { %8440 = vrcp.f32 %v5769_v36  ;;  %v5770_v63 = vadd.f32 1.0, %v5763_v59  ;;  %6314 = vmatpush1.msra.mxu0 %v6084_v13  ;;  %v5872_v24 = vmul.f32 1.442695, %v5861_v52  ;;  %v6063_v34 = vld [vmem:[%s13556_s6 + $0x608] sm:$0xff]  ;;  %v6121_v10 = vld [vmem:[%s13556_s6 + $0x7d8] sm:$0xff] }
0x1d2b   :  { %8442 = vrcp.f32 %v5772_v0  ;;  %6315 = vmatprep.subr.mxu0 %v6083_v37  ;;  %v6066_v0 = vld [vmem:[%s13556_s6 + $0x620] sm:$0xff]  ;;  %v6064_v37 = vld [vmem:[%s13556_s6 + $0x610] sm:$0xff]  ;;  %v6119_v52 = vld [vmem:[%s13556_s6 + $0x7c8] sm:$0xff] }
0x1d2c   :  { %8444 = vrcp.f32 %v5770_v63  ;;  %6316 = vmatpush1.msra.mxu0 %v6082_v46 }
0x1d2d   :  { %6317 = vmatprep.subr.mxu0 %v6081_v2  ;;  %8446 = vpow2.f32 %v5868_v55  ;;  %v6062_v2 = vld [vmem:[%s13556_s6 + $0x600] sm:$0xff] }
0x1d2e   :  { %6318 = vmatpush1.msra.mxu0 %v6080_v58  ;;  %8448 = vpow2.f32 %v5870_v8 }
0x1d2f   :  { %6319 = vmatprep.subr.mxu0 %v6079_v44  ;;  %8450 = vpow2.f32 %v5872_v24  ;;  %v6115_v24 = vld [vmem:[%s13556_s6 + $0x7a8] sm:$0xff] }
0x1d30   :  { %6320 = vmatpush1.msra.mxu0 %v6078_v21  ;;  %v6125_v21 = vld [vmem:[%s13556_s6 + $0x7f8] sm:$0xff] }
0x1d31   :  { %6321 = vmatprep.subr.mxu0 %v6077_v23  ;;  %v6124_v23 = vld [vmem:[%s13556_s6 + $0x7f0] sm:$0xff] }
0x1d32   :  { %6322 = vmatpush1.msra.mxu0 %v6076_v29  ;;  %v6123_v29 = vld [vmem:[%s13556_s6 + $0x7e8] sm:$0xff] }
0x1d33   :  { %6323 = vmatprep.subr.mxu0 %v6075_v9 }
0x1d34   :  { %6324 = vmatpush1.msra.mxu0 %v6074_v20  ;;  %v6122_v20 = vld [vmem:[%s13556_s6 + $0x7e0] sm:$0xff] }
0x1d35   :  { %6325 = vmatprep.subr.mxu0 %v6073_v15 }
0x1d36   :  { %6326 = vmatpush1.msra.mxu0 %v6072_v17 }
0x1d37   :  { %v12755_v57 = vpop.eup %8440  ;;  %6327 = vmatprep.subr.mxu0 %v6071_v22  ;;  %v6120_v22 = vld [vmem:[%s13556_s6 + $0x7d0] sm:$0xff] }
0x1d38   :  { %v12760_v31 = vpop.eup %8442  ;;  %v5790_v5 = vmul.f32 1.0614054, %v12755_v57  ;;  %6328 = vmatpush1.msra.mxu0 %v6070_v27  ;;  %v5856_v27 = vmul.f32 %v12652_v1, %v12652_v1  ;;  %v6133_v1 = vld [vmem:[%s13556_s6 + $0x838] sm:$0xff] }
0x1d39   :  { %v12769_v33 = vpop.eup %8444  ;;  %6329 = vmatprep.subr.mxu0 %v6069_v30  ;;  %v5793_v36 = vmul.f32 1.0614054, %v12760_v31 }
0x1d3a   :  { %v5797_v32 = vadd.f32 -1.4531521, %v5790_v5  ;;  %v5791_v13 = vmul.f32 1.0614054, %v12769_v33  ;;  %6330 = vmatpush1.msra.mxu0 %v6068_v18  ;;  %v8447_v51 = vpop.eup %8446  ;;  %v6118_v5 = vld [vmem:[%s13556_s6 + $0x7c0] sm:$0xff] }
0x1d3b   :  { %6331 = vmatprep.subr.mxu0 %v6067_v41  ;;  %v5880_v58 = vmul.f32 %v8447_v51, %v5845_v39  ;;  %v5800_v55 = vadd.f32 -1.4531521, %v5793_v36  ;;  %v8449_v39 = vpop.eup %8448  ;;  %v5863_v36 = vsub.f32 0.0, %v5856_v27  ;;  %v6113_v51 = vld [vmem:[%s13556_s6 + $0x798] sm:$0xff] }
0x1d3c   :  { %v5804_v59 = vmul.f32 %v12755_v57, %v5797_v32  ;;  %v5798_v46 = vadd.f32 -1.4531521, %v5791_v13  ;;  %6332 = vmatpush1.msra.mxu0 %v6066_v0  ;;  %v6117_v32 = vld [vmem:[%s13556_s6 + $0x7b8] sm:$0xff] }
0x1d3d   :  { %6333 = vmatprep.subr.mxu0 %v6065_v56  ;;  %v5887_v53 = vsub.f32 1.0, %v5880_v58  ;;  %v5807_v48 = vmul.f32 %v12760_v31, %v5800_v55  ;;  %v6116_v56 = vld [vmem:[%s13556_s6 + $0x7b0] sm:$0xff]  ;;  %v5876_v58 = vmul.f32 1.442695, %v5863_v36 }
0x1d3e   :  { %v5811_v63 = vadd.f32 1.4214138, %v5804_v59  ;;  %v5805_v44 = vmul.f32 %v12769_v33, %v5798_v46  ;;  %6334 = vmatpush1.msra.mxu0 %v6064_v37 }
0x1d3f   :  { %6335 = vmatprep.subr.mxu0 %v6063_v34  ;;  %v5901_v8 = vsub.f32 0.0, %v5887_v53  ;;  %v5814_v18 = vadd.f32 1.4214138, %v5807_v48  ;;  %8452 = vpow2.f32 %v5876_v58  ;;  %v6096_v58 = vld [vmem:[%s13556_s6 + $0x710] sm:$0xff] }
0x1d40   :  { %v5818_v61 = vmul.f32 %v12755_v57, %v5811_v63  ;;  %v5812_v3 = vadd.f32 1.4214138, %v5805_v44  ;;  %6336 = vmatpush1.msra.mxu0 %v6062_v2  ;;  %v8451_v63 = vpop.eup %8450  ;;  %v6111_v44 = vld [vmem:[%s13556_s6 + $0x788] sm:$0xff] }
0x1d41   :  { %6337 = vmatprep.subr.mxu0 %v6125_v21  ;;  %v5908_v37 = vsel %vm5894_vm10, %v5887_v53, %v5901_v8  ;;  %v5821_v46 = vmul.f32 %v12760_v31, %v5814_v18  ;;  %v5740_v53 = vmul.f32 0.5, %v12624_v62  ;;  %v6106_v62 = vld [vmem:[%s13556_s6 + $0x760] sm:$0xff]  ;;  %v6104_v8 = vld [vmem:[%s13556_s6 + $0x750] sm:$0xff] }
0x1d42   :  { %v5825_v9 = vadd.f32 -0.28449672, %v5818_v61  ;;  %v5819_v15 = vmul.f32 %v12769_v33, %v5812_v3  ;;  %6338 = vmatpush2.msra.mxu0 %v6124_v23  ;;  %v6110_v61 = vld [vmem:[%s13556_s6 + $0x780] sm:$0xff]  ;;  %v5183_v23 = vrot.slane %v12592_v40, %v12655_v47 }
0x1d43   :  { %6339 = vmatprep.subr.mxu0 %v6123_v29  ;;  %v5828_v3 = vadd.f32 -0.28449672, %v5821_v46  ;;  %v5742_v46 = vmul.f32 0.5, %v12676_v28  ;;  %v6151_v28 = vld [vmem:[%s13556_s6 + $0x8c8] sm:$0xff] }
0x1d44   :  { %v5832_v17 = vmul.f32 %v12755_v57, %v5825_v9  ;;  %v5826_v42 = vadd.f32 -0.28449672, %v5819_v15  ;;  %6340 = vmatpush2.msra.mxu0 %v6122_v20  ;;  %v6109_v9 = vld [vmem:[%s13556_s6 + $0x778] sm:$0xff]  ;;  %v5179_v20 = vrot.slane %v12592_v40, %v12646_v45  ;;  %v6108_v15 = vld [vmem:[%s13556_s6 + $0x770] sm:$0xff] }
0x1d45   :  { %6341 = vmatprep.subr.mxu0 %v6121_v10 }
0x1d46   :  { %v5839_v30 = vadd.f32 0.2548296, %v5832_v17  ;;  %v5833_v41 = vmul.f32 %v12769_v33, %v5826_v42  ;;  %6342 = vmatpush2.msra.mxu0 %v6120_v22  ;;  %v6107_v22 = vld [vmem:[%s13556_s6 + $0x768] sm:$0xff]  ;;  %v5381_v42 = vadd.f32 %v12604_v12, %v5183_v23  ;;  %v6148_v23 = vld [vmem:[%s13556_s6 + $0x8b0] sm:$0xff] }
0x1d47   :  { %6343 = vmatprep.subr.mxu0 %v6119_v52  ;;  %v5835_v52 = vmul.f32 %v12760_v31, %v5828_v3  ;;  %v6103_v12 = vld [vmem:[%s13556_s6 + $0x748] sm:$0xff] }
0x1d48   :  { %v5846_v0 = vmul.f32 %v12755_v57, %v5839_v30  ;;  %v5840_v13 = vadd.f32 0.2548296, %v5833_v41  ;;  %6344 = vmatpush2.msra.mxu0 %v6118_v5  ;;  %v6114_v57 = vld [vmem:[%s13556_s6 + $0x7a0] sm:$0xff]  ;;  %v5379_v5 = vadd.f32 %v12598_v25, %v5179_v20  ;;  %v6145_v20 = vld [vmem:[%s13556_s6 + $0x898] sm:$0xff] }
0x1d49   :  { %6345 = vmatprep.subr.mxu0 %v6117_v32  ;;  %v6102_v25 = vld [vmem:[%s13556_s6 + $0x740] sm:$0xff] }
0x1d4a   :  { %v5881_v59 = vmul.f32 %v8449_v39, %v5846_v0  ;;  %v5847_v34 = vmul.f32 %v12769_v33, %v5840_v13  ;;  %6346 = vmatpush2.msra.mxu0 %v6116_v56  ;;  %v5915_v33 = vadd.f32 1.0, %v5908_v37  ;;  %v5842_v0 = vadd.f32 0.2548296, %v5835_v52  ;;  %v6101_v56 = vld [vmem:[%s13556_s6 + $0x738] sm:$0xff]  ;;  %v6155_v39 = vld [vmem:[%s13556_s6 + $0x8e8] sm:$0xff]  ;;  %v6100_v13 = vld [vmem:[%s13556_s6 + $0x730] sm:$0xff] }
0x1d4b   :  { %6347 = vmatprep.subr.mxu0 %v6115_v24  ;;  %v6154_v24 = vld [vmem:[%s13556_s6 + $0x8e0] sm:$0xff]  ;;  %v5187_v37 = vrot.slane %v12592_v40, %v12602_v16  ;;  %v6136_v52 = vld [vmem:[%s13556_s6 + $0x850] sm:$0xff] }
0x1d4c   :  { %v5888_v2 = vsub.f32 1.0, %v5881_v59  ;;  %v5882_v55 = vmul.f32 %v8451_v63, %v5847_v34  ;;  %6348 = vmatpush2.msra.mxu0 %v6114_v57  ;;  %v5922_v27 = vmul.f32 %v5915_v33, %v5740_v53  ;;  %v6099_v59 = vld [vmem:[%s13556_s6 + $0x728] sm:$0xff]  ;;  %v6153_v57 = vld [vmem:[%s13556_s6 + $0x8d8] sm:$0xff]  ;;  %v6098_v34 = vld [vmem:[%s13556_s6 + $0x720] sm:$0xff]  ;;  %v5849_v63 = vmul.f32 %v12760_v31, %v5842_v0  ;;  %v8453_v33 = vpop.eup %8452 }
0x1d4d   :  { %6349 = vmatprep.subr.mxu0 %v6113_v51  ;;  %v6152_v51 = vld [vmem:[%s13556_s6 + $0x8d0] sm:$0xff]  ;;  %v6150_v31 = vld [vmem:[%s13556_s6 + $0x8c0] sm:$0xff]  ;;  %v6129_v0 = vld [vmem:[%s13556_s6 + $0x818] sm:$0xff] }
0x1d4e   :  { %v5902_v21 = vsub.f32 0.0, %v5888_v2  ;;  %v5889_v29 = vsub.f32 1.0, %v5882_v55  ;;  %6350 = vmatpush2.msra.mxu0 %v6112_v19  ;;  %v5929_v32 = vmul.f32 %v5922_v27, %v5379_v5  ;;  %v6095_v55 = vld [vmem:[%s13556_s6 + $0x708] sm:$0xff]  ;;  %v5884_v3 = vmul.f32 %v8453_v33, %v5849_v63  ;;  %v6144_v53 = vld [vmem:[%s13556_s6 + $0x890] sm:$0xff] }
0x1d4f   :  { %6351 = vmatprep.subr.mxu0 %v6111_v44  ;;  %v6149_v44 = vld [vmem:[%s13556_s6 + $0x8b8] sm:$0xff]  ;;  %v6139_v27 = vld [vmem:[%s13556_s6 + $0x868] sm:$0xff]  ;;  %v5194_v5 = vsub.s32 6, %v8982_v49 }
0x1d50   :  { %v5909_v48 = vsel %vm5895_vm11, %v5888_v2, %v5902_v21  ;;  %v5903_v17 = vsub.f32 0.0, %v5889_v29  ;;  %6352 = vmatpush2.msra.mxu0 %v6110_v61  ;;  %v6097_v2 = vld [vmem:[%s13556_s6 + $0x718] sm:$0xff]  ;;  %v5450_v21 = vadd.f32 %v12415_v4, %v5187_v37  ;;  %v6094_v61 = vld [vmem:[%s13556_s6 + $0x700] sm:$0xff]  ;;  %v6465_v37 = vld [vmem:[%s13553_s3 + $0x110] sm:$0xff] }
0x1d51   :  { %v5916_v10 = vadd.f32 1.0, %v5909_v48  ;;  %6353 = vmatprep.subr.mxu0 %v6109_v9  ;;  %v6146_v4 = vld [vmem:[%s13556_s6 + $0x8a0] sm:$0xff]  ;;  %v5891_v48 = vsub.f32 1.0, %v5884_v3  ;;  %v6457_v63 = vld [vmem:[%s13553_s3 + $0xa8] sm:$0xff] }
0x1d52   :  { %6354 = vmatpush2.msra.mxu0 %v6108_v15  ;;  %v5910_v18 = vsel %vm5896_vm12, %v5889_v29, %v5903_v17  ;;  %v6147_v29 = vld [vmem:[%s13556_s6 + $0x8a8] sm:$0xff]  ;;  %v6140_v17 = vld [vmem:[%s13556_s6 + $0x870] sm:$0xff] }
0x1d53   :  { %v5923_v30 = vmul.f32 %v5916_v10, %v5741_v60  ;;  %6355 = vmatprep.subr.mxu0 %v6107_v22  ;;  %v5917_v36 = vadd.f32 1.0, %v5910_v18  ;;  %v6143_v15 = vld [vmem:[%s13556_s6 + $0x888] sm:$0xff]  ;;  %v6142_v60 = vld [vmem:[%s13556_s6 + $0x880] sm:$0xff]  ;;  %v6141_v10 = vld [vmem:[%s13556_s6 + $0x878] sm:$0xff]  ;;  %v5905_v22 = vsub.f32 0.0, %v5891_v48 }
0x1d54   :  { %6356 = vmatpush2.msra.mxu0 %v6106_v62  ;;  %v6138_v62 = vld [vmem:[%s13556_s6 + $0x860] sm:$0xff]  ;;  %v6475_v33 = vld [vmem:[%s13553_s3 + $0x188] sm:$0xff] }
0x1d55   :  { %v5930_v41 = vmul.f32 %v5923_v30, %v5381_v42  ;;  %6357 = vmatprep.subr.mxu0 %v6105_v7  ;;  %v5924_v19 = vmul.f32 %v5917_v36, %v5742_v46  ;;  %v6137_v42 = vld [vmem:[%s13556_s6 + $0x858] sm:$0xff]  ;;  %v5912_v30 = vsel %vm5898_vm13, %v5891_v48, %v5905_v22  ;;  %v6135_v7 = vld [vmem:[%s13556_s6 + $0x848] sm:$0xff]  ;;  %v6126_v36 = vld [vmem:[%s13556_s6 + $0x800] sm:$0xff] }
0x1d56   :  { %6358 = vmatpush2.msra.mxu0 %v6104_v8  ;;  %v6134_v8 = vld [vmem:[%s13556_s6 + $0x840] sm:$0xff]  ;;  %v5919_v18 = vadd.f32 1.0, %v5912_v30  ;;  %v6845_v30 = vld [vmem:[%s13557_s7 + $0xf0] sm:$0xff]  ;;  %v6928_v49 = vld [vmem:[%s13557_s7 + $0x388] sm:$0xff] }
0x1d57   :  { %6299 = vmatprep.mubr.f32.mxu1 %v5930_v41  ;;  %6359 = vmatprep.subr.mxu0 %v6103_v12  ;;  %v5931_v9 = vmul.f32 %v5924_v19, %v5450_v21  ;;  %v6132_v12 = vld [vmem:[%s13556_s6 + $0x830] sm:$0xff]  ;;  %v6131_v41 = vld [vmem:[%s13556_s6 + $0x828] sm:$0xff]  ;;  %v6463_v46 = vld [vmem:[%s13553_s3 + $0x100] sm:$0xff] }
0x1d58   :  { %6300 = vmatmul.mubr.f32.vlgmr.msra.gmra.mxu1 %v5929_v32  ;;  %6360 = vmatpush2.msra.mxu0 %v6102_v25  ;;  %v5195_v32 = vrot.slane %v12592_v40, %v5194_v5  ;;  %v5744_v25 = vmul.f32 0.5, %v12637_v26  ;;  %v6127_v40 = vld [vmem:[%s13556_s6 + $0x808] sm:$0xff]  ;;  %v6454_v19 = vld [vmem:[%s13553_s3 + $0x90] sm:$0xff]  ;;  %v6846_v21 = vld [vmem:[%s13557_s7 + $0xf8] sm:$0xff] }
0x1d59   :  { %6376 = vmatpush1.msra.mxu1 %v6156_v14  ;;  %6361 = vmatprep.subr.mxu0 %v6101_v56  ;;  %v6130_v14 = vld [vmem:[%s13556_s6 + $0x820] sm:$0xff] }
0x1d5a   :  { %6377 = vmatprep.subr.mxu1 %v6155_v39  ;;  %6362 = vmatpush2.msra.mxu0 %v6100_v13  ;;  %v5926_v56 = vmul.f32 %v5919_v18, %v5744_v25  ;;  %v6128_v39 = vld [vmem:[%s13556_s6 + $0x810] sm:$0xff]  ;;  %v5521_v26 = vadd.f32 %v12611_v11, %v5195_v32  ;;  %v6471_v11 = vld [vmem:[%s13553_s3 + $0x168] sm:$0xff]  ;;  %v6843_v25 = vld [vmem:[%s13557_s7 + $0xe0] sm:$0xff] }
0x1d5b   :  { %6378 = vmatpush1.msra.mxu1 %v6154_v24  ;;  %6363 = vmatprep.subr.mxu0 %v6099_v59  ;;  %v6473_v24 = vld [vmem:[%s13553_s3 + $0x178] sm:$0xff]  ;;  %v6472_v59 = vld [vmem:[%s13553_s3 + $0x170] sm:$0xff]  ;;  %v6844_v18 = vld [vmem:[%s13557_s7 + $0xe8] sm:$0xff] }
0x1d5c   :  { %6379 = vmatprep.subr.mxu1 %v6153_v57  ;;  %6364 = vmatpush2.msra.mxu0 %v6098_v34  ;;  %v5933_v13 = vmul.f32 %v5926_v56, %v5521_v26  ;;  %v6470_v57 = vld [vmem:[%s13553_s3 + $0x160] sm:$0xff]  ;;  %v6464_v34 = vld [vmem:[%s13553_s3 + $0x108] sm:$0xff]  ;;  %v6469_v56 = vld [vmem:[%s13553_s3 + $0x130] sm:$0xff] }
0x1d5d   :  { %6380 = vmatpush1.msra.mxu1 %v6152_v51  ;;  %6365 = vmatprep.subr.mxu0 %v6097_v2  ;;  %v6462_v51 = vld [vmem:[%s13553_s3 + $0xf8] sm:$0xff]  ;;  %v6450_v32 = vld [vmem:[%s13553_s3 + $0x48] sm:$0xff] }
0x1d5e   :  { %6381 = vmatprep.subr.mxu1 %v6151_v28  ;;  %6366 = vmatpush2.msra.mxu0 %v6096_v58  ;;  %v6455_v2 = vld [vmem:[%s13553_s3 + $0x98] sm:$0xff]  ;;  %v6456_v28 = vld [vmem:[%s13553_s3 + $0xa0] sm:$0xff] }
0x1d5f   :  { %6382 = vmatpush1.msra.mxu1 %v6150_v31  ;;  %6367 = vmatprep.subr.mxu0 %v6095_v55  ;;  %v6449_v58 = vld [vmem:[%s13553_s3 + $0x40] sm:$0xff]  ;;  %v6447_v31 = vld [vmem:[%s13553_s3 + $0x30] sm:$0xff]  ;;  %v6448_v55 = vld [vmem:[%s13553_s3 + $0x38] sm:$0xff] }
0x1d60   :  { %6383 = vmatprep.subr.mxu1 %v6149_v44  ;;  %6368 = vmatpush2.msra.mxu0 %v6094_v61  ;;  %v6446_v44 = vld [vmem:[%s13553_s3 + $0x28] sm:$0xff]  ;;  %v6842_v26 = vld [vmem:[%s13557_s7 + $0xd8] sm:$0xff] }
0x1d61   :  { %6384 = vmatpush1.msra.mxu1 %v6148_v23  ;;  %6370 = vmatmul.mubr.f32.vlgmr.msra.gmra.mxu0 %v5931_v9 }
0x1d62   :  { %6385 = vmatprep.subr.mxu1 %v6147_v29  ;;  %6439 = vmatprep.mubr.f32.mxu1 %v8455_v6 }
0x1d63   :  { %6386 = vmatpush1.msra.mxu1 %v6146_v4  ;;  %6587 = vmatprep.mubr.f32.mxu0 %v8455_v6 }
0x1d64   :  { %6387 = vmatprep.subr.mxu1 %v6145_v20  ;;  %6547 = vmatprep.subr.mxu0 %v6471_v11  ;;  %v6158_v20 = vld [vmem:[%s13554_s2 + $0x29] sm:$0x3]  ;;  %v6841_v11 = vld [vmem:[%s13557_s7 + $0xd0] sm:$0xff] }
0x1d65   :  { %6388 = vmatpush1.msra.mxu1 %v6144_v53  ;;  %6548 = vmatpush1.msra.mxu0 %v6470_v57  ;;  %v6163_v53 = vrot.slane %v6158_v20, %v10031_v38  ;;  %v6825_v57 = vld [vmem:[%s13557_s7 + $0x50] sm:$0xff]  ;;  %v6820_v20 = vld [vmem:[%s13557_s7 + $0x28] sm:$0xff] }
0x1d66   :  { %6389 = vmatprep.subr.mxu1 %v6143_v15  ;;  %6549 = vmatprep.subr.mxu0 %v6463_v46  ;;  %v6840_v46 = vld [vmem:[%s13557_s7 + $0xc8] sm:$0xff] }
0x1d67   :  { %6390 = vmatpush1.msra.mxu1 %v6142_v60  ;;  %6550 = vmatpush1.msra.mxu0 %v6462_v51  ;;  %v6862_v51 = vld [vmem:[%s13557_s7 + $0x178] sm:$0xff] }
0x1d68   :  { %6391 = vmatprep.subr.mxu1 %v6141_v10  ;;  %6551 = vmatprep.subr.mxu0 %v6455_v2  ;;  %v6877_v2 = vld [vmem:[%s13557_s7 + $0x1f0] sm:$0xff] }
0x1d69   :  { %6392 = vmatpush1.msra.mxu1 %v6140_v17  ;;  %6552 = vmatpush1.msra.mxu0 %v6454_v19  ;;  %v6861_v19 = vld [vmem:[%s13557_s7 + $0x170] sm:$0xff] }
0x1d6a   :  { %6393 = vmatprep.subr.mxu1 %v6139_v27  ;;  %6553 = vmatprep.subr.mxu0 %v6447_v31  ;;  %v6876_v31 = vld [vmem:[%s13557_s7 + $0x1e8] sm:$0xff] }
0x1d6b   :  { %6394 = vmatpush1.msra.mxu1 %v6138_v62  ;;  %6554 = vmatpush1.msra.mxu0 %v6446_v44  ;;  %v6474_v62 = vld [vmem:[%s13553_s3 + $0x180] sm:$0xff]  ;;  %v6860_v44 = vld [vmem:[%s13557_s7 + $0x168] sm:$0xff] }
0x1d6c   :  { %6395 = vmatprep.subr.mxu1 %v6137_v42  ;;  %7605 = vmatprep.subr.mxu0 %v6846_v21  ;;  %v6467_v42 = vld [vmem:[%s13553_s3 + $0x120] sm:$0xff] }
0x1d6d   :  { %6396 = vmatpush1.msra.mxu1 %v6136_v52  ;;  %v6830_v52 = vld [vmem:[%s13557_s7 + $0x78] sm:$0xff]  ;;  %v6875_v21 = vld [vmem:[%s13557_s7 + $0x1e0] sm:$0xff] }
0x1d6e   :  { %6397 = vmatprep.subr.mxu1 %v6135_v7  ;;  %v6459_v7 = vld [vmem:[%s13553_s3 + $0xb8] sm:$0xff] }
0x1d6f   :  { %6398 = vmatpush1.msra.mxu1 %v6134_v8  ;;  %v6829_v8 = vld [vmem:[%s13557_s7 + $0x70] sm:$0xff] }
0x1d70   :  { %6399 = vmatprep.subr.mxu1 %v6133_v1  ;;  %v6458_v1 = vld [vmem:[%s13553_s3 + $0xb0] sm:$0xff] }
0x1d71   :  { %6400 = vmatpush1.msra.mxu1 %v6132_v12  ;;  %v6451_v12 = vld [vmem:[%s13553_s3 + $0x50] sm:$0xff] }
0x1d72   :  { %6401 = vmatprep.subr.mxu1 %v6131_v41  ;;  %v6828_v41 = vld [vmem:[%s13557_s7 + $0x68] sm:$0xff] }
0x1d73   :  { %6402 = vmatpush1.msra.mxu1 %v6130_v14  ;;  %v6477_v14 = vld [vmem:[%s13553_s3 + $0x198] sm:$0xff] }
0x1d74   :  { %6403 = vmatprep.subr.mxu1 %v6129_v0  ;;  %v6476_v0 = vld [vmem:[%s13553_s3 + $0x190] sm:$0xff] }
0x1d75   :  { %6404 = vmatpush1.msra.mxu1 %v6128_v39  ;;  %v6827_v39 = vld [vmem:[%s13557_s7 + $0x60] sm:$0xff] }
0x1d76   :  { %6405 = vmatprep.subr.mxu1 %v6127_v40  ;;  %v6468_v40 = vld [vmem:[%s13553_s3 + $0x128] sm:$0xff] }
0x1d77   :  { %6406 = vmatpush1.msra.mxu1 %v6126_v36  ;;  %v6461_v36 = vld [vmem:[%s13553_s3 + $0xc8] sm:$0xff] }
0x1d78   :  { %6440 = vmatmul.mubr.f32.vlgmr.msra.gmra.mxu1 %v5933_v13  ;;  %6618 = vmatprep.subr.mxu1 %v6473_v24  ;;  %v6826_v13 = vld [vmem:[%s13557_s7 + $0x58] sm:$0xff]  ;;  %v6460_v24 = vld [vmem:[%s13553_s3 + $0xc0] sm:$0xff] }
0x1d79   :  { %6658 = vmatprep.mubr.f32.mxu1 %v8455_v6  ;;  %6619 = vmatpush1.msra.mxu1 %v6472_v59  ;;  %v6453_v59 = vld [vmem:[%s13553_s3 + $0x60] sm:$0xff] }
0x1d7a   :  { %6620 = vmatprep.subr.mxu1 %v6465_v37  ;;  %v6452_v37 = vld [vmem:[%s13553_s3 + $0x58] sm:$0xff] }
0x1d7b   :  { %6621 = vmatpush1.msra.mxu1 %v6464_v34  ;;  %v6878_v34 = vld [vmem:[%s13557_s7 + $0x1f8] sm:$0xff] }
0x1d7c   :  { %6622 = vmatprep.subr.mxu1 %v6457_v63  ;;  %v6824_v63 = vld [vmem:[%s13557_s7 + $0x48] sm:$0xff] }
0x1d7d   :  { %6623 = vmatpush1.msra.mxu1 %v6456_v28  ;;  %v6839_v28 = vld [vmem:[%s13557_s7 + $0xc0] sm:$0xff] }
0x1d7e   :  { %6624 = vmatprep.subr.mxu1 %v6449_v58  ;;  %v6823_v58 = vld [vmem:[%s13557_s7 + $0x40] sm:$0xff] }
0x1d7f   :  { %6625 = vmatpush1.msra.mxu1 %v6448_v55  ;;  %v6838_v55 = vld [vmem:[%s13557_s7 + $0xb8] sm:$0xff] }
0x1d80   :  { %6689 = vmatprep.subr.mxu1 %v6475_v33  ;;  %v6822_v33 = vld [vmem:[%s13557_s7 + $0x38] sm:$0xff] }
0x1de1   :  { %v6231_v61 = vpop.f32.mrf.mxu0 }
0x1de2   :  { %v6232_v48 = vadd.f32 %v6231_v61, %v6163_v53  ;;  %v6837_v61 = vld [vmem:[%s13557_s7 + $0xb0] sm:$0xff] }
0x1de3   :  { %v6233_v23 = vpop.f32.mrf.mxu0  ;;  %v6873_v53 = vld [vmem:[%s13557_s7 + $0x1d0] sm:$0xff] }
0x1de4   :  { %v6859_v23 = vld [vmem:[%s13557_s7 + $0x160] sm:$0xff] }
0x1e18   :  { %v6301_v3 = vpop.f32.mrf.mxu1 }
0x1e19   :  { %v6302_v15 = vadd.f32 %v6301_v3, %v6232_v48  ;;  %v6821_v3 = vld [vmem:[%s13557_s7 + $0x30] sm:$0xff]  ;;  %v6835_v48 = vld [vmem:[%s13557_s7 + $0xa0] sm:$0xff] }
0x1e1a   :  { %v6303_v29 = vpop.f32.mrf.mxu1 }
0x1e1b   :  { %v6874_v29 = vld [vmem:[%s13557_s7 + $0x1d8] sm:$0xff] }
0x1e21   :  { %v6371_v9 = vpop.f32.mrf.mxu0 }
0x1e22   :  { %v6372_v60 = vadd.f32 %v6371_v9, %v6302_v15  ;;  %v6836_v9 = vld [vmem:[%s13557_s7 + $0xa8] sm:$0xff]  ;;  %v6857_v15 = vld [vmem:[%s13557_s7 + $0x150] sm:$0xff] }
0x1e23   :  { %v6373_v4 = vpop.f32.mrf.mxu0 }
0x1e24   :  { %v6858_v4 = vld [vmem:[%s13557_s7 + $0x158] sm:$0xff] }
0x1e38   :  { %v6441_v10 = vpop.f32.mrf.mxu1 }
0x1e39   :  { %v6442_v17 = vadd.f32 %v6441_v10, %v6372_v60  ;;  %v6819_v60 = vld [vmem:[%s13557_s7 + $0x20] sm:$0xff]  ;;  %v6872_v10 = vld [vmem:[%s13557_s7 + $0x1c8] sm:$0xff] }
0x1e3a   :  { %v6443_v22 = vpop.f32.mrf.mxu1 }
0x1e3b   :  { %v13076_v27 = vadd.f32 %v6442_v17, %v11319_v50  ;;  %v6466_v50 = vld [vmem:[%s13553_s3 + $0x118] sm:$0xff]  ;;  %v6856_v22 = vld [vmem:[%s13557_s7 + $0x148] sm:$0xff] }
0x1e3c   :  { %v6834_v17 = vld [vmem:[%s13557_s7 + $0x98] sm:$0xff] }
0x1e3d   :  { %7383 = vmatmul.mubr.msk.f32.vlgmr.msra.gmra.mxu0 %vm59_vm2, %v13076_v27  ;;  %7384 = vmatmul.mubr.msk.f32.vlgmr.msra.gmra.mxu1 %vm59_vm2, %v13076_v27 }
0x1e3e   :  { %6690 = vmatpush1.msra.mxu1 %v6474_v62  ;;  %6729 = vmatprep.mubr.f32.mxu1 %v8455_v6  ;;  %v6855_v62 = vld [vmem:[%s13557_s7 + $0x140] sm:$0xff] }
0x1e3f   :  { %6691 = vmatprep.subr.mxu1 %v6467_v42  ;;  %7606 = vmatpush3.msra.mxu0 %v6830_v52  ;;  %v6870_v42 = vld [vmem:[%s13557_s7 + $0x1b8] sm:$0xff] }
0x1e40   :  { %6692 = vmatpush1.msra.mxu1 %v6466_v50  ;;  %7607 = vmatprep.subr.mxu0 %v6845_v30  ;;  %v6854_v52 = vld [vmem:[%s13557_s7 + $0x138] sm:$0xff]  ;;  %v6869_v50 = vld [vmem:[%s13557_s7 + $0x1b0] sm:$0xff] }
0x1e41   :  { %6693 = vmatprep.subr.mxu1 %v6459_v7  ;;  %7608 = vmatpush3.msra.mxu0 %v6829_v8  ;;  %v6853_v30 = vld [vmem:[%s13557_s7 + $0x130] sm:$0xff]  ;;  %v6868_v7 = vld [vmem:[%s13557_s7 + $0x1a8] sm:$0xff] }
0x1e42   :  { %6694 = vmatpush1.msra.mxu1 %v6458_v1  ;;  %7609 = vmatprep.subr.mxu0 %v6844_v18  ;;  %v6852_v8 = vld [vmem:[%s13557_s7 + $0x128] sm:$0xff]  ;;  %v6867_v1 = vld [vmem:[%s13557_s7 + $0x1a0] sm:$0xff] }
0x1e43   :  { %6695 = vmatprep.subr.mxu1 %v6451_v12  ;;  %7610 = vmatpush3.msra.mxu0 %v6828_v41  ;;  %v6851_v18 = vld [vmem:[%s13557_s7 + $0x120] sm:$0xff]  ;;  %v6866_v12 = vld [vmem:[%s13557_s7 + $0x198] sm:$0xff] }
0x1e44   :  { %6696 = vmatpush1.msra.mxu1 %v6450_v32  ;;  %7611 = vmatprep.subr.mxu0 %v6843_v25  ;;  %v6818_v41 = vld [vmem:[%s13557_s7 + $0x18] sm:$0xff]  ;;  %v6833_v25 = vld [vmem:[%s13557_s7 + $0x90] sm:$0xff] }
0x1e45   :  { %7385 = vmatmul.mubr.msk.f32.vlgmr.msra.gmra.mxu1 %vm59_vm2, %v13076_v27  ;;  %6760 = vmatprep.subr.mxu1 %v6477_v14  ;;  %v6850_v32 = vld [vmem:[%s13557_s7 + $0x118] sm:$0xff]  ;;  %v6865_v14 = vld [vmem:[%s13557_s7 + $0x190] sm:$0xff] }
0x1e46   :  { %6761 = vmatpush1.msra.mxu1 %v6476_v0  ;;  %6800 = vmatprep.mubr.f32.mxu1 %v8455_v6  ;;  %v6817_v0 = vld [vmem:[%s13557_s7 + $0x10] sm:$0xff] }
0x1e47   :  { %6762 = vmatprep.subr.mxu1 %v6469_v56  ;;  %7612 = vmatpush3.msra.mxu0 %v6827_v39  ;;  %v6849_v56 = vld [vmem:[%s13557_s7 + $0x110] sm:$0xff]  ;;  %v6832_v39 = vld [vmem:[%s13557_s7 + $0x88] sm:$0xff] }
0x1e48   :  { %6763 = vmatpush1.msra.mxu1 %v6468_v40  ;;  %7613 = vmatprep.subr.mxu0 %v6842_v26  ;;  %v6864_v40 = vld [vmem:[%s13557_s7 + $0x188] sm:$0xff] }
0x1e49   :  { %6764 = vmatprep.subr.mxu1 %v6461_v36  ;;  %7614 = vmatpush3.msra.mxu0 %v6826_v13  ;;  %v6816_v26 = vld [vmem:[%s13557_s7 + $0x8] sm:$0xff]  ;;  %v6831_v13 = vld [vmem:[%s13557_s7 + $0x80] sm:$0xff] }
0x1e4a   :  { %6765 = vmatpush1.msra.mxu1 %v6460_v24  ;;  %7615 = vmatprep.subr.mxu0 %v6841_v11  ;;  %v6848_v36 = vld [vmem:[%s13557_s7 + $0x108] sm:$0xff]  ;;  %v6863_v24 = vld [vmem:[%s13557_s7 + $0x180] sm:$0xff] }
0x1e4b   :  { %6766 = vmatprep.subr.mxu1 %v6453_v59  ;;  %7616 = vmatpush3.msra.mxu0 %v6825_v57  ;;  %v6815_v11 = vld [vmem:[%s13557_s7] sm:$0xff]  ;;  %v6910_v57 = vld [vmem:[%s13557_s7 + $0x2f8] sm:$0xff] }
0x1e4c   :  { %6767 = vmatpush1.msra.mxu1 %v6452_v37  ;;  %7617 = vmatprep.subr.mxu0 %v6840_v46  ;;  %v6847_v59 = vld [vmem:[%s13557_s7 + $0x100] sm:$0xff]  ;;  %v13329_v37 = vld [vmem:[%s13554_s2 + $0x2b] sm:$0xff] }
0x1e4d   :  { %7386 = vmatmul.mubr.msk.f32.vlgmr.msra.gmra.mxu1 %vm59_vm2, %v13076_v27  ;;  %7640 = vmatprep.subr.mxu1 %v6878_v34  ;;  %v6871_v27 = vld [vmem:[%s13557_s7 + $0x1c0] sm:$0xff]  ;;  %v6483_v46 = vrot.slane %v13329_v37, %v10031_v38  ;;  %v6491_v34 = vrot.slane %v13329_v37, %v12646_v45  ;;  %v6894_v45 = vld [vmem:[%s13557_s7 + $0x278] sm:$0xff]  ;;  %vm7225_vm2 = vcmask 195584  }
0x1e4e   :  { %7641 = vmatpush3.msra.mxu1 %v6862_v51  ;;  %7618 = vmatpush3.msra.mxu0 %v6824_v63  ;;  %v6487_v51 = vrot.slane %v13329_v37, %v9949_v54  ;;  %v6495_v63 = vrot.slane %v13329_v37, %v12655_v47  ;;  %v6926_v54 = vld [vmem:[%s13557_s7 + $0x378] sm:$0xff]  ;;  %v6503_v47 = vrot.slane %v13329_v37, %v12633_v35  ;;  %v6908_v35 = vld [vmem:[%s13557_s7 + $0x2e8] sm:$0xff] }
0x1e4f   :  { %7642 = vmatprep.subr.mxu1 %v6877_v2  ;;  %7619 = vmatprep.subr.mxu0 %v6839_v28 }
0x1e50   :  { %7643 = vmatpush3.msra.mxu1 %v6861_v19  ;;  %7620 = vmatpush3.msra.mxu0 %v6823_v58 }
0x1e51   :  { %7644 = vmatprep.subr.mxu1 %v6876_v31  ;;  %7621 = vmatprep.subr.mxu0 %v6838_v55 }
0x1e52   :  { %7645 = vmatpush3.msra.mxu1 %v6860_v44  ;;  %7622 = vmatpush3.msra.mxu0 %v6822_v33 }
0x1e53   :  { %7646 = vmatprep.subr.mxu1 %v6875_v21  ;;  %7623 = vmatprep.subr.mxu0 %v6837_v61 }
0x1e54   :  { %7647 = vmatpush3.msra.mxu1 %v6859_v23  ;;  %7624 = vmatpush3.msra.mxu0 %v6821_v3  ;;  %v6909_v3 = vld [vmem:[%s13557_s7 + $0x2f0] sm:$0xff] }
0x1e55   :  { %7648 = vmatprep.subr.mxu1 %v6874_v29  ;;  %7625 = vmatprep.subr.mxu0 %v6836_v9  ;;  %v6893_v9 = vld [vmem:[%s13557_s7 + $0x270] sm:$0xff] }
0x1e56   :  { %7649 = vmatpush3.msra.mxu1 %v6858_v4  ;;  %7626 = vmatpush3.msra.mxu0 %v6820_v20  ;;  %v6925_v4 = vld [vmem:[%s13557_s7 + $0x370] sm:$0xff] }
0x1e57   :  { %7650 = vmatprep.subr.mxu1 %v6873_v53  ;;  %7627 = vmatprep.subr.mxu0 %v6835_v48  ;;  %v6892_v53 = vld [vmem:[%s13557_s7 + $0x268] sm:$0xff] }
0x1e58   :  { %7651 = vmatpush3.msra.mxu1 %v6857_v15  ;;  %7628 = vmatpush3.msra.mxu0 %v6819_v60  ;;  %v6924_v48 = vld [vmem:[%s13557_s7 + $0x368] sm:$0xff]  ;;  %v6907_v60 = vld [vmem:[%s13557_s7 + $0x2e0] sm:$0xff] }
0x1e59   :  { %7652 = vmatprep.subr.mxu1 %v6872_v10  ;;  %7629 = vmatprep.subr.mxu0 %v6834_v17  ;;  %v6891_v10 = vld [vmem:[%s13557_s7 + $0x260] sm:$0xff] }
0x1e5a   :  { %7653 = vmatpush3.msra.mxu1 %v6856_v22  ;;  %7630 = vmatpush3.msra.mxu0 %v6818_v41  ;;  %v6923_v22 = vld [vmem:[%s13557_s7 + $0x360] sm:$0xff]  ;;  %v6920_v41 = vld [vmem:[%s13557_s7 + $0x348] sm:$0xff] }
0x1e5b   :  { %7654 = vmatprep.subr.mxu1 %v6871_v27  ;;  %7631 = vmatprep.subr.mxu0 %v6833_v25  ;;  %v6906_v27 = vld [vmem:[%s13557_s7 + $0x2d8] sm:$0xff]  ;;  %v6887_v25 = vld [vmem:[%s13557_s7 + $0x240] sm:$0xff] }
0x1e5c   :  { %7655 = vmatpush3.msra.mxu1 %v6855_v62  ;;  %7632 = vmatpush3.msra.mxu0 %v6817_v0  ;;  %v6890_v62 = vld [vmem:[%s13557_s7 + $0x258] sm:$0xff]  ;;  %v6919_v0 = vld [vmem:[%s13557_s7 + $0x340] sm:$0xff] }
0x1e5d   :  { %7656 = vmatprep.subr.mxu1 %v6870_v42  ;;  %7633 = vmatprep.subr.mxu0 %v6832_v39  ;;  %v6922_v42 = vld [vmem:[%s13557_s7 + $0x358] sm:$0xff] }
0x1e5e   :  { %7657 = vmatpush3.msra.mxu1 %v6854_v52  ;;  %7634 = vmatpush3.msra.mxu0 %v6816_v26  ;;  %v6511_v52 = vrot.slane %v13329_v37, %v5198_v43  ;;  %v6904_v43 = vld [vmem:[%s13557_s7 + $0x2c8] sm:$0xff]  ;;  %v6886_v39 = vld [vmem:[%s13557_s7 + $0x238] sm:$0xff]  ;;  %v6901_v26 = vld [vmem:[%s13557_s7 + $0x2b0] sm:$0xff] }
0x1e5f   :  { %7658 = vmatprep.subr.mxu1 %v6869_v50  ;;  %7635 = vmatprep.subr.mxu0 %v6831_v13  ;;  %v6905_v50 = vld [vmem:[%s13557_s7 + $0x2d0] sm:$0xff] }
0x1e60   :  { %7659 = vmatpush3.msra.mxu1 %v6853_v30  ;;  %7636 = vmatpush3.msra.mxu0 %v6815_v11  ;;  %v6917_v13 = vld [vmem:[%s13557_s7 + $0x330] sm:$0xff]  ;;  %v6884_v11 = vld [vmem:[%s13557_s7 + $0x228] sm:$0xff] }
0x1e61   :  { %7660 = vmatprep.subr.mxu1 %v6868_v7  ;;  %7675 = vmatprep.subr.mxu0 %v6910_v57  ;;  %v6889_v7 = vld [vmem:[%s13557_s7 + $0x250] sm:$0xff]  ;;  %v6899_v57 = vld [vmem:[%s13557_s7 + $0x2a0] sm:$0xff] }
0x1e62   :  { %7661 = vmatpush3.msra.mxu1 %v6852_v8  ;;  %v6921_v8 = vld [vmem:[%s13557_s7 + $0x350] sm:$0xff] }
0x1e63   :  { %7662 = vmatprep.subr.mxu1 %v6867_v1 }
0x1e64   :  { %7663 = vmatpush3.msra.mxu1 %v6851_v18  ;;  %v6888_v18 = vld [vmem:[%s13557_s7 + $0x248] sm:$0xff] }
0x1e65   :  { %7664 = vmatprep.subr.mxu1 %v6866_v12 }
0x1e66   :  { %7665 = vmatpush3.msra.mxu1 %v6850_v32  ;;  %v6903_v32 = vld [vmem:[%s13557_s7 + $0x2c0] sm:$0xff] }
0x1e67   :  { %7666 = vmatprep.subr.mxu1 %v6865_v14 }
0x1e68   :  { %7667 = vmatpush3.msra.mxu1 %v6849_v56  ;;  %v6902_v56 = vld [vmem:[%s13557_s7 + $0x2b8] sm:$0xff] }
0x1e69   :  { %7668 = vmatprep.subr.mxu1 %v6864_v40  ;;  %v6918_v40 = vld [vmem:[%s13557_s7 + $0x338] sm:$0xff] }
0x1e6a   :  { %7669 = vmatpush3.msra.mxu1 %v6848_v36  ;;  %v6885_v36 = vld [vmem:[%s13557_s7 + $0x230] sm:$0xff] }
0x1e6b   :  { %7670 = vmatprep.subr.mxu1 %v6863_v24  ;;  %v6900_v24 = vld [vmem:[%s13557_s7 + $0x2a8] sm:$0xff] }
0x1e6c   :  { %7671 = vmatpush3.msra.mxu1 %v6847_v59  ;;  %v6916_v59 = vld [vmem:[%s13557_s7 + $0x328] sm:$0xff] }
0x1e6d   :  { %7155 = vmatprep.subr.mxu1 %v8455_v6 }
0x1efd   :  { %v6589_v2 = vpop.f32.mrf.mxu0  ;;  %v6660_v28 = vpop.f32.mrf.mxu1 }
0x1efe   :  { %v6590_v19 = vadd.f32 %v6589_v2, %v6483_v46  ;;  %v6661_v58 = vadd.f32 %v6660_v28, %v6491_v34  ;;  %v6883_v46 = vld [vmem:[%s13557_s7 + $0x220] sm:$0xff]  ;;  %v6882_v2 = vld [vmem:[%s13557_s7 + $0x218] sm:$0xff] }
0x1eff   :  { %v6591_v31 = vpop.f32.mrf.mxu0  ;;  %v6662_v55 = vpop.f32.mrf.mxu1  ;;  %v6915_v34 = vld [vmem:[%s13557_s7 + $0x320] sm:$0xff]  ;;  %v6914_v28 = vld [vmem:[%s13557_s7 + $0x318] sm:$0xff] }
0x1f00   :  { %v6592_v44 = vadd.f32 %v6591_v31, %v6487_v51  ;;  %v6663_v33 = vadd.f32 %v6662_v55, %v6495_v63  ;;  %v6807_v38 = vmax.f32 %v6590_v19, 0.0  ;;  %v6809_v23 = vmax.f32 %v6661_v58, 0.0  ;;  %v6898_v51 = vld [vmem:[%s13557_s7 + $0x298] sm:$0xff]  ;;  %v6897_v19 = vld [vmem:[%s13557_s7 + $0x290] sm:$0xff]  ;;  %v6896_v31 = vld [vmem:[%s13557_s7 + $0x288] sm:$0xff] }
0x1f01   :  { %v6499_v63 = vrot.slane %v13329_v37, %v12602_v16  ;;  %v6881_v16 = vld [vmem:[%s13557_s7 + $0x210] sm:$0xff] }
0x1f02   :  { %v6808_v21 = vmax.f32 %v6592_v44, 0.0  ;;  %v6810_v61 = vmax.f32 %v6663_v33, 0.0  ;;  %v6913_v58 = vld [vmem:[%s13557_s7 + $0x310] sm:$0xff]  ;;  %v6880_v44 = vld [vmem:[%s13557_s7 + $0x208] sm:$0xff] }
0x1f03   :  { %v6912_v33 = vld [vmem:[%s13557_s7 + $0x308] sm:$0xff] }
0x1f04   :  { %7009 = vmatprep.mubr.f32.mxu0 %v6808_v21  ;;  %7079 = vmatprep.mubr.f32.mxu1 %v6810_v61  ;;  %v6895_v21 = vld [vmem:[%s13557_s7 + $0x280] sm:$0xff] }
0x1f05   :  { %v13350_v29 = vpop.f32.mrf.mxu1  ;;  %7010 = vmatmul.mubr.f32.vlgmr.msra.gmra.mxu0 %v6807_v38  ;;  %7080 = vmatmul.mubr.f32.vlgmr.msra.gmra.mxu1 %v6809_v23  ;;  %v6879_v61 = vld [vmem:[%s13557_s7 + $0x200] sm:$0xff] }
0x1f06   :  { %7676 = vmatpush3.msra.mxu0 %v6894_v45  ;;  %7156 = vmatpush1.msra.mxu1 %v6926_v54  ;;  %v6732_v55 = vadd.f32 %v13350_v29, %v6499_v63  ;;  %v6911_v38 = vld [vmem:[%s13557_s7 + $0x300] sm:$0xff]  ;;  %v6934_v45 = vld [vmem:[%s13557_s7 + $0x3b8] sm:$0xff]  ;;  %v6933_v54 = vld [vmem:[%s13557_s7 + $0x3b0] sm:$0xff]  ;;  %v6507_v29 = vrot.slane %v13329_v37, %v5194_v5 }
0x1f07   :  { %v6733_v20 = vpop.f32.mrf.mxu1  ;;  %7677 = vmatprep.subr.mxu0 %v6909_v3  ;;  %7157 = vmatprep.subr.mxu1 %v8455_v6  ;;  %v6931_v3 = vld [vmem:[%s13557_s7 + $0x3a0] sm:$0xff] }
0x1f08   :  { %v6734_v15 = vadd.f32 %v6733_v20, %v6503_v47  ;;  %7678 = vmatpush3.msra.mxu0 %v6893_v9  ;;  %7158 = vmatpush1.msra.mxu1 %v6925_v4  ;;  %v6811_v23 = vmax.f32 %v6732_v55, 0.0  ;;  %v6932_v47 = vld [vmem:[%s13557_s7 + $0x3a8] sm:$0xff]  ;;  %v6930_v9 = vld [vmem:[%s13557_s7 + $0x398] sm:$0xff]  ;;  %v6929_v4 = vld [vmem:[%s13557_s7 + $0x390] sm:$0xff] }
0x1f09   :  { %7679 = vmatprep.subr.mxu0 %v6908_v35  ;;  %7159 = vmatprep.subr.mxu1 %v8455_v6  ;;  %v6927_v5 = vld [vmem:[%s13557_s7 + $0x380] sm:$0xff] }
0x1f0a   :  { %v6812_v17 = vmax.f32 %v6734_v15, 0.0  ;;  %7680 = vmatpush3.msra.mxu0 %v6892_v53  ;;  %7160 = vmatpush1.msra.mxu1 %v6924_v48 }
0x1f0b   :  { %7681 = vmatprep.subr.mxu0 %v6907_v60  ;;  %7161 = vmatprep.subr.mxu1 %v8455_v6 }
0x1f0c   :  { %7682 = vmatpush3.msra.mxu0 %v6891_v10  ;;  %7149 = vmatprep.mubr.f32.mxu0 %v6812_v17  ;;  %v7387_v10 = vld [vmem:[%s13554_s2 + $0x33] ss:$0 sm:$0xff] }
0x1f0d   :  { %7162 = vmatpush1.msra.mxu1 %v6923_v22  ;;  %v13394_v30 = vpop.f32.mrf.mxu1  ;;  %7683 = vmatprep.subr.mxu0 %v6906_v27 }
0x1f0e   :  { %7163 = vmatprep.subr.mxu1 %v8455_v6  ;;  %7684 = vmatpush3.msra.mxu0 %v6890_v62  ;;  %v6803_v35 = vadd.f32 %v13394_v30, %v6507_v29 }
0x1f0f   :  { %7164 = vmatpush1.msra.mxu1 %v6922_v42  ;;  %v6804_v1 = vpop.f32.mrf.mxu1  ;;  %7685 = vmatprep.subr.mxu0 %v6905_v50 }
0x1f10   :  { %v6805_v12 = vadd.f32 %v6804_v1, %v6511_v52  ;;  %7165 = vmatprep.subr.mxu1 %v8455_v6  ;;  %7686 = vmatpush3.msra.mxu0 %v6889_v7  ;;  %v6813_v37 = vmax.f32 %v6803_v35, 0.0 }
0x1f11   :  { %7166 = vmatpush1.msra.mxu1 %v6921_v8  ;;  %7687 = vmatprep.subr.mxu0 %v6904_v43 }
0x1f12   :  { %v6814_v14 = vmax.f32 %v6805_v12, 0.0  ;;  %7167 = vmatprep.subr.mxu1 %v8455_v6  ;;  %7688 = vmatpush3.msra.mxu0 %v6888_v18 }
0x1f13   :  { %7168 = vmatpush1.msra.mxu1 %v6920_v41  ;;  %7689 = vmatprep.subr.mxu0 %v6903_v32 }
0x1f14   :  { %7169 = vmatprep.subr.mxu1 %v8455_v6  ;;  %7690 = vmatpush3.msra.mxu0 %v6887_v25 }
0x1f15   :  { %7170 = vmatpush1.msra.mxu1 %v6919_v0  ;;  %7388 = vmatprep.mubr.msk.f32.mxu1 %vm905_vm8, %v6814_v14 }
0x1f16   :  { %7691 = vmatprep.subr.mxu0 %v6902_v56  ;;  %7171 = vmatprep.subr.mxu1 %v8455_v6 }
0x1f17   :  { %7692 = vmatpush3.msra.mxu0 %v6886_v39  ;;  %7172 = vmatpush1.msra.mxu1 %v6918_v40 }
0x1f18   :  { %7693 = vmatprep.subr.mxu0 %v6901_v26  ;;  %7173 = vmatprep.subr.mxu1 %v8455_v6 }
0x1f19   :  { %7694 = vmatpush3.msra.mxu0 %v6885_v36  ;;  %7174 = vmatpush1.msra.mxu1 %v6917_v13 }
0x1f1a   :  { %7695 = vmatprep.subr.mxu0 %v6900_v24  ;;  %7175 = vmatprep.subr.mxu1 %v8455_v6 }
0x1f1b   :  { %7696 = vmatpush3.msra.mxu0 %v6884_v11  ;;  %7176 = vmatpush1.msra.mxu1 %v6916_v59 }
0x1f1c   :  { %7697 = vmatprep.subr.mxu0 %v6899_v57  ;;  %7177 = vmatprep.subr.mxu1 %v8455_v6 }
0x1f1d   :  { %7698 = vmatpush3.msra.mxu0 %v6883_v46  ;;  %7178 = vmatpush1.msra.mxu1 %v6915_v34 }
0x1f1e   :  { %7699 = vmatprep.subr.mxu0 %v6898_v51  ;;  %7179 = vmatprep.subr.mxu1 %v8455_v6 }
0x1f1f   :  { %7700 = vmatpush3.msra.mxu0 %v6882_v2  ;;  %7180 = vmatpush1.msra.mxu1 %v6914_v28 }
0x1f20   :  { %7701 = vmatprep.subr.mxu0 %v6897_v19  ;;  %7181 = vmatprep.subr.mxu1 %v8455_v6 }
0x1f21   :  { %7702 = vmatpush3.msra.mxu0 %v6881_v16  ;;  %7182 = vmatpush1.msra.mxu1 %v6913_v58 }
0x1f22   :  { %7703 = vmatprep.subr.mxu0 %v6896_v31  ;;  %7183 = vmatprep.subr.mxu1 %v8455_v6 }
0x1f23   :  { %7704 = vmatpush3.msra.mxu0 %v6880_v44  ;;  %7184 = vmatpush1.msra.mxu1 %v6912_v33 }
0x1f24   :  { %7705 = vmatprep.subr.mxu0 %v6895_v21  ;;  %7185 = vmatprep.subr.mxu1 %v8455_v6 }
0x1f25   :  { %7706 = vmatpush3.msra.mxu0 %v6879_v61  ;;  %7186 = vmatpush1.msra.mxu1 %v6911_v38 }
0x1f26   :  { %7150 = vmatmul.mubr.f32.vlgmr.msra.gmra.mxu0 %v6811_v23  ;;  %7203 = vmatprep.subr.mxu1 %v8455_v6 }
0x1f27   :  { %7204 = vmatpush2.msra.mxu1 %v6934_v45 }
0x1f28   :  { %7205 = vmatprep.subr.mxu1 %v8455_v6 }
0x1f29   :  { %7206 = vmatpush2.msra.mxu1 %v6933_v54 }
0x1f2a   :  { %7207 = vmatprep.subr.mxu1 %v8455_v6 }
0x1f2b   :  { %7208 = vmatpush2.msra.mxu1 %v6932_v47 }
0x1f2c   :  { %7209 = vmatprep.subr.mxu1 %v8455_v6 }
0x1f2d   :  { %7210 = vmatpush2.msra.mxu1 %v6931_v3 }
0x1f2e   :  { %7211 = vmatprep.subr.mxu1 %v8455_v6 }
0x1f2f   :  { %7212 = vmatpush2.msra.mxu1 %v6930_v9 }
0x1f30   :  { %7213 = vmatprep.subr.mxu1 %v8455_v6 }
0x1f31   :  { %7214 = vmatpush2.msra.mxu1 %v6929_v4 }
0x1f32   :  { %7215 = vmatprep.subr.mxu1 %v8455_v6 }
0x1f33   :  { %7216 = vmatpush2.msra.mxu1 %v6928_v49 }
0x1f34   :  { %7217 = vmatprep.subr.mxu1 %v8455_v6 }
0x1f35   :  { %7218 = vmatpush2.msra.mxu1 %v6927_v5 }
0x1f36   :  { %7220 = vmatmul.mubr.f32.vlgmr.msra.gmra.mxu1 %v6813_v37 }
0x1fc5   :  { %v7637_v20 = vpop.f32.mrf.mxu0  ;;  %v7672_v48 = vpop.f32.mrf.mxu1 }
0x1fc7   :  { %v7638_v53 = vpop.f32.mrf.mxu0  ;;  %v7673_v17 = vpop.f32.mrf.mxu1 }
0x1fc8   :  { %v7639_v60 = vadd.f32 %v7638_v53, %v7637_v20  ;;  %v7674_v62 = vadd.f32 %v7673_v17, %v7672_v48 }
0x1fca   :  { %v7012_v27 = vadd.f32 %v7639_v60, %v7387_v10 }
0x1fcc   :  { %v7082_v52 = vadd.f32 %v7674_v62, %v7012_v27 }
0x1fe6   :  { %v7707_v15 = vpop.f32.mrf.mxu0 }
0x1fe8   :  { %v7708_v22 = vpop.f32.mrf.mxu0 }
0x1fe9   :  { %v7709_v42 = vadd.f32 %v7708_v22, %v7707_v15 }
0x1feb   :  { %v7152_v50 = vadd.f32 %v7709_v42, %v7082_v52 }
0x1ff6   :  { %v7221_v30 = vpop.f32.mrf.mxu1 }
0x1ff7   :  { %v7222_v6 = vadd.f32 %v7221_v30, %v7152_v50 }
0x1ff8   :  { %v7223_v7 = vpop.f32.mrf.mxu1 }
0x1ff9   :  { %7226 = vst.msk [vmem:[%s13558_s8] sm:$0xff] %vm7225_vm2, %v7222_v6 }

</bundles_post_ra>
